<compile_context>
chip_gen: v5e
topology: v5e:2x2
jax: 0.10.0
libtpu: 0.0.40
codegen_flags: <defaults>
</compile_context>

<pallas_src>
import math

import numpy as np
import jax
import jax.numpy as jnp
from jax.experimental import pallas as pl
from jax.experimental.pallas import tpu as pltpu

# ---------------- static configuration (derived from the irreps) ----------------
MUL0E_IN, MUL1O_IN = 16, 8
MUL0E_OUT, MUL1O_OUT = 16, 8
IN_DIM = MUL0E_IN + 3 * MUL1O_IN          # 40
OUT_DIM = MUL0E_OUT + 3 * MUL1O_OUT       # 40
C0E = MUL0E_IN + MUL1O_IN                 # 24 channels feeding the 0e output
C1O = MUL0E_IN + MUL1O_IN                 # 24 channels feeding the 1o output
assert C0E == C1O                         # single uniform 1/sqrt(C) scale folded on output
W0E_NUM = C0E * MUL0E_OUT                 # 384
W1O_NUM = C1O * MUL1O_OUT                 # 192
WEIGHT_NUMEL = W0E_NUM + W1O_NUM          # 576

N_EDGE_FEATURES = 32
HIDDEN = 32                               # hidden_features defaults to n_edge_features

INV_SQRT3 = 1.0 / math.sqrt(3.0)
INV_SQRT_C = 1.0 / math.sqrt(float(C0E))  # == 1/sqrt(C1O)

# ---------------- lane-dense layout constants ----------------
K_F = 128                                 # 112 bilinear (x_i * sh_j) columns, padded to 128
BLK_1O = 256                              # each 1o component block padded 192 -> 256 lanes
P_WIDTH = W0E_NUM + 3 * BLK_1O            # 384 + 768 = 1152  (128-aligned sections)
OUT_PAD = 128                             # lane-dense output tile (cols 40..127 are zero)

# (block start, block width) for 0e and the three 1o xyz blocks -- all 128-aligned
BLOCKS = ((0, W0E_NUM),) + tuple((W0E_NUM + d * BLK_1O, BLK_1O) for d in range(3))


def _build_constants():
    """Constant matrices that turn the tensor product into pure matmuls.

    A (f32, 40x128): node features -> bilinear-product columns (1/sqrt(3) baked in).
    B (f32, 4x128):  spherical harmonics -> bilinear-product columns (0/1).
    Ex (bf16, 128x1152): product columns -> weight-aligned layout (pure 0/1, exact bf16).
    S  (bf16, 1152x128): channel reduce + (mul,xyz) interleave (pure 0/1, exact bf16);
                         the 1/sqrt(24) normalization is applied as a scalar on the output.
    """
    A = np.zeros((IN_DIM, K_F), np.float32)
    B = np.zeros((4, K_F), np.float32)
    Ex = np.zeros((K_F, P_WIDTH), np.float32)
    S = np.zeros((P_WIDTH, OUT_PAD), np.float32)

    col = 0
    # products feeding the 0e output weight block (P columns [0, 384))
    for c in range(MUL0E_IN):                   # x0[c] * sh0
        A[c, col] = 1.0
        B[0, col] = 1.0
        Ex[col, c * MUL0E_OUT:(c + 1) * MUL0E_OUT] = 1.0
        col += 1
    for j in range(MUL1O_IN):                   # (x1[j] . sh1) / sqrt(3)
        c = MUL0E_IN + j
        for d in range(3):
            A[MUL0E_IN + j * 3 + d, col] = INV_SQRT3
            B[1 + d, col] = 1.0
            Ex[col, c * MUL0E_OUT:(c + 1) * MUL0E_OUT] = 1.0
            col += 1
    # products feeding the 1o output weight blocks (P columns [384 + d*256, +192))
    for d in range(3):
        base = W0E_NUM + d * BLK_1O
        for c in range(MUL0E_IN):               # x0[c] * sh1[d]
            A[c, col] = 1.0
            B[1 + d, col] = 1.0
            Ex[col, base + c * MUL1O_OUT: base + (c + 1) * MUL1O_OUT] = 1.0
            col += 1
        for j in range(MUL1O_IN):               # x1[j, d] * sh0
            c = MUL0E_IN + j
            A[MUL0E_IN + j * 3 + d, col] = 1.0
            B[0, col] = 1.0
            Ex[col, base + c * MUL1O_OUT: base + (c + 1) * MUL1O_OUT] = 1.0
            col += 1
    assert col == MUL0E_IN + 3 * MUL1O_IN + 3 * (MUL0E_IN + MUL1O_IN)   # 112 (< K_F)

    # selection matrix: sum over channels, interleave 1o output as (mul, xyz); pure 0/1
    for c in range(C0E):
        for o in range(MUL0E_OUT):
            S[c * MUL0E_OUT + o, o] = 1.0
    for d in range(3):
        base = W0E_NUM + d * BLK_1O
        for c in range(C1O):
            for o in range(MUL1O_OUT):
                S[base + c * MUL1O_OUT + o, MUL0E_OUT + o * 3 + d] = 1.0

    return (jnp.asarray(A), jnp.asarray(B),
            jnp.asarray(Ex, dtype=jnp.bfloat16), jnp.asarray(S, dtype=jnp.bfloat16))


# ---------------- kernel A: edge MLP + tensor product, tiled over edges ----------------
def tp_edge_kernel(x_ref, sh_ref, ea_ref, w1_ref, b1_ref, w2_ref, b2_ref,
                   a_ref, bsh_ref, ex_ref, sel_ref, tp_ref):
    # all bilinear products (x_i * sh_j) at full 128-lane width; cast once to bf16 for the
    # constant MXU matmuls (Ex/S are exact 0/1 in bf16, accumulation stays f32)
    f = (jnp.dot(x_ref[...], a_ref[...], preferred_element_type=jnp.float32) *
         jnp.dot(sh_ref[...], bsh_ref[...], preferred_element_type=jnp.float32)
         ).astype(jnp.bfloat16)                                                  # [TE, 128]

    # fc: Identity -> Linear -> ReLU -> Dropout(0.0) -> Linear (second layer sliced per block)
    h = jnp.maximum(
        jnp.dot(ea_ref[...], w1_ref[...], preferred_element_type=jnp.float32) + b1_ref[...],
        0.0)                                                                     # [TE, 32]

    # per-block fusion: expand -> multiply by per-edge weights (f32) -> select/reduce.
    # No [TE, 1152] intermediate is ever live; each block is 128-lane aligned.
    acc = None
    for lo, width in BLOCKS:
        w_blk = (jnp.dot(h, w2_ref[:, lo:lo + width],
                         preferred_element_type=jnp.float32)
                 + b2_ref[:, lo:lo + width])                                     # [TE, width] f32
        p_blk = jnp.dot(f, ex_ref[:, lo:lo + width],
                        preferred_element_type=jnp.float32)                      # [TE, width] f32
        pw = (p_blk * w_blk).astype(jnp.bfloat16)                                # f32 VPU mul
        term = jnp.dot(pw, sel_ref[lo:lo + width, :],
                       preferred_element_type=jnp.float32)                       # [TE, 128] f32
        acc = term if acc is None else acc + term

    # uniform channel normalization (C0E == C1O == 24), single lane-dense bf16 store
    tp_ref[...] = (acc * INV_SQRT_C).astype(tp_ref.dtype)


# ---------------- kernel B: tiled scatter-mean over edge_src + residual ----------------
def scatter_mean_kernel(src_ref, tp_ref, inv_cnt_ref, res_ref, out_ref, acc_ref):
    k_step = pl.program_id(1)

    @pl.when(k_step == 0)
    def _init():
        acc_ref[...] = jnp.zeros_like(acc_ref)

    tn = acc_ref.shape[0]
    tes = tp_ref.shape[0]
    # in-kernel one-hot: node ids of this tile vs. the src id of each edge in this tile
    node_ids = pl.program_id(0) * tn + jax.lax.broadcasted_iota(jnp.int32, (tn, tes), 0)
    oh = jnp.where(node_ids == src_ref[...], 1.0, 0.0).astype(jnp.bfloat16)      # [TN, TES]
    acc_ref[...] += jnp.dot(oh, tp_ref[...], preferred_element_type=jnp.float32)

    @pl.when(k_step == pl.num_programs(1) - 1)
    def _finalize():
        out_ref[...] = acc_ref[...] * inv_cnt_ref[...] + res_ref[...]


# ---------------- wrapper ----------------
def tensor_product_conv_layer(node_attr, edge_index, edge_attr, edge_sh, params,
                              *, edge_tile=256, node_tile=128):
    N, in_dim = node_attr.shape
    E = edge_attr.shape[0]
    assert in_dim == IN_DIM
    edge_tile = min(edge_tile, E)
    node_tile = min(node_tile, N)
    # TODO(synk): ragged E / N need zero-padding plus masking of padded edges in the
    # one-hot compare and the counts.
    assert E % edge_tile == 0 and N % node_tile == 0

    edge_src, edge_dst = edge_index[0], edge_index[1]
    w1, b1, w2, b2 = params
    b1 = b1.reshape(1, HIDDEN)

    # second MLP layer laid out directly in the 1152-wide p layout:
    # [0e weights | 1o weights (pad to 256) replicated for x, y, z]
    w2_0e, w2_1o = w2[:, :W0E_NUM], w2[:, W0E_NUM:]
    b2_0e, b2_1o = b2.reshape(1, -1)[:, :W0E_NUM], b2.reshape(1, -1)[:, W0E_NUM:]
    w_pad = jnp.zeros((HIDDEN, BLK_1O - W1O_NUM), jnp.float32)
    b_pad = jnp.zeros((1, BLK_1O - W1O_NUM), jnp.float32)
    w2p = jnp.concatenate([w2_0e] + [jnp.concatenate([w2_1o, w_pad], 1)] * 3, axis=1)
    b2p = jnp.concatenate([b2_0e] + [jnp.concatenate([b2_1o, b_pad], 1)] * 3, axis=1)

    a_mat, bsh_mat, ex_mat, sel_mat = _build_constants()

    # cheap O(E*IN_DIM) gather of destination-node features in the wrapper
    x_e = jnp.take(node_attr, edge_dst, axis=0)                       # [E, 40]

    TE = edge_tile
    tp = pl.pallas_call(
        tp_edge_kernel,
        out_shape=jax.ShapeDtypeStruct((E, OUT_PAD), jnp.bfloat16),
        grid=(E // TE,),
        in_specs=[
            pl.BlockSpec((TE, IN_DIM), lambda i: (i, 0)),
            pl.BlockSpec((TE, 4), lambda i: (i, 0)),
            pl.BlockSpec((TE, N_EDGE_FEATURES), lambda i: (i, 0)),
            pl.BlockSpec((N_EDGE_FEATURES, HIDDEN), lambda i: (0, 0)),
            pl.BlockSpec((1, HIDDEN), lambda i: (0, 0)),
            pl.BlockSpec((HIDDEN, P_WIDTH), lambda i: (0, 0)),
            pl.BlockSpec((1, P_WIDTH), lambda i: (0, 0)),
            pl.BlockSpec((IN_DIM, K_F), lambda i: (0, 0)),
            pl.BlockSpec((4, K_F), lambda i: (0, 0)),
            pl.BlockSpec((K_F, P_WIDTH), lambda i: (0, 0)),
            pl.BlockSpec((P_WIDTH, OUT_PAD), lambda i: (0, 0)),
        ],
        out_specs=pl.BlockSpec((TE, OUT_PAD), lambda i: (i, 0)),
        compiler_params=pltpu.CompilerParams(
            dimension_semantics=("parallel",),
            vmem_limit_bytes=32 * 1024 * 1024),
    )(x_e, edge_sh, edge_attr, w1, b1, w2p, b2p, a_mat, bsh_mat, ex_mat, sel_mat)

    # scatter-mean inputs: edge_src as int32 [1, E] (one-hot built in-kernel),
    # precomputed inverse counts, residual = F.pad(node_attr, ...) lane-padded to 128.
    src2d = edge_src.astype(jnp.int32).reshape(1, E)
    counts = jnp.zeros((N,), jnp.float32).at[edge_src].add(1.0)
    inv_counts = (1.0 / jnp.maximum(counts, 1.0)).reshape(N, 1)
    res_pad = jnp.pad(node_attr, ((0, 0), (0, OUT_PAD - in_dim)))

    TN, TES = node_tile, edge_tile
    out_pad = pl.pallas_call(
        scatter_mean_kernel,
        out_shape=jax.ShapeDtypeStruct((N, OUT_PAD), jnp.float32),
        grid=(N // TN, E // TES),
        in_specs=[
            pl.BlockSpec((1, TES), lambda i, k: (0, k)),
            pl.BlockSpec((TES, OUT_PAD), lambda i, k: (k, 0)),
            pl.BlockSpec((TN, 1), lambda i, k: (i, 0)),
            pl.BlockSpec((TN, OUT_PAD), lambda i, k: (i, 0)),
        ],
        out_specs=pl.BlockSpec((TN, OUT_PAD), lambda i, k: (i, 0)),
        scratch_shapes=[pltpu.VMEM((TN, OUT_PAD), jnp.float32)],
        compiler_params=pltpu.CompilerParams(
            dimension_semantics=("parallel", "arbitrary"),
            vmem_limit_bytes=32 * 1024 * 1024),
    )(src2d, tp, inv_counts, res_pad)

    return out_pad[:, :OUT_DIM]


# ---------------- pure-JAX reference (mirrors the PyTorch forward exactly) ----------------
def reference_forward(node_attr, edge_index, edge_attr, edge_sh, params):
    hp = jax.lax.Precision.HIGHEST
    w1, b1, w2, b2 = params
    N = node_attr.shape[0]
    E = edge_attr.shape[0]
    edge_src, edge_dst = edge_index[0], edge_index[1]
    x = node_attr[edge_dst]
    h = jnp.maximum(jnp.dot(edge_attr, w1, precision=hp) + b1, 0.0)
    w = jnp.dot(h, w2, precision=hp) + b2
    x0 = x[:, :MUL0E_IN]
    x1 = x[:, MUL0E_IN:].reshape(E, MUL1O_IN, 3)
    sh0 = edge_sh[:, 0]
    sh1 = edge_sh[:, 1:]
    f0e = jnp.concatenate(
        [x0 * sh0[:, None], (x1 * sh1[:, None, :]).sum(-1) / math.sqrt(3.0)], axis=-1)
    f1o = jnp.concatenate(
        [x0[:, :, None] * sh1[:, None, :], x1 * sh0[:, None, None]], axis=1)
    W0e = w[:, :W0E_NUM].reshape(E, C0E, MUL0E_OUT) / math.sqrt(float(C0E))
    W1o = w[:, W0E_NUM:].reshape(E, C1O, MUL1O_OUT) / math.sqrt(float(C1O))
    o0 = jnp.einsum('ec,eco->eo', f0e, W0e, precision=hp)
    o1 = jnp.einsum('ecd,eco->eod', f1o, W1o, precision=hp).reshape(E, 3 * MUL1O_OUT)
    tp = jnp.concatenate([o0, o1], axis=-1)
    sums = jnp.zeros((N, OUT_DIM), jnp.float32).at[edge_src].add(tp)
    counts = jnp.zeros((N,), jnp.float32).at[edge_src].add(1.0)
    out = sums / jnp.maximum(counts, 1.0)[:, None]
    res = jnp.pad(node_attr, ((0, 0), (0, OUT_DIM - node_attr.shape[1])))
    return out + res


if __name__ == "__main__":
    key = jax.random.PRNGKey(0)
    kn, kea, ksh, ki1, ki2, kw1, kb1, kw2, kb2 = jax.random.split(key, 9)

    N_NODES, N_EDGES = 128, 512
    node_attr = jax.random.normal(kn, (N_NODES, IN_DIM), jnp.float32)
    edge_attr = jax.random.normal(kea, (N_EDGES, N_EDGE_FEATURES), jnp.float32)
    edge_sh = jax.random.normal(ksh, (N_EDGES, 4), jnp.float32)
    edge_src = jax.random.randint(ki1, (N_EDGES,), 0, N_NODES)
    edge_dst = jax.random.randint(ki2, (N_EDGES,), 0, N_NODES)
    edge_index = jnp.stack([edge_src, edge_dst], axis=0)

    # deterministic parameter init (fc: Linear(32,32) -> ReLU -> Linear(32,576))
    w1 = jax.random.normal(kw1, (N_EDGE_FEATURES, HIDDEN), jnp.float32) * 0.1
    b1 = jax.random.normal(kb1, (HIDDEN,), jnp.float32) * 0.1
    w2 = jax.random.normal(kw2, (HIDDEN, WEIGHT_NUMEL), jnp.float32) * 0.1
    b2 = jax.random.normal(kb2, (WEIGHT_NUMEL,), jnp.float32) * 0.1
    params = (w1, b1, w2, b2)

    out = jax.block_until_ready(
        tensor_product_conv_layer(node_attr, edge_index, edge_attr, edge_sh, params))
    ref = jax.block_until_ready(
        reference_forward(node_attr, edge_index, edge_attr, edge_sh, params))

    assert out.shape == (N_NODES, OUT_DIM)
    # Kernel uses bf16 operands on the dominant constant MXU matmuls and stores tp in
    # bf16 (~2^-8 relative quantization of activations); reference runs f32/HIGHEST.
    max_err = float(jnp.max(jnp.abs(out - ref)))
    assert jnp.allclose(out, ref, rtol=2e-2, atol=2e-2), max_err

    # TODO(synk): batch_norm=True path (e3nn BatchNorm over irreps) not implemented (default off).
    print("KERNEL_OK")
</pallas_src>

<mosaic_0001>
module attributes {stable_mosaic.version = 11 : i64} {
  func.func @tp_edge_kernel(%arg0: i32, %arg1: memref<256x40xf32, #tpu.memory_space<vmem>>, %arg2: memref<256x4xf32, #tpu.memory_space<vmem>>, %arg3: memref<256x32xf32, #tpu.memory_space<vmem>>, %arg4: memref<32x32xf32, #tpu.memory_space<vmem>>, %arg5: memref<1x32xf32, #tpu.memory_space<vmem>>, %arg6: memref<32x1152xf32, #tpu.memory_space<vmem>>, %arg7: memref<1x1152xf32, #tpu.memory_space<vmem>>, %arg8: memref<40x128xf32, #tpu.memory_space<vmem>>, %arg9: memref<4x128xf32, #tpu.memory_space<vmem>>, %arg10: memref<128x1152xbf16, #tpu.memory_space<vmem>>, %arg11: memref<1152x128xbf16, #tpu.memory_space<vmem>>, %arg12: memref<256x128xbf16, #tpu.memory_space<vmem>>) attributes {dimension_semantics = [#tpu.dimension_semantics<parallel>], iteration_bounds = array<i64: 2>, scalar_prefetch = 0 : i64, scratch_operands = 0 : i64, tpu.core_type = #tpu.core_type<tc>, window_params = [{transform_indices = @transform_0, window_bounds = array<i64: 256, 40>}, {transform_indices = @transform_1, window_bounds = array<i64: 256, 4>}, {transform_indices = @transform_2, window_bounds = array<i64: 256, 32>}, {pipeline_mode = #tpu.pipeline_mode<synchronous>, transform_indices = @transform_3, window_bounds = array<i64: 32, 32>}, {pipeline_mode = #tpu.pipeline_mode<synchronous>, transform_indices = @transform_4, window_bounds = array<i64: 1, 32>}, {pipeline_mode = #tpu.pipeline_mode<synchronous>, transform_indices = @transform_5, window_bounds = array<i64: 32, 1152>}, {pipeline_mode = #tpu.pipeline_mode<synchronous>, transform_indices = @transform_6, window_bounds = array<i64: 1, 1152>}, {pipeline_mode = #tpu.pipeline_mode<synchronous>, transform_indices = @transform_7, window_bounds = array<i64: 40, 128>}, {pipeline_mode = #tpu.pipeline_mode<synchronous>, transform_indices = @transform_8, window_bounds = array<i64: 4, 128>}, {pipeline_mode = #tpu.pipeline_mode<synchronous>, transform_indices = @transform_9, window_bounds = array<i64: 128, 1152>}, {pipeline_mode = #tpu.pipeline_mode<synchronous>, transform_indices = @transform_10, window_bounds = array<i64: 1152, 128>}, {transform_indices = @transform_11, window_bounds = array<i64: 256, 128>}]} {
    %c0 = arith.constant 0 : index
    %c0_0 = arith.constant 0 : index
    %0 = vector.load %arg1[%c0, %c0_0] : memref<256x40xf32, #tpu.memory_space<vmem>>, vector<256x40xf32>
    %c0_1 = arith.constant 0 : index
    %c0_2 = arith.constant 0 : index
    %1 = vector.load %arg8[%c0_1, %c0_2] : memref<40x128xf32, #tpu.memory_space<vmem>>, vector<40x128xf32>
    %cst = arith.constant dense<0.000000e+00> : vector<256x128xf32>
    %2 = tpu.matmul %0, %1, %cst {dimension_numbers = #tpu.dot_dimension_numbers<[1], [0], [0], [1], [0, 0, 1, 1], [], []>} : vector<256x40xf32>, vector<40x128xf32>, vector<256x128xf32> -> vector<256x128xf32>
    %c0_3 = arith.constant 0 : index
    %c0_4 = arith.constant 0 : index
    %3 = vector.load %arg2[%c0_3, %c0_4] : memref<256x4xf32, #tpu.memory_space<vmem>>, vector<256x4xf32>
    %c0_5 = arith.constant 0 : index
    %c0_6 = arith.constant 0 : index
    %4 = vector.load %arg9[%c0_5, %c0_6] : memref<4x128xf32, #tpu.memory_space<vmem>>, vector<4x128xf32>
    %cst_7 = arith.constant dense<0.000000e+00> : vector<256x128xf32>
    %5 = tpu.matmul %3, %4, %cst_7 {dimension_numbers = #tpu.dot_dimension_numbers<[1], [0], [0], [1], [0, 0, 1, 1], [], []>} : vector<256x4xf32>, vector<4x128xf32>, vector<256x128xf32> -> vector<256x128xf32>
    %6 = arith.mulf %2, %5 : vector<256x128xf32>
    %7 = arith.truncf %6 : vector<256x128xf32> to vector<256x128xbf16>
    %c0_8 = arith.constant 0 : index
    %c0_9 = arith.constant 0 : index
    %8 = vector.load %arg3[%c0_8, %c0_9] : memref<256x32xf32, #tpu.memory_space<vmem>>, vector<256x32xf32>
    %c0_10 = arith.constant 0 : index
    %c0_11 = arith.constant 0 : index
    %9 = vector.load %arg4[%c0_10, %c0_11] : memref<32x32xf32, #tpu.memory_space<vmem>>, vector<32x32xf32>
    %cst_12 = arith.constant dense<0.000000e+00> : vector<256x32xf32>
    %10 = tpu.matmul %8, %9, %cst_12 {dimension_numbers = #tpu.dot_dimension_numbers<[1], [0], [0], [1], [0, 0, 1, 1], [], []>} : vector<256x32xf32>, vector<32x32xf32>, vector<256x32xf32> -> vector<256x32xf32>
    %c0_13 = arith.constant 0 : index
    %c0_14 = arith.constant 0 : index
    %11 = vector.load %arg5[%c0_13, %c0_14] : memref<1x32xf32, #tpu.memory_space<vmem>>, vector<1x32xf32>
    %12 = vector.broadcast %11 : vector<1x32xf32> to vector<256x32xf32>
    %13 = arith.addf %10, %12 : vector<256x32xf32>
    %cst_15 = arith.constant 0.000000e+00 : f32
    %14 = vector.broadcast %cst_15 : f32 to vector<256x32xf32>
    %15 = arith.maximumf %13, %14 : vector<256x32xf32>
    %c0_16 = arith.constant 0 : index
    %c0_17 = arith.constant 0 : index
    %16 = vector.load %arg6[%c0_16, %c0_17] : memref<32x1152xf32, #tpu.memory_space<vmem>>, vector<32x384xf32>
    %cst_18 = arith.constant dense<0.000000e+00> : vector<256x384xf32>
    %17 = tpu.matmul %15, %16, %cst_18 {dimension_numbers = #tpu.dot_dimension_numbers<[1], [0], [0], [1], [0, 0, 1, 1], [], []>} : vector<256x32xf32>, vector<32x384xf32>, vector<256x384xf32> -> vector<256x384xf32>
    %c0_19 = arith.constant 0 : index
    %c0_20 = arith.constant 0 : index
    %18 = vector.load %arg7[%c0_19, %c0_20] : memref<1x1152xf32, #tpu.memory_space<vmem>>, vector<1x384xf32>
    %19 = vector.broadcast %18 : vector<1x384xf32> to vector<256x384xf32>
    %20 = arith.addf %17, %19 : vector<256x384xf32>
    %c0_21 = arith.constant 0 : index
    %c0_22 = arith.constant 0 : index
    %21 = vector.load %arg10[%c0_21, %c0_22] : memref<128x1152xbf16, #tpu.memory_space<vmem>>, vector<128x384xbf16>
    %cst_23 = arith.constant dense<0.000000e+00> : vector<256x384xf32>
    %22 = tpu.matmul %7, %21, %cst_23 {dimension_numbers = #tpu.dot_dimension_numbers<[1], [0], [0], [1], [0, 0, 1, 1], [], []>} : vector<256x128xbf16>, vector<128x384xbf16>, vector<256x384xf32> -> vector<256x384xf32>
    %23 = arith.mulf %22, %20 : vector<256x384xf32>
    %24 = arith.truncf %23 : vector<256x384xf32> to vector<256x384xbf16>
    %c0_24 = arith.constant 0 : index
    %c0_25 = arith.constant 0 : index
    %25 = vector.load %arg11[%c0_24, %c0_25] : memref<1152x128xbf16, #tpu.memory_space<vmem>>, vector<384x128xbf16>
    %cst_26 = arith.constant dense<0.000000e+00> : vector<256x128xf32>
    %26 = tpu.matmul %24, %25, %cst_26 {dimension_numbers = #tpu.dot_dimension_numbers<[1], [0], [0], [1], [0, 0, 1, 1], [], []>} : vector<256x384xbf16>, vector<384x128xbf16>, vector<256x128xf32> -> vector<256x128xf32>
    %c0_27 = arith.constant 0 : index
    %c384 = arith.constant 384 : index
    %27 = vector.load %arg6[%c0_27, %c384] : memref<32x1152xf32, #tpu.memory_space<vmem>>, vector<32x256xf32>
    %cst_28 = arith.constant dense<0.000000e+00> : vector<256x256xf32>
    %28 = tpu.matmul %15, %27, %cst_28 {dimension_numbers = #tpu.dot_dimension_numbers<[1], [0], [0], [1], [0, 0, 1, 1], [], []>} : vector<256x32xf32>, vector<32x256xf32>, vector<256x256xf32> -> vector<256x256xf32>
    %c0_29 = arith.constant 0 : index
    %c384_30 = arith.constant 384 : index
    %29 = vector.load %arg7[%c0_29, %c384_30] : memref<1x1152xf32, #tpu.memory_space<vmem>>, vector<1x256xf32>
    %30 = vector.broadcast %29 : vector<1x256xf32> to vector<256x256xf32>
    %31 = arith.addf %28, %30 : vector<256x256xf32>
    %c0_31 = arith.constant 0 : index
    %c384_32 = arith.constant 384 : index
    %32 = vector.load %arg10[%c0_31, %c384_32] : memref<128x1152xbf16, #tpu.memory_space<vmem>>, vector<128x256xbf16>
    %cst_33 = arith.constant dense<0.000000e+00> : vector<256x256xf32>
    %33 = tpu.matmul %7, %32, %cst_33 {dimension_numbers = #tpu.dot_dimension_numbers<[1], [0], [0], [1], [0, 0, 1, 1], [], []>} : vector<256x128xbf16>, vector<128x256xbf16>, vector<256x256xf32> -> vector<256x256xf32>
    %34 = arith.mulf %33, %31 : vector<256x256xf32>
    %35 = arith.truncf %34 : vector<256x256xf32> to vector<256x256xbf16>
    %c384_34 = arith.constant 384 : index
    %c0_35 = arith.constant 0 : index
    %36 = vector.load %arg11[%c384_34, %c0_35] : memref<1152x128xbf16, #tpu.memory_space<vmem>>, vector<256x128xbf16>
    %cst_36 = arith.constant dense<0.000000e+00> : vector<256x128xf32>
    %37 = tpu.matmul %35, %36, %cst_36 {dimension_numbers = #tpu.dot_dimension_numbers<[1], [0], [0], [1], [0, 0, 1, 1], [], []>} : vector<256x256xbf16>, vector<256x128xbf16>, vector<256x128xf32> -> vector<256x128xf32>
    %38 = arith.addf %26, %37 : vector<256x128xf32>
    %c0_37 = arith.constant 0 : index
    %c640 = arith.constant 640 : index
    %39 = vector.load %arg6[%c0_37, %c640] : memref<32x1152xf32, #tpu.memory_space<vmem>>, vector<32x256xf32>
    %cst_38 = arith.constant dense<0.000000e+00> : vector<256x256xf32>
    %40 = tpu.matmul %15, %39, %cst_38 {dimension_numbers = #tpu.dot_dimension_numbers<[1], [0], [0], [1], [0, 0, 1, 1], [], []>} : vector<256x32xf32>, vector<32x256xf32>, vector<256x256xf32> -> vector<256x256xf32>
    %c0_39 = arith.constant 0 : index
    %c640_40 = arith.constant 640 : index
    %41 = vector.load %arg7[%c0_39, %c640_40] : memref<1x1152xf32, #tpu.memory_space<vmem>>, vector<1x256xf32>
    %42 = vector.broadcast %41 : vector<1x256xf32> to vector<256x256xf32>
    %43 = arith.addf %40, %42 : vector<256x256xf32>
    %c0_41 = arith.constant 0 : index
    %c640_42 = arith.constant 640 : index
    %44 = vector.load %arg10[%c0_41, %c640_42] : memref<128x1152xbf16, #tpu.memory_space<vmem>>, vector<128x256xbf16>
    %cst_43 = arith.constant dense<0.000000e+00> : vector<256x256xf32>
    %45 = tpu.matmul %7, %44, %cst_43 {dimension_numbers = #tpu.dot_dimension_numbers<[1], [0], [0], [1], [0, 0, 1, 1], [], []>} : vector<256x128xbf16>, vector<128x256xbf16>, vector<256x256xf32> -> vector<256x256xf32>
    %46 = arith.mulf %45, %43 : vector<256x256xf32>
    %47 = arith.truncf %46 : vector<256x256xf32> to vector<256x256xbf16>
    %c640_44 = arith.constant 640 : index
    %c0_45 = arith.constant 0 : index
    %48 = vector.load %arg11[%c640_44, %c0_45] : memref<1152x128xbf16, #tpu.memory_space<vmem>>, vector<256x128xbf16>
    %cst_46 = arith.constant dense<0.000000e+00> : vector<256x128xf32>
    %49 = tpu.matmul %47, %48, %cst_46 {dimension_numbers = #tpu.dot_dimension_numbers<[1], [0], [0], [1], [0, 0, 1, 1], [], []>} : vector<256x256xbf16>, vector<256x128xbf16>, vector<256x128xf32> -> vector<256x128xf32>
    %50 = arith.addf %38, %49 : vector<256x128xf32>
    %c0_47 = arith.constant 0 : index
    %c896 = arith.constant 896 : index
    %51 = vector.load %arg6[%c0_47, %c896] : memref<32x1152xf32, #tpu.memory_space<vmem>>, vector<32x256xf32>
    %cst_48 = arith.constant dense<0.000000e+00> : vector<256x256xf32>
    %52 = tpu.matmul %15, %51, %cst_48 {dimension_numbers = #tpu.dot_dimension_numbers<[1], [0], [0], [1], [0, 0, 1, 1], [], []>} : vector<256x32xf32>, vector<32x256xf32>, vector<256x256xf32> -> vector<256x256xf32>
    %c0_49 = arith.constant 0 : index
    %c896_50 = arith.constant 896 : index
    %53 = vector.load %arg7[%c0_49, %c896_50] : memref<1x1152xf32, #tpu.memory_space<vmem>>, vector<1x256xf32>
    %54 = vector.broadcast %53 : vector<1x256xf32> to vector<256x256xf32>
    %55 = arith.addf %52, %54 : vector<256x256xf32>
    %c0_51 = arith.constant 0 : index
    %c896_52 = arith.constant 896 : index
    %56 = vector.load %arg10[%c0_51, %c896_52] : memref<128x1152xbf16, #tpu.memory_space<vmem>>, vector<128x256xbf16>
    %cst_53 = arith.constant dense<0.000000e+00> : vector<256x256xf32>
    %57 = tpu.matmul %7, %56, %cst_53 {dimension_numbers = #tpu.dot_dimension_numbers<[1], [0], [0], [1], [0, 0, 1, 1], [], []>} : vector<256x128xbf16>, vector<128x256xbf16>, vector<256x256xf32> -> vector<256x256xf32>
    %58 = arith.mulf %57, %55 : vector<256x256xf32>
    %59 = arith.truncf %58 : vector<256x256xf32> to vector<256x256xbf16>
    %c896_54 = arith.constant 896 : index
    %c0_55 = arith.constant 0 : index
    %60 = vector.load %arg11[%c896_54, %c0_55] : memref<1152x128xbf16, #tpu.memory_space<vmem>>, vector<256x128xbf16>
    %cst_56 = arith.constant dense<0.000000e+00> : vector<256x128xf32>
    %61 = tpu.matmul %59, %60, %cst_56 {dimension_numbers = #tpu.dot_dimension_numbers<[1], [0], [0], [1], [0, 0, 1, 1], [], []>} : vector<256x256xbf16>, vector<256x128xbf16>, vector<256x128xf32> -> vector<256x128xf32>
    %62 = arith.addf %50, %61 : vector<256x128xf32>
    %cst_57 = arith.constant 0.204124153 : f32
    %63 = vector.broadcast %cst_57 : f32 to vector<256x128xf32>
    %64 = arith.mulf %62, %63 : vector<256x128xf32>
    %65 = arith.truncf %64 : vector<256x128xf32> to vector<256x128xbf16>
    %c0_58 = arith.constant 0 : index
    %c0_59 = arith.constant 0 : index
    %66 = vector.load %arg12[%c0_58, %c0_59] : memref<256x128xbf16, #tpu.memory_space<vmem>>, vector<256x128xbf16>
    tpu.vector_store %arg12[%c0_58, %c0_59], %65 {strides = array<i32>} : memref<256x128xbf16, #tpu.memory_space<vmem>>, vector<256x128xbf16>,
    return
  }
  func.func @transform_0(%arg0: i32) -> (i32, i32) {
    %c0_i32 = arith.constant 0 : i32
    %c0_i32_0 = arith.constant 0 : i32
    return %arg0, %c0_i32 : i32, i32
  }
  func.func @transform_1(%arg0: i32) -> (i32, i32) {
    %c0_i32 = arith.constant 0 : i32
    %c0_i32_0 = arith.constant 0 : i32
    return %arg0, %c0_i32 : i32, i32
  }
  func.func @transform_2(%arg0: i32) -> (i32, i32) {
    %c0_i32 = arith.constant 0 : i32
    %c0_i32_0 = arith.constant 0 : i32
    return %arg0, %c0_i32 : i32, i32
  }
  func.func @transform_3(%arg0: i32) -> (i32, i32) {
    %c0_i32 = arith.constant 0 : i32
    %c0_i32_0 = arith.constant 0 : i32
    %c0_i32_1 = arith.constant 0 : i32
    return %c0_i32, %c0_i32_0 : i32, i32
  }
  func.func @transform_4(%arg0: i32) -> (i32, i32) {
    %c0_i32 = arith.constant 0 : i32
    %c0_i32_0 = arith.constant 0 : i32
    %c0_i32_1 = arith.constant 0 : i32
    return %c0_i32, %c0_i32_0 : i32, i32
  }
  func.func @transform_5(%arg0: i32) -> (i32, i32) {
    %c0_i32 = arith.constant 0 : i32
    %c0_i32_0 = arith.constant 0 : i32
    %c0_i32_1 = arith.constant 0 : i32
    return %c0_i32, %c0_i32_0 : i32, i32
  }
  func.func @transform_6(%arg0: i32) -> (i32, i32) {
    %c0_i32 = arith.constant 0 : i32
    %c0_i32_0 = arith.constant 0 : i32
    %c0_i32_1 = arith.constant 0 : i32
    return %c0_i32, %c0_i32_0 : i32, i32
  }
  func.func @transform_7(%arg0: i32) -> (i32, i32) {
    %c0_i32 = arith.constant 0 : i32
    %c0_i32_0 = arith.constant 0 : i32
    %c0_i32_1 = arith.constant 0 : i32
    return %c0_i32, %c0_i32_0 : i32, i32
  }
  func.func @transform_8(%arg0: i32) -> (i32, i32) {
    %c0_i32 = arith.constant 0 : i32
    %c0_i32_0 = arith.constant 0 : i32
    %c0_i32_1 = arith.constant 0 : i32
    return %c0_i32, %c0_i32_0 : i32, i32
  }
  func.func @transform_9(%arg0: i32) -> (i32, i32) {
    %c0_i32 = arith.constant 0 : i32
    %c0_i32_0 = arith.constant 0 : i32
    %c0_i32_1 = arith.constant 0 : i32
    return %c0_i32, %c0_i32_0 : i32, i32
  }
  func.func @transform_10(%arg0: i32) -> (i32, i32) {
    %c0_i32 = arith.constant 0 : i32
    %c0_i32_0 = arith.constant 0 : i32
    %c0_i32_1 = arith.constant 0 : i32
    return %c0_i32, %c0_i32_0 : i32, i32
  }
  func.func @transform_11(%arg0: i32) -> (i32, i32) {
    %c0_i32 = arith.constant 0 : i32
    %c0_i32_0 = arith.constant 0 : i32
    return %arg0, %c0_i32 : i32, i32
  }
}

</mosaic_0001>

<bundles_post_ra>
// kernel: tpu_custom_call.1
= control target key start
LH: loop header
LB: loop body
LE: loop exit
PB: predicated region body
PF: predicated region fallthrough
CT: control target
= control target key end

     0   :  { %s11386_s0 = inlined_call_operand.vmem [shape: f32[512,40], index: 0, kind: input, shape index: {}]   ;;  %s11387_s1 = inlined_call_operand.vmem [shape: f32[512,4], index: 1, kind: input, shape index: {}]   ;;  %s11388_s2 = inlined_call_operand.vmem [shape: f32[512,32], index: 2, kind: input, shape index: {}]   ;;  %s11389_s3 = inlined_call_operand.vmem [shape: f32[32,32], index: 3, kind: input, shape index: {}]   ;;  %s11390_s4 = inlined_call_operand.vmem [shape: f32[1,32], index: 4, kind: input, shape index: {}]   ;;  %s11391_s5 = inlined_call_operand.vmem [shape: f32[32,1152], index: 5, kind: input, shape index: {}]   ;;  %s11392_s6 = inlined_call_operand.vmem [shape: f32[1,1152], index: 6, kind: input, shape index: {}]   ;;  %s11393_s7 = inlined_call_operand.vmem [shape: f32[40,128], index: 7, kind: input, shape index: {}]   ;;  %s11394_s8 = inlined_call_operand.vmem [shape: f32[4,128], index: 8, kind: input, shape index: {}]   ;;  %s11395_s9 = inlined_call_operand.vmem [shape: bf16[128,1152], index: 9, kind: input, shape index: {}]   ;;  %s11396_s10 = inlined_call_operand.vmem [shape: bf16[1152,128], index: 10, kind: input, shape index: {}]   ;;  %s11397_s11 = inlined_call_operand.hbm [shape: bf16[512,128], index: 11, kind: output, shape index: {}]  }
   0x1   :  { %11624 = sst [smem:[#allocation135_spill]] %s11394_s8 }
   0x2   :  { %16 = vsyncpa [#allocation3], 0 }
   0x3   :  { %18 = vsyncpa [#allocation3 + $0x1], 0  ;;  %s7141_s17 = smov 0   ;;  %s7143_s18 = smov 0  }
   0x4   :  { %s7145_s19 = smov 0   ;;  %s7147_s20 = smov 0  }
   0x5 LB: > { %s7162_s21 = sadd.s32 4294967295, %s7077_s20   ;;  %s5751_s22 = sadd.s32 4294967294, %s7077_s20   ;;  %s7077_s20 = sphi %s7147_s20, %s12338_s20   ;;  %s7073_s19 = sphi %s7145_s19, %s12337_s19   ;;  %s7069_s18 = sphi %s7143_s18, %s12336_s18   ;;  %s7065_s17 = sphi %s7141_s17, %s12335_s17  }
   0x6   : > { %s7166_s23 = sadd.s32 1, %s7077_s20   ;;  %s277_s24 = sadd.s32 1, %s7073_s19 }
   0x7   : > { %s274_s25 = ssub.s32 %s7077_s20, %s7166_s23  ;;  %p287_p0 = scmp.ne.s32.totalorder %s7073_s19, %s7069_s18 }
   0x8   : > { %p275_p1 = scmp.eq.s32.totalorder %s274_s25, 0  ;;  %p288_p2 = scmp.eq.s32.totalorder %s7162_s21, 1 }
   0x9   : > { %p293_p3 = scmp.ne.s32.totalorder %s7069_s18, %s7065_s17  ;;  %p294_p4 = scmp.eq.s32.totalorder %s5751_s22, 1 }
   0xa   : > { %s7177_s26 = scalar_select %p275_p1, %s7073_s19, %s277_s24  }
   0xb   : > { %p7179_p5 = por %p288_p2, %p287_p0  ;;  %p7183_p6 = por %p294_p4, %p293_p3 }
   0xc   : > { %p5754_p7 = scmp.ge.s32.totalorder %s7077_s20, 1  ;;  %p363_p8 = scmp.lt.s32.totalorder %s7077_s20, 3 }
   0xe   : > { %p364_p9 = pnand %p5754_p7, %p363_p8 }
  0x10   : > { %367 = sbr.rel (%p364_p9) target bundleno = 2261 (0x8d5), region = 64 }
  0x15   : > { %v468_v0 = vld [vmem:[%s11393_s7 + $0x20] sm:$0xff]  ;;  %v1009_v1 = vld [vmem:[%s11389_s3 + $0x18] sm:$0xff]  ;;  %s5756_s16 = sshll.u32 %s7162_s21, 5  ;;  %v1008_v3 = vld [vmem:[%s11389_s3 + $0x10] sm:$0xff]  ;;  %vm809_vm0 = vcmask 1043456   ;;  %s11627_s8 = sld [smem:[#allocation135_spill]] }
  0x16   : > { %v467_v2 = vld [vmem:[%s11393_s7 + $0x18] sm:$0xff]  ;;  %577 = vmatpush.msra.mxu0 %v468_v0  ;;  %1123 = vmatpush.msra.mxu2 %v1009_v1  ;;  %p414_p10 = scmp.lt.s32.totalorder %s5756_s16, 63  ;;  %v466_v4 = vld [vmem:[%s11393_s7 + $0x10] sm:$0xff]  ;;  %v1007_v5 = vld [vmem:[%s11389_s3 + $0x8] sm:$0xff]  ;;  %vm712_vm1 = vcmask 31744   ;;  %vm1014_vm2 = vcmask 261120  }
  0x17   : > { %6969 = vmatpush.msra.mxu3 %v1009_v1  ;;  %v465_v7 = vld [vmem:[%s11393_s7 + $0x8] sm:$0xff]  ;;  %v1006_v8 = vld [vmem:[%s11389_s3] sm:$0xff]  ;;  %vm469_vm3 = vcmask 326656   ;;  %v1265_v16 = vld [vmem:[%s11391_s5 + $0xd8] sm:$0xff]  ;;  %s410_s24 = sand.u32 1, %s7069_s18  }
  0x18   : > { %578 = vmatpush.msra.mxu0 %v467_v2  ;;  %1124 = vmatpush.msra.mxu2 %v1008_v3  ;;  %s12340_s16 = smov (!%p414_p10, %s5756_s16), 63  ;;  %v464_v9 = vld [vmem:[%s11393_s7] sm:$0xff]  ;;  %v1262_v31 = vld [vmem:[%s11391_s5 + $0x90] sm:$0xff]  ;;  %v1259_v48 = vld [vmem:[%s11391_s5 + $0x48] sm:$0xff] }
  0x19   : > { %6970 = vmatpush.msra.mxu3 %v1008_v3  ;;  %s5757_s29 = sshll.u32 %s12340_s16, 3  ;;  %v1266_v1 = vld [vmem:[%s11391_s5 + $0xe0] sm:$0xff]  ;;  %v1267_v2 = vld [vmem:[%s11391_s5 + $0xe8] sm:$0xff]  ;;  %v1263_v3 = vld [vmem:[%s11391_s5 + $0x98] sm:$0xff]  ;;  %s5755_s16 = sshll.u32 %s410_s24, 7 }
  0x1a   : > { %579 = vmatpush.msra.mxu0 %v466_v4  ;;  %1125 = vmatpush.msra.mxu2 %v1007_v5  ;;  %s7221_s13 = scalar_lea.vmem %s11387_s1, %s5757_s29  ;;  %s7226_s22 = scalar_lea.vmem %s11388_s2, %s5757_s29  ;;  %v1264_v4 = vld [vmem:[%s11391_s5 + $0xa0] sm:$0xff] }
  0x1b   : > { %v711_v6 = vld [vmem:[%s11627_s8] sm:$0xf]  ;;  %6971 = vmatpush.msra.mxu3 %v1007_v5  ;;  %v694_v10 = vld [vmem:[%s7221_s13 + $0x78] sm:$0xff]  ;;  %s7236_s30 = scalar_lea.vmem %s11386_s0, %s5757_s29  ;;  %v975_v15 = vld [vmem:[%s7226_s22 + $0x8] sm:$0xff]  ;;  %s11260_s25 = scalar_lea.vmem [#allocation2], %s5755_s16 }
  0x1c   : > { %6968 = vmatpush.msk.msra.mxu1 %vm809_vm0, %v711_v6  ;;  %580 = vmatpush.msra.mxu0 %v465_v7  ;;  %v974_v11 = vld [vmem:[%s7226_s22] sm:$0xff]  ;;  %v433_v17 = vld [vmem:[%s7236_s30 + $0x8] sm:$0xff]  ;;  %v976_v20 = vld [vmem:[%s7226_s22 + $0x10] sm:$0xff]  ;;  %s6872_s8 = sshll.u32 %s7162_s21, 7  ;;  %s5662_s12 = sshll.u32 %s11260_s25, 4  ;;  %s5663_s12 = int_to_ptr.vmem [resolvable:$true] %s5662_s12 }
  0x1d   : > { %1126 = vmatpush.msra.mxu2 %v1006_v8  ;;  %5810 = vmatmul.msk.f32.vlgmr.msra.gmra.mxu1 %vm712_vm1, %v694_v10  ;;  %v432_v12 = vld [vmem:[%s7236_s30] sm:$0xff]  ;;  %v991_v18 = vld [vmem:[%s7226_s22 + $0x88] sm:$0xff]  ;;  %v434_v21 = vld [vmem:[%s7236_s30 + $0x10] sm:$0xff]  ;;  %s5650_s21 = scalar_lea.sflag [#allocation3], %s410_s24  ;;  %s7035_s29 = scalar_lea.hbm %s11397_s11, 256 }
  0x1e   : > { %5827 = vmatmul.msk.f32.vlgmr.msra.gmra.mxu2 %vm1014_vm2, %v974_v11  ;;  %v990_v13 = vld [vmem:[%s7226_s22 + $0x80] sm:$0xff]  ;;  %581 = vmatpush.msra.mxu0 %v464_v9  ;;  %v696_v19 = vld [vmem:[%s7221_s13 + $0x88] sm:$0xff]  ;;  %v992_v22 = vld [vmem:[%s7226_s22 + $0x90] sm:$0xff] }
  0x1f   : > { %6972 = vmatpush.msra.mxu3 %v1006_v8  ;;  %5762 = vmatmul.msk.f32.vlgmr.msra.gmra.mxu0 %vm469_vm3, %v432_v12  ;;  %v695_v14 = vld [vmem:[%s7221_s13 + $0x80] sm:$0xff]  ;;  %v697_v23 = vld [vmem:[%s7221_s13 + $0x90] sm:$0xff]  ;;  %v977_v24 = vld [vmem:[%s7226_s22 + $0x18] sm:$0xff] }
  0x20   : > { %5843 = vmatmul.msk.f32.vlgmr.msra.gmra.mxu3 %vm1014_vm2, %v990_v13  ;;  %5794 = vmatpush.msk.msrb.mxu0 %vm809_vm0, %v711_v6  ;;  %v435_v25 = vld [vmem:[%s7236_s30 + $0x18] sm:$0xff]  ;;  %v978_v28 = vld [vmem:[%s7226_s22 + $0x20] sm:$0xff]  ;;  %v979_v33 = vld [vmem:[%s7226_s22 + $0x28] sm:$0xff] }
  0x21   : > { %1384 = vmatpush.msrb.mxu3 %v1265_v16  ;;  %v993_v26 = vld [vmem:[%s7226_s22 + $0x98] sm:$0xff]  ;;  %v436_v29 = vld [vmem:[%s7236_s30 + $0x20] sm:$0xff]  ;;  %v437_v34 = vld [vmem:[%s7236_s30 + $0x28] sm:$0xff]  ;;  %1497 = vmatpush.msrb.mxu1 %v1266_v1 }
  0x22   : > { %v698_v27 = vld [vmem:[%s7221_s13 + $0x98] sm:$0xff]  ;;  %v994_v30 = vld [vmem:[%s7226_s22 + $0xa0] sm:$0xff]  ;;  %v995_v35 = vld [vmem:[%s7226_s22 + $0xa8] sm:$0xff]  ;;  %1610 = vmatpush.msrb.mxu2 %v1267_v2 }
  0x23   : > { %1385 = vmatpush.msrb.mxu3 %v1262_v31  ;;  %v699_v32 = vld [vmem:[%s7221_s13 + $0xa0] sm:$0xff]  ;;  %v700_v36 = vld [vmem:[%s7221_s13 + $0xa8] sm:$0xff]  ;;  %v980_v37 = vld [vmem:[%s7226_s22 + $0x30] sm:$0xff]  ;;  %1498 = vmatpush.msrb.mxu1 %v1263_v3 }
  0x24   : > { %v438_v38 = vld [vmem:[%s7236_s30 + $0x30] sm:$0xff]  ;;  %v981_v41 = vld [vmem:[%s7226_s22 + $0x38] sm:$0xff]  ;;  %v982_v45 = vld [vmem:[%s7226_s22 + $0x40] sm:$0xff]  ;;  %1611 = vmatpush.msrb.mxu2 %v1264_v4 }
  0x25   : > { %5811 = vmatmul.msk.f32.gmra.mxu1 %vm712_vm1, %v695_v14  ;;  %v996_v39 = vld [vmem:[%s7226_s22 + $0xb0] sm:$0xff]  ;;  %v439_v42 = vld [vmem:[%s7236_s30 + $0x38] sm:$0xff]  ;;  %v440_v46 = vld [vmem:[%s7236_s30 + $0x40] sm:$0xff]  ;;  %1386 = vmatpush.msrb.mxu3 %v1259_v48 }
  0x26   : > { %5828 = vmatmul.msk.f32.gmra.mxu2 %vm1014_vm2, %v975_v15  ;;  %v701_v40 = vld [vmem:[%s7221_s13 + $0xb0] sm:$0xff]  ;;  %v997_v43 = vld [vmem:[%s7226_s22 + $0xb8] sm:$0xff]  ;;  %v998_v47 = vld [vmem:[%s7226_s22 + $0xc0] sm:$0xff] }
  0x27   : > { %5763 = vmatmul.msk.f32.gmra.mxu0 %vm469_vm3, %v433_v17  ;;  %v702_v44 = vld [vmem:[%s7221_s13 + $0xb8] sm:$0xff]  ;;  %v703_v49 = vld [vmem:[%s7221_s13 + $0xc0] sm:$0xff]  ;;  %v983_v50 = vld [vmem:[%s7226_s22 + $0x48] sm:$0xff] }
  0x28   : > { %5844 = vmatmul.msk.f32.gmra.mxu3 %vm1014_vm2, %v991_v18  ;;  %v441_v51 = vld [vmem:[%s7236_s30 + $0x48] sm:$0xff]  ;;  %v984_v54 = vld [vmem:[%s7226_s22 + $0x50] sm:$0xff]  ;;  %v985_v58 = vld [vmem:[%s7226_s22 + $0x58] sm:$0xff] }
  0x29   : > { %v999_v52 = vld [vmem:[%s7226_s22 + $0xc8] sm:$0xff]  ;;  %v442_v55 = vld [vmem:[%s7236_s30 + $0x50] sm:$0xff]  ;;  %v443_v59 = vld [vmem:[%s7236_s30 + $0x58] sm:$0xff] }
  0x2a   : > { %v704_v53 = vld [vmem:[%s7221_s13 + $0xc8] sm:$0xff]  ;;  %v1000_v56 = vld [vmem:[%s7226_s22 + $0xd0] sm:$0xff]  ;;  %v1001_v60 = vld [vmem:[%s7226_s22 + $0xd8] sm:$0xff] }
  0x2b   : > { %v705_v57 = vld [vmem:[%s7221_s13 + $0xd0] sm:$0xff]  ;;  %v706_v61 = vld [vmem:[%s7221_s13 + $0xd8] sm:$0xff]  ;;  %v986_v62 = vld [vmem:[%s7226_s22 + $0x60] sm:$0xff] }
  0x2c   : > { %v444_v63 = vld [vmem:[%s7236_s30 + $0x60] sm:$0xff]  ;;  %v1260_v5 = vld [vmem:[%s11391_s5 + $0x50] sm:$0xff]  ;;  %v1261_v6 = vld [vmem:[%s11391_s5 + $0x58] sm:$0xff] }
  0x2d   : > { %5812 = vmatmul.msk.f32.gmra.mxu1 %vm712_vm1, %v696_v19  ;;  %v1002_v0 = vld [vmem:[%s7226_s22 + $0xe0] sm:$0xff]  ;;  %v987_v8 = vld [vmem:[%s7226_s22 + $0x68] sm:$0xff]  ;;  %1612 = vmatpush.msrb.mxu2 %v1261_v6  ;;  %v1258_v11 = vld [vmem:[%s11391_s5 + $0x10] sm:$0xff] }
  0x2e   : > { %5829 = vmatmul.msk.f32.gmra.mxu2 %vm1014_vm2, %v976_v20  ;;  %v707_v7 = vld [vmem:[%s7221_s13 + $0xe0] sm:$0xff]  ;;  %1499 = vmatpush.msrb.mxu1 %v1260_v5  ;;  %v1257_v10 = vld [vmem:[%s11391_s5 + $0x8] sm:$0xff]  ;;  %v988_v15 = vld [vmem:[%s7226_s22 + $0x70] sm:$0xff] }
  0x2f   : > { %5764 = vmatmul.msk.f32.gmra.mxu0 %vm469_vm3, %v434_v21  ;;  %v1256_v9 = vld [vmem:[%s11391_s5] sm:$0xff]  ;;  %v445_v12 = vld [vmem:[%s7236_s30 + $0x68] sm:$0xff]  ;;  %1613 = vmatpush.msrb.mxu2 %v1258_v11  ;;  %v446_v16 = vld [vmem:[%s7236_s30 + $0x70] sm:$0xff] }
  0x30   : > { %5845 = vmatmul.msk.f32.gmra.mxu3 %vm1014_vm2, %v992_v22  ;;  %v1003_v13 = vld [vmem:[%s7226_s22 + $0xe8] sm:$0xff]  ;;  %1500 = vmatpush.msrb.mxu1 %v1257_v10  ;;  %v1004_v17 = vld [vmem:[%s7226_s22 + $0xf0] sm:$0xff]  ;;  %v989_v19 = vld [vmem:[%s7226_s22 + $0x78] sm:$0xff] }
  0x31   : > { %1387 = vmatpush.msrb.mxu3 %v1256_v9  ;;  %v708_v14 = vld [vmem:[%s7221_s13 + $0xe8] sm:$0xff]  ;;  %v709_v18 = vld [vmem:[%s7221_s13 + $0xf0] sm:$0xff]  ;;  %v447_v20 = vld [vmem:[%s7236_s30 + $0x78] sm:$0xff] }
  0x32   : > { %v1005_v21 = vld [vmem:[%s7226_s22 + $0xf8] sm:$0xff]  ;;  %v453_v2 = vld [vmem:[%s7236_s30 + $0xa8] sm:$0xff]  ;;  %v454_v10 = vld [vmem:[%s7236_s30 + $0xb0] sm:$0xff]  ;;  %s5661_s22 = scalar_lea.hbm %s11397_s11, %s6872_s8 }
  0x33   : > { %s5664_s14 = sshll.u32 %s5661_s22, 4  ;;  %s5665_s14 = int_to_ptr.hbm [resolvable:$true] %s5664_s14 }
  0x34   : > { %s7029_s15 = sshra.s32 %s5665_s14, 4  ;;  %s7030_s15 = int_to_ptr.hbm [resolvable:$true] %s7029_s15 }
  0x35   : > { %5813 = vmatmul.msk.f32.gmra.mxu1 %vm712_vm1, %v697_v23  ;;  %v710_v23 = vld [vmem:[%s7221_s13 + $0xf8] sm:$0xff]  ;;  %p7036_p0 = scmp.lt.s32.totalorder %s7030_s15, %s11397_s11 }
  0x36   : > { %5830 = vmatmul.msk.f32.gmra.mxu2 %vm1014_vm2, %v977_v24 }
  0x37   : > { %5765 = vmatmul.msk.f32.gmra.mxu0 %vm469_vm3, %v435_v25  ;;  %v448_v25 = vld [vmem:[%s7236_s30 + $0x80] sm:$0xff] }
  0x38   : > { %5846 = vmatmul.msk.f32.gmra.mxu3 %vm1014_vm2, %v993_v26  ;;  %v7411_v26 = vld [vmem:[%s11390_s4] ss:$0 sm:$0xff] }
  0x3d   : > { %5814 = vmatmul.msk.f32.gmra.mxu1 %vm712_vm1, %v698_v27 }
  0x3e   : > { %5831 = vmatmul.msk.f32.gmra.mxu2 %vm1014_vm2, %v978_v28 }
  0x3f   : > { %5766 = vmatmul.msk.f32.gmra.mxu0 %vm469_vm3, %v436_v29 }
  0x40   : > { %5847 = vmatmul.msk.f32.gmra.mxu3 %vm1014_vm2, %v994_v30 }
  0x45   : > { %5815 = vmatmul.msk.f32.gmra.mxu1 %vm712_vm1, %v699_v32  ;;  %v6041_v32 = vld [vmem:[%s11395_s9 + $0x1f8] sm:$0xf] }
  0x46   : > { %5832 = vmatmul.msk.f32.gmra.mxu2 %vm1014_vm2, %v979_v33  ;;  %v6750_v33 = vld [vmem:[%s11395_s9 + $0x218] sm:$0xf0] }
  0x47   : > { %5767 = vmatmul.msk.f32.gmra.mxu0 %vm469_vm3, %v437_v34 }
  0x48   : > { %5848 = vmatmul.msk.f32.gmra.mxu3 %vm1014_vm2, %v995_v35  ;;  %v449_v35 = vld [vmem:[%s7236_s30 + $0x88] sm:$0xff] }
  0x4d   : > { %5816 = vmatmul.msk.f32.gmra.mxu1 %vm712_vm1, %v700_v36  ;;  %v6042_v36 = vor.u32 %v6750_v33, %v6041_v32 }
  0x4e   : > { %5833 = vmatmul.msk.f32.gmra.mxu2 %vm1014_vm2, %v980_v37 }
  0x4f   : > { %5768 = vmatmul.msk.f32.gmra.mxu0 %vm469_vm3, %v438_v38  ;;  %1871 = vmatpush.bf16.msra.mxu3 %v6042_v36 }
  0x50   : > { %5849 = vmatmul.msk.f32.gmra.mxu3 %vm1014_vm2, %v996_v39 }
  0x55   : > { %5817 = vmatmul.msk.f32.gmra.mxu1 %vm712_vm1, %v701_v40 }
  0x56   : > { %5834 = vmatmul.msk.f32.gmra.mxu2 %vm1014_vm2, %v981_v41 }
  0x57   : > { %5769 = vmatmul.msk.f32.gmra.mxu0 %vm469_vm3, %v439_v42 }
  0x58   : > { %5850 = vmatmul.msk.f32.gmra.mxu3 %vm1014_vm2, %v997_v43  ;;  %v450_v43 = vld [vmem:[%s7236_s30 + $0x90] sm:$0xff] }
  0x5d   : > { %5818 = vmatmul.msk.f32.gmra.mxu1 %vm712_vm1, %v702_v44 }
  0x5e   : > { %5835 = vmatmul.msk.f32.gmra.mxu2 %vm1014_vm2, %v982_v45 }
  0x5f   : > { %5770 = vmatmul.msk.f32.gmra.mxu0 %vm469_vm3, %v440_v46 }
  0x60   : > { %5851 = vmatmul.msk.f32.gmra.mxu3 %vm1014_vm2, %v998_v47 }
  0x65   : > { %5819 = vmatmul.msk.f32.gmra.mxu1 %vm712_vm1, %v703_v49 }
  0x66   : > { %5836 = vmatmul.msk.f32.gmra.mxu2 %vm1014_vm2, %v983_v50  ;;  %v451_v50 = vld [vmem:[%s7236_s30 + $0x98] sm:$0xff] }
  0x67   : > { %5771 = vmatmul.msk.f32.gmra.mxu0 %vm469_vm3, %v441_v51 }
  0x68   : > { %5852 = vmatmul.msk.f32.gmra.mxu3 %vm1014_vm2, %v999_v52 }
  0x6d   : > { %5820 = vmatmul.msk.f32.gmra.mxu1 %vm712_vm1, %v704_v53 }
  0x6e   : > { %5837 = vmatmul.msk.f32.gmra.mxu2 %vm1014_vm2, %v984_v54 }
  0x6f   : > { %5772 = vmatmul.msk.f32.gmra.mxu0 %vm469_vm3, %v442_v55 }
  0x70   : > { %5853 = vmatmul.msk.f32.gmra.mxu3 %vm1014_vm2, %v1000_v56 }
  0x75   : > { %5821 = vmatmul.msk.f32.gmra.mxu1 %vm712_vm1, %v705_v57  ;;  %v452_v57 = vld [vmem:[%s7236_s30 + $0xa0] sm:$0xff] }
  0x76   : > { %5838 = vmatmul.msk.f32.gmra.mxu2 %vm1014_vm2, %v985_v58 }
  0x77   : > { %5773 = vmatmul.msk.f32.gmra.mxu0 %vm469_vm3, %v443_v59 }
  0x78   : > { %5854 = vmatmul.msk.f32.gmra.mxu3 %vm1014_vm2, %v1001_v60 }
  0x7d   : > { %5822 = vmatmul.msk.f32.gmra.mxu1 %vm712_vm1, %v706_v61 }
  0x7e   : > { %5839 = vmatmul.msk.f32.gmra.mxu2 %vm1014_vm2, %v986_v62 }
  0x7f   : > { %5774 = vmatmul.msk.f32.gmra.mxu0 %vm469_vm3, %v444_v63  ;;  %v6029_v63 = vld [vmem:[%s11395_s9 + $0x1b0] sm:$0xf] }
  0x80   : > { %5855 = vmatmul.msk.f32.gmra.mxu3 %vm1014_vm2, %v1002_v0  ;;  %v6747_v0 = vld [vmem:[%s11395_s9 + $0x1d0] sm:$0xf0] }
  0x81   : > { %v6030_v3 = vor.u32 %v6747_v0, %v6029_v63  ;;  %v458_v63 = vld [vmem:[%s7236_s30 + $0xd0] sm:$0xff] }
  0x83   : > { %1872 = vmatpush.bf16.msra.mxu3 %v6030_v3 }
  0x85   : > { %5823 = vmatmul.msk.f32.gmra.mxu1 %vm712_vm1, %v707_v7 }
  0x86   : > { %5840 = vmatmul.msk.f32.gmra.mxu2 %vm1014_vm2, %v987_v8 }
  0x87   : > { %5775 = vmatmul.msk.f32.gmra.mxu0 %vm469_vm3, %v445_v12 }
  0x88   : > { %5856 = vmatmul.msk.f32.gmra.mxu3 %vm1014_vm2, %v1003_v13 }
  0x8d   : > { %5824 = vmatmul.msk.f32.gmra.mxu1 %vm712_vm1, %v708_v14 }
  0x8e   : > { %5841 = vmatmul.msk.f32.gmra.mxu2 %vm1014_vm2, %v988_v15 }
  0x8f   : > { %5776 = vmatmul.msk.f32.gmra.mxu0 %vm469_vm3, %v446_v16 }
  0x90   : > { %5857 = vmatmul.msk.f32.gmra.mxu3 %vm1014_vm2, %v1004_v17  ;;  %v455_v17 = vld [vmem:[%s7236_s30 + $0xb8] sm:$0xff] }
  0x95   : > { %5825 = vmatmul.msk.f32.gmra.mxu1 %vm712_vm1, %v709_v18 }
  0x96   : > { %5842 = vmatmul.msk.f32.gmra.mxu2 %vm1014_vm2, %v989_v19 }
  0x97   : > { %5777 = vmatmul.msk.f32.gmra.mxu0 %vm469_vm3, %v447_v20 }
  0x98   : > { %5858 = vmatmul.msk.f32.gmra.mxu3 %vm1014_vm2, %v1005_v21 }
  0x9a   : > { %v7401_v22 = vpop.f32.mrf.mxu1 }
  0x9c   : > { %v7404_v24 = vpop.f32.mrf.mxu0 }
  0x9d   : > { %5826 = vmatmul.msk.f32.gmra.mxu1 %vm712_vm1, %v710_v23 }
  0x9f   : > { %5778 = vmatmul.msk.f32.gmra.mxu0 %vm469_vm3, %v448_v25 }
  0xa1   : > { %v1128_v27 = vpop.f32.mrf.mxu2 }
  0xa2   : > { %v1129_v28 = vadd.f32 %v7411_v26, %v1128_v27  ;;  %v7415_v29 = vpop.f32.mrf.mxu1  ;;  %v456_v27 = vld [vmem:[%s7236_s30 + $0xc0] sm:$0xff] }
  0xa3   : > { %v7417_v30 = vpop.f32.mrf.mxu3 }
  0xa4   : > { %v7419_v31 = vmax.f32 %v1129_v28, 0.0  ;;  %v7427_v34 = vpop.f32.mrf.mxu0 }
  0xa6   : > { %11628 = vst [vmem:[#allocation5_spill] sm:$0xff] %v7419_v31  ;;  %5859 = vmatmul.msk.f32.vlgmr.msrb.gmra.mxu3 %vm1014_vm2, %v7419_v31  ;;  %5891 = vmatmul.msk.f32.vlgmr.msrb.gmra.mxu1 %vm1014_vm2, %v7419_v31 }
  0xa7   : > { %5923 = vmatmul.msk.f32.vlgmr.msrb.gmra.mxu2 %vm1014_vm2, %v7419_v31  ;;  %5779 = vmatmul.msk.f32.gmra.mxu0 %vm469_vm3, %v449_v35 }
  0xa9   : > { %v1131_v37 = vpop.f32.mrf.mxu2 }
  0xaa   : > { %v1132_v38 = vadd.f32 %v7411_v26, %v1131_v37  ;;  %v7438_v39 = vpop.f32.mrf.mxu1  ;;  %v6017_v37 = vld [vmem:[%s11395_s9 + $0x168] sm:$0xf] }
  0xab   : > { %v7440_v40 = vpop.f32.mrf.mxu3 }
  0xac   : > { %v7442_v41 = vmax.f32 %v1132_v38, 0.0  ;;  %v7444_v42 = vpop.f32.mrf.mxu0  ;;  %v6744_v38 = vld [vmem:[%s11395_s9 + $0x188] sm:$0xf0] }
  0xae   : > { %11629 = vst [vmem:[#allocation6_spill] sm:$0xff] %v7442_v41  ;;  %5860 = vmatmul.msk.f32.gmra.mxu3 %vm1014_vm2, %v7442_v41  ;;  %5892 = vmatmul.msk.f32.gmra.mxu1 %vm1014_vm2, %v7442_v41 }
  0xaf   : > { %5924 = vmatmul.msk.f32.gmra.mxu2 %vm1014_vm2, %v7442_v41  ;;  %5780 = vmatmul.msk.f32.gmra.mxu0 %vm469_vm3, %v450_v43 }
  0xb1   : > { %v1134_v44 = vpop.f32.mrf.mxu2 }
  0xb2   : > { %v1135_v45 = vadd.f32 %v7411_v26, %v1134_v44  ;;  %v7455_v46 = vpop.f32.mrf.mxu1  ;;  %v457_v44 = vld [vmem:[%s7236_s30 + $0xc8] sm:$0xff] }
  0xb3   : > { %11630 = vst [vmem:[#allocation7_spill] sm:$0xff] %v7455_v46  ;;  %v7457_v47 = vpop.f32.mrf.mxu3 }
  0xb4   : > { %v7459_v48 = vmax.f32 %v1135_v45, 0.0  ;;  %v7461_v49 = vpop.f32.mrf.mxu0  ;;  %v6018_v45 = vor.u32 %v6744_v38, %v6017_v37 }
  0xb6   : > { %11631 = vst [vmem:[#allocation8_spill] sm:$0xff] %v7459_v48  ;;  %5861 = vmatmul.msk.f32.gmra.mxu3 %vm1014_vm2, %v7459_v48  ;;  %5893 = vmatmul.msk.f32.gmra.mxu1 %vm1014_vm2, %v7459_v48 }
  0xb7   : > { %5925 = vmatmul.msk.f32.gmra.mxu2 %vm1014_vm2, %v7459_v48  ;;  %5781 = vmatmul.msk.f32.gmra.mxu0 %vm469_vm3, %v451_v50 }
  0xb8   : > { %1873 = vmatpush.bf16.msra.mxu3 %v6018_v45 }
  0xb9   : > { %v1137_v51 = vpop.f32.mrf.mxu2 }
  0xba   : > { %v1138_v52 = vadd.f32 %v7411_v26, %v1137_v51  ;;  %v7472_v53 = vpop.f32.mrf.mxu1 }
  0xbb   : > { %11632 = vst [vmem:[#allocation9_spill] sm:$0xff] %v7472_v53  ;;  %v7474_v54 = vpop.f32.mrf.mxu3 }
  0xbc   : > { %v7476_v55 = vmax.f32 %v1138_v52, 0.0  ;;  %v7478_v56 = vpop.f32.mrf.mxu0 }
  0xbe   : > { %11633 = vst [vmem:[#allocation10_spill] sm:$0xff] %v7476_v55  ;;  %5862 = vmatmul.msk.f32.gmra.mxu3 %vm1014_vm2, %v7476_v55  ;;  %5894 = vmatmul.msk.f32.gmra.mxu1 %vm1014_vm2, %v7476_v55 }
  0xbf   : > { %5926 = vmatmul.msk.f32.gmra.mxu2 %vm1014_vm2, %v7476_v55  ;;  %5782 = vmatmul.msk.f32.gmra.mxu0 %vm469_vm3, %v452_v57 }
  0xc1   : > { %v1140_v58 = vpop.f32.mrf.mxu2 }
  0xc2   : > { %v1141_v59 = vadd.f32 %v7411_v26, %v1140_v58  ;;  %v7489_v60 = vpop.f32.mrf.mxu1 }
  0xc3   : > { %11634 = vst [vmem:[#allocation11_spill] sm:$0xff] %v7489_v60  ;;  %v7491_v61 = vpop.f32.mrf.mxu3 }
  0xc4   : > { %v7493_v62 = vmax.f32 %v1141_v59, 0.0  ;;  %v7501_v1 = vpop.f32.mrf.mxu0 }
  0xc6   : > { %11635 = vst [vmem:[#allocation12_spill] sm:$0xff] %v7493_v62  ;;  %5863 = vmatmul.msk.f32.gmra.mxu3 %vm1014_vm2, %v7493_v62  ;;  %5895 = vmatmul.msk.f32.gmra.mxu1 %vm1014_vm2, %v7493_v62 }
  0xc7   : > { %5927 = vmatmul.msk.f32.gmra.mxu2 %vm1014_vm2, %v7493_v62  ;;  %5783 = vmatmul.msk.f32.gmra.mxu0 %vm469_vm3, %v453_v2 }
  0xc9   : > { %v1143_v4 = vpop.f32.mrf.mxu2 }
  0xca   : > { %v1144_v5 = vadd.f32 %v7411_v26, %v1143_v4  ;;  %v7512_v6 = vpop.f32.mrf.mxu1 }
  0xcb   : > { %11636 = vst [vmem:[#allocation13_spill] sm:$0xff] %v7512_v6  ;;  %v7514_v7 = vpop.f32.mrf.mxu3  ;;  %v680_v6 = vld [vmem:[%s7221_s13 + $0x8] sm:$0xff] }
  0xcc   : > { %v7516_v8 = vmax.f32 %v1144_v5, 0.0  ;;  %v7518_v9 = vpop.f32.mrf.mxu0 }
  0xce   : > { %11637 = vst [vmem:[#allocation14_spill] sm:$0xff] %v7516_v8  ;;  %5864 = vmatmul.msk.f32.gmra.mxu3 %vm1014_vm2, %v7516_v8  ;;  %5896 = vmatmul.msk.f32.gmra.mxu1 %vm1014_vm2, %v7516_v8 }
  0xcf   : > { %5928 = vmatmul.msk.f32.gmra.mxu2 %vm1014_vm2, %v7516_v8  ;;  %5784 = vmatmul.msk.f32.gmra.mxu0 %vm469_vm3, %v454_v10 }
  0xd1   : > { %v1146_v11 = vpop.f32.mrf.mxu2 }
  0xd2   : > { %v1147_v12 = vadd.f32 %v7411_v26, %v1146_v11  ;;  %v7529_v13 = vpop.f32.mrf.mxu1  ;;  %v459_v11 = vld [vmem:[%s7236_s30 + $0xd8] sm:$0xff] }
  0xd3   : > { %11638 = vst [vmem:[#allocation15_spill] sm:$0xff] %v7529_v13  ;;  %v7531_v14 = vpop.f32.mrf.mxu3 }
  0xd4   : > { %v7533_v15 = vmax.f32 %v1147_v12, 0.0  ;;  %v7535_v16 = vpop.f32.mrf.mxu0 }
  0xd6   : > { %11639 = vst [vmem:[#allocation16_spill] sm:$0xff] %v7533_v15  ;;  %5865 = vmatmul.msk.f32.gmra.mxu3 %vm1014_vm2, %v7533_v15  ;;  %5897 = vmatmul.msk.f32.gmra.mxu1 %vm1014_vm2, %v7533_v15 }
  0xd7   : > { %5929 = vmatmul.msk.f32.gmra.mxu2 %vm1014_vm2, %v7533_v15  ;;  %5785 = vmatmul.msk.f32.gmra.mxu0 %vm469_vm3, %v455_v17 }
  0xd9   : > { %v1149_v18 = vpop.f32.mrf.mxu2 }
  0xda   : > { %v1150_v19 = vadd.f32 %v7411_v26, %v1149_v18  ;;  %v7546_v20 = vpop.f32.mrf.mxu1 }
  0xdb   : > { %11640 = vst [vmem:[#allocation17_spill] sm:$0xff] %v7546_v20  ;;  %v7548_v21 = vpop.f32.mrf.mxu3 }
  0xdc   : > { %v7550_v23 = vmax.f32 %v1150_v19, 0.0  ;;  %v7552_v25 = vpop.f32.mrf.mxu0 }
  0xde   : > { %11641 = vst [vmem:[#allocation18_spill] sm:$0xff] %v7550_v23  ;;  %5866 = vmatmul.msk.f32.gmra.mxu3 %vm1014_vm2, %v7550_v23  ;;  %5898 = vmatmul.msk.f32.gmra.mxu1 %vm1014_vm2, %v7550_v23 }
  0xdf   : > { %5930 = vmatmul.msk.f32.gmra.mxu2 %vm1014_vm2, %v7550_v23  ;;  %5786 = vmatmul.msk.f32.gmra.mxu0 %vm469_vm3, %v456_v27 }
  0xe1   : > { %v1152_v28 = vpop.f32.mrf.mxu2 }
  0xe2   : > { %v1153_v32 = vadd.f32 %v7411_v26, %v1152_v28  ;;  %v7563_v33 = vpop.f32.mrf.mxu1 }
  0xe3   : > { %11642 = vst [vmem:[#allocation19_spill] sm:$0xff] %v7563_v33  ;;  %v7565_v35 = vpop.f32.mrf.mxu3  ;;  %v6751_v33 = vld [vmem:[%s11395_s9 + $0x220] sm:$0xf0] }
  0xe4   : > { %v7567_v36 = vmax.f32 %v1153_v32, 0.0  ;;  %v7575_v43 = vpop.f32.mrf.mxu0  ;;  %v460_v32 = vld [vmem:[%s7236_s30 + $0xe0] sm:$0xff] }
  0xe6   : > { %11643 = vst [vmem:[#allocation20_spill] sm:$0xff] %v7567_v36  ;;  %5867 = vmatmul.msk.f32.gmra.mxu3 %vm1014_vm2, %v7567_v36  ;;  %5899 = vmatmul.msk.f32.gmra.mxu1 %vm1014_vm2, %v7567_v36 }
  0xe7   : > { %5931 = vmatmul.msk.f32.gmra.mxu2 %vm1014_vm2, %v7567_v36  ;;  %5787 = vmatmul.msk.f32.gmra.mxu0 %vm469_vm3, %v457_v44 }
  0xe9   : > { %v1155_v50 = vpop.f32.mrf.mxu2 }
  0xea   : > { %v1156_v51 = vadd.f32 %v7411_v26, %v1155_v50  ;;  %v7586_v52 = vpop.f32.mrf.mxu1 }
  0xeb   : > { %11644 = vst [vmem:[#allocation21_spill] sm:$0xff] %v7586_v52  ;;  %v7588_v57 = vpop.f32.mrf.mxu3 }
  0xec   : > { %v7590_v58 = vmax.f32 %v1156_v51, 0.0  ;;  %v7592_v59 = vpop.f32.mrf.mxu0  ;;  %v6005_v51 = vld [vmem:[%s11395_s9 + $0x120] sm:$0xf] }
  0xee   : > { %11645 = vst [vmem:[#allocation22_spill] sm:$0xff] %v7590_v58  ;;  %5868 = vmatmul.msk.f32.gmra.mxu3 %vm1014_vm2, %v7590_v58  ;;  %5900 = vmatmul.msk.f32.gmra.mxu1 %vm1014_vm2, %v7590_v58 }
  0xef   : > { %5932 = vmatmul.msk.f32.gmra.mxu2 %vm1014_vm2, %v7590_v58  ;;  %5788 = vmatmul.msk.f32.gmra.mxu0 %vm469_vm3, %v458_v63  ;;  %v6741_v63 = vld [vmem:[%s11395_s9 + $0x140] sm:$0xf0] }
  0xf1   : > { %v1158_v0 = vpop.f32.mrf.mxu2 }
  0xf2   : > { %v1159_v2 = vadd.f32 %v7411_v26, %v1158_v0  ;;  %v7603_v3 = vpop.f32.mrf.mxu1 }
  0xf3   : > { %11646 = vst [vmem:[#allocation23_spill] sm:$0xff] %v7603_v3  ;;  %v7605_v4 = vpop.f32.mrf.mxu3 }
  0xf4   : > { %v7607_v5 = vmax.f32 %v1159_v2, 0.0  ;;  %v7609_v10 = vpop.f32.mrf.mxu0  ;;  %v461_v2 = vld [vmem:[%s7236_s30 + $0xe8] sm:$0xff] }
  0xf6   : > { %11647 = vst [vmem:[#allocation24_spill] sm:$0xff] %v7607_v5  ;;  %5869 = vmatmul.msk.f32.gmra.mxu3 %vm1014_vm2, %v7607_v5  ;;  %5901 = vmatmul.msk.f32.gmra.mxu1 %vm1014_vm2, %v7607_v5 }
  0xf7   : > { %5933 = vmatmul.msk.f32.gmra.mxu2 %vm1014_vm2, %v7607_v5  ;;  %5789 = vmatmul.msk.f32.gmra.mxu0 %vm469_vm3, %v459_v11  ;;  %v6006_v11 = vor.u32 %v6741_v63, %v6005_v51  ;;  %v462_v63 = vld [vmem:[%s7236_s30 + $0xf0] sm:$0xff] }
  0xf9   : > { %v1161_v12 = vpop.f32.mrf.mxu2  ;;  %1874 = vmatpush.bf16.msra.mxu3 %v6006_v11 }
  0xfa   : > { %v1162_v17 = vadd.f32 %v7411_v26, %v1161_v12  ;;  %v7620_v18 = vpop.f32.mrf.mxu1 }
  0xfb   : > { %11648 = vst [vmem:[#allocation25_spill] sm:$0xff] %v7620_v18  ;;  %v7622_v19 = vpop.f32.mrf.mxu3 }
  0xfc   : > { %v7624_v27 = vmax.f32 %v1162_v17, 0.0  ;;  %v7626_v28 = vpop.f32.mrf.mxu0 }
  0xfe   : > { %11649 = vst [vmem:[#allocation26_spill] sm:$0xff] %v7624_v27  ;;  %5870 = vmatmul.msk.f32.gmra.mxu3 %vm1014_vm2, %v7624_v27  ;;  %5902 = vmatmul.msk.f32.gmra.mxu1 %vm1014_vm2, %v7624_v27 }
  0xff   : > { %5934 = vmatmul.msk.f32.gmra.mxu2 %vm1014_vm2, %v7624_v27  ;;  %5790 = vmatmul.msk.f32.gmra.mxu0 %vm469_vm3, %v460_v32 }
 0x101   : > { %v1164_v37 = vpop.f32.mrf.mxu2 }
 0x102   : > { %v1165_v38 = vadd.f32 %v7411_v26, %v1164_v37  ;;  %v7637_v44 = vpop.f32.mrf.mxu1 }
 0x103   : > { %11650 = vst [vmem:[#allocation27_spill] sm:$0xff] %v7637_v44  ;;  %v7639_v45 = vpop.f32.mrf.mxu3  ;;  %v6043_v44 = vld [vmem:[%s11395_s9 + $0x21c] sm:$0xf0] }
 0x104   : > { %v7641_v50 = vmax.f32 %v1165_v38, 0.0  ;;  %v7649_v0 = vpop.f32.mrf.mxu0 }
 0x106   : > { %11651 = vst [vmem:[#allocation28_spill] sm:$0xff] %v7641_v50  ;;  %5871 = vmatmul.msk.f32.gmra.mxu3 %vm1014_vm2, %v7641_v50  ;;  %5903 = vmatmul.msk.f32.gmra.mxu1 %vm1014_vm2, %v7641_v50 }
 0x107   : > { %5935 = vmatmul.msk.f32.gmra.mxu2 %vm1014_vm2, %v7641_v50  ;;  %5791 = vmatmul.msk.f32.gmra.mxu0 %vm469_vm3, %v461_v2 }
 0x109   : > { %v1167_v12 = vpop.f32.mrf.mxu2 }
 0x10a   : > { %v1168_v17 = vadd.f32 %v7411_v26, %v1167_v12  ;;  %v7660_v32 = vpop.f32.mrf.mxu1 }
 0x10b   : > { %11652 = vst [vmem:[#allocation29_spill] sm:$0xff] %v7660_v32  ;;  %v7662_v37 = vpop.f32.mrf.mxu3 }
 0x10c   : > { %v7664_v38 = vmax.f32 %v1168_v17, 0.0  ;;  %v7666_v51 = vpop.f32.mrf.mxu0  ;;  %v6749_v17 = vld [vmem:[%s11395_s9 + $0x1fc] sm:$0xf] }
 0x10d   : > { %v6046_v3 = vor.u32 %v6749_v17, %v6043_v44 }
 0x10e   : > { %11653 = vst [vmem:[#allocation30_spill] sm:$0xff] %v7664_v38  ;;  %5872 = vmatmul.msk.f32.gmra.mxu3 %vm1014_vm2, %v7664_v38  ;;  %5904 = vmatmul.msk.f32.gmra.mxu1 %vm1014_vm2, %v7664_v38 }
 0x10f   : > { %5936 = vmatmul.msk.f32.gmra.mxu2 %vm1014_vm2, %v7664_v38  ;;  %5792 = vmatmul.msk.f32.gmra.mxu0 %vm469_vm3, %v462_v63  ;;  %v2336_v63 = vld [vmem:[%s11391_s5 + $0xf0] sm:$0xff] }
 0x110   : > { %2356 = vmatpush.msra.mxu2 %v2336_v63  ;;  %1960 = vmatpush.bf16.msra.mxu0 %v6046_v3  ;;  %v6049_v63 = vld [vmem:[%s11395_s9 + $0x200] sm:$0xf] }
 0x111   : > { %v1170_v2 = vpop.f32.mrf.mxu2  ;;  %v6050_v13 = vor.u32 %v6751_v33, %v6049_v63  ;;  %v679_v3 = vld [vmem:[%s7221_s13] sm:$0xff]  ;;  %v6031_v63 = vld [vmem:[%s11395_s9 + $0x1d4] sm:$0xf0] }
 0x112   : > { %v1171_v11 = vadd.f32 %v7411_v26, %v1170_v2  ;;  %v7677_v12 = vpop.f32.mrf.mxu1  ;;  %v463_v2 = vld [vmem:[%s7236_s30 + $0xf8] sm:$0xff]  ;;  %s7031_s30 = scalar_lea.hbm %s7030_s15, 128 }
 0x113   : > { %11654 = vst [vmem:[#allocation31_spill] sm:$0xff] %v7677_v12  ;;  %v7693_v12 = vpop.f32.mrf.mxu3  ;;  %2049 = vmatpush.bf16.msra.mxu1 %v6050_v13  ;;  %v5993_v13 = vld [vmem:[%s11395_s9 + $0xd8] sm:$0xf]  ;;  %p7032_p11 = scmp.ne.s32.totalorder %s7030_s15, %s7031_s30  ;;  %p7037_p1 = scmp.lt.s32.totalorder %s7035_s29, %s7031_s30 }
 0x114   : > { %v7685_v32 = vmax.f32 %v1171_v11, 0.0  ;;  %v7690_v18 = vpop.f32.mrf.mxu0 }
 0x115   : > { %p7033_p12 = pnand %p7032_p11, %p7179_p5  ;;  %p7038_p2 = por %p7037_p1, %p7036_p0 }
 0x116   : > { %11655 = vst [vmem:[#allocation32_spill] sm:$0xff] %v7685_v32  ;;  %5873 = vmatmul.msk.f32.gmra.mxu3 %vm1014_vm2, %v7685_v32  ;;  %5905 = vmatmul.msk.f32.gmra.mxu1 %vm1014_vm2, %v7685_v32 }
 0x117   : > { %5937 = vmatmul.msk.f32.gmra.mxu2 %vm1014_vm2, %v7685_v32  ;;  %5793 = vmatmul.msk.f32.gmra.mxu0 %vm469_vm3, %v463_v2  ;;  %p7034_p13 = pneg %p7033_p12 }
 0x119   : > { %v1173_v44 = vpop.f32.mrf.mxu2  ;;  %p7039_p3 = pnand %p7038_p2, %p7034_p13 }
 0x11a   : > { %v1174_v11 = vadd.f32 %v7411_v26, %v1173_v44  ;;  %v7703_v17 = vpop.f32.mrf.mxu1  ;;  %v1177_v44 = vadd.f32 %v7411_v26, %v7417_v30  ;;  %v6738_v30 = vld [vmem:[%s11395_s9 + $0xf8] sm:$0xf0] }
 0x11b   : > { %11656 = vst [vmem:[#allocation33_spill] sm:$0xff] %v7703_v17  ;;  %v7722_v2 = vpop.f32.mrf.mxu3  ;;  %v5994_v46 = vor.u32 %v6738_v30, %v5993_v13 }
 0x11c   : > { %v7711_v52 = vmax.f32 %v1174_v11, 0.0  ;;  %v7713_v20 = vpop.f32.mrf.mxu0  ;;  %v6746_v11 = vld [vmem:[%s11395_s9 + $0x1b4] sm:$0xf]  ;;  %v7735_v17 = vmax.f32 %v1177_v44, 0.0  ;;  %v1180_v44 = vadd.f32 %v7411_v26, %v7440_v40  ;;  %v1183_v40 = vadd.f32 %v7411_v26, %v7457_v47 }
 0x11d   : > { %v6034_v60 = vor.u32 %v6746_v11, %v6031_v63  ;;  %1875 = vmatpush.bf16.msra.mxu3 %v5994_v46  ;;  %v6743_v46 = vld [vmem:[%s11395_s9 + $0x16c] sm:$0xf] }
 0x11e   : > { %11657 = vst [vmem:[#allocation34_spill] sm:$0xff] %v7711_v52  ;;  %5874 = vmatmul.msk.f32.gmra.mxu3 %vm1014_vm2, %v7711_v52  ;;  %5906 = vmatmul.msk.f32.gmra.mxu1 %vm1014_vm2, %v7711_v52  ;;  %v7761_v30 = vmax.f32 %v1180_v44, 0.0 }
 0x11f   : > { %5938 = vmatmul.msk.f32.gmra.mxu2 %vm1014_vm2, %v7711_v52  ;;  %5795 = vmatmul.msk.f32.vlgmr.msrb.gmra.mxu0 %vm712_vm1, %v679_v3  ;;  %11659 = vst [vmem:[#allocation36_spill] sm:$0xff] %v7735_v17 }
 0x120   : > { %1961 = vmatpush.bf16.msra.mxu0 %v6034_v60  ;;  %11661 = vst [vmem:[#allocation38_spill] sm:$0xff] %v7761_v30  ;;  %v6019_v60 = vld [vmem:[%s11395_s9 + $0x18c] sm:$0xf0] }
 0x121   : > { %v6022_v44 = vor.u32 %v6743_v46, %v6019_v60  ;;  %v1186_v46 = vadd.f32 %v7411_v26, %v7474_v54 }
 0x123   : > { %v7727_v33 = vpop.f32.mrf.mxu1 }
 0x124   : > { %11658 = vst [vmem:[#allocation35_spill] sm:$0xff] %v7727_v33  ;;  %v7743_v3 = vpop.f32.mrf.mxu0  ;;  %v681_v33 = vld [vmem:[%s7221_s13 + $0x10] sm:$0xff]  ;;  %1962 = vmatpush.bf16.msra.mxu0 %v6022_v44 }
 0x126   : > { %5875 = vmatmul.msk.f32.gmra.mxu3 %vm1014_vm2, %v7735_v17  ;;  %5907 = vmatmul.msk.f32.gmra.mxu1 %vm1014_vm2, %v7735_v17 }
 0x127   : > { %5939 = vmatmul.msk.f32.gmra.mxu2 %vm1014_vm2, %v7735_v17  ;;  %5796 = vmatmul.msk.f32.gmra.mxu0 %vm712_vm1, %v680_v6 }
 0x129   : > { %v7755_v11 = vpop.f32.mrf.mxu3 }
 0x12a   : > { %v7757_v63 = vpop.f32.mrf.mxu2 }
 0x12b   : > { %v7759_v13 = vpop.f32.mrf.mxu1 }
 0x12c   : > { %11660 = vst [vmem:[#allocation37_spill] sm:$0xff] %v7759_v13  ;;  %v7763_v53 = vpop.f32.mrf.mxu0 }
 0x12d   : > { %11662 = vst [vmem:[#allocation39_spill] sm:$0xff] %v7763_v53 }
 0x12e   : > { %5876 = vmatmul.msk.f32.gmra.mxu3 %vm1014_vm2, %v7761_v30  ;;  %5908 = vmatmul.msk.f32.gmra.mxu1 %vm1014_vm2, %v7761_v30 }
 0x12f   : > { %5940 = vmatmul.msk.f32.gmra.mxu2 %vm1014_vm2, %v7761_v30  ;;  %5797 = vmatmul.msk.f32.gmra.mxu0 %vm712_vm1, %v681_v33  ;;  %v7787_v30 = vmax.f32 %v1183_v40, 0.0  ;;  %v682_v33 = vld [vmem:[%s7221_s13 + $0x18] sm:$0xff] }
 0x131   : > { %v7781_v6 = vpop.f32.mrf.mxu3  ;;  %11665 = vst [vmem:[#allocation42_spill] sm:$0xff] %v7787_v30 }
 0x132   : > { %11663 = vst [vmem:[#allocation40_spill] sm:$0xff] %v7781_v6  ;;  %v7783_v53 = vpop.f32.mrf.mxu2 }
 0x133   : > { %v7785_v13 = vpop.f32.mrf.mxu1 }
 0x134   : > { %11664 = vst [vmem:[#allocation41_spill] sm:$0xff] %v7785_v13  ;;  %v7789_v47 = vpop.f32.mrf.mxu0  ;;  %v6037_v13 = vld [vmem:[%s11395_s9 + $0x1b8] sm:$0xf] }
 0x135   : > { %11666 = vst [vmem:[#allocation43_spill] sm:$0xff] %v7789_v47  ;;  %v6748_v47 = vld [vmem:[%s11395_s9 + $0x1d8] sm:$0xf0] }
 0x136   : > { %5877 = vmatmul.msk.f32.gmra.mxu3 %vm1014_vm2, %v7787_v30  ;;  %5909 = vmatmul.msk.f32.gmra.mxu1 %vm1014_vm2, %v7787_v30  ;;  %v6038_v6 = vor.u32 %v6748_v47, %v6037_v13  ;;  %v6007_v13 = vld [vmem:[%s11395_s9 + $0x144] sm:$0xf0]  ;;  %v1189_v47 = vadd.f32 %v7411_v26, %v7491_v61  ;;  %v6735_v61 = vld [vmem:[%s11395_s9 + $0xb0] sm:$0xf0] }
 0x137   : > { %5941 = vmatmul.msk.f32.gmra.mxu2 %vm1014_vm2, %v7787_v30  ;;  %5798 = vmatmul.msk.f32.gmra.mxu0 %vm712_vm1, %v682_v33  ;;  %v7813_v30 = vmax.f32 %v1186_v46, 0.0  ;;  %v683_v33 = vld [vmem:[%s7221_s13 + $0x20] sm:$0xff] }
 0x138   : > { %2050 = vmatpush.bf16.msra.mxu1 %v6038_v6  ;;  %v6740_v46 = vld [vmem:[%s11395_s9 + $0x124] sm:$0xf] }
 0x139   : > { %v7801_v40 = vpop.f32.mrf.mxu3  ;;  %11670 = vst [vmem:[#allocation47_spill] sm:$0xff] %v7813_v30 }
 0x13a   : > { %11667 = vst [vmem:[#allocation44_spill] sm:$0xff] %v7801_v40  ;;  %v7803_v60 = vpop.f32.mrf.mxu2 }
 0x13b   : > { %11668 = vst [vmem:[#allocation45_spill] sm:$0xff] %v7803_v60  ;;  %v7805_v44 = vpop.f32.mrf.mxu1  ;;  %v5981_v60 = vld [vmem:[%s11395_s9 + $0x90] sm:$0xf] }
 0x13c   : > { %11669 = vst [vmem:[#allocation46_spill] sm:$0xff] %v7805_v44  ;;  %v7815_v54 = vpop.f32.mrf.mxu0 }
 0x13d   : > { %11671 = vst [vmem:[#allocation48_spill] sm:$0xff] %v7815_v54  ;;  %v6010_v54 = vor.u32 %v6740_v46, %v6007_v13  ;;  %v684_v46 = vld [vmem:[%s7221_s13 + $0x28] sm:$0xff]  ;;  %v5982_v13 = vor.u32 %v6735_v61, %v5981_v60 }
 0x13e   : > { %5878 = vmatmul.msk.f32.gmra.mxu3 %vm1014_vm2, %v7813_v30  ;;  %5910 = vmatmul.msk.f32.gmra.mxu1 %vm1014_vm2, %v7813_v30 }
 0x13f   : > { %5942 = vmatmul.msk.f32.gmra.mxu2 %vm1014_vm2, %v7813_v30  ;;  %5799 = vmatmul.msk.f32.gmra.mxu0 %vm712_vm1, %v683_v33  ;;  %v7839_v30 = vmax.f32 %v1189_v47, 0.0 }
 0x140   : > { %1963 = vmatpush.bf16.msra.mxu0 %v6010_v54  ;;  %1876 = vmatpush.bf16.msra.mxu3 %v5982_v13  ;;  %v1192_v54 = vadd.f32 %v7411_v26, %v7514_v7  ;;  %v6737_v7 = vld [vmem:[%s11395_s9 + $0xdc] sm:$0xf]  ;;  %v1195_v13 = vadd.f32 %v7411_v26, %v7531_v14 }
 0x141   : > { %v7833_v44 = vpop.f32.mrf.mxu3  ;;  %11674 = vst [vmem:[#allocation51_spill] sm:$0xff] %v7839_v30  ;;  %v686_v14 = vld [vmem:[%s7221_s13 + $0x38] sm:$0xff] }
 0x142   : > { %11672 = vst [vmem:[#allocation49_spill] sm:$0xff] %v7833_v44  ;;  %v7835_v40 = vpop.f32.mrf.mxu2  ;;  %v7865_v61 = vmax.f32 %v1192_v54, 0.0  ;;  %v685_v44 = vld [vmem:[%s7221_s13 + $0x30] sm:$0xff] }
 0x143   : > { %v7837_v6 = vpop.f32.mrf.mxu1 }
 0x144   : > { %11673 = vst [vmem:[#allocation50_spill] sm:$0xff] %v7837_v6  ;;  %v7847_v33 = vpop.f32.mrf.mxu0 }
 0x145   : > { %11675 = vst [vmem:[#allocation52_spill] sm:$0xff] %v7847_v33 }
 0x146   : > { %5879 = vmatmul.msk.f32.gmra.mxu3 %vm1014_vm2, %v7839_v30  ;;  %5911 = vmatmul.msk.f32.gmra.mxu1 %vm1014_vm2, %v7839_v30  ;;  %11679 = vst [vmem:[#allocation56_spill] sm:$0xff] %v7865_v61 }
 0x147   : > { %5943 = vmatmul.msk.f32.gmra.mxu2 %vm1014_vm2, %v7839_v30  ;;  %5800 = vmatmul.msk.f32.gmra.mxu0 %vm712_vm1, %v684_v46  ;;  %v5995_v46 = vld [vmem:[%s11395_s9 + $0xfc] sm:$0xf0]  ;;  %v2334_v30 = vld [vmem:[%s11391_s5 + $0xa8] sm:$0xff] }
 0x148   : > { %v5998_v54 = vor.u32 %v6737_v7, %v5995_v46  ;;  %2357 = vmatpush.msra.mxu2 %v2334_v30  ;;  %v6025_v30 = vld [vmem:[%s11395_s9 + $0x170] sm:$0xf] }
 0x149   : > { %v7859_v47 = vpop.f32.mrf.mxu3 }
 0x14a   : > { %11676 = vst [vmem:[#allocation53_spill] sm:$0xff] %v7859_v47  ;;  %v7861_v6 = vpop.f32.mrf.mxu2  ;;  %1964 = vmatpush.bf16.msra.mxu0 %v5998_v54  ;;  %v7891_v47 = vmax.f32 %v1195_v13, 0.0  ;;  %v6745_v54 = vld [vmem:[%s11395_s9 + $0x190] sm:$0xf0] }
 0x14b   : > { %11677 = vst [vmem:[#allocation54_spill] sm:$0xff] %v7861_v6  ;;  %v7863_v60 = vpop.f32.mrf.mxu1 }
 0x14c   : > { %11678 = vst [vmem:[#allocation55_spill] sm:$0xff] %v7863_v60  ;;  %v7867_v33 = vpop.f32.mrf.mxu0 }
 0x14d   : > { %11680 = vst [vmem:[#allocation57_spill] sm:$0xff] %v7867_v33 }
 0x14e   : > { %5880 = vmatmul.msk.f32.gmra.mxu3 %vm1014_vm2, %v7865_v61  ;;  %5912 = vmatmul.msk.f32.gmra.mxu1 %vm1014_vm2, %v7865_v61  ;;  %11682 = vst [vmem:[#allocation59_spill] sm:$0xff] %v7891_v47 }
 0x14f   : > { %5944 = vmatmul.msk.f32.gmra.mxu2 %vm1014_vm2, %v7865_v61  ;;  %5801 = vmatmul.msk.f32.gmra.mxu0 %vm712_vm1, %v685_v44  ;;  %v1198_v44 = vadd.f32 %v7411_v26, %v7548_v21 }
 0x151   : > { %v7885_v33 = vpop.f32.mrf.mxu3 }
 0x152   : > { %v7887_v60 = vpop.f32.mrf.mxu2 }
 0x153   : > { %v7889_v61 = vpop.f32.mrf.mxu1 }
 0x154   : > { %11681 = vst [vmem:[#allocation58_spill] sm:$0xff] %v7889_v61  ;;  %v7896_v6 = vpop.f32.mrf.mxu0  ;;  %v7920_v61 = vmax.f32 %v1198_v44, 0.0  ;;  %v5983_v44 = vld [vmem:[%s11395_s9 + $0xb4] sm:$0xf0] }
 0x155   : > { %11683 = vst [vmem:[#allocation60_spill] sm:$0xff] %v7896_v6 }
 0x156   : > { %5881 = vmatmul.msk.f32.gmra.mxu3 %vm1014_vm2, %v7891_v47  ;;  %5913 = vmatmul.msk.f32.gmra.mxu1 %vm1014_vm2, %v7891_v47  ;;  %11687 = vst [vmem:[#allocation64_spill] sm:$0xff] %v7920_v61 }
 0x157   : > { %5945 = vmatmul.msk.f32.gmra.mxu2 %vm1014_vm2, %v7891_v47  ;;  %5802 = vmatmul.msk.f32.gmra.mxu0 %vm712_vm1, %v686_v14  ;;  %v6026_v47 = vor.u32 %v6745_v54, %v6025_v30  ;;  %v687_v14 = vld [vmem:[%s7221_s13 + $0x40] sm:$0xff]  ;;  %v1201_v54 = vadd.f32 %v7411_v26, %v7565_v35 }
 0x159   : > { %v7908_v7 = vpop.f32.mrf.mxu3  ;;  %2051 = vmatpush.bf16.msra.mxu1 %v6026_v47  ;;  %v7946_v6 = vmax.f32 %v1201_v54, 0.0  ;;  %v6732_v47 = vld [vmem:[%s11395_s9 + $0x68] sm:$0xf0] }
 0x15a   : > { %11684 = vst [vmem:[#allocation61_spill] sm:$0xff] %v7908_v7  ;;  %v7910_v46 = vpop.f32.mrf.mxu2 }
 0x15b   : > { %11685 = vst [vmem:[#allocation62_spill] sm:$0xff] %v7910_v46  ;;  %v7912_v13 = vpop.f32.mrf.mxu1 }
 0x15c   : > { %11686 = vst [vmem:[#allocation63_spill] sm:$0xff] %v7912_v13  ;;  %v7922_v21 = vpop.f32.mrf.mxu0  ;;  %v6734_v13 = vld [vmem:[%s11395_s9 + $0x94] sm:$0xf] }
 0x15d   : > { %11688 = vst [vmem:[#allocation65_spill] sm:$0xff] %v7922_v21  ;;  %v5986_v30 = vor.u32 %v6734_v13, %v5983_v44  ;;  %v688_v13 = vld [vmem:[%s7221_s13 + $0x48] sm:$0xff]  ;;  %v1204_v44 = vadd.f32 %v7411_v26, %v7588_v57 }
 0x15e   : > { %5882 = vmatmul.msk.f32.gmra.mxu3 %vm1014_vm2, %v7920_v61  ;;  %5914 = vmatmul.msk.f32.gmra.mxu1 %vm1014_vm2, %v7920_v61  ;;  %11690 = vst [vmem:[#allocation67_spill] sm:$0xff] %v7946_v6 }
 0x15f   : > { %5946 = vmatmul.msk.f32.gmra.mxu2 %vm1014_vm2, %v7920_v61  ;;  %5803 = vmatmul.msk.f32.gmra.mxu0 %vm712_vm1, %v687_v14  ;;  %v5969_v61 = vld [vmem:[%s11395_s9 + $0x48] sm:$0xf] }
 0x160   : > { %1965 = vmatpush.bf16.msra.mxu0 %v5986_v30  ;;  %v5970_v14 = vor.u32 %v6732_v47, %v5969_v61  ;;  %v7972_v47 = vmax.f32 %v1204_v44, 0.0  ;;  %v1207_v44 = vadd.f32 %v7411_v26, %v7605_v4  ;;  %v6742_v4 = vld [vmem:[%s11395_s9 + $0x148] sm:$0xf0] }
 0x161   : > { %v7940_v21 = vpop.f32.mrf.mxu3 }
 0x162   : > { %v7942_v7 = vpop.f32.mrf.mxu2  ;;  %1877 = vmatpush.bf16.msra.mxu3 %v5970_v14  ;;  %11694 = vst [vmem:[#allocation71_spill] sm:$0xff] %v7972_v47  ;;  %v5971_v14 = vld [vmem:[%s11395_s9 + $0x6c] sm:$0xf0] }
 0x163   : > { %v7944_v46 = vpop.f32.mrf.mxu1 }
 0x164   : > { %11689 = vst [vmem:[#allocation66_spill] sm:$0xff] %v7944_v46  ;;  %v7954_v35 = vpop.f32.mrf.mxu0  ;;  %v6731_v46 = vld [vmem:[%s11395_s9 + $0x4c] sm:$0xf] }
 0x166   : > { %5883 = vmatmul.msk.f32.gmra.mxu3 %vm1014_vm2, %v7946_v6  ;;  %5915 = vmatmul.msk.f32.gmra.mxu1 %vm1014_vm2, %v7946_v6 }
 0x167   : > { %5947 = vmatmul.msk.f32.gmra.mxu2 %vm1014_vm2, %v7946_v6  ;;  %5804 = vmatmul.msk.f32.gmra.mxu0 %vm712_vm1, %v688_v13  ;;  %v689_v13 = vld [vmem:[%s7221_s13 + $0x50] sm:$0xff]  ;;  %v5974_v6 = vor.u32 %v6731_v46, %v5971_v14  ;;  %v7998_v14 = vmax.f32 %v1207_v44, 0.0  ;;  %v1210_v44 = vadd.f32 %v7411_v26, %v7622_v19  ;;  %v6728_v19 = vld [vmem:[%s11395_s9 + $0x4] sm:$0xf] }
 0x169   : > { %v7966_v30 = vpop.f32.mrf.mxu3  ;;  %1966 = vmatpush.bf16.msra.mxu0 %v5974_v6  ;;  %11699 = vst [vmem:[#allocation76_spill] sm:$0xff] %v7998_v14  ;;  %v6013_v6 = vld [vmem:[%s11395_s9 + $0x128] sm:$0xf] }
 0x16a   : > { %11691 = vst [vmem:[#allocation68_spill] sm:$0xff] %v7966_v30  ;;  %v7968_v54 = vpop.f32.mrf.mxu2 }
 0x16b   : > { %11692 = vst [vmem:[#allocation69_spill] sm:$0xff] %v7968_v54  ;;  %v7970_v61 = vpop.f32.mrf.mxu1  ;;  %v690_v54 = vld [vmem:[%s7221_s13 + $0x58] sm:$0xff] }
 0x16c   : > { %11693 = vst [vmem:[#allocation70_spill] sm:$0xff] %v7970_v61  ;;  %v7980_v57 = vpop.f32.mrf.mxu0 }
 0x16d   : > { %11695 = vst [vmem:[#allocation72_spill] sm:$0xff] %v7980_v57 }
 0x16e   : > { %5884 = vmatmul.msk.f32.gmra.mxu3 %vm1014_vm2, %v7972_v47  ;;  %5916 = vmatmul.msk.f32.gmra.mxu1 %vm1014_vm2, %v7972_v47 }
 0x16f   : > { %5948 = vmatmul.msk.f32.gmra.mxu2 %vm1014_vm2, %v7972_v47  ;;  %5805 = vmatmul.msk.f32.gmra.mxu0 %vm712_vm1, %v689_v13  ;;  %v6014_v13 = vor.u32 %v6742_v4, %v6013_v6  ;;  %v6739_v6 = vld [vmem:[%s11395_s9 + $0x100] sm:$0xf0] }
 0x170   : > { %v691_v47 = vld [vmem:[%s7221_s13 + $0x60] sm:$0xff] }
 0x171   : > { %v7992_v61 = vpop.f32.mrf.mxu3  ;;  %2052 = vmatpush.bf16.msra.mxu1 %v6014_v13 }
 0x172   : > { %11696 = vst [vmem:[#allocation73_spill] sm:$0xff] %v7992_v61  ;;  %v7994_v57 = vpop.f32.mrf.mxu2 }
 0x173   : > { %11697 = vst [vmem:[#allocation74_spill] sm:$0xff] %v7994_v57  ;;  %v7996_v46 = vpop.f32.mrf.mxu1 }
 0x174   : > { %11698 = vst [vmem:[#allocation75_spill] sm:$0xff] %v7996_v46  ;;  %v8000_v30 = vpop.f32.mrf.mxu0 }
 0x175   : > { %11700 = vst [vmem:[#allocation77_spill] sm:$0xff] %v8000_v30  ;;  %v6001_v30 = vld [vmem:[%s11395_s9 + $0xe0] sm:$0xf] }
 0x176   : > { %5885 = vmatmul.msk.f32.gmra.mxu3 %vm1014_vm2, %v7998_v14  ;;  %5917 = vmatmul.msk.f32.gmra.mxu1 %vm1014_vm2, %v7998_v14  ;;  %v6002_v4 = vor.u32 %v6739_v6, %v6001_v30  ;;  %v5989_v30 = vld [vmem:[%s11395_s9 + $0x98] sm:$0xf] }
 0x177   : > { %5949 = vmatmul.msk.f32.gmra.mxu2 %vm1014_vm2, %v7998_v14  ;;  %5806 = vmatmul.msk.f32.gmra.mxu0 %vm712_vm1, %v690_v54  ;;  %v8028_v14 = vmax.f32 %v1210_v44, 0.0  ;;  %v5959_v54 = vld [vmem:[%s11395_s9 + $0x24] sm:$0xf0]  ;;  %v6736_v44 = vld [vmem:[%s11395_s9 + $0xb8] sm:$0xf0] }
 0x178   : > { %2053 = vmatpush.bf16.msra.mxu1 %v6002_v4  ;;  %v5962_v57 = vor.u32 %v6728_v19, %v5959_v54  ;;  %v5990_v6 = vor.u32 %v6736_v44, %v5989_v30  ;;  %v1213_v4 = vadd.f32 %v7411_v26, %v7639_v45  ;;  %v5977_v54 = vld [vmem:[%s11395_s9 + $0x50] sm:$0xf]  ;;  %v6733_v30 = vld [vmem:[%s11395_s9 + $0x70] sm:$0xf0]  ;;  %v2332_v45 = vld [vmem:[%s11391_s5 + $0x60] sm:$0xff] }
 0x179   : > { %v8018_v46 = vpop.f32.mrf.mxu3  ;;  %11702 = vst [vmem:[#allocation79_spill] sm:$0xff] %v8028_v14  ;;  %v5978_v44 = vor.u32 %v6733_v30, %v5977_v54  ;;  %2358 = vmatpush.msra.mxu2 %v2332_v45 }
 0x17a   : > { %11701 = vst [vmem:[#allocation78_spill] sm:$0xff] %v8018_v46  ;;  %v8036_v13 = vpop.f32.mrf.mxu2  ;;  %1967 = vmatpush.bf16.msra.mxu0 %v5962_v57  ;;  %v8069_v57 = vmax.f32 %v1213_v4, 0.0  ;;  %v5965_v4 = vld [vmem:[%s11395_s9 + $0x8] sm:$0xf] }
 0x17b   : > { %v8026_v61 = vpop.f32.mrf.mxu1 }
 0x17c   : > { %v8038_v46 = vpop.f32.mrf.mxu0  ;;  %2054 = vmatpush.bf16.msra.mxu1 %v5990_v6  ;;  %11706 = vst [vmem:[#allocation83_spill] sm:$0xff] %v8069_v57  ;;  %v5957_v6 = vld [vmem:[%s11395_s9] sm:$0xf] }
 0x17d   : > { %11703 = vst [vmem:[#allocation80_spill] sm:$0xff] %v8038_v46 }
 0x17e   : > { %5886 = vmatmul.msk.f32.gmra.mxu3 %vm1014_vm2, %v8028_v14  ;;  %5918 = vmatmul.msk.f32.gmra.mxu1 %vm1014_vm2, %v8028_v14 }
 0x17f   : > { %5950 = vmatmul.msk.f32.gmra.mxu2 %vm1014_vm2, %v8028_v14  ;;  %5807 = vmatmul.msk.f32.gmra.mxu0 %vm712_vm1, %v691_v47  ;;  %v692_v47 = vld [vmem:[%s7221_s13 + $0x68] sm:$0xff] }
 0x180   : > { %2055 = vmatpush.bf16.msra.mxu1 %v5978_v44  ;;  %v6730_v44 = vld [vmem:[%s11395_s9 + $0x28] sm:$0xf0] }
 0x181   : > { %v8056_v19 = vpop.f32.mrf.mxu3 }
 0x182   : > { %11704 = vst [vmem:[#allocation81_spill] sm:$0xff] %v8056_v19  ;;  %v6729_v19 = vld [vmem:[%s11395_s9 + $0x20] sm:$0xf0]  ;;  %v8093_v45 = vpop.f32.mrf.mxu2 }
 0x183   : > { %v8064_v46 = vpop.f32.mrf.mxu1  ;;  %v5958_v30 = vor.u32 %v6729_v19, %v5957_v6  ;;  %v5966_v19 = vor.u32 %v6730_v44, %v5965_v4  ;;  %v1216_v6 = vadd.f32 %v7411_v26, %v7662_v37  ;;  %v6173_v4 = vld [vmem:[%s11395_s9 + $0x204] sm:$0xf]  ;;  %v6791_v44 = vld [vmem:[%s11395_s9 + $0x224] sm:$0xf0] }
 0x184   : > { %11705 = vst [vmem:[#allocation82_spill] sm:$0xff] %v8064_v46  ;;  %v8078_v54 = vpop.f32.mrf.mxu0  ;;  %v2330_v46 = vld [vmem:[%s11391_s5 + $0x18] sm:$0xff] }
 0x185   : > { %11707 = vst [vmem:[#allocation84_spill] sm:$0xff] %v8078_v54  ;;  %1878 = vmatpush.bf16.msra.mxu3 %v5958_v30  ;;  %2359 = vmatpush.msra.mxu2 %v2330_v46  ;;  %v8110_v30 = vmax.f32 %v1216_v6, 0.0  ;;  %v1219_v46 = vadd.f32 %v7411_v26, %v7693_v12  ;;  %v1222_v12 = vadd.f32 %v7411_v26, %v7722_v2  ;;  %v2337_v2 = vld [vmem:[%s11391_s5 + $0xf8] sm:$0xff] }
 0x186   : > { %5887 = vmatmul.msk.f32.gmra.mxu3 %vm1014_vm2, %v8069_v57  ;;  %5919 = vmatmul.msk.f32.gmra.mxu1 %vm1014_vm2, %v8069_v57 }
 0x187   : > { %5951 = vmatmul.msk.f32.gmra.mxu2 %vm1014_vm2, %v8069_v57  ;;  %5808 = vmatmul.msk.f32.gmra.mxu0 %vm712_vm1, %v692_v47  ;;  %11708 = vst [vmem:[#allocation85_spill] sm:$0xff] %v8110_v30  ;;  %v6174_v57 = vor.u32 %v6791_v44, %v6173_v4  ;;  %v693_v47 = vld [vmem:[%s7221_s13 + $0x70] sm:$0xff]  ;;  %v8130_v44 = vmax.f32 %v1219_v46, 0.0 }
 0x188   : > { %2056 = vmatpush.bf16.msra.mxu1 %v5966_v19 }
 0x189   : > { %v8100_v54 = vpop.f32.mrf.mxu3  ;;  %2666 = vmatpush.bf16.msrb.mxu0 %v6174_v57  ;;  %11712 = vst [vmem:[#allocation89_spill] sm:$0xff] %v8130_v44  ;;  %2469 = vmatpush.msrb.mxu3 %v2337_v2 }
 0x18a   : > { %v8124_v19 = vpop.f32.mrf.mxu2 }
 0x18b   : > { %v8102_v14 = vpop.f32.mrf.mxu1 }
 0x18c   : > { %v8112_v37 = vpop.f32.mrf.mxu0 }
 0x18d   : > { %11709 = vst [vmem:[#allocation86_spill] sm:$0xff] %v8112_v37 }
 0x18e   : > { %5888 = vmatmul.msk.f32.gmra.mxu3 %vm1014_vm2, %v8110_v30  ;;  %5920 = vmatmul.msk.f32.gmra.mxu1 %vm1014_vm2, %v8110_v30 }
 0x18f   : > { %5952 = vmatmul.msk.f32.gmra.mxu2 %vm1014_vm2, %v8110_v30  ;;  %5809 = vmatmul.msk.f32.gmra.mxu0 %vm712_vm1, %v693_v47 }
 0x191   : > { %v8126_v6 = vpop.f32.mrf.mxu3 }
 0x192   : > { %11710 = vst [vmem:[#allocation87_spill] sm:$0xff] %v8126_v6  ;;  %v8144_v47 = vpop.f32.mrf.mxu2 }
 0x193   : > { %v8128_v4 = vpop.f32.mrf.mxu1 }
 0x194   : > { %11711 = vst [vmem:[#allocation88_spill] sm:$0xff] %v8128_v4  ;;  %v8132_v37 = vpop.f32.mrf.mxu0  ;;  %v8148_v4 = vmax.f32 %v1222_v12, 0.0 }
 0x195   : > { %11713 = vst [vmem:[#allocation90_spill] sm:$0xff] %v8132_v37 }
 0x196   : > { %5889 = vmatmul.msk.f32.gmra.mxu3 %vm1014_vm2, %v8130_v44  ;;  %5921 = vmatmul.msk.f32.gmra.mxu1 %vm1014_vm2, %v8130_v44  ;;  %11716 = vst [vmem:[#allocation93_spill] sm:$0xff] %v8148_v4 }
 0x197   : > { %5953 = vmatmul.msk.f32.gmra.mxu2 %vm1014_vm2, %v8130_v44 }
 0x199   : > { %v8142_v57 = vpop.f32.mrf.mxu3 }
 0x19a   : > { %11714 = vst [vmem:[#allocation91_spill] sm:$0xff] %v8142_v57  ;;  %v8163_v12 = vpop.f32.mrf.mxu2 }
 0x19b   : > { %v8146_v46 = vpop.f32.mrf.mxu1 }
 0x19c   : > { %11715 = vst [vmem:[#allocation92_spill] sm:$0xff] %v8146_v46  ;;  %v830_v37 = vpop.f32.mrf.mxu0 }
 0x19d   : > { %v926_v57 = vmul.f32 %v830_v37, %v7404_v24  ;;  %v6165_v24 = vld [vmem:[%s11395_s9 + $0x1bc] sm:$0xf] }
 0x19e   : > { %5890 = vmatmul.msk.f32.gmra.mxu3 %vm1014_vm2, %v8148_v4  ;;  %5922 = vmatmul.msk.f32.gmra.mxu1 %vm1014_vm2, %v8148_v4 }
 0x19f   : > { %5954 = vmatmul.msk.f32.gmra.mxu2 %vm1014_vm2, %v8148_v4 }
 0x1a1   : > { %v8156_v44 = vpop.f32.mrf.mxu3 }
 0x1a2   : > { %11717 = vst [vmem:[#allocation94_spill] sm:$0xff] %v8156_v44 }
 0x1a3   : > { %v8158_v26 = vpop.f32.mrf.mxu1 }
 0x1a4   : > { %11718 = vst [vmem:[#allocation95_spill] sm:$0xff] %v8158_v26  ;;  %v833_v46 = vpop.f32.mrf.mxu0 }
 0x1a5   : > { %v927_v6 = vmul.f32 %v833_v46, %v7427_v34  ;;  %v6789_v34 = vld [vmem:[%s11395_s9 + $0x1dc] sm:$0xf0] }
 0x1a6   : > { %v6166_v37 = vor.u32 %v6789_v34, %v6165_v24 }
 0x1a7   : > { %6051 = vmatmul.msk.f32.vlgmr.msra.gmra.mxu2 %vm1014_vm2, %v7419_v31  ;;  %v8169_v4 = vpack.c.bf16 %v927_v6, %v926_v57  ;;  %v8184_v57 = vpop.f32.mrf.mxu2 }
 0x1a8   : > { %2667 = vmatpush.bf16.msrb.mxu0 %v6166_v37 }
 0x1a9   : > { %11719 = vst [vmem:[#allocation96_spill] sm:$0xff] %v8169_v4  ;;  %v8171_v44 = vpop.f32.mrf.mxu3  ;;  %1879 = vmatmul.bf16.vlgmr.msra.gmra.mxu3 %v8169_v4  ;;  %1968 = vmatmul.bf16.vlgmr.msra.gmra.mxu0 %v8169_v4 }
 0x1aa   : > { %11720 = vst [vmem:[#allocation97_spill] sm:$0xff] %v8171_v44  ;;  %2057 = vmatmul.bf16.vlgmr.msra.gmra.mxu1 %v8169_v4 }
 0x1ab   : > { %v8176_v26 = vpop.f32.mrf.mxu1 }
 0x1ac   : > { %11721 = vst [vmem:[#allocation98_spill] sm:$0xff] %v8176_v26  ;;  %v836_v6 = vpop.f32.mrf.mxu0 }
 0x1ad   : > { %v928_v44 = vmul.f32 %v836_v6, %v7444_v42 }
 0x1af   : > { %6052 = vmatmul.msk.f32.gmra.mxu2 %vm1014_vm2, %v7442_v41  ;;  %v8198_v34 = vpop.f32.mrf.mxu2 }
 0x1b1   : > { %v8188_v46 = vpop.f32.mrf.mxu3 }
 0x1b3   : > { %v8190_v2 = vpop.f32.mrf.mxu1 }
 0x1b4   : > { %11722 = vst [vmem:[#allocation99_spill] sm:$0xff] %v8190_v2  ;;  %v839_v26 = vpop.f32.mrf.mxu0 }
 0x1b5   : > { %v929_v4 = vmul.f32 %v839_v26, %v7461_v49 }
 0x1b7   : > { %6053 = vmatmul.msk.f32.gmra.mxu2 %vm1014_vm2, %v7459_v48  ;;  %v8196_v24 = vpack.c.bf16 %v929_v4, %v928_v44  ;;  %v8211_v4 = vpop.f32.mrf.mxu2 }
 0x1b9   : > { %11723 = vst [vmem:[#allocation100_spill] sm:$0xff] %v8196_v24  ;;  %v8200_v37 = vpop.f32.mrf.mxu3  ;;  %1884 = vmatmul.bf16.gmra.mxu3 %v8196_v24  ;;  %1973 = vmatmul.bf16.gmra.mxu0 %v8196_v24 }
 0x1ba   : > { %11724 = vst [vmem:[#allocation101_spill] sm:$0xff] %v8200_v37  ;;  %2062 = vmatmul.bf16.gmra.mxu1 %v8196_v24 }
 0x1bb   : > { %v8205_v2 = vpop.f32.mrf.mxu1 }
 0x1bc   : > { %11725 = vst [vmem:[#allocation102_spill] sm:$0xff] %v8205_v2  ;;  %v842_v42 = vpop.f32.mrf.mxu0 }
 0x1bd   : > { %v930_v6 = vmul.f32 %v842_v42, %v7478_v56  ;;  %v6157_v56 = vld [vmem:[%s11395_s9 + $0x174] sm:$0xf] }
 0x1bf   : > { %6054 = vmatmul.msk.f32.gmra.mxu2 %vm1014_vm2, %v7476_v55  ;;  %v8234_v42 = vpop.f32.mrf.mxu2 }
 0x1c1   : > { %v8209_v49 = vpop.f32.mrf.mxu3 }
 0x1c2   : > { %11726 = vst [vmem:[#allocation103_spill] sm:$0xff] %v8209_v49 }
 0x1c3   : > { %v8213_v44 = vpop.f32.mrf.mxu1 }
 0x1c4   : > { %11727 = vst [vmem:[#allocation104_spill] sm:$0xff] %v8213_v44  ;;  %v845_v26 = vpop.f32.mrf.mxu0 }
 0x1c5   : > { %v931_v37 = vmul.f32 %v845_v26, %v7501_v1  ;;  %v6787_v1 = vld [vmem:[%s11395_s9 + $0x194] sm:$0xf0] }
 0x1c7   : > { %6055 = vmatmul.msk.f32.gmra.mxu2 %vm1014_vm2, %v7493_v62  ;;  %v8219_v24 = vpack.c.bf16 %v931_v37, %v930_v6  ;;  %v6158_v37 = vor.u32 %v6787_v1, %v6157_v56  ;;  %v8244_v44 = vpop.f32.mrf.mxu2 }
 0x1c9   : > { %11728 = vst [vmem:[#allocation105_spill] sm:$0xff] %v8219_v24  ;;  %v8221_v2 = vpop.f32.mrf.mxu3  ;;  %1889 = vmatmul.bf16.gmra.mxu3 %v8219_v24  ;;  %1978 = vmatmul.bf16.gmra.mxu0 %v8219_v24 }
 0x1ca   : > { %11729 = vst [vmem:[#allocation106_spill] sm:$0xff] %v8221_v2  ;;  %2067 = vmatmul.bf16.gmra.mxu1 %v8219_v24  ;;  %2668 = vmatpush.bf16.msrb.mxu0 %v6158_v37 }
 0x1cb   : > { %v8226_v49 = vpop.f32.mrf.mxu1 }
 0x1cc   : > { %11730 = vst [vmem:[#allocation107_spill] sm:$0xff] %v8226_v49  ;;  %v848_v26 = vpop.f32.mrf.mxu0 }
 0x1cd   : > { %v932_v24 = vmul.f32 %v848_v26, %v7518_v9 }
 0x1cf   : > { %6056 = vmatmul.msk.f32.gmra.mxu2 %vm1014_vm2, %v7516_v8 }
 0x1d1   : > { %v8238_v6 = vpop.f32.mrf.mxu3 }
 0x1d3   : > { %v8240_v2 = vpop.f32.mrf.mxu1 }
 0x1d4   : > { %v851_v49 = vpop.f32.mrf.mxu0 }
 0x1d5   : > { %v933_v62 = vmul.f32 %v851_v49, %v7535_v16  ;;  %v8259_v16 = vpop.f32.mrf.mxu2 }
 0x1d7   : > { %6057 = vmatmul.msk.f32.gmra.mxu2 %vm1014_vm2, %v7533_v15  ;;  %v8248_v56 = vpack.c.bf16 %v933_v62, %v932_v24  ;;  %v2335_v24 = vld [vmem:[%s11391_s5 + $0xb0] sm:$0xff] }
 0x1d8   : > { %2470 = vmatpush.msrb.mxu3 %v2335_v24 }
 0x1d9   : > { %11731 = vst [vmem:[#allocation108_spill] sm:$0xff] %v8248_v56  ;;  %v8250_v1 = vpop.f32.mrf.mxu3  ;;  %1894 = vmatmul.bf16.gmra.mxu3 %v8248_v56  ;;  %1983 = vmatmul.bf16.gmra.mxu0 %v8248_v56 }
 0x1da   : > { %11732 = vst [vmem:[#allocation109_spill] sm:$0xff] %v8250_v1  ;;  %2072 = vmatmul.bf16.gmra.mxu1 %v8248_v56 }
 0x1db   : > { %v8255_v37 = vpop.f32.mrf.mxu1 }
 0x1dc   : > { %11733 = vst [vmem:[#allocation110_spill] sm:$0xff] %v8255_v37  ;;  %v854_v9 = vpop.f32.mrf.mxu0 }
 0x1dd   : > { %v934_v1 = vmul.f32 %v854_v9, %v7552_v25  ;;  %v6149_v25 = vld [vmem:[%s11395_s9 + $0x12c] sm:$0xf] }
 0x1df   : > { %6058 = vmatmul.msk.f32.gmra.mxu2 %vm1014_vm2, %v7550_v23 }
 0x1e1   : > { %v8261_v49 = vpop.f32.mrf.mxu3 }
 0x1e3   : > { %v8263_v62 = vpop.f32.mrf.mxu1 }
 0x1e4   : > { %11734 = vst [vmem:[#allocation111_spill] sm:$0xff] %v8263_v62  ;;  %v857_v26 = vpop.f32.mrf.mxu0  ;;  %v8278_v62 = vpop.f32.mrf.mxu2 }
 0x1e5   : > { %v935_v37 = vmul.f32 %v857_v26, %v7575_v43  ;;  %v6785_v43 = vld [vmem:[%s11395_s9 + $0x14c] sm:$0xf0] }
 0x1e7   : > { %6059 = vmatmul.msk.f32.gmra.mxu2 %vm1014_vm2, %v7567_v36  ;;  %v8272_v23 = vpack.c.bf16 %v935_v37, %v934_v1  ;;  %v6150_v1 = vor.u32 %v6785_v43, %v6149_v25 }
 0x1e9   : > { %11735 = vst [vmem:[#allocation112_spill] sm:$0xff] %v8272_v23  ;;  %v8274_v56 = vpop.f32.mrf.mxu3  ;;  %1899 = vmatmul.bf16.gmra.mxu3 %v8272_v23  ;;  %1988 = vmatmul.bf16.gmra.mxu0 %v8272_v23 }
 0x1ea   : > { %11736 = vst [vmem:[#allocation113_spill] sm:$0xff] %v8274_v56  ;;  %2077 = vmatmul.bf16.gmra.mxu1 %v8272_v23  ;;  %2669 = vmatpush.bf16.msrb.mxu0 %v6150_v1 }
 0x1eb   : > { %v8281_v24 = vpop.f32.mrf.mxu1 }
 0x1ec   : > { %11737 = vst [vmem:[#allocation114_spill] sm:$0xff] %v8281_v24  ;;  %v860_v37 = vpop.f32.mrf.mxu0  ;;  %v8295_v56 = vpop.f32.mrf.mxu2 }
 0x1ed   : > { %v936_v23 = vmul.f32 %v860_v37, %v7592_v59 }
 0x1ef   : > { %6060 = vmatmul.msk.f32.gmra.mxu2 %vm1014_vm2, %v7590_v58 }
 0x1f1   : > { %v8291_v9 = vpop.f32.mrf.mxu3 }
 0x1f2   : > { %11738 = vst [vmem:[#allocation115_spill] sm:$0xff] %v8291_v9 }
 0x1f3   : > { %v8293_v26 = vpop.f32.mrf.mxu1 }
 0x1f4   : > { %11739 = vst [vmem:[#allocation116_spill] sm:$0xff] %v8293_v26  ;;  %v863_v24 = vpop.f32.mrf.mxu0  ;;  %v8310_v9 = vpop.f32.mrf.mxu2 }
 0x1f5   : > { %v937_v36 = vmul.f32 %v863_v24, %v7609_v10 }
 0x1f7   : > { %6061 = vmatmul.msk.f32.gmra.mxu2 %vm1014_vm2, %v7607_v5  ;;  %v8301_v25 = vpack.c.bf16 %v937_v36, %v936_v23 }
 0x1f9   : > { %11740 = vst [vmem:[#allocation117_spill] sm:$0xff] %v8301_v25  ;;  %v8303_v43 = vpop.f32.mrf.mxu3  ;;  %1904 = vmatmul.bf16.gmra.mxu3 %v8301_v25  ;;  %1993 = vmatmul.bf16.gmra.mxu0 %v8301_v25 }
 0x1fa   : > { %11741 = vst [vmem:[#allocation118_spill] sm:$0xff] %v8303_v43  ;;  %2082 = vmatmul.bf16.gmra.mxu1 %v8301_v25 }
 0x1fb   : > { %v8308_v1 = vpop.f32.mrf.mxu1 }
 0x1fc   : > { %11742 = vst [vmem:[#allocation119_spill] sm:$0xff] %v8308_v1  ;;  %v866_v26 = vpop.f32.mrf.mxu0  ;;  %v8324_v1 = vpop.f32.mrf.mxu2 }
 0x1fd   : > { %v938_v10 = vmul.f32 %v866_v26, %v7626_v28  ;;  %v6141_v28 = vld [vmem:[%s11395_s9 + $0xe4] sm:$0xf] }
 0x1ff   : > { %6062 = vmatmul.msk.f32.gmra.mxu2 %vm1014_vm2, %v7624_v27 }
 0x201   : > { %v8314_v59 = vpop.f32.mrf.mxu3 }
 0x203   : > { %v8316_v23 = vpop.f32.mrf.mxu1 }
 0x204   : > { %11743 = vst [vmem:[#allocation120_spill] sm:$0xff] %v8316_v23  ;;  %v869_v36 = vpop.f32.mrf.mxu0 }
 0x205   : > { %v939_v24 = vmul.f32 %v869_v36, %v7649_v0  ;;  %v6783_v0 = vld [vmem:[%s11395_s9 + $0x104] sm:$0xf0] }
 0x206   : > { %v6142_v36 = vor.u32 %v6783_v0, %v6141_v28 }
 0x207   : > { %6063 = vmatmul.msk.f32.gmra.mxu2 %vm1014_vm2, %v7641_v50  ;;  %v8322_v37 = vpack.c.bf16 %v939_v24, %v938_v10 }
 0x208   : > { %2670 = vmatpush.bf16.msrb.mxu0 %v6142_v36 }
 0x209   : > { %11744 = vst [vmem:[#allocation121_spill] sm:$0xff] %v8322_v37  ;;  %v8326_v43 = vpop.f32.mrf.mxu3  ;;  %1909 = vmatmul.bf16.gmra.mxu3 %v8322_v37  ;;  %1998 = vmatmul.bf16.gmra.mxu0 %v8322_v37 }
 0x20a   : > { %11745 = vst [vmem:[#allocation122_spill] sm:$0xff] %v8326_v43  ;;  %2087 = vmatmul.bf16.gmra.mxu1 %v8322_v37  ;;  %v8343_v43 = vpop.f32.mrf.mxu2  ;;  %v6799_v37 = vld [vmem:[%s11396_s10 + $0xf8] sm:$0xff] }
 0x20b   : > { %v8337_v26 = vpop.f32.mrf.mxu1  ;;  %3068 = vmatpush.bf16.msrb.mxu2 %v6799_v37 }
 0x20c   : > { %11746 = vst [vmem:[#allocation123_spill] sm:$0xff] %v8337_v26  ;;  %v872_v10 = vpop.f32.mrf.mxu0  ;;  %v941_v26 = vmul.f32 %v7401_v22, %v7690_v18  ;;  %v6175_v22 = vld [vmem:[%s11395_s9 + $0x228] sm:$0xf0] }
 0x20d   : > { %v940_v50 = vmul.f32 %v872_v10, %v7666_v51  ;;  %v6790_v51 = vld [vmem:[%s11395_s9 + $0x208] sm:$0xf] }
 0x20e   : > { %v6178_v18 = vor.u32 %v6790_v51, %v6175_v22  ;;  %v943_v51 = vmul.f32 %v7438_v39, %v7743_v3 }
 0x20f   : > { %6064 = vmatmul.msk.f32.gmra.mxu2 %vm1014_vm2, %v7664_v38  ;;  %v8355_v0 = vpack.c.bf16 %v941_v26, %v940_v50  ;;  %v1268_v26 = vld [vmem:[%s11392_s6] sm:$0x7] }
 0x210   : > { %2755 = vmatpush.bf16.msrb.mxu1 %v6178_v18  ;;  %v8377_v10 = vperm.slane %v1268_v26, 2  ;;  %v942_v18 = vmul.f32 %v7415_v29, %v7713_v20  ;;  %v6133_v29 = vld [vmem:[%s11395_s9 + $0x9c] sm:$0xf]  ;;  %v6781_v20 = vld [vmem:[%s11395_s9 + $0xbc] sm:$0xf0] }
 0x211   : > { %v8341_v24 = vpop.f32.mrf.mxu3  ;;  %11749 = vst [vmem:[#allocation126_spill] sm:$0xff] %v8355_v0 }
 0x212   : > { %11747 = vst [vmem:[#allocation124_spill] sm:$0xff] %v8341_v24  ;;  %v8368_v37 = vpop.f32.mrf.mxu2  ;;  %v11758_v24 = vld [vmem:[#allocation38_spill] sm:$0xff] }
 0x213   : > { %v8351_v28 = vpop.f32.mrf.mxu1 }
 0x214   : > { %11748 = vst [vmem:[#allocation125_spill] sm:$0xff] %v8351_v28  ;;  %v8396_v28 = vperm.slane %v1268_v26, 0 }
 0x217   : > { %6065 = vmatmul.msk.f32.gmra.mxu2 %vm1014_vm2, %v7685_v32  ;;  %v8394_v32 = vpack.c.bf16 %v943_v51, %v942_v18  ;;  %v11755_v51 = vld [vmem:[#allocation35_spill] sm:$0xff] }
 0x219   : > { %1914 = vmatmul.bf16.gmra.mxu3 %v8355_v0  ;;  %2003 = vmatmul.bf16.gmra.mxu0 %v8355_v0  ;;  %v8359_v36 = vpop.f32.mrf.mxu3  ;;  %11753 = vst [vmem:[#allocation130_spill] sm:$0xff] %v8394_v32 }
 0x21a   : > { %11750 = vst [vmem:[#allocation127_spill] sm:$0xff] %v8359_v36  ;;  %2092 = vmatmul.bf16.gmra.mxu1 %v8355_v0  ;;  %v2333_v36 = vld [vmem:[%s11391_s5 + $0x68] sm:$0xff] }
 0x21b   : > { %v8372_v50 = vpop.f32.mrf.mxu1  ;;  %2471 = vmatpush.msrb.mxu3 %v2333_v36  ;;  %v8400_v36 = vperm.slane %v1268_v26, 1 }
 0x21c   : > { %11751 = vst [vmem:[#allocation128_spill] sm:$0xff] %v8372_v50  ;;  %v8390_v50 = vpop.f32.mrf.mxu2 }
 0x21d   : > { %v1503_v18 = vadd.f32 %v11755_v51, %v8400_v36 }
 0x21f   : > { %6066 = vmatmul.msk.f32.gmra.mxu2 %vm1014_vm2, %v7711_v52  ;;  %v1616_v52 = vadd.f32 %v7757_v63, %v8377_v10  ;;  %v6134_v63 = vor.u32 %v6781_v20, %v6133_v29 }
 0x221   : > { %v8384_v22 = vpop.f32.mrf.mxu3  ;;  %2671 = vmatpush.bf16.msrb.mxu0 %v6134_v63 }
 0x222   : > { %11752 = vst [vmem:[#allocation129_spill] sm:$0xff] %v8384_v22  ;;  %v1619_v22 = vadd.f32 %v7783_v53, %v8377_v10  ;;  %v6798_v53 = vld [vmem:[%s11396_s10 + $0xf0] sm:$0xff] }
 0x223   : > { %3069 = vmatpush.bf16.msrb.mxu2 %v6798_v53 }
 0x224   : > { %v8427_v20 = vpop.f32.mrf.mxu2 }
 0x225   : > { %11761 = vst [vmem:[#allocation133_spill] sm:$0xff] %v8427_v20 }
 0x226   : > { %v1969_v0 = vpop.f32.mrf.mxu0 }
 0x227   : > { %6067 = vmatmul.msk.f32.gmra.mxu2 %vm1014_vm2, %v7735_v17  ;;  %v2058_v39 = vpop.f32.mrf.mxu1  ;;  %v8423_v23 = vmul.f32 %v1969_v0, %v1503_v18  ;;  %v11763_v0 = vld [vmem:[#allocation40_spill] sm:$0xff] }
 0x228   : > { %v8398_v3 = vmul.f32 %v2058_v39, %v1616_v52  ;;  %v1390_v52 = vadd.f32 %v7755_v11, %v8396_v28  ;;  %v11756_v39 = vld [vmem:[#allocation37_spill] sm:$0xff] }
 0x229   : > { %1919 = vmatmul.bf16.gmra.mxu3 %v8394_v32  ;;  %2008 = vmatmul.bf16.gmra.mxu0 %v8394_v32  ;;  %v1506_v17 = vadd.f32 %v11756_v39, %v8400_v36  ;;  %11759 = vst [vmem:[#allocation37_spill] sm:$0xff] %v8423_v23 }
 0x22a   : > { %11754 = vst [vmem:[#allocation131_spill] sm:$0xff] %v8398_v3  ;;  %2097 = vmatmul.bf16.gmra.mxu1 %v8394_v32  ;;  %v11770_v3 = vld [vmem:[#allocation42_spill] sm:$0xff] }
 0x22c   : > { %v1880_v26 = vpop.f32.mrf.mxu3  ;;  %v8458_v53 = vpop.f32.mrf.mxu2 }
 0x22d   : > { %v8417_v32 = vmul.f32 %v1880_v26, %v1390_v52  ;;  %v1393_v26 = vadd.f32 %v11763_v0, %v8396_v28  ;;  %v11769_v52 = vld [vmem:[#allocation45_spill] sm:$0xff] }
 0x22e   : > { %v1971_v38 = vpop.f32.mrf.mxu0  ;;  %v1622_v63 = vadd.f32 %v11769_v52, %v8377_v10  ;;  %v6788_v52 = vld [vmem:[%s11395_s9 + $0x1c0] sm:$0xf] }
 0x22f   : > { %11757 = vst [vmem:[#allocation35_spill] sm:$0xff] %v8417_v32  ;;  %6068 = vmatmul.msk.f32.gmra.mxu2 %vm1014_vm2, %v11758_v24  ;;  %v8425_v11 = vmul.f32 %v1971_v38, %v1506_v17  ;;  %v2060_v29 = vpop.f32.mrf.mxu1  ;;  %v11764_v38 = vld [vmem:[#allocation43_spill] sm:$0xff]  ;;  %v11765_v17 = vld [vmem:[#allocation9_spill] sm:$0xff]  ;;  %v1625_v32 = vadd.f32 %v7835_v40, %v8377_v10 }
 0x230   : > { %v8429_v51 = vmul.f32 %v2060_v29, %v1619_v22  ;;  %v945_v18 = vmul.f32 %v11765_v17, %v11764_v38  ;;  %v11766_v22 = vld [vmem:[#allocation39_spill] sm:$0xff] }
 0x231   : > { %11760 = vst [vmem:[#allocation132_spill] sm:$0xff] %v8425_v11  ;;  %v11767_v29 = vld [vmem:[#allocation7_spill] sm:$0xff] }
 0x232   : > { %11762 = vst [vmem:[#allocation134_spill] sm:$0xff] %v8429_v51  ;;  %v944_v24 = vmul.f32 %v11767_v29, %v11766_v22  ;;  %v11775_v22 = vld [vmem:[#allocation41_spill] sm:$0xff] }
 0x233   : > { %11773 = vst [vmem:[#allocation39_spill] sm:$0xff] %v8458_v53  ;;  %v1509_v29 = vadd.f32 %v11775_v22, %v8400_v36 }
 0x234   : > { %v1882_v39 = vpop.f32.mrf.mxu3  ;;  %v8450_v23 = vpack.c.bf16 %v945_v18, %v944_v24  ;;  %v6167_v24 = vld [vmem:[%s11395_s9 + $0x1e0] sm:$0xf0]  ;;  %v8493_v53 = vpop.f32.mrf.mxu2 }
 0x235   : > { %v8444_v20 = vmul.f32 %v1882_v39, %v1393_v26  ;;  %v11774_v26 = vld [vmem:[#allocation44_spill] sm:$0xff]  ;;  %v6170_v18 = vor.u32 %v6788_v52, %v6167_v24 }
 0x236   : > { %v1974_v51 = vpop.f32.mrf.mxu0  ;;  %11771 = vst [vmem:[#allocation43_spill] sm:$0xff] %v8450_v23 }
 0x237   : > { %11768 = vst [vmem:[#allocation40_spill] sm:$0xff] %v8444_v20  ;;  %6069 = vmatmul.msk.f32.gmra.mxu2 %vm1014_vm2, %v11770_v3  ;;  %v2063_v38 = vpop.f32.mrf.mxu1  ;;  %2756 = vmatpush.bf16.msrb.mxu1 %v6170_v18  ;;  %v11778_v20 = vld [vmem:[#allocation47_spill] sm:$0xff]  ;;  %v8479_v3 = vmul.f32 %v1974_v51, %v1509_v29  ;;  %v11782_v18 = vld [vmem:[#allocation49_spill] sm:$0xff] }
 0x238   : > { %v8454_v17 = vmul.f32 %v2063_v38, %v1622_v63  ;;  %v1396_v63 = vadd.f32 %v11774_v26, %v8396_v28  ;;  %v11776_v38 = vld [vmem:[#allocation46_spill] sm:$0xff]  ;;  %v1399_v40 = vadd.f32 %v11782_v18, %v8396_v28 }
 0x239   : > { %1924 = vmatmul.bf16.gmra.mxu3 %v8450_v23  ;;  %2013 = vmatmul.bf16.gmra.mxu0 %v8450_v23  ;;  %v1512_v0 = vadd.f32 %v11776_v38, %v8400_v36  ;;  %11779 = vst [vmem:[#allocation45_spill] sm:$0xff] %v8479_v3  ;;  %v11784_v38 = vld [vmem:[#allocation13_spill] sm:$0xff]  ;;  %v11789_v3 = vld [vmem:[#allocation51_spill] sm:$0xff] }
 0x23a   : > { %11772 = vst [vmem:[#allocation9_spill] sm:$0xff] %v8454_v17  ;;  %2102 = vmatmul.bf16.gmra.mxu1 %v8450_v23 }
 0x23c   : > { %v1885_v39 = vpop.f32.mrf.mxu3 }
 0x23d   : > { %v8473_v11 = vmul.f32 %v1885_v39, %v1396_v63  ;;  %v11783_v39 = vld [vmem:[#allocation52_spill] sm:$0xff] }
 0x23e   : > { %v1976_v23 = vpop.f32.mrf.mxu0 }
 0x23f   : > { %11777 = vst [vmem:[#allocation7_spill] sm:$0xff] %v8473_v11  ;;  %6070 = vmatmul.msk.f32.gmra.mxu2 %vm1014_vm2, %v11778_v20  ;;  %v8481_v52 = vmul.f32 %v1976_v23, %v1512_v0  ;;  %v2065_v24 = vpop.f32.mrf.mxu1  ;;  %v947_v20 = vmul.f32 %v11784_v38, %v11783_v39  ;;  %v11785_v23 = vld [vmem:[#allocation48_spill] sm:$0xff]  ;;  %v11786_v0 = vld [vmem:[#allocation11_spill] sm:$0xff]  ;;  %v8528_v11 = vpop.f32.mrf.mxu2 }
 0x240   : > { %v8483_v26 = vmul.f32 %v2065_v24, %v1625_v32  ;;  %v946_v29 = vmul.f32 %v11786_v0, %v11785_v23  ;;  %v11788_v24 = vld [vmem:[#allocation54_spill] sm:$0xff] }
 0x241   : > { %11780 = vst [vmem:[#allocation44_spill] sm:$0xff] %v8481_v52  ;;  %v1628_v22 = vadd.f32 %v11788_v24, %v8377_v10  ;;  %v1631_v52 = vadd.f32 %v7887_v60, %v8377_v10  ;;  %v6797_v60 = vld [vmem:[%s11396_s10 + $0xe8] sm:$0xff] }
 0x242   : > { %11781 = vst [vmem:[#allocation41_spill] sm:$0xff] %v8483_v26  ;;  %v8503_v17 = vpack.c.bf16 %v947_v20, %v946_v29  ;;  %v6779_v20 = vld [vmem:[%s11395_s9 + $0x74] sm:$0xf0]  ;;  %v11793_v29 = vld [vmem:[#allocation50_spill] sm:$0xff]  ;;  %3070 = vmatpush.bf16.msrb.mxu2 %v6797_v60 }
 0x243   : > { %v1515_v24 = vadd.f32 %v11793_v29, %v8400_v36 }
 0x244   : > { %v1887_v51 = vpop.f32.mrf.mxu3  ;;  %11790 = vst [vmem:[#allocation49_spill] sm:$0xff] %v8503_v17 }
 0x245   : > { %v8497_v32 = vmul.f32 %v1887_v51, %v1399_v40  ;;  %v6125_v40 = vld [vmem:[%s11395_s9 + $0x54] sm:$0xf]  ;;  %v11792_v51 = vld [vmem:[#allocation53_spill] sm:$0xff] }
 0x246   : > { %v1979_v63 = vpop.f32.mrf.mxu0  ;;  %v1402_v23 = vadd.f32 %v11792_v51, %v8396_v28  ;;  %v6126_v0 = vor.u32 %v6779_v20, %v6125_v40 }
 0x247   : > { %11787 = vst [vmem:[#allocation46_spill] sm:$0xff] %v8497_v32  ;;  %6071 = vmatmul.msk.f32.gmra.mxu2 %vm1014_vm2, %v11789_v3  ;;  %v2068_v39 = vpop.f32.mrf.mxu1  ;;  %v11796_v32 = vld [vmem:[#allocation56_spill] sm:$0xff]  ;;  %v8532_v40 = vmul.f32 %v1979_v63, %v1515_v24  ;;  %v11801_v24 = vld [vmem:[#allocation17_spill] sm:$0xff] }
 0x248   : > { %v8507_v38 = vmul.f32 %v2068_v39, %v1628_v22  ;;  %v11794_v39 = vld [vmem:[#allocation55_spill] sm:$0xff]  ;;  %2672 = vmatpush.bf16.msrb.mxu0 %v6126_v0  ;;  %v11800_v63 = vld [vmem:[#allocation60_spill] sm:$0xff] }
 0x249   : > { %1929 = vmatmul.bf16.gmra.mxu3 %v8503_v17  ;;  %2018 = vmatmul.bf16.gmra.mxu0 %v8503_v17  ;;  %v1518_v18 = vadd.f32 %v11794_v39, %v8400_v36  ;;  %11797 = vst [vmem:[#allocation48_spill] sm:$0xff] %v8532_v40 }
 0x24a   : > { %11791 = vst [vmem:[#allocation52_spill] sm:$0xff] %v8507_v38  ;;  %2107 = vmatmul.bf16.gmra.mxu1 %v8503_v17  ;;  %v11806_v38 = vld [vmem:[#allocation59_spill] sm:$0xff] }
 0x24c   : > { %v1890_v22 = vpop.f32.mrf.mxu3 }
 0x24d   : > { %v8524_v26 = vmul.f32 %v1890_v22, %v1402_v23  ;;  %v1405_v22 = vadd.f32 %v7885_v33, %v8396_v28  ;;  %v11805_v23 = vld [vmem:[#allocation62_spill] sm:$0xff] }
 0x24e   : > { %v1981_v51 = vpop.f32.mrf.mxu0  ;;  %v1634_v0 = vadd.f32 %v11805_v23, %v8377_v10  ;;  %v6786_v23 = vld [vmem:[%s11395_s9 + $0x178] sm:$0xf] }
 0x24f   : > { %11795 = vst [vmem:[#allocation13_spill] sm:$0xff] %v8524_v26  ;;  %6072 = vmatmul.msk.f32.gmra.mxu2 %vm1014_vm2, %v11796_v32  ;;  %v8534_v20 = vmul.f32 %v1981_v51, %v1518_v18  ;;  %v2070_v29 = vpop.f32.mrf.mxu1  ;;  %v949_v18 = vmul.f32 %v11801_v24, %v11800_v63  ;;  %v11803_v51 = vld [vmem:[#allocation15_spill] sm:$0xff]  ;;  %v8561_v24 = vpop.f32.mrf.mxu2  ;;  %v1637_v26 = vadd.f32 %v7942_v7, %v8377_v10  ;;  %v2331_v7 = vld [vmem:[%s11391_s5 + $0x20] sm:$0xff] }
 0x250   : > { %v8536_v17 = vmul.f32 %v2070_v29, %v1631_v52  ;;  %v11802_v52 = vld [vmem:[#allocation57_spill] sm:$0xff]  ;;  %2472 = vmatpush.msrb.mxu3 %v2331_v7 }
 0x251   : > { %11798 = vst [vmem:[#allocation11_spill] sm:$0xff] %v8534_v20  ;;  %v948_v29 = vmul.f32 %v11803_v51, %v11802_v52  ;;  %v11810_v51 = vld [vmem:[#allocation58_spill] sm:$0xff] }
 0x252   : > { %11799 = vst [vmem:[#allocation54_spill] sm:$0xff] %v8536_v17 }
 0x253   : > { %v8557_v40 = vpack.c.bf16 %v949_v18, %v948_v29  ;;  %v11809_v18 = vld [vmem:[#allocation61_spill] sm:$0xff]  ;;  %v1521_v29 = vadd.f32 %v11810_v51, %v8400_v36 }
 0x254   : > { %v1892_v39 = vpop.f32.mrf.mxu3 }
 0x255   : > { %v8551_v32 = vmul.f32 %v1892_v39, %v1405_v22  ;;  %11807 = vst [vmem:[#allocation50_spill] sm:$0xff] %v8557_v40  ;;  %v6159_v22 = vld [vmem:[%s11395_s9 + $0x198] sm:$0xf0]  ;;  %v1408_v39 = vadd.f32 %v11809_v18, %v8396_v28 }
 0x256   : > { %v1984_v17 = vpop.f32.mrf.mxu0  ;;  %v6162_v52 = vor.u32 %v6786_v23, %v6159_v22 }
 0x257   : > { %11804 = vst [vmem:[#allocation53_spill] sm:$0xff] %v8551_v32  ;;  %6073 = vmatmul.msk.f32.gmra.mxu2 %vm1014_vm2, %v11806_v38  ;;  %v2073_v63 = vpop.f32.mrf.mxu1  ;;  %v11813_v32 = vld [vmem:[#allocation64_spill] sm:$0xff]  ;;  %v8586_v38 = vmul.f32 %v1984_v17, %v1521_v29  ;;  %v1411_v17 = vadd.f32 %v7940_v21, %v8396_v28  ;;  %v11819_v29 = vld [vmem:[#allocation19_spill] sm:$0xff] }
 0x258   : > { %v8563_v60 = vmul.f32 %v2073_v63, %v1634_v0  ;;  %v11811_v63 = vld [vmem:[#allocation63_spill] sm:$0xff]  ;;  %2757 = vmatpush.bf16.msrb.mxu1 %v6162_v52  ;;  %v11822_v52 = vld [vmem:[#allocation69_spill] sm:$0xff] }
 0x259   : > { %1934 = vmatmul.bf16.gmra.mxu3 %v8557_v40  ;;  %2023 = vmatmul.bf16.gmra.mxu0 %v8557_v40  ;;  %v1524_v33 = vadd.f32 %v11811_v63, %v8400_v36  ;;  %11814 = vst [vmem:[#allocation17_spill] sm:$0xff] %v8586_v38 }
 0x25a   : > { %11808 = vst [vmem:[#allocation55_spill] sm:$0xff] %v8563_v60  ;;  %2112 = vmatmul.bf16.gmra.mxu1 %v8557_v40  ;;  %v1640_v60 = vadd.f32 %v11822_v52, %v8377_v10  ;;  %v6117_v52 = vld [vmem:[%s11395_s9 + $0xc] sm:$0xf] }
 0x25c   : > { %v1895_v0 = vpop.f32.mrf.mxu3 }
 0x25d   : > { %v8580_v20 = vmul.f32 %v1895_v0, %v1408_v39  ;;  %v8594_v39 = vpop.f32.mrf.mxu2  ;;  %v11818_v0 = vld [vmem:[#allocation65_spill] sm:$0xff] }
 0x25e   : > { %v1986_v40 = vpop.f32.mrf.mxu0  ;;  %v950_v63 = vmul.f32 %v11819_v29, %v11818_v0 }
 0x25f   : > { %11812 = vst [vmem:[#allocation60_spill] sm:$0xff] %v8580_v20  ;;  %6074 = vmatmul.msk.f32.gmra.mxu2 %vm1014_vm2, %v11813_v32  ;;  %v8588_v23 = vmul.f32 %v1986_v40, %v1524_v33  ;;  %v2075_v22 = vpop.f32.mrf.mxu1  ;;  %v11817_v40 = vld [vmem:[#allocation21_spill] sm:$0xff]  ;;  %v11831_v20 = vld [vmem:[#allocation71_spill] sm:$0xff] }
 0x260   : > { %v8590_v18 = vmul.f32 %v2075_v22, %v1637_v26  ;;  %v951_v33 = vmul.f32 %v11817_v40, %v7954_v35  ;;  %v11820_v22 = vld [vmem:[#allocation66_spill] sm:$0xff] }
 0x261   : > { %11815 = vst [vmem:[#allocation57_spill] sm:$0xff] %v8588_v23  ;;  %v1527_v51 = vadd.f32 %v11820_v22, %v8400_v36 }
 0x262   : > { %11816 = vst [vmem:[#allocation15_spill] sm:$0xff] %v8590_v18  ;;  %v11823_v18 = vld [vmem:[#allocation67_spill] sm:$0xff]  ;;  %v8615_v23 = vpack.c.bf16 %v951_v33, %v950_v63  ;;  %v11828_v63 = vld [vmem:[#allocation70_spill] sm:$0xff] }
 0x263   : > { %v1530_v22 = vadd.f32 %v11828_v63, %v8400_v36 }
 0x264   : > { %v1897_v26 = vpop.f32.mrf.mxu3  ;;  %11824 = vst [vmem:[#allocation61_spill] sm:$0xff] %v8615_v23 }
 0x265   : > { %v8609_v38 = vmul.f32 %v1897_v26, %v1411_v17  ;;  %v6777_v17 = vld [vmem:[%s11395_s9 + $0x2c] sm:$0xf0] }
 0x266   : > { %v1989_v21 = vpop.f32.mrf.mxu0  ;;  %v6118_v26 = vor.u32 %v6777_v17, %v6117_v52  ;;  %v11838_v17 = vld [vmem:[#allocation23_spill] sm:$0xff] }
 0x267   : > { %11821 = vst [vmem:[#allocation62_spill] sm:$0xff] %v8609_v38  ;;  %6075 = vmatmul.msk.f32.gmra.mxu2 %vm1014_vm2, %v11823_v18  ;;  %v8619_v7 = vmul.f32 %v1989_v21, %v1527_v51  ;;  %v2078_v40 = vpop.f32.mrf.mxu1  ;;  %v11827_v51 = vld [vmem:[#allocation68_spill] sm:$0xff] }
 0x268   : > { %v8621_v0 = vmul.f32 %v2078_v40, %v1640_v60  ;;  %v1414_v33 = vadd.f32 %v11827_v51, %v8396_v28  ;;  %v8634_v60 = vpop.f32.mrf.mxu2  ;;  %2673 = vmatpush.bf16.msrb.mxu0 %v6118_v26  ;;  %v11830_v40 = vld [vmem:[#allocation74_spill] sm:$0xff]  ;;  %v6796_v26 = vld [vmem:[%s11396_s10 + $0xe0] sm:$0xff] }
 0x269   : > { %11825 = vst [vmem:[#allocation58_spill] sm:$0xff] %v8619_v7  ;;  %1939 = vmatmul.bf16.gmra.mxu3 %v8615_v23  ;;  %2028 = vmatmul.bf16.gmra.mxu0 %v8615_v23  ;;  %v1643_v35 = vadd.f32 %v11830_v40, %v8377_v10  ;;  %v11835_v40 = vld [vmem:[#allocation77_spill] sm:$0xff] }
 0x26a   : > { %11826 = vst [vmem:[#allocation63_spill] sm:$0xff] %v8621_v0  ;;  %2117 = vmatmul.bf16.gmra.mxu1 %v8615_v23  ;;  %3071 = vmatpush.bf16.msrb.mxu2 %v6796_v26 }
 0x26c   : > { %v1900_v29 = vpop.f32.mrf.mxu3 }
 0x26d   : > { %v8638_v21 = vmul.f32 %v1900_v29, %v1414_v33  ;;  %v11834_v29 = vld [vmem:[#allocation73_spill] sm:$0xff]  ;;  %v11837_v33 = vld [vmem:[#allocation72_spill] sm:$0xff] }
 0x26e   : > { %v1991_v38 = vpop.f32.mrf.mxu0  ;;  %v1417_v63 = vadd.f32 %v11834_v29, %v8396_v28  ;;  %v952_v0 = vmul.f32 %v11838_v17, %v11837_v33 }
 0x26f   : > { %11829 = vst [vmem:[#allocation21_spill] sm:$0xff] %v8638_v21  ;;  %6076 = vmatmul.msk.f32.gmra.mxu2 %vm1014_vm2, %v11831_v20  ;;  %v8644_v23 = vmul.f32 %v1991_v38, %v1530_v22  ;;  %v2080_v51 = vpop.f32.mrf.mxu1  ;;  %v11836_v20 = vld [vmem:[#allocation25_spill] sm:$0xff] }
 0x270   : > { %v8646_v52 = vmul.f32 %v2080_v51, %v1643_v35  ;;  %v953_v38 = vmul.f32 %v11836_v20, %v11835_v40  ;;  %v6784_v35 = vld [vmem:[%s11395_s9 + $0x130] sm:$0xf]  ;;  %v6151_v51 = vld [vmem:[%s11395_s9 + $0x150] sm:$0xf0]  ;;  %v1646_v20 = vadd.f32 %v8036_v13, %v8377_v10  ;;  %v8673_v26 = vpop.f32.mrf.mxu2  ;;  %v11841_v40 = vld [vmem:[#allocation76_spill] sm:$0xff] }
 0x271   : > { %11832 = vst [vmem:[#allocation65_spill] sm:$0xff] %v8644_v23  ;;  %v6154_v23 = vor.u32 %v6784_v35, %v6151_v51  ;;  %v6782_v13 = vld [vmem:[%s11395_s9 + $0xe8] sm:$0xf]  ;;  %v6135_v35 = vld [vmem:[%s11395_s9 + $0xc0] sm:$0xf0]  ;;  %v1536_v51 = vadd.f32 %v8026_v61, %v8400_v36 }
 0x272   : > { %11833 = vst [vmem:[#allocation19_spill] sm:$0xff] %v8646_v52  ;;  %v11839_v52 = vld [vmem:[#allocation75_spill] sm:$0xff]  ;;  %v8677_v32 = vpack.c.bf16 %v953_v38, %v952_v0  ;;  %v6780_v38 = vld [vmem:[%s11395_s9 + $0xa0] sm:$0xf]  ;;  %v6778_v61 = vld [vmem:[%s11395_s9 + $0x58] sm:$0xf] }
 0x273   : > { %v1533_v7 = vadd.f32 %v11839_v52, %v8400_v36  ;;  %2758 = vmatpush.bf16.msrb.mxu1 %v6154_v23 }
 0x274   : > { %v1902_v22 = vpop.f32.mrf.mxu3  ;;  %11842 = vst [vmem:[#allocation69_spill] sm:$0xff] %v8677_v32 }
 0x275   : > { %v8669_v29 = vmul.f32 %v1902_v22, %v1417_v63  ;;  %v6143_v22 = vld [vmem:[%s11395_s9 + $0x108] sm:$0xf0] }
 0x276   : > { %v1994_v18 = vpop.f32.mrf.mxu0  ;;  %v6146_v0 = vor.u32 %v6782_v13, %v6143_v22  ;;  %v1649_v13 = vadd.f32 %v8093_v45, %v8377_v10  ;;  %v11846_v22 = vld [vmem:[#allocation79_spill] sm:$0xff]  ;;  %v6127_v45 = vld [vmem:[%s11395_s9 + $0x78] sm:$0xf0] }
 0x277   : > { %11840 = vst [vmem:[#allocation66_spill] sm:$0xff] %v8669_v29  ;;  %6077 = vmatmul.msk.f32.gmra.mxu2 %vm1014_vm2, %v11841_v40  ;;  %v8681_v33 = vmul.f32 %v1994_v18, %v1533_v7  ;;  %v2083_v52 = vpop.f32.mrf.mxu1  ;;  %v11845_v18 = vld [vmem:[#allocation78_spill] sm:$0xff] }
 0x278   : > { %v8683_v63 = vmul.f32 %v2083_v52, %v1646_v20  ;;  %v1420_v23 = vadd.f32 %v11845_v18, %v8396_v28  ;;  %2759 = vmatpush.bf16.msrb.mxu1 %v6146_v0  ;;  %v6138_v52 = vor.u32 %v6780_v38, %v6135_v35  ;;  %v8712_v21 = vpop.f32.mrf.mxu2  ;;  %v11849_v35 = vld [vmem:[#allocation81_spill] sm:$0xff]  ;;  %v11854_v38 = vld [vmem:[#allocation82_spill] sm:$0xff] }
 0x279   : > { %11843 = vst [vmem:[#allocation68_spill] sm:$0xff] %v8681_v33  ;;  %1944 = vmatmul.bf16.gmra.mxu3 %v8677_v32  ;;  %2033 = vmatmul.bf16.gmra.mxu0 %v8677_v32 }
 0x27a   : > { %11844 = vst [vmem:[#allocation70_spill] sm:$0xff] %v8683_v63  ;;  %2122 = vmatmul.bf16.gmra.mxu1 %v8677_v32  ;;  %v1539_v63 = vadd.f32 %v11854_v38, %v8400_v36  ;;  %v11867_v32 = vld [vmem:[#allocation88_spill] sm:$0xff] }
 0x27c   : > { %v1905_v7 = vpop.f32.mrf.mxu3  ;;  %2760 = vmatpush.bf16.msrb.mxu1 %v6138_v52  ;;  %v11851_v52 = vld [vmem:[#allocation29_spill] sm:$0xff] }
 0x27d   : > { %v8704_v20 = vmul.f32 %v1905_v7, %v1420_v23  ;;  %v6130_v7 = vor.u32 %v6778_v61, %v6127_v45  ;;  %v6119_v23 = vld [vmem:[%s11395_s9 + $0x30] sm:$0xf0]  ;;  %v11852_v61 = vld [vmem:[#allocation80_spill] sm:$0xff] }
 0x27e   : > { %v1996_v0 = vpop.f32.mrf.mxu0  ;;  %v11853_v45 = vld [vmem:[#allocation27_spill] sm:$0xff] }
 0x27f   : > { %6078 = vmatmul.msk.f32.gmra.mxu2 %vm1014_vm2, %v11846_v22  ;;  %v8710_v18 = vmul.f32 %v1996_v0, %v1536_v51  ;;  %v2085_v17 = vpop.f32.mrf.mxu1  ;;  %v1423_v51 = vadd.f32 %v11849_v35, %v8396_v28  ;;  %v6776_v22 = vld [vmem:[%s11395_s9 + $0x10] sm:$0xf]  ;;  %v954_v33 = vmul.f32 %v11853_v45, %v11852_v61 }
 0x280   : > { %v8714_v29 = vmul.f32 %v2085_v17, %v1649_v13  ;;  %v11850_v17 = vld [vmem:[#allocation84_spill] sm:$0xff]  ;;  %2761 = vmatpush.bf16.msrb.mxu1 %v6130_v7  ;;  %v1652_v7 = vadd.f32 %v8124_v19, %v8377_v10  ;;  %v8756_v19 = vpop.f32.mrf.mxu2 }
 0x281   : > { %11847 = vst [vmem:[#allocation74_spill] sm:$0xff] %v8710_v18  ;;  %v955_v13 = vmul.f32 %v11851_v52, %v11850_v17  ;;  %v11855_v17 = vld [vmem:[#allocation83_spill] sm:$0xff] }
 0x282   : > { %11848 = vst [vmem:[#allocation73_spill] sm:$0xff] %v8714_v29  ;;  %v6122_v29 = vor.u32 %v6776_v22, %v6119_v23 }
 0x283   : > { %v8746_v18 = vpack.c.bf16 %v955_v13, %v954_v33  ;;  %v1426_v33 = vadd.f32 %v8100_v54, %v8396_v28 }
 0x284   : > { %v1907_v0 = vpop.f32.mrf.mxu3  ;;  %2762 = vmatpush.bf16.msrb.mxu1 %v6122_v29  ;;  %v1655_v29 = vadd.f32 %v8144_v47, %v8377_v10  ;;  %v11862_v47 = vld [vmem:[#allocation87_spill] sm:$0xff] }
 0x285   : > { %v8740_v35 = vmul.f32 %v1907_v0, %v1423_v51  ;;  %11856 = vst [vmem:[#allocation77_spill] sm:$0xff] %v8746_v18 }
 0x286   : > { %v1999_v52 = vpop.f32.mrf.mxu0 }
 0x287   : > { %6079 = vmatmul.msk.f32.gmra.mxu2 %vm1014_vm2, %v11855_v17  ;;  %v8750_v40 = vmul.f32 %v1999_v52, %v1539_v63  ;;  %v2088_v61 = vpop.f32.mrf.mxu1  ;;  %v1542_v63 = vadd.f32 %v8102_v14, %v8400_v36  ;;  %v1429_v52 = vadd.f32 %v11862_v47, %v8396_v28  ;;  %v1545_v14 = vadd.f32 %v11867_v32, %v8400_v36 }
 0x288   : > { %v8752_v38 = vmul.f32 %v2088_v61, %v1652_v7  ;;  %v6795_v7 = vld [vmem:[%s11396_s10 + $0xd8] sm:$0xff]  ;;  %v11863_v61 = vld [vmem:[#allocation90_spill] sm:$0xff] }
 0x289   : > { %11857 = vst [vmem:[#allocation25_spill] sm:$0xff] %v8750_v40  ;;  %1949 = vmatmul.bf16.gmra.mxu3 %v8746_v18  ;;  %2038 = vmatmul.bf16.gmra.mxu0 %v8746_v18  ;;  %v11869_v40 = vld [vmem:[#allocation89_spill] sm:$0xff] }
 0x28a   : > { %11858 = vst [vmem:[#allocation72_spill] sm:$0xff] %v8752_v38  ;;  %2127 = vmatmul.bf16.gmra.mxu1 %v8746_v18  ;;  %3072 = vmatpush.bf16.msrb.mxu2 %v6795_v7 }
 0x28c   : > { %v1910_v22 = vpop.f32.mrf.mxu3 }
 0x28d   : > { %v8763_v23 = vmul.f32 %v1910_v22, %v1426_v33  ;;  %v11864_v33 = vld [vmem:[#allocation33_spill] sm:$0xff] }
 0x28e   : > { %v2001_v51 = vpop.f32.mrf.mxu0  ;;  %v957_v22 = vmul.f32 %v11864_v33, %v11863_v61 }
 0x28f   : > { %11859 = vst [vmem:[#allocation23_spill] sm:$0xff] %v8763_v23  ;;  %6080 = vmatmul.msk.f32.gmra.mxu2 %vm1014_vm2, %v8110_v30  ;;  %v8769_v13 = vmul.f32 %v2001_v51, %v1542_v63  ;;  %v2090_v0 = vpop.f32.mrf.mxu1  ;;  %v8784_v63 = vpop.f32.mrf.mxu2  ;;  %v11865_v51 = vld [vmem:[#allocation86_spill] sm:$0xff] }
 0x290   : > { %v8771_v45 = vmul.f32 %v2090_v0, %v1655_v29  ;;  %v11866_v0 = vld [vmem:[#allocation31_spill] sm:$0xff] }
 0x291   : > { %11860 = vst [vmem:[#allocation75_spill] sm:$0xff] %v8769_v13  ;;  %v956_v54 = vmul.f32 %v11866_v0, %v11865_v51 }
 0x292   : > { %11861 = vst [vmem:[#allocation78_spill] sm:$0xff] %v8771_v45  ;;  %v1658_v45 = vadd.f32 %v8163_v12, %v8377_v10  ;;  %v11873_v12 = vld [vmem:[#allocation91_spill] sm:$0xff] }
 0x293   : > { %v8796_v61 = vpack.c.bf16 %v957_v22, %v956_v54  ;;  %v1432_v32 = vadd.f32 %v11873_v12, %v8396_v28  ;;  %v11874_v54 = vld [vmem:[#allocation92_spill] sm:$0xff] }
 0x294   : > { %v1912_v29 = vpop.f32.mrf.mxu3  ;;  %v1548_v22 = vadd.f32 %v11874_v54, %v8400_v36  ;;  %v11878_v54 = vld [vmem:[#allocation94_spill] sm:$0xff] }
 0x295   : > { %v8790_v38 = vmul.f32 %v1912_v29, %v1429_v52  ;;  %11870 = vst [vmem:[#allocation84_spill] sm:$0xff] %v8796_v61 }
 0x296   : > { %v2004_v47 = vpop.f32.mrf.mxu0 }
 0x297   : > { %11868 = vst [vmem:[#allocation81_spill] sm:$0xff] %v8790_v38  ;;  %6081 = vmatmul.msk.f32.gmra.mxu2 %vm1014_vm2, %v11869_v40  ;;  %v8800_v33 = vmul.f32 %v2004_v47, %v1545_v14  ;;  %v2093_v51 = vpop.f32.mrf.mxu1  ;;  %v1661_v14 = vadd.f32 %v8184_v57, %v8377_v10  ;;  %v11875_v47 = vld [vmem:[#allocation93_spill] sm:$0xff]  ;;  %v6807_v57 = vld [vmem:[%s11396_s10 + $0x138] sm:$0xff] }
 0x298   : > { %v8802_v0 = vmul.f32 %v2093_v51, %v1658_v45  ;;  %v8815_v45 = vpop.f32.mrf.mxu2  ;;  %3157 = vmatpush.bf16.msra.mxu3 %v6807_v57  ;;  %v11881_v57 = vld [vmem:[#allocation96_spill] sm:$0xff] }
 0x299   : > { %11871 = vst [vmem:[#allocation29_spill] sm:$0xff] %v8800_v33  ;;  %1954 = vmatmul.bf16.gmra.mxu3 %v8796_v61  ;;  %2043 = vmatmul.bf16.gmra.mxu0 %v8796_v61 }
 0x29a   : > { %11872 = vst [vmem:[#allocation80_spill] sm:$0xff] %v8802_v0  ;;  %2132 = vmatmul.bf16.gmra.mxu1 %v8796_v61 }
 0x29c   : > { %v1915_v52 = vpop.f32.mrf.mxu3 }
 0x29d   : > { %v8811_v29 = vmul.f32 %v1915_v52, %v1432_v32  ;;  %v6759_v52 = vld [vmem:[%s11396_s10 + $0x38] sm:$0xff]  ;;  %v1664_v32 = vadd.f32 %v8198_v34, %v8377_v10 }
 0x29e   : > { %v2006_v51 = vpop.f32.mrf.mxu0  ;;  %3390 = vmatpush.bf16.msra.mxu0 %v6759_v52  ;;  %v11882_v52 = vld [vmem:[#allocation97_spill] sm:$0xff] }
 0x29f   : > { %6082 = vmatmul.msk.f32.gmra.mxu2 %vm1014_vm2, %v11875_v47  ;;  %v8819_v7 = vmul.f32 %v2006_v51, %v1548_v22  ;;  %v2095_v13 = vpop.f32.mrf.mxu1  ;;  %v1435_v22 = vadd.f32 %v11878_v54, %v8396_v28  ;;  %v1438_v54 = vadd.f32 %v11882_v52, %v8396_v28 }
 0x2a0   : > { %v8821_v23 = vmul.f32 %v2095_v13, %v1661_v14  ;;  %v11879_v13 = vld [vmem:[#allocation95_spill] sm:$0xff] }
 0x2a1   : > { %11876 = vst [vmem:[#allocation27_spill] sm:$0xff] %v8819_v7  ;;  %v1551_v14 = vadd.f32 %v11879_v13, %v8400_v36 }
 0x2a2   : > { %11877 = vst [vmem:[#allocation82_spill] sm:$0xff] %v8821_v23 }
 0x2a4   : > { %v1917_v51 = vpop.f32.mrf.mxu3 }
 0x2a5   : > { %v8837_v12 = vmul.f32 %v1917_v51, %v1435_v22  ;;  %v11883_v22 = vld [vmem:[#allocation98_spill] sm:$0xff] }
 0x2a6   : > { %v2009_v0 = vpop.f32.mrf.mxu0  ;;  %v1554_v51 = vadd.f32 %v11883_v22, %v8400_v36  ;;  %v11885_v22 = vld [vmem:[#allocation99_spill] sm:$0xff] }
 0x2a7   : > { %v8843_v33 = vmul.f32 %v2009_v0, %v1551_v14  ;;  %v2098_v7 = vpop.f32.mrf.mxu1 }
 0x2a8   : > { %v8845_v38 = vmul.f32 %v2098_v7, %v1664_v32  ;;  %v1667_v7 = vadd.f32 %v8211_v4, %v8377_v10  ;;  %v1441_v4 = vadd.f32 %v8188_v46, %v8396_v28  ;;  %v11887_v46 = vld [vmem:[#allocation100_spill] sm:$0xff] }
 0x2a9   : > { %6083 = vmatmul.msk.f32.vlgmr.msrb.gmra.mxu3 %vm1014_vm2, %v7419_v31  ;;  %2674 = vmatmul.bf16.vlgmr.msrb.gmra.mxu0 %v11881_v57 }
 0x2aa   : > { %11880 = vst [vmem:[#allocation87_spill] sm:$0xff] %v8845_v38  ;;  %2763 = vmatmul.bf16.vlgmr.msrb.gmra.mxu1 %v11881_v57 }
 0x2ac   : > { %v1920_v34 = vpop.f32.mrf.mxu3 }
 0x2ad   : > { %v8855_v13 = vmul.f32 %v1920_v34, %v1438_v54  ;;  %v6794_v54 = vld [vmem:[%s11396_s10 + $0xd0] sm:$0xff] }
 0x2ae   : > { %v2011_v0 = vpop.f32.mrf.mxu0  ;;  %3073 = vmatpush.bf16.msrb.mxu2 %v6794_v54  ;;  %v11888_v54 = vld [vmem:[#allocation101_spill] sm:$0xff] }
 0x2af   : > { %v8859_v32 = vmul.f32 %v2011_v0, %v1554_v51  ;;  %v2100_v14 = vpop.f32.mrf.mxu1  ;;  %v1557_v51 = vadd.f32 %v11885_v22, %v8400_v36  ;;  %v1670_v0 = vadd.f32 %v8234_v42, %v8377_v10 }
 0x2b0   : > { %v8861_v23 = vmul.f32 %v2100_v14, %v1667_v7 }
 0x2b1   : > { %6084 = vmatmul.msk.f32.gmra.mxu3 %vm1014_vm2, %v7442_v41  ;;  %v8926_v41 = vpop.f32.mrf.mxu2 }
 0x2b2   : > { %11884 = vst [vmem:[#allocation90_spill] sm:$0xff] %v8861_v23 }
 0x2b4   : > { %v1922_v34 = vpop.f32.mrf.mxu3 }
 0x2b5   : > { %v8876_v7 = vmul.f32 %v1922_v34, %v1441_v4  ;;  %v1444_v4 = vadd.f32 %v11888_v54, %v8396_v28  ;;  %v11889_v34 = vld [vmem:[#allocation102_spill] sm:$0xff]  ;;  %v1676_v54 = vadd.f32 %v8259_v16, %v8377_v10 }
 0x2b6   : > { %v2014_v14 = vpop.f32.mrf.mxu0  ;;  %v1560_v22 = vadd.f32 %v11889_v34, %v8400_v36  ;;  %v11897_v16 = vld [vmem:[#allocation106_spill] sm:$0xff] }
 0x2b7   : > { %v8882_v57 = vmul.f32 %v2014_v14, %v1557_v51  ;;  %v2103_v38 = vpop.f32.mrf.mxu1 }
 0x2b8   : > { %v8884_v23 = vmul.f32 %v2103_v38, %v1670_v0  ;;  %v1673_v38 = vadd.f32 %v8244_v44, %v8377_v10  ;;  %v6758_v44 = vld [vmem:[%s11396_s10 + $0x30] sm:$0xff] }
 0x2b9   : > { %6085 = vmatmul.msk.f32.gmra.mxu3 %vm1014_vm2, %v7459_v48  ;;  %2679 = vmatmul.bf16.gmra.mxu0 %v11887_v46 }
 0x2ba   : > { %11886 = vst [vmem:[#allocation33_spill] sm:$0xff] %v8884_v23  ;;  %2768 = vmatmul.bf16.gmra.mxu1 %v11887_v46  ;;  %3391 = vmatpush.bf16.msra.mxu0 %v6758_v44  ;;  %v11896_v44 = vld [vmem:[#allocation105_spill] sm:$0xff] }
 0x2bc   : > { %v1925_v42 = vpop.f32.mrf.mxu3 }
 0x2bd   : > { %v8894_v52 = vmul.f32 %v1925_v42, %v1444_v4  ;;  %v6806_v4 = vld [vmem:[%s11396_s10 + $0x130] sm:$0xff] }
 0x2be   : > { %v2016_v51 = vpop.f32.mrf.mxu0  ;;  %v11891_v42 = vld [vmem:[#allocation103_spill] sm:$0xff]  ;;  %3158 = vmatpush.bf16.msra.mxu3 %v6806_v4  ;;  %v11895_v4 = vld [vmem:[#allocation12_spill] sm:$0xff] }
 0x2bf   : > { %v8898_v0 = vmul.f32 %v2016_v51, %v1560_v22  ;;  %v2105_v14 = vpop.f32.mrf.mxu1  ;;  %v1447_v34 = vadd.f32 %v11891_v42, %v8396_v28 }
 0x2c0   : > { %v8900_v48 = vmul.f32 %v2105_v14, %v1673_v38  ;;  %v11892_v38 = vld [vmem:[#allocation104_spill] sm:$0xff] }
 0x2c1   : > { %6086 = vmatmul.msk.f32.gmra.mxu3 %vm1014_vm2, %v7476_v55  ;;  %v1563_v51 = vadd.f32 %v11892_v38, %v8400_v36  ;;  %v11898_v38 = vld [vmem:[#allocation107_spill] sm:$0xff] }
 0x2c2   : > { %11890 = vst [vmem:[#allocation86_spill] sm:$0xff] %v8900_v48 }
 0x2c4   : > { %v1927_v22 = vpop.f32.mrf.mxu3 }
 0x2c5   : > { %v8918_v14 = vmul.f32 %v1927_v22, %v1447_v34  ;;  %v1450_v34 = vadd.f32 %v11897_v16, %v8396_v28  ;;  %v8950_v16 = vpop.f32.mrf.mxu2 }
 0x2c6   : > { %v2019_v46 = vpop.f32.mrf.mxu0 }
 0x2c7   : > { %v8924_v48 = vmul.f32 %v2019_v46, %v1563_v51  ;;  %v2108_v55 = vpop.f32.mrf.mxu1  ;;  %v1566_v46 = vadd.f32 %v11898_v38, %v8400_v36  ;;  %v1569_v38 = vadd.f32 %v8240_v2, %v8400_v36  ;;  %v11903_v2 = vld [vmem:[#allocation109_spill] sm:$0xff] }
 0x2c8   : > { %v8928_v42 = vmul.f32 %v2108_v55, %v1676_v54  ;;  %v1679_v55 = vadd.f32 %v8278_v62, %v8377_v10  ;;  %v6793_v62 = vld [vmem:[%s11396_s10 + $0xc8] sm:$0xff] }
 0x2c9   : > { %11893 = vst [vmem:[#allocation31_spill] sm:$0xff] %v8924_v48  ;;  %6087 = vmatmul.msk.f32.gmra.mxu3 %vm1014_vm2, %v11895_v4  ;;  %2684 = vmatmul.bf16.gmra.mxu0 %v11896_v44  ;;  %v11975_v48 = vld [vmem:[#allocation79_spill] sm:$0xff] }
 0x2ca   : > { %11894 = vst [vmem:[#allocation88_spill] sm:$0xff] %v8928_v42  ;;  %2773 = vmatmul.bf16.gmra.mxu1 %v11896_v44  ;;  %3074 = vmatpush.bf16.msrb.mxu2 %v6793_v62  ;;  %v1456_v62 = vadd.f32 %v11903_v2, %v8396_v28 }
 0x2cc   : > { %v1930_v22 = vpop.f32.mrf.mxu3 }
 0x2cd   : > { %v8938_v51 = vmul.f32 %v1930_v22, %v1450_v34  ;;  %v1453_v22 = vadd.f32 %v8238_v6, %v8396_v28  ;;  %v11902_v6 = vld [vmem:[#allocation108_spill] sm:$0xff] }
 0x2ce   : > { %v2021_v54 = vpop.f32.mrf.mxu0 }
 0x2cf   : > { %v8942_v23 = vmul.f32 %v2021_v54, %v1566_v46  ;;  %v2110_v4 = vpop.f32.mrf.mxu1 }
 0x2d0   : > { %v8944_v31 = vmul.f32 %v2110_v4, %v1679_v55  ;;  %v1682_v55 = vadd.f32 %v8295_v56, %v8377_v10  ;;  %v8977_v56 = vpop.f32.mrf.mxu2 }
 0x2d1   : > { %6088 = vmatmul.msk.f32.gmra.mxu3 %vm1014_vm2, %v7516_v8 }
 0x2d2   : > { %11899 = vst [vmem:[#allocation91_spill] sm:$0xff] %v8944_v31 }
 0x2d4   : > { %v1932_v4 = vpop.f32.mrf.mxu3 }
 0x2d5   : > { %v8961_v46 = vmul.f32 %v1932_v4, %v1453_v22  ;;  %v11904_v4 = vld [vmem:[#allocation110_spill] sm:$0xff] }
 0x2d6   : > { %v2024_v54 = vpop.f32.mrf.mxu0 }
 0x2d7   : > { %v8967_v44 = vmul.f32 %v2024_v54, %v1569_v38  ;;  %v2113_v42 = vpop.f32.mrf.mxu1  ;;  %v1572_v38 = vadd.f32 %v11904_v4, %v8400_v36  ;;  %v1688_v4 = vadd.f32 %v8324_v1, %v8377_v10  ;;  %v11915_v1 = vld [vmem:[#allocation113_spill] sm:$0xff] }
 0x2d8   : > { %v8969_v31 = vmul.f32 %v2113_v42, %v1682_v55  ;;  %v1685_v42 = vadd.f32 %v8310_v9, %v8377_v10  ;;  %v6757_v9 = vld [vmem:[%s11396_s10 + $0x28] sm:$0xff]  ;;  %v9009_v2 = vpop.f32.mrf.mxu2 }
 0x2d9   : > { %11900 = vst [vmem:[#allocation92_spill] sm:$0xff] %v8967_v44  ;;  %6089 = vmatmul.msk.f32.gmra.mxu3 %vm1014_vm2, %v7533_v15  ;;  %2689 = vmatmul.bf16.gmra.mxu0 %v11902_v6 }
 0x2da   : > { %11901 = vst [vmem:[#allocation94_spill] sm:$0xff] %v8969_v31  ;;  %2778 = vmatmul.bf16.gmra.mxu1 %v11902_v6  ;;  %v11908_v6 = vld [vmem:[#allocation18_spill] sm:$0xff]  ;;  %3392 = vmatpush.bf16.msra.mxu0 %v6757_v9  ;;  %v11914_v9 = vld [vmem:[#allocation112_spill] sm:$0xff] }
 0x2dc   : > { %v1935_v22 = vpop.f32.mrf.mxu3 }
 0x2dd   : > { %v8981_v54 = vmul.f32 %v1935_v22, %v1456_v62  ;;  %v6805_v62 = vld [vmem:[%s11396_s10 + $0x128] sm:$0xff] }
 0x2de   : > { %v2026_v55 = vpop.f32.mrf.mxu0  ;;  %3159 = vmatpush.bf16.msra.mxu3 %v6805_v62  ;;  %v11913_v62 = vld [vmem:[#allocation20_spill] sm:$0xff] }
 0x2df   : > { %11905 = vst [vmem:[#allocation95_spill] sm:$0xff] %v8981_v54  ;;  %v8985_v34 = vmul.f32 %v2026_v55, %v1572_v38  ;;  %v2115_v15 = vpop.f32.mrf.mxu1  ;;  %v11909_v38 = vld [vmem:[#allocation111_spill] sm:$0xff] }
 0x2e0   : > { %v8987_v8 = vmul.f32 %v2115_v15, %v1685_v42  ;;  %v1459_v15 = vadd.f32 %v8261_v49, %v8396_v28  ;;  %v1575_v42 = vadd.f32 %v11909_v38, %v8400_v36  ;;  %v11916_v38 = vld [vmem:[#allocation114_spill] sm:$0xff] }
 0x2e1   : > { %11906 = vst [vmem:[#allocation97_spill] sm:$0xff] %v8985_v34  ;;  %6090 = vmatmul.msk.f32.gmra.mxu3 %vm1014_vm2, %v11908_v6  ;;  %v1578_v34 = vadd.f32 %v11916_v38, %v8400_v36 }
 0x2e2   : > { %11907 = vst [vmem:[#allocation98_spill] sm:$0xff] %v8987_v8 }
 0x2e4   : > { %v1937_v22 = vpop.f32.mrf.mxu3 }
 0x2e5   : > { %v9005_v55 = vmul.f32 %v1937_v22, %v1459_v15  ;;  %v1462_v15 = vadd.f32 %v11915_v1, %v8396_v28  ;;  %v1694_v1 = vadd.f32 %v8368_v37, %v8377_v10  ;;  %v11925_v37 = vld [vmem:[#allocation118_spill] sm:$0xff] }
 0x2e6   : > { %v2029_v31 = vpop.f32.mrf.mxu0 }
 0x2e7   : > { %11910 = vst [vmem:[#allocation99_spill] sm:$0xff] %v9005_v55  ;;  %v9013_v6 = vmul.f32 %v2029_v31, %v1575_v42  ;;  %v2118_v49 = vpop.f32.mrf.mxu1  ;;  %v1691_v31 = vadd.f32 %v8343_v43, %v8377_v10  ;;  %v6792_v43 = vld [vmem:[%s11396_s10 + $0xc0] sm:$0xff]  ;;  %v11972_v55 = vld [vmem:[#allocation71_spill] sm:$0xff] }
 0x2e8   : > { %v9015_v44 = vmul.f32 %v2118_v49, %v1688_v4  ;;  %3075 = vmatpush.bf16.msrb.mxu2 %v6792_v43 }
 0x2e9   : > { %11911 = vst [vmem:[#allocation101_spill] sm:$0xff] %v9013_v6  ;;  %6091 = vmatmul.msk.f32.gmra.mxu3 %vm1014_vm2, %v11913_v62  ;;  %2694 = vmatmul.bf16.gmra.mxu0 %v11914_v9  ;;  %v9031_v62 = vpop.f32.mrf.mxu2  ;;  %v11964_v6 = vld [vmem:[#allocation47_spill] sm:$0xff] }
 0x2ea   : > { %11912 = vst [vmem:[#allocation102_spill] sm:$0xff] %v9015_v44  ;;  %2783 = vmatmul.bf16.gmra.mxu1 %v11914_v9 }
 0x2ec   : > { %v1940_v22 = vpop.f32.mrf.mxu3 }
 0x2ed   : > { %v9025_v8 = vmul.f32 %v1940_v22, %v1462_v15 }
 0x2ee   : > { %v2031_v4 = vpop.f32.mrf.mxu0 }
 0x2ef   : > { %11917 = vst [vmem:[#allocation103_spill] sm:$0xff] %v9025_v8  ;;  %v9029_v42 = vmul.f32 %v2031_v4, %v1578_v34  ;;  %v2120_v49 = vpop.f32.mrf.mxu1  ;;  %v11920_v34 = vld [vmem:[#allocation115_spill] sm:$0xff]  ;;  %v11969_v8 = vld [vmem:[#allocation64_spill] sm:$0xff] }
 0x2f0   : > { %v9033_v54 = vmul.f32 %v2120_v49, %v1691_v31  ;;  %v1465_v22 = vadd.f32 %v11920_v34, %v8396_v28  ;;  %v11921_v31 = vld [vmem:[#allocation116_spill] sm:$0xff]  ;;  %v1468_v34 = vadd.f32 %v11925_v37, %v8396_v28  ;;  %v11932_v37 = vld [vmem:[#allocation133_spill] sm:$0xff] }
 0x2f1   : > { %11918 = vst [vmem:[#allocation104_spill] sm:$0xff] %v9029_v42  ;;  %6092 = vmatmul.msk.f32.gmra.mxu3 %vm1014_vm2, %v7590_v58  ;;  %v1581_v4 = vadd.f32 %v11921_v31, %v8400_v36  ;;  %v9061_v43 = vpop.f32.mrf.mxu2 }
 0x2f2   : > { %11919 = vst [vmem:[#allocation106_spill] sm:$0xff] %v9033_v54 }
 0x2f4   : > { %v1942_v38 = vpop.f32.mrf.mxu3 }
 0x2f5   : > { %v9048_v49 = vmul.f32 %v1942_v38, %v1465_v22  ;;  %v11926_v38 = vld [vmem:[#allocation119_spill] sm:$0xff] }
 0x2f6   : > { %v2034_v58 = vpop.f32.mrf.mxu0 }
 0x2f7   : > { %11922 = vst [vmem:[#allocation107_spill] sm:$0xff] %v9048_v49  ;;  %v9054_v44 = vmul.f32 %v2034_v58, %v1581_v4  ;;  %v2123_v54 = vpop.f32.mrf.mxu1  ;;  %v1584_v58 = vadd.f32 %v11926_v38, %v8400_v36 }
 0x2f8   : > { %v9056_v9 = vmul.f32 %v2123_v54, %v1694_v1  ;;  %v1697_v54 = vadd.f32 %v8390_v50, %v8377_v10  ;;  %v6756_v50 = vld [vmem:[%s11396_s10 + $0x20] sm:$0xff] }
 0x2f9   : > { %11923 = vst [vmem:[#allocation109_spill] sm:$0xff] %v9054_v44  ;;  %6093 = vmatmul.msk.f32.gmra.mxu3 %vm1014_vm2, %v7607_v5  ;;  %2699 = vmatmul.bf16.gmra.mxu0 %v8301_v25 }
 0x2fa   : > { %11924 = vst [vmem:[#allocation110_spill] sm:$0xff] %v9056_v9  ;;  %2788 = vmatmul.bf16.gmra.mxu1 %v8301_v25  ;;  %3393 = vmatpush.bf16.msra.mxu0 %v6756_v50  ;;  %v1700_v25 = vadd.f32 %v11932_v37, %v8377_v10  ;;  %v11937_v50 = vld [vmem:[#allocation122_spill] sm:$0xff] }
 0x2fc   : > { %v1945_v22 = vpop.f32.mrf.mxu3 }
 0x2fd   : > { %v9068_v31 = vmul.f32 %v1945_v22, %v1468_v34  ;;  %v6804_v34 = vld [vmem:[%s11396_s10 + $0x120] sm:$0xff]  ;;  %v9090_v22 = vpop.f32.mrf.mxu2 }
 0x2fe   : > { %v2036_v1 = vpop.f32.mrf.mxu0  ;;  %3160 = vmatpush.bf16.msra.mxu3 %v6804_v34  ;;  %v11936_v34 = vld [vmem:[#allocation121_spill] sm:$0xff] }
 0x2ff   : > { %11927 = vst [vmem:[#allocation111_spill] sm:$0xff] %v9068_v31  ;;  %v9072_v4 = vmul.f32 %v2036_v1, %v1584_v58  ;;  %v2125_v15 = vpop.f32.mrf.mxu1  ;;  %v11930_v58 = vld [vmem:[#allocation120_spill] sm:$0xff] }
 0x300   : > { %v9074_v5 = vmul.f32 %v2125_v15, %v1697_v54  ;;  %v1471_v15 = vadd.f32 %v8314_v59, %v8396_v28  ;;  %v1587_v54 = vadd.f32 %v11930_v58, %v8400_v36 }
 0x301   : > { %11928 = vst [vmem:[#allocation113_spill] sm:$0xff] %v9072_v4  ;;  %6094 = vmatmul.msk.f32.gmra.mxu3 %vm1014_vm2, %v7624_v27  ;;  %v11935_v4 = vld [vmem:[#allocation28_spill] sm:$0xff] }
 0x302   : > { %11929 = vst [vmem:[#allocation114_spill] sm:$0xff] %v9074_v5 }
 0x304   : > { %v1947_v38 = vpop.f32.mrf.mxu3 }
 0x305   : > { %v9094_v1 = vmul.f32 %v1947_v38, %v1471_v15  ;;  %v1474_v15 = vadd.f32 %v11937_v50, %v8396_v28  ;;  %v11938_v38 = vld [vmem:[#allocation123_spill] sm:$0xff]  ;;  %v1706_v50 = vadd.f32 %v8493_v53, %v8377_v10  ;;  %v6767_v53 = vld [vmem:[%s11396_s10 + $0x78] sm:$0xff] }
 0x306   : > { %v2039_v9 = vpop.f32.mrf.mxu0  ;;  %v1590_v58 = vadd.f32 %v11938_v38, %v8400_v36  ;;  %3479 = vmatpush.bf16.msra.mxu1 %v6767_v53 }
 0x307   : > { %11931 = vst [vmem:[#allocation115_spill] sm:$0xff] %v9094_v1  ;;  %v9100_v27 = vmul.f32 %v2039_v9, %v1587_v54  ;;  %v2128_v59 = vpop.f32.mrf.mxu1  ;;  %v11940_v9 = vld [vmem:[#allocation39_spill] sm:$0xff]  ;;  %v9116_v54 = vpop.f32.mrf.mxu2 }
 0x308   : > { %v9102_v44 = vmul.f32 %v2128_v59, %v1700_v25  ;;  %v1703_v25 = vadd.f32 %v11940_v9, %v8377_v10 }
 0x309   : > { %11933 = vst [vmem:[#allocation116_spill] sm:$0xff] %v9100_v27  ;;  %6095 = vmatmul.msk.f32.gmra.mxu3 %vm1014_vm2, %v11935_v4  ;;  %2704 = vmatmul.bf16.gmra.mxu0 %v11936_v34 }
 0x30a   : > { %11934 = vst [vmem:[#allocation118_spill] sm:$0xff] %v9102_v44  ;;  %2793 = vmatmul.bf16.gmra.mxu1 %v11936_v34  ;;  %v11943_v34 = vld [vmem:[#allocation30_spill] sm:$0xff] }
 0x30c   : > { %v1950_v37 = vpop.f32.mrf.mxu3 }
 0x30d   : > { %v9112_v5 = vmul.f32 %v1950_v37, %v1474_v15  ;;  %v11944_v37 = vld [vmem:[#allocation124_spill] sm:$0xff] }
 0x30e   : > { %v2041_v59 = vpop.f32.mrf.mxu0  ;;  %v1477_v38 = vadd.f32 %v11944_v37, %v8396_v28 }
 0x30f   : > { %11939 = vst [vmem:[#allocation119_spill] sm:$0xff] %v9112_v5  ;;  %v9118_v4 = vmul.f32 %v2041_v59, %v1590_v58  ;;  %v2130_v31 = vpop.f32.mrf.mxu1  ;;  %v6775_v58 = vld [vmem:[%s11396_s10 + $0xb8] sm:$0xff] }
 0x310   : > { %v9120_v1 = vmul.f32 %v2130_v31, %v1703_v25  ;;  %v11945_v31 = vld [vmem:[#allocation125_spill] sm:$0xff]  ;;  %3568 = vmatpush.bf16.msra.mxu2 %v6775_v58  ;;  %v11951_v58 = vld [vmem:[#allocation127_spill] sm:$0xff] }
 0x311   : > { %11941 = vst [vmem:[#allocation120_spill] sm:$0xff] %v9118_v4  ;;  %6096 = vmatmul.msk.f32.gmra.mxu3 %vm1014_vm2, %v11943_v34  ;;  %v1593_v25 = vadd.f32 %v11945_v31, %v8400_v36  ;;  %v11949_v4 = vld [vmem:[#allocation32_spill] sm:$0xff] }
 0x312   : > { %11942 = vst [vmem:[#allocation133_spill] sm:$0xff] %v9120_v1  ;;  %v9143_v1 = vpop.f32.mrf.mxu2  ;;  %v11952_v31 = vld [vmem:[#allocation128_spill] sm:$0xff] }
 0x314   : > { %v1952_v9 = vpop.f32.mrf.mxu3 }
 0x315   : > { %v9135_v59 = vmul.f32 %v1952_v9, %v1477_v38  ;;  %v11950_v38 = vld [vmem:[#allocation126_spill] sm:$0xff] }
 0x316   : > { %v2044_v34 = vpop.f32.mrf.mxu0 }
 0x317   : > { %11946 = vst [vmem:[#allocation122_spill] sm:$0xff] %v9135_v59  ;;  %v9141_v44 = vmul.f32 %v2044_v34, %v1593_v25  ;;  %v2133_v37 = vpop.f32.mrf.mxu1  ;;  %v1480_v34 = vadd.f32 %v11951_v58, %v8396_v28  ;;  %v11956_v58 = vld [vmem:[#allocation34_spill] sm:$0xff] }
 0x318   : > { %v9145_v27 = vmul.f32 %v2133_v37, %v1706_v50  ;;  %v1596_v50 = vadd.f32 %v11952_v31, %v8400_v36  ;;  %v1709_v37 = vadd.f32 %v8528_v11, %v8377_v10  ;;  %v6803_v11 = vld [vmem:[%s11396_s10 + $0x118] sm:$0xff]  ;;  %v2338_v31 = vld [vmem:[%s11392_s6 + $0x3] sm:$0x3]  ;;  %v11960_v59 = vld [vmem:[#allocation130_spill] sm:$0xff] }
 0x319   : > { %11947 = vst [vmem:[#allocation123_spill] sm:$0xff] %v9141_v44  ;;  %6097 = vmatmul.msk.f32.gmra.mxu3 %vm1014_vm2, %v11949_v4  ;;  %2709 = vmatmul.bf16.gmra.mxu0 %v11950_v38  ;;  %v11959_v36 = vld [vmem:[#allocation36_spill] sm:$0xff] }
 0x31a   : > { %11948 = vst [vmem:[#allocation39_spill] sm:$0xff] %v9145_v27  ;;  %2798 = vmatmul.bf16.gmra.mxu1 %v11950_v38  ;;  %v9170_v53 = vpop.f32.mrf.mxu2  ;;  %3161 = vmatpush.bf16.msra.mxu3 %v6803_v11 }
 0x31c   : > { %v1955_v9 = vpop.f32.mrf.mxu3 }
 0x31d   : > { %v9158_v25 = vmul.f32 %v1955_v9, %v1480_v34  ;;  %v11957_v34 = vld [vmem:[#allocation129_spill] sm:$0xff] }
 0x31e   : > { %v2046_v15 = vpop.f32.mrf.mxu0  ;;  %v1483_v10 = vadd.f32 %v11957_v34, %v8396_v28  ;;  %v9189_v34 = vperm.slane %v2338_v31, 0 }
 0x31f   : > { %11953 = vst [vmem:[#allocation124_spill] sm:$0xff] %v9158_v25  ;;  %v9162_v4 = vmul.f32 %v2046_v15, %v1596_v50  ;;  %v2135_v38 = vpop.f32.mrf.mxu1  ;;  %v6755_v15 = vld [vmem:[%s11396_s10 + $0x18] sm:$0xff]  ;;  %v11961_v25 = vld [vmem:[#allocation38_spill] sm:$0xff] }
 0x320   : > { %v9164_v5 = vmul.f32 %v2135_v38, %v1709_v37  ;;  %3394 = vmatpush.bf16.msra.mxu0 %v6755_v15  ;;  %v2365_v28 = vadd.f32 %v8594_v39, %v9189_v34 }
 0x321   : > { %11954 = vst [vmem:[#allocation125_spill] sm:$0xff] %v9162_v4  ;;  %6098 = vmatmul.msk.f32.gmra.mxu3 %vm1014_vm2, %v11956_v58 }
 0x322   : > { %11955 = vst [vmem:[#allocation127_spill] sm:$0xff] %v9164_v5  ;;  %v9197_v11 = vpop.f32.mrf.mxu2 }
 0x324   : > { %v1957_v38 = vpop.f32.mrf.mxu3 }
 0x325   : > { %v9182_v9 = vmul.f32 %v1957_v38, %v1483_v10  ;;  %v9194_v10 = vperm.slane %v2338_v31, 1  ;;  %v2362_v38 = vadd.f32 %v8561_v24, %v9189_v34  ;;  %v6774_v24 = vld [vmem:[%s11396_s10 + $0xb0] sm:$0xff] }
 0x326   : > { %v2675_v50 = vpop.f32.mrf.mxu0  ;;  %3569 = vmatpush.bf16.msra.mxu2 %v6774_v24 }
 0x327   : > { %11958 = vst [vmem:[#allocation128_spill] sm:$0xff] %v9182_v9  ;;  %v2764_v37 = vpop.f32.mrf.mxu1  ;;  %v2844_v58 = vmul.f32 %v2675_v50, %v2362_v38  ;;  %v2371_v38 = vadd.f32 %v8673_v26, %v9189_v34  ;;  %v6754_v26 = vld [vmem:[%s11396_s10 + $0x10] sm:$0xff] }
 0x328   : > { %3395 = vmatpush.bf16.msra.mxu0 %v6754_v26 }
 0x329   : > { %6099 = vmatmul.msk.f32.gmra.mxu3 %vm1014_vm2, %v11959_v36  ;;  %2714 = vmatmul.bf16.gmra.mxu0 %v11960_v59 }
 0x32a   : > { %2803 = vmatmul.bf16.gmra.mxu1 %v11960_v59 }
 0x32c   : > { %v2474_v15 = vpop.f32.mrf.mxu3 }
 0x32d   : > { %v2475_v27 = vadd.f32 %v2474_v15, %v9194_v10  ;;  %v9212_v15 = vpop.f32.mrf.mxu2 }
 0x32e   : > { %v2677_v5 = vpop.f32.mrf.mxu0 }
 0x32f   : > { %v9204_v36 = vmul.f32 %v2764_v37, %v2475_v27  ;;  %v2846_v44 = vmul.f32 %v2677_v5, %v2365_v28  ;;  %v2766_v31 = vpop.f32.mrf.mxu1  ;;  %v2368_v37 = vadd.f32 %v8634_v60, %v9189_v34  ;;  %v6802_v60 = vld [vmem:[%s11396_s10 + $0x110] sm:$0xff] }
 0x330   : > { %3162 = vmatpush.bf16.msra.mxu3 %v6802_v60 }
 0x331   : > { %v2908_v4 = vpack.c.bf16 %v2846_v44, %v2844_v58  ;;  %6100 = vmatmul.msk.f32.gmra.mxu3 %vm1014_vm2, %v11961_v25  ;;  %v11962_v58 = vld [vmem:[#allocation42_spill] sm:$0xff] }
 0x333   : > { %3076 = vmatmul.bf16.vlgmr.msrb.gmra.mxu2 %v2908_v4  ;;  %v11963_v4 = vld [vmem:[#allocation43_spill] sm:$0xff] }
 0x334   : > { %v2477_v59 = vpop.f32.mrf.mxu3 }
 0x335   : > { %v2478_v39 = vadd.f32 %v2477_v59, %v9194_v10  ;;  %v6766_v59 = vld [vmem:[%s11396_s10 + $0x70] sm:$0xff]  ;;  %v9232_v25 = vpop.f32.mrf.mxu2 }
 0x336   : > { %v2680_v50 = vpop.f32.mrf.mxu0  ;;  %3480 = vmatpush.bf16.msra.mxu1 %v6766_v59 }
 0x337   : > { %v9214_v27 = vmul.f32 %v2766_v31, %v2478_v39  ;;  %v2769_v5 = vpop.f32.mrf.mxu1  ;;  %v2848_v39 = vmul.f32 %v2680_v50, %v2368_v37 }
 0x339   : > { %6101 = vmatmul.msk.f32.gmra.mxu3 %vm1014_vm2, %v11962_v58  ;;  %2719 = vmatmul.bf16.gmra.mxu0 %v11963_v4 }
 0x33a   : > { %2808 = vmatmul.bf16.gmra.mxu1 %v11963_v4 }
 0x33c   : > { %v2480_v28 = vpop.f32.mrf.mxu3 }
 0x33d   : > { %v2481_v31 = vadd.f32 %v2480_v28, %v9194_v10 }
 0x33e   : > { %v2682_v24 = vpop.f32.mrf.mxu0 }
 0x33f   : > { %v9230_v44 = vmul.f32 %v2769_v5, %v2481_v31  ;;  %v2850_v58 = vmul.f32 %v2682_v24, %v2371_v38  ;;  %v2771_v4 = vpop.f32.mrf.mxu1  ;;  %v9250_v38 = vpop.f32.mrf.mxu2  ;;  %v2374_v24 = vadd.f32 %v8712_v21, %v9189_v34  ;;  %v6773_v21 = vld [vmem:[%s11396_s10 + $0xa8] sm:$0xff] }
 0x340   : > { %3570 = vmatpush.bf16.msra.mxu2 %v6773_v21 }
 0x341   : > { %v2910_v9 = vpack.c.bf16 %v2850_v58, %v2848_v39  ;;  %6102 = vmatmul.msk.f32.gmra.mxu3 %vm1014_vm2, %v11964_v6  ;;  %v11966_v6 = vld [vmem:[#allocation56_spill] sm:$0xff] }
 0x343   : > { %3081 = vmatmul.bf16.gmra.mxu2 %v2910_v9  ;;  %v11965_v9 = vld [vmem:[#allocation49_spill] sm:$0xff] }
 0x344   : > { %v2483_v50 = vpop.f32.mrf.mxu3 }
 0x345   : > { %v2484_v5 = vadd.f32 %v2483_v50, %v9194_v10 }
 0x346   : > { %v2685_v59 = vpop.f32.mrf.mxu0 }
 0x347   : > { %v9243_v28 = vmul.f32 %v2771_v4, %v2484_v5  ;;  %v2774_v58 = vpop.f32.mrf.mxu1  ;;  %v2377_v4 = vadd.f32 %v8756_v19, %v9189_v34  ;;  %v2852_v26 = vmul.f32 %v2685_v59, %v2374_v24 }
 0x349   : > { %6103 = vmatmul.msk.f32.gmra.mxu3 %vm1014_vm2, %v11789_v3  ;;  %2724 = vmatmul.bf16.gmra.mxu0 %v11965_v9 }
 0x34a   : > { %2813 = vmatmul.bf16.gmra.mxu1 %v11965_v9  ;;  %v9265_v9 = vpop.f32.mrf.mxu2 }
 0x34c   : > { %v2486_v31 = vpop.f32.mrf.mxu3 }
 0x34d   : > { %v2487_v39 = vadd.f32 %v2486_v31, %v9194_v10 }
 0x34e   : > { %v2687_v60 = vpop.f32.mrf.mxu0 }
 0x34f   : > { %v9258_v50 = vmul.f32 %v2774_v58, %v2487_v39  ;;  %v2854_v5 = vmul.f32 %v2687_v60, %v2377_v4  ;;  %v2776_v3 = vpop.f32.mrf.mxu1  ;;  %v11967_v4 = vld [vmem:[#allocation59_spill] sm:$0xff]  ;;  %v11968_v39 = vld [vmem:[#allocation50_spill] sm:$0xff] }
 0x350   : > { %v6765_v60 = vld [vmem:[%s11396_s10 + $0x68] sm:$0xff] }
 0x351   : > { %v2912_v37 = vpack.c.bf16 %v2854_v5, %v2852_v26  ;;  %6104 = vmatmul.msk.f32.gmra.mxu3 %vm1014_vm2, %v11966_v6  ;;  %3481 = vmatpush.bf16.msra.mxu1 %v6765_v60  ;;  %v2383_v5 = vadd.f32 %v8815_v45, %v9189_v34  ;;  %v6753_v45 = vld [vmem:[%s11396_s10 + $0x8] sm:$0xff] }
 0x352   : > { %3396 = vmatpush.bf16.msra.mxu0 %v6753_v45 }
 0x353   : > { %3086 = vmatmul.bf16.gmra.mxu2 %v2912_v37 }
 0x354   : > { %v2489_v19 = vpop.f32.mrf.mxu3 }
 0x355   : > { %v2490_v31 = vadd.f32 %v2489_v19, %v9194_v10  ;;  %v9284_v19 = vpop.f32.mrf.mxu2 }
 0x356   : > { %v2690_v59 = vpop.f32.mrf.mxu0 }
 0x357   : > { %v9268_v58 = vmul.f32 %v2776_v3, %v2490_v31  ;;  %v2779_v24 = vpop.f32.mrf.mxu1  ;;  %v2380_v3 = vadd.f32 %v8784_v63, %v9189_v34  ;;  %v6801_v63 = vld [vmem:[%s11396_s10 + $0x108] sm:$0xff] }
 0x358   : > { %3163 = vmatpush.bf16.msra.mxu3 %v6801_v63 }
 0x359   : > { %6105 = vmatmul.msk.f32.gmra.mxu3 %vm1014_vm2, %v11967_v4  ;;  %2729 = vmatmul.bf16.gmra.mxu0 %v11968_v39  ;;  %v2856_v37 = vmul.f32 %v2690_v59, %v2380_v3  ;;  %v11971_v3 = vld [vmem:[#allocation61_spill] sm:$0xff] }
 0x35a   : > { %2818 = vmatmul.bf16.gmra.mxu1 %v11968_v39 }
 0x35c   : > { %v2492_v26 = vpop.f32.mrf.mxu3 }
 0x35d   : > { %v2493_v21 = vadd.f32 %v2492_v26, %v9194_v10 }
 0x35e   : > { %v2692_v31 = vpop.f32.mrf.mxu0 }
 0x35f   : > { %v9286_v4 = vmul.f32 %v2779_v24, %v2493_v21  ;;  %v2858_v39 = vmul.f32 %v2692_v31, %v2383_v5  ;;  %v2781_v6 = vpop.f32.mrf.mxu1  ;;  %v2386_v31 = vadd.f32 %v8926_v41, %v9189_v34  ;;  %v6772_v41 = vld [vmem:[%s11396_s10 + $0xa0] sm:$0xff] }
 0x360   : > { %3571 = vmatpush.bf16.msra.mxu2 %v6772_v41  ;;  %v2392_v41 = vadd.f32 %v8977_v56, %v9189_v34  ;;  %v6761_v56 = vld [vmem:[%s11396_s10 + $0x48] sm:$0xff] }
 0x361   : > { %v2914_v42 = vpack.c.bf16 %v2858_v39, %v2856_v37  ;;  %6106 = vmatmul.msk.f32.gmra.mxu3 %vm1014_vm2, %v11969_v8  ;;  %v9299_v37 = vpop.f32.mrf.mxu2 }
 0x363   : > { %3091 = vmatmul.bf16.gmra.mxu2 %v2914_v42  ;;  %v11970_v42 = vld [vmem:[#allocation67_spill] sm:$0xff] }
 0x364   : > { %v2495_v60 = vpop.f32.mrf.mxu3 }
 0x365   : > { %v2496_v59 = vadd.f32 %v2495_v60, %v9194_v10 }
 0x366   : > { %v2695_v24 = vpop.f32.mrf.mxu0 }
 0x367   : > { %v9297_v26 = vmul.f32 %v2781_v6, %v2496_v59  ;;  %v2784_v39 = vpop.f32.mrf.mxu1  ;;  %v2389_v6 = vadd.f32 %v8950_v16, %v9189_v34  ;;  %v2860_v60 = vmul.f32 %v2695_v24, %v2386_v31  ;;  %v6764_v24 = vld [vmem:[%s11396_s10 + $0x60] sm:$0xff] }
 0x368   : > { %3482 = vmatpush.bf16.msra.mxu1 %v6764_v24  ;;  %v6762_v24 = vld [vmem:[%s11396_s10 + $0x50] sm:$0xff] }
 0x369   : > { %6107 = vmatmul.msk.f32.gmra.mxu3 %vm1014_vm2, %v11970_v42  ;;  %2734 = vmatmul.bf16.gmra.mxu0 %v11971_v3  ;;  %v9316_v5 = vpop.f32.mrf.mxu2 }
 0x36a   : > { %2823 = vmatmul.bf16.gmra.mxu1 %v11971_v3 }
 0x36c   : > { %v2498_v21 = vpop.f32.mrf.mxu3 }
 0x36d   : > { %v2499_v63 = vadd.f32 %v2498_v21, %v9194_v10 }
 0x36e   : > { %v2697_v45 = vpop.f32.mrf.mxu0 }
 0x36f   : > { %v9312_v59 = vmul.f32 %v2784_v39, %v2499_v63  ;;  %v2862_v42 = vmul.f32 %v2697_v45, %v2389_v6  ;;  %v2786_v8 = vpop.f32.mrf.mxu1  ;;  %v11973_v6 = vld [vmem:[#allocation76_spill] sm:$0xff] }
 0x370   : > { %v6763_v63 = vld [vmem:[%s11396_s10 + $0x58] sm:$0xff] }
 0x371   : > { %v2916_v49 = vpack.c.bf16 %v2862_v42, %v2860_v60  ;;  %6108 = vmatmul.msk.f32.gmra.mxu3 %vm1014_vm2, %v11972_v55  ;;  %3483 = vmatpush.bf16.msra.mxu1 %v6763_v63  ;;  %v9336_v60 = vpop.f32.mrf.mxu2 }
 0x373   : > { %3096 = vmatmul.bf16.gmra.mxu2 %v2916_v49  ;;  %v11974_v49 = vld [vmem:[#allocation69_spill] sm:$0xff] }
 0x374   : > { %v2501_v16 = vpop.f32.mrf.mxu3 }
 0x375   : > { %v2502_v21 = vadd.f32 %v2501_v16, %v9194_v10  ;;  %v2395_v16 = vadd.f32 %v9009_v2, %v9189_v34  ;;  %3484 = vmatpush.bf16.msra.mxu1 %v6762_v24  ;;  %v6800_v2 = vld [vmem:[%s11396_s10 + $0x100] sm:$0xff] }
 0x376   : > { %v2700_v39 = vpop.f32.mrf.mxu0  ;;  %3164 = vmatpush.bf16.msra.mxu3 %v6800_v2 }
 0x377   : > { %v9325_v42 = vmul.f32 %v2786_v8, %v2502_v21  ;;  %v2789_v31 = vpop.f32.mrf.mxu1  ;;  %v2864_v45 = vmul.f32 %v2700_v39, %v2392_v41  ;;  %v6752_v39 = vld [vmem:[%s11396_s10] sm:$0xff] }
 0x378   : > { %3397 = vmatpush.bf16.msra.mxu0 %v6752_v39 }
 0x379   : > { %6109 = vmatmul.msk.f32.gmra.mxu3 %vm1014_vm2, %v11973_v6  ;;  %2739 = vmatmul.bf16.gmra.mxu0 %v11974_v49 }
 0x37a   : > { %2828 = vmatmul.bf16.gmra.mxu1 %v11974_v49 }
 0x37b   : > { %3485 = vmatpush.bf16.msra.mxu1 %v6761_v56 }
 0x37c   : > { %v2504_v8 = vpop.f32.mrf.mxu3 }
 0x37d   : > { %v2505_v21 = vadd.f32 %v2504_v8, %v9194_v10  ;;  %v9363_v8 = vpop.f32.mrf.mxu2 }
 0x37e   : > { %v2702_v6 = vpop.f32.mrf.mxu0 }
 0x37f   : > { %v9346_v55 = vmul.f32 %v2789_v31, %v2505_v21  ;;  %v2866_v63 = vmul.f32 %v2702_v6, %v2395_v16  ;;  %v2791_v49 = vpop.f32.mrf.mxu1 }
 0x381   : > { %v2918_v3 = vpack.c.bf16 %v2866_v63, %v2864_v45  ;;  %6110 = vmatmul.msk.f32.gmra.mxu3 %vm1014_vm2, %v11975_v48  ;;  %v6760_v45 = vld [vmem:[%s11396_s10 + $0x40] sm:$0xff]  ;;  %v2398_v63 = vadd.f32 %v9031_v62, %v9189_v34  ;;  %v6771_v62 = vld [vmem:[%s11396_s10 + $0x98] sm:$0xff] }
 0x382   : > { %3486 = vmatpush.bf16.msra.mxu1 %v6760_v45  ;;  %3572 = vmatpush.bf16.msra.mxu2 %v6771_v62 }
 0x383   : > { %3101 = vmatmul.bf16.gmra.mxu2 %v2918_v3 }
 0x384   : > { %v2507_v31 = vpop.f32.mrf.mxu3 }
 0x385   : > { %v2508_v6 = vadd.f32 %v2507_v31, %v9194_v10 }
 0x386   : > { %v2705_v3 = vpop.f32.mrf.mxu0 }
 0x387   : > { %v9365_v41 = vmul.f32 %v2791_v49, %v2508_v6  ;;  %v2794_v16 = vpop.f32.mrf.mxu1  ;;  %v2401_v49 = vadd.f32 %v9061_v43, %v9189_v34  ;;  %v2868_v39 = vmul.f32 %v2705_v3, %v2398_v63 }
 0x389   : > { %6111 = vmatmul.msk.f32.gmra.mxu3 %vm1014_vm2, %v11855_v17  ;;  %2744 = vmatmul.bf16.gmra.mxu0 %v8746_v18  ;;  %v9380_v17 = vpop.f32.mrf.mxu2 }
 0x38a   : > { %2833 = vmatmul.bf16.gmra.mxu1 %v8746_v18 }
 0x38c   : > { %v2510_v24 = vpop.f32.mrf.mxu3 }
 0x38d   : > { %v2511_v56 = vadd.f32 %v2510_v24, %v9194_v10 }
 0x38e   : > { %v2707_v2 = vpop.f32.mrf.mxu0 }
 0x38f   : > { %v9378_v31 = vmul.f32 %v2794_v16, %v2511_v56  ;;  %v2870_v6 = vmul.f32 %v2707_v2, %v2401_v49  ;;  %v2796_v45 = vpop.f32.mrf.mxu1  ;;  %v2404_v2 = vadd.f32 %v9090_v22, %v9189_v34  ;;  %v3663_v22 = vld [vmem:[%s11391_s5 + $0x100] sm:$0xff] }
 0x390   : > { %3683 = vmatpush.msrb.mxu3 %v3663_v22  ;;  %v11981_v22 = vld [vmem:[#allocation37_spill] sm:$0xff] }
 0x391   : > { %v2920_v21 = vpack.c.bf16 %v2870_v6, %v2868_v39  ;;  %6112 = vmatmul.msk.f32.gmra.mxu3 %vm1014_vm2, %v8110_v30  ;;  %v9395_v49 = vpop.f32.mrf.mxu2  ;;  %v2407_v39 = vadd.f32 %v9116_v54, %v9189_v34  ;;  %v3664_v54 = vld [vmem:[%s11391_s5 + $0x108] sm:$0xff] }
 0x392   : > { %3796 = vmatpush.msrb.mxu0 %v3664_v54 }
 0x393   : > { %3106 = vmatmul.bf16.gmra.mxu2 %v2920_v21 }
 0x394   : > { %v2513_v43 = vpop.f32.mrf.mxu3 }
 0x395   : > { %v2514_v24 = vadd.f32 %v2513_v43, %v9194_v10 }
 0x396   : > { %v2710_v3 = vpop.f32.mrf.mxu0 }
 0x397   : > { %v9388_v16 = vmul.f32 %v2796_v45, %v2514_v24  ;;  %v2799_v63 = vpop.f32.mrf.mxu1  ;;  %v2872_v62 = vmul.f32 %v2710_v3, %v2404_v2 }
 0x399   : > { %6113 = vmatmul.msk.f32.gmra.mxu3 %vm1014_vm2, %v11869_v40  ;;  %2749 = vmatmul.bf16.gmra.mxu0 %v8796_v61 }
 0x39a   : > { %2838 = vmatmul.bf16.gmra.mxu1 %v8796_v61  ;;  %v11980_v61 = vld [vmem:[#allocation132_spill] sm:$0xff] }
 0x39b   : > { %v11982_v54 = vpack.c.bf16 %v11980_v61, %v11981_v22  ;;  %v6770_v61 = vld [vmem:[%s11396_s10 + $0x90] sm:$0xff] }
 0x39c   : > { %v2516_v56 = vpop.f32.mrf.mxu3  ;;  %3573 = vmatpush.bf16.msra.mxu2 %v6770_v61 }
 0x39d   : > { %v2517_v6 = vadd.f32 %v2516_v56, %v9194_v10  ;;  %v9413_v56 = vpop.f32.mrf.mxu2 }
 0x39e   : > { %v2712_v45 = vpop.f32.mrf.mxu0 }
 0x39f   : > { %v9403_v43 = vmul.f32 %v2799_v63, %v2517_v6  ;;  %v2874_v24 = vmul.f32 %v2712_v45, %v2407_v39  ;;  %v2801_v40 = vpop.f32.mrf.mxu1  ;;  %v11977_v45 = vld [vmem:[#allocation40_spill] sm:$0xff] }
 0x3a1   : > { %v2922_v21 = vpack.c.bf16 %v2874_v24, %v2872_v62  ;;  %6114 = vmatmul.msk.f32.gmra.mxu3 %vm1014_vm2, %v11875_v47  ;;  %v11978_v62 = vld [vmem:[#allocation35_spill] sm:$0xff] }
 0x3a2   : > { %v11979_v24 = vpack.c.bf16 %v11977_v45, %v11978_v62 }
 0x3a3   : > { %3111 = vmatmul.bf16.gmra.mxu2 %v2922_v21  ;;  %v11976_v21 = vpack.c.bf16 %v9214_v27, %v9204_v36 }
 0x3a4   : > { %v2519_v3 = vpop.f32.mrf.mxu3 }
 0x3a5   : > { %v2520_v63 = vadd.f32 %v2519_v3, %v9194_v10  ;;  %v9434_v27 = vpop.f32.mrf.mxu2 }
 0x3a6   : > { %v2715_v2 = vpop.f32.mrf.mxu0 }
 0x3a7   : > { %v9416_v39 = vmul.f32 %v2801_v40, %v2520_v63  ;;  %v2804_v6 = vpop.f32.mrf.mxu1  ;;  %v2410_v40 = vadd.f32 %v9143_v1, %v9189_v34  ;;  %v2413_v63 = vadd.f32 %v9170_v53, %v9189_v34 }
 0x3a9   : > { %3165 = vmatmul.bf16.vlgmr.msra.gmra.mxu3 %v11976_v21  ;;  %3398 = vmatmul.bf16.vlgmr.msra.gmra.mxu0 %v11979_v24  ;;  %v2876_v45 = vmul.f32 %v2715_v2, %v2410_v40  ;;  %v11984_v40 = vld [vmem:[#allocation46_spill] sm:$0xff] }
 0x3aa   : > { %3487 = vmatmul.bf16.vlgmr.msra.gmra.mxu1 %v11982_v54 }
 0x3ac   : > { %v2522_v3 = vpop.f32.mrf.mxu3 }
 0x3ad   : > { %v2523_v36 = vadd.f32 %v2522_v3, %v9194_v10 }
 0x3ae   : > { %v2717_v21 = vpop.f32.mrf.mxu0 }
 0x3af   : > { %v9436_v62 = vmul.f32 %v2804_v6, %v2523_v36  ;;  %v2878_v24 = vmul.f32 %v2717_v21, %v2413_v63  ;;  %v2806_v47 = vpop.f32.mrf.mxu1  ;;  %v11983_v6 = vpack.c.bf16 %v9243_v28, %v9230_v44  ;;  %v11987_v21 = vld [vmem:[#allocation44_spill] sm:$0xff] }
 0x3b1   : > { %v2924_v30 = vpack.c.bf16 %v2878_v24, %v2876_v45  ;;  %v11988_v45 = vld [vmem:[#allocation45_spill] sm:$0xff] }
 0x3b2   : > { %v11989_v24 = vpack.c.bf16 %v11987_v21, %v11988_v45 }
 0x3b3   : > { %3116 = vmatmul.bf16.gmra.mxu2 %v2924_v30  ;;  %v11985_v30 = vld [vmem:[#allocation7_spill] sm:$0xff] }
 0x3b4   : > { %v2525_v1 = vpop.f32.mrf.mxu3  ;;  %v11986_v63 = vpack.c.bf16 %v11984_v40, %v11985_v30 }
 0x3b5   : > { %v2526_v22 = vadd.f32 %v2525_v1, %v9194_v10  ;;  %v2419_v1 = vadd.f32 %v9212_v15, %v9189_v34 }
 0x3b6   : > { %v2720_v53 = vpop.f32.mrf.mxu0  ;;  %v9442_v54 = vpop.f32.mrf.mxu2 }
 0x3b7   : > { %v9444_v3 = vmul.f32 %v2806_v47, %v2526_v22  ;;  %v2809_v2 = vpop.f32.mrf.mxu1  ;;  %v2416_v47 = vadd.f32 %v9197_v11, %v9189_v34 }
 0x3b9   : > { %3170 = vmatmul.bf16.gmra.mxu3 %v11983_v6  ;;  %3403 = vmatmul.bf16.gmra.mxu0 %v11986_v63  ;;  %v2880_v6 = vmul.f32 %v2720_v53, %v2416_v47  ;;  %v11991_v53 = vld [vmem:[#allocation53_spill] sm:$0xff] }
 0x3ba   : > { %3492 = vmatmul.bf16.gmra.mxu1 %v11989_v24 }
 0x3bc   : > { %v2528_v61 = vpop.f32.mrf.mxu3 }
 0x3bd   : > { %v2529_v44 = vadd.f32 %v2528_v61, %v9194_v10  ;;  %v11990_v61 = vpack.c.bf16 %v9268_v58, %v9258_v50 }
 0x3be   : > { %v2722_v28 = vpop.f32.mrf.mxu0  ;;  %v9462_v22 = vpop.f32.mrf.mxu2 }
 0x3bf   : > { %v9464_v40 = vmul.f32 %v2809_v2, %v2529_v44  ;;  %v2882_v30 = vmul.f32 %v2722_v28, %v2419_v1  ;;  %v2811_v63 = vpop.f32.mrf.mxu1  ;;  %v11992_v2 = vld [vmem:[#allocation13_spill] sm:$0xff]  ;;  %v11994_v1 = vld [vmem:[#allocation11_spill] sm:$0xff]  ;;  %v11995_v44 = vld [vmem:[#allocation48_spill] sm:$0xff] }
 0x3c0   : > { %v11993_v47 = vpack.c.bf16 %v11991_v53, %v11992_v2  ;;  %v11996_v28 = vpack.c.bf16 %v11994_v1, %v11995_v44  ;;  %v6769_v1 = vld [vmem:[%s11396_s10 + $0x88] sm:$0xff] }
 0x3c1   : > { %v2926_v36 = vpack.c.bf16 %v2882_v30, %v2880_v6  ;;  %v2422_v30 = vadd.f32 %v9232_v25, %v9189_v34  ;;  %3574 = vmatpush.bf16.msra.mxu2 %v6769_v1 }
 0x3c3   : > { %3121 = vmatmul.bf16.gmra.mxu2 %v2926_v36 }
 0x3c4   : > { %v2531_v21 = vpop.f32.mrf.mxu3 }
 0x3c5   : > { %v2532_v45 = vadd.f32 %v2531_v21, %v9194_v10 }
 0x3c6   : > { %v2725_v24 = vpop.f32.mrf.mxu0  ;;  %v9467_v11 = vpop.f32.mrf.mxu2 }
 0x3c7   : > { %v9469_v18 = vmul.f32 %v2811_v63, %v2532_v45  ;;  %v2814_v15 = vpop.f32.mrf.mxu1  ;;  %v2425_v63 = vadd.f32 %v9250_v38, %v9189_v34  ;;  %v2884_v45 = vmul.f32 %v2725_v24, %v2422_v30  ;;  %v11998_v30 = vld [vmem:[#allocation62_spill] sm:$0xff] }
 0x3c9   : > { %3175 = vmatmul.bf16.gmra.mxu3 %v11990_v61  ;;  %3408 = vmatmul.bf16.gmra.mxu0 %v11993_v47  ;;  %v2927_v36 = vpack.c.bf16 %v9469_v18, %v9464_v40 }
 0x3ca   : > { %3497 = vmatmul.bf16.gmra.mxu1 %v11996_v28 }
 0x3cc   : > { %v2534_v6 = vpop.f32.mrf.mxu3 }
 0x3cd   : > { %v2535_v50 = vadd.f32 %v2534_v6, %v9194_v10 }
 0x3ce   : > { %v2727_v58 = vpop.f32.mrf.mxu0  ;;  %v9487_v21 = vpop.f32.mrf.mxu2 }
 0x3cf   : > { %v9489_v61 = vmul.f32 %v2814_v15, %v2535_v50  ;;  %v2886_v53 = vmul.f32 %v2727_v58, %v2425_v63  ;;  %v2816_v2 = vpop.f32.mrf.mxu1  ;;  %v11997_v15 = vpack.c.bf16 %v9297_v26, %v9286_v4  ;;  %v11999_v63 = vld [vmem:[#allocation60_spill] sm:$0xff] }
 0x3d0   : > { %v12000_v50 = vpack.c.bf16 %v11998_v30, %v11999_v63 }
 0x3d1   : > { %v2928_v47 = vpack.c.bf16 %v2886_v53, %v2884_v45  ;;  %v12001_v45 = vld [vmem:[#allocation57_spill] sm:$0xff] }
 0x3d2   : > { %v12002_v53 = vld [vmem:[#allocation17_spill] sm:$0xff] }
 0x3d3   : > { %3126 = vmatmul.bf16.gmra.mxu2 %v2928_v47  ;;  %v12003_v47 = vpack.c.bf16 %v12001_v45, %v12002_v53  ;;  %v3661_v45 = vld [vmem:[%s11391_s5 + $0xb8] sm:$0xff] }
 0x3d4   : > { %v2537_v25 = vpop.f32.mrf.mxu3  ;;  %3684 = vmatpush.msrb.mxu3 %v3661_v45 }
 0x3d5   : > { %v2538_v44 = vadd.f32 %v2537_v25, %v9194_v10  ;;  %v2431_v25 = vadd.f32 %v9284_v19, %v9189_v34 }
 0x3d6   : > { %v2730_v38 = vpop.f32.mrf.mxu0  ;;  %v9495_v28 = vpop.f32.mrf.mxu2 }
 0x3d7   : > { %v9497_v6 = vmul.f32 %v2816_v2, %v2538_v44  ;;  %v2819_v24 = vpop.f32.mrf.mxu1  ;;  %v2428_v2 = vadd.f32 %v9265_v9, %v9189_v34  ;;  %v3662_v9 = vld [vmem:[%s11391_s5 + $0xc0] sm:$0xff] }
 0x3d8   : > { %3797 = vmatpush.msrb.mxu0 %v3662_v9 }
 0x3d9   : > { %3180 = vmatmul.bf16.gmra.mxu3 %v11997_v15  ;;  %3413 = vmatmul.bf16.gmra.mxu0 %v12000_v50  ;;  %v2888_v15 = vmul.f32 %v2730_v38, %v2428_v2  ;;  %v12005_v2 = vld [vmem:[#allocation66_spill] sm:$0xff] }
 0x3da   : > { %3502 = vmatmul.bf16.gmra.mxu1 %v12003_v47 }
 0x3dc   : > { %v2540_v1 = vpop.f32.mrf.mxu3 }
 0x3dd   : > { %v2541_v4 = vadd.f32 %v2540_v1, %v9194_v10 }
 0x3de   : > { %v2732_v26 = vpop.f32.mrf.mxu0  ;;  %v9515_v44 = vpop.f32.mrf.mxu2 }
 0x3df   : > { %v9517_v30 = vmul.f32 %v2819_v24, %v2541_v4  ;;  %v2890_v63 = vmul.f32 %v2732_v26, %v2431_v25  ;;  %v2821_v50 = vpop.f32.mrf.mxu1  ;;  %v12006_v25 = vld [vmem:[#allocation21_spill] sm:$0xff] }
 0x3e0   : > { %v12007_v4 = vpack.c.bf16 %v12005_v2, %v12006_v25 }
 0x3e1   : > { %v2930_v58 = vpack.c.bf16 %v2890_v63, %v2888_v15  ;;  %v12008_v15 = vld [vmem:[#allocation65_spill] sm:$0xff]  ;;  %v12009_v63 = vld [vmem:[#allocation58_spill] sm:$0xff] }
 0x3e2   : > { %v12010_v45 = vpack.c.bf16 %v12008_v15, %v12009_v63  ;;  %v6768_v15 = vld [vmem:[%s11396_s10 + $0x80] sm:$0xff] }
 0x3e3   : > { %3131 = vmatmul.bf16.gmra.mxu2 %v2930_v58  ;;  %v12004_v58 = vpack.c.bf16 %v9325_v42, %v9312_v59 }
 0x3e4   : > { %v2543_v19 = vpop.f32.mrf.mxu3  ;;  %3575 = vmatpush.bf16.msra.mxu2 %v6768_v15 }
 0x3e5   : > { %v2544_v53 = vadd.f32 %v2543_v19, %v9194_v10  ;;  %v2437_v19 = vadd.f32 %v9316_v5, %v9189_v34 }
 0x3e6   : > { %v2735_v38 = vpop.f32.mrf.mxu0  ;;  %v9526_v24 = vpop.f32.mrf.mxu2 }
 0x3e7   : > { %v9528_v47 = vmul.f32 %v2821_v50, %v2544_v53  ;;  %v2824_v1 = vpop.f32.mrf.mxu1  ;;  %v2434_v50 = vadd.f32 %v9299_v37, %v9189_v34 }
 0x3e9   : > { %3185 = vmatmul.bf16.gmra.mxu3 %v12004_v58  ;;  %3418 = vmatmul.bf16.gmra.mxu0 %v12007_v4  ;;  %v2892_v58 = vmul.f32 %v2735_v38, %v2434_v50 }
 0x3ea   : > { %3507 = vmatmul.bf16.gmra.mxu1 %v12010_v45 }
 0x3ec   : > { %v2546_v9 = vpop.f32.mrf.mxu3 }
 0x3ed   : > { %v2547_v59 = vadd.f32 %v2546_v9, %v9194_v10 }
 0x3ee   : > { %v2737_v42 = vpop.f32.mrf.mxu0  ;;  %v9546_v53 = vpop.f32.mrf.mxu2 }
 0x3ef   : > { %v9548_v2 = vmul.f32 %v2824_v1, %v2547_v59  ;;  %v2894_v25 = vmul.f32 %v2737_v42, %v2437_v19  ;;  %v2826_v4 = vpop.f32.mrf.mxu1  ;;  %v12011_v1 = vpack.c.bf16 %v9365_v41, %v9346_v55  ;;  %v12013_v19 = vld [vmem:[#allocation74_spill] sm:$0xff]  ;;  %v12014_v59 = vld [vmem:[#allocation68_spill] sm:$0xff] }
 0x3f0   : > { %v12015_v42 = vpack.c.bf16 %v12013_v19, %v12014_v59 }
 0x3f1   : > { %v2932_v26 = vpack.c.bf16 %v2894_v25, %v2892_v58  ;;  %v2440_v25 = vadd.f32 %v9336_v60, %v9189_v34 }
 0x3f3   : > { %3136 = vmatmul.bf16.gmra.mxu2 %v2932_v26  ;;  %v12012_v26 = vpack.c.bf16 %v8740_v35, %v8704_v20 }
 0x3f4   : > { %v2549_v37 = vpop.f32.mrf.mxu3 }
 0x3f5   : > { %v2550_v63 = vadd.f32 %v2549_v37, %v9194_v10 }
 0x3f6   : > { %v2740_v5 = vpop.f32.mrf.mxu0  ;;  %v9554_v45 = vpop.f32.mrf.mxu2 }
 0x3f7   : > { %v9556_v9 = vmul.f32 %v2826_v4, %v2550_v63  ;;  %v2829_v38 = vpop.f32.mrf.mxu1  ;;  %v2443_v4 = vadd.f32 %v9363_v8, %v9189_v34  ;;  %v2896_v20 = vmul.f32 %v2740_v5, %v2440_v25  ;;  %v12017_v5 = vld [vmem:[#allocation81_spill] sm:$0xff] }
 0x3f9   : > { %3190 = vmatmul.bf16.gmra.mxu3 %v12011_v1  ;;  %3423 = vmatmul.bf16.gmra.mxu0 %v12012_v26  ;;  %v2933_v50 = vpack.c.bf16 %v9556_v9, %v9548_v2  ;;  %v12062_v9 = vld [vmem:[#allocation19_spill] sm:$0xff] }
 0x3fa   : > { %3512 = vmatmul.bf16.gmra.mxu1 %v12015_v42 }
 0x3fc   : > { %v2552_v58 = vpop.f32.mrf.mxu3 }
 0x3fd   : > { %v2553_v55 = vadd.f32 %v2552_v58, %v9194_v10  ;;  %v12016_v58 = vpack.c.bf16 %v9388_v16, %v9378_v31 }
 0x3fe   : > { %v2742_v41 = vpop.f32.mrf.mxu0  ;;  %v9574_v15 = vpop.f32.mrf.mxu2 }
 0x3ff   : > { %v9576_v35 = vmul.f32 %v2829_v38, %v2553_v55  ;;  %v2898_v37 = vmul.f32 %v2742_v41, %v2443_v4  ;;  %v2831_v63 = vpop.f32.mrf.mxu1  ;;  %v12018_v38 = vld [vmem:[#allocation23_spill] sm:$0xff]  ;;  %v12021_v41 = vld [vmem:[#allocation25_spill] sm:$0xff] }
 0x400   : > { %v12019_v25 = vpack.c.bf16 %v12017_v5, %v12018_v38  ;;  %v12020_v55 = vld [vmem:[#allocation75_spill] sm:$0xff] }
 0x401   : > { %v2934_v1 = vpack.c.bf16 %v2898_v37, %v2896_v20  ;;  %v12022_v20 = vpack.c.bf16 %v12020_v55, %v12021_v41  ;;  %v6822_v55 = vld [vmem:[%s11395_s9 + $0x210] sm:$0xf] }
 0x403   : > { %3141 = vmatmul.bf16.gmra.mxu2 %v2934_v1  ;;  %v2449_v1 = vadd.f32 %v9395_v49, %v9189_v34 }
 0x404   : > { %v2555_v26 = vpop.f32.mrf.mxu3 }
 0x405   : > { %v2556_v19 = vadd.f32 %v2555_v26, %v9194_v10 }
 0x406   : > { %v2745_v59 = vpop.f32.mrf.mxu0  ;;  %v9579_v60 = vpop.f32.mrf.mxu2 }
 0x407   : > { %v9581_v42 = vmul.f32 %v2831_v63, %v2556_v19  ;;  %v2834_v8 = vpop.f32.mrf.mxu1  ;;  %v2446_v63 = vadd.f32 %v9380_v17, %v9189_v34  ;;  %v6463_v17 = vld [vmem:[%s11395_s9 + $0x230] sm:$0xf0] }
 0x408   : > { %v6466_v41 = vor.u32 %v6822_v55, %v6463_v17 }
 0x409   : > { %3195 = vmatmul.bf16.gmra.mxu3 %v12016_v58  ;;  %3428 = vmatmul.bf16.gmra.mxu0 %v12019_v25  ;;  %v2935_v4 = vpack.c.bf16 %v9581_v42, %v9576_v35  ;;  %v2900_v19 = vmul.f32 %v2745_v59, %v2446_v63  ;;  %v6813_v35 = vld [vmem:[%s11395_s9 + $0xc4] sm:$0xf0] }
 0x40a   : > { %3517 = vmatmul.bf16.gmra.mxu1 %v12022_v20  ;;  %4082 = vmatpush.bf16.msrb.mxu2 %v6466_v41 }
 0x40c   : > { %v2558_v37 = vpop.f32.mrf.mxu3 }
 0x40d   : > { %v2559_v31 = vadd.f32 %v2558_v37, %v9194_v10 }
 0x40e   : > { %v2747_v16 = vpop.f32.mrf.mxu0  ;;  %v9599_v26 = vpop.f32.mrf.mxu2 }
 0x40f   : > { %v9601_v58 = vmul.f32 %v2834_v8, %v2559_v31  ;;  %v2902_v5 = vmul.f32 %v2747_v16, %v2449_v1  ;;  %v2836_v38 = vpop.f32.mrf.mxu1  ;;  %v12023_v1 = vpack.c.bf16 %v9416_v39, %v9403_v43  ;;  %v12024_v31 = vpack.c.bf16 %v8837_v12, %v8811_v29  ;;  %v6823_v43 = vld [vmem:[%s11395_s9 + $0x22c] sm:$0xf0] }
 0x410   : > { %v2452_v29 = vadd.f32 %v9413_v56, %v9189_v34  ;;  %v2455_v12 = vadd.f32 %v9434_v27, %v9189_v34  ;;  %v3659_v56 = vld [vmem:[%s11391_s5 + $0x70] sm:$0xff]  ;;  %v3660_v34 = vld [vmem:[%s11391_s5 + $0x78] sm:$0xff] }
 0x411   : > { %v2936_v25 = vpack.c.bf16 %v2902_v5, %v2900_v19  ;;  %v12025_v19 = vld [vmem:[#allocation27_spill] sm:$0xff]  ;;  %v12026_v5 = vld [vmem:[#allocation29_spill] sm:$0xff]  ;;  %3685 = vmatpush.msrb.mxu3 %v3659_v56  ;;  %3798 = vmatpush.msrb.mxu0 %v3660_v34 }
 0x413   : > { %3146 = vmatmul.bf16.gmra.mxu2 %v2936_v25  ;;  %v12027_v25 = vpack.c.bf16 %v12025_v19, %v12026_v5 }
 0x414   : > { %v2561_v49 = vpop.f32.mrf.mxu3 }
 0x415   : > { %v2562_v20 = vadd.f32 %v2561_v49, %v9194_v10 }
 0x416   : > { %v2750_v37 = vpop.f32.mrf.mxu0  ;;  %v9610_v59 = vpop.f32.mrf.mxu2 }
 0x417   : > { %v9612_v8 = vmul.f32 %v2836_v38, %v2562_v20  ;;  %v2839_v63 = vpop.f32.mrf.mxu1  ;;  %v6461_v38 = vld [vmem:[%s11395_s9 + $0x20c] sm:$0xf]  ;;  %v2904_v20 = vmul.f32 %v2750_v37, %v2452_v29 }
 0x418   : > { %v6462_v39 = vor.u32 %v6823_v43, %v6461_v38 }
 0x419   : > { %3200 = vmatmul.bf16.gmra.mxu3 %v12023_v1  ;;  %3433 = vmatmul.bf16.gmra.mxu0 %v12024_v31  ;;  %v2937_v16 = vpack.c.bf16 %v9612_v8, %v9601_v58  ;;  %v12080_v8 = vld [vmem:[#allocation78_spill] sm:$0xff] }
 0x41a   : > { %3522 = vmatmul.bf16.gmra.mxu1 %v12027_v25 }
 0x41b   : > { %3993 = vmatpush.bf16.msrb.mxu1 %v6462_v39  ;;  %v12028_v39 = vpack.c.bf16 %v9444_v3, %v9436_v62 }
 0x41c   : > { %v2564_v55 = vpop.f32.mrf.mxu3 }
 0x41d   : > { %v2565_v17 = vadd.f32 %v2564_v55, %v9194_v10  ;;  %v12029_v55 = vpack.c.bf16 %v8876_v7, %v8855_v13  ;;  %v12032_v13 = vld [vmem:[#allocation131_spill] sm:$0xff] }
 0x41e   : > { %v2752_v49 = vpop.f32.mrf.mxu0  ;;  %v9636_v41 = vpop.f32.mrf.mxu2 }
 0x41f   : > { %v9638_v1 = vmul.f32 %v2839_v63, %v2565_v17  ;;  %v2906_v31 = vmul.f32 %v2752_v49, %v2455_v12  ;;  %v2841_v19 = vpop.f32.mrf.mxu1 }
 0x421   : > { %v2938_v5 = vpack.c.bf16 %v2906_v31, %v2904_v20 }
 0x423   : > { %3151 = vmatmul.bf16.gmra.mxu2 %v2938_v5  ;;  %v6820_v5 = vld [vmem:[%s11395_s9 + $0x1c8] sm:$0xf] }
 0x424   : > { %v2567_v27 = vpop.f32.mrf.mxu3 }
 0x425   : > { %v2568_v25 = vadd.f32 %v2567_v27, %v9194_v10  ;;  %v12030_v10 = vpack.c.bf16 %v8859_v32, %v8843_v33  ;;  %v6455_v33 = vld [vmem:[%s11395_s9 + $0x1e8] sm:$0xf0] }
 0x426   : > { %v9647_v37 = vpop.f32.mrf.mxu2  ;;  %v3399_v63 = vpop.f32.mrf.mxu0 }
 0x427   : > { %v9649_v38 = vmul.f32 %v2841_v19, %v2568_v25  ;;  %v3488_v43 = vpop.f32.mrf.mxu1  ;;  %v12031_v19 = vld [vmem:[#allocation134_spill] sm:$0xff] }
 0x428   : > { %v12033_v7 = vpack.c.bf16 %v12031_v19, %v12032_v13 }
 0x429   : > { %3205 = vmatmul.bf16.gmra.mxu3 %v12028_v39  ;;  %3438 = vmatmul.bf16.gmra.mxu0 %v12029_v55  ;;  %v2939_v29 = vpack.c.bf16 %v9649_v38, %v9638_v1  ;;  %v12035_v55 = vpack.c.bf16 %v8898_v0, %v8882_v57  ;;  %v12036_v0 = vld [vmem:[#allocation41_spill] sm:$0xff]  ;;  %v12089_v38 = vld [vmem:[#allocation82_spill] sm:$0xff] }
 0x42a   : > { %3527 = vmatmul.bf16.gmra.mxu1 %v12030_v10  ;;  %v6821_v10 = vld [vmem:[%s11395_s9 + $0x1e4] sm:$0xf0] }
 0x42c   : > { %v3166_v12 = vpop.f32.mrf.mxu3 }
 0x42d   : > { %v3167_v17 = vadd.f32 %v3166_v12, %v9442_v54  ;;  %v6458_v54 = vor.u32 %v6820_v5, %v6455_v33  ;;  %v12039_v33 = vpack.c.bf16 %v9497_v6, %v9489_v61  ;;  %v12043_v6 = vld [vmem:[#allocation54_spill] sm:$0xff] }
 0x42e   : > { %v9663_v49 = vpop.f32.mrf.mxu2  ;;  %v3401_v20 = vpop.f32.mrf.mxu0 }
 0x42f   : > { %v3400_v31 = vadd.f32 %v3399_v63, %v3167_v17  ;;  %v3490_v62 = vpop.f32.mrf.mxu1  ;;  %4083 = vmatpush.bf16.msrb.mxu2 %v6458_v54 }
 0x431   : > { %v9665_v3 = vadd.f32 %v3488_v43, %v3400_v31  ;;  %v12034_v43 = vpack.c.bf16 %v8918_v14, %v8894_v52 }
 0x433   : > { %3576 = vmatmul.bf16.vlgmr.msra.gmra.mxu2 %v12033_v7 }
 0x434   : > { %v3168_v32 = vpop.f32.mrf.mxu3 }
 0x435   : > { %v3169_v56 = vadd.f32 %v3168_v32, %v9462_v22  ;;  %v6453_v22 = vld [vmem:[%s11395_s9 + $0x1c4] sm:$0xf]  ;;  %v12040_v32 = vpack.c.bf16 %v8961_v46, %v8938_v51  ;;  %v6818_v46 = vld [vmem:[%s11395_s9 + $0x180] sm:$0xf] }
 0x436   : > { %v9677_v34 = vpop.f32.mrf.mxu2  ;;  %v3404_v27 = vpop.f32.mrf.mxu0  ;;  %v6454_v18 = vor.u32 %v6821_v10, %v6453_v22  ;;  %v12044_v10 = vld [vmem:[#allocation52_spill] sm:$0xff] }
 0x437   : > { %v3402_v25 = vadd.f32 %v3401_v20, %v3169_v56  ;;  %v3493_v63 = vpop.f32.mrf.mxu1  ;;  %v12037_v20 = vld [vmem:[#allocation9_spill] sm:$0xff]  ;;  %v12041_v56 = vld [vmem:[#allocation31_spill] sm:$0xff]  ;;  %v12045_v51 = vpack.c.bf16 %v12043_v6, %v12044_v10  ;;  %v3657_v10 = vld [vmem:[%s11391_s5 + $0x28] sm:$0xff] }
 0x438   : > { %3994 = vmatpush.bf16.msrb.mxu1 %v6454_v18  ;;  %v12038_v31 = vpack.c.bf16 %v12036_v0, %v12037_v20  ;;  %v12046_v0 = vpack.c.bf16 %v9528_v47, %v9517_v30  ;;  %v12047_v20 = vld [vmem:[#allocation99_spill] sm:$0xff]  ;;  %3686 = vmatpush.msrb.mxu3 %v3657_v10 }
 0x439   : > { %3210 = vmatmul.bf16.gmra.mxu3 %v2927_v36  ;;  %3443 = vmatmul.bf16.gmra.mxu0 %v12034_v43  ;;  %v9685_v39 = vadd.f32 %v3490_v62, %v3402_v25 }
 0x43a   : > { %3532 = vmatmul.bf16.gmra.mxu1 %v12035_v55 }
 0x43c   : > { %v3171_v40 = vpop.f32.mrf.mxu3 }
 0x43d   : > { %v3172_v36 = vadd.f32 %v3171_v40, %v9467_v11 }
 0x43e   : > { %v9697_v52 = vpop.f32.mrf.mxu2  ;;  %v3406_v14 = vpop.f32.mrf.mxu0 }
 0x43f   : > { %v3405_v12 = vadd.f32 %v3404_v27, %v3172_v36  ;;  %v3495_v17 = vpop.f32.mrf.mxu1  ;;  %v12042_v27 = vpack.c.bf16 %v8942_v23, %v12041_v56  ;;  %v6447_v23 = vld [vmem:[%s11395_s9 + $0x1a0] sm:$0xf0] }
 0x440   : > { %v6450_v18 = vor.u32 %v6818_v46, %v6447_v23 }
 0x441   : > { %v9699_v57 = vadd.f32 %v3493_v63, %v3405_v12 }
 0x442   : > { %4084 = vmatpush.bf16.msrb.mxu2 %v6450_v18 }
 0x443   : > { %3581 = vmatmul.bf16.gmra.mxu2 %v12038_v31  ;;  %v12048_v31 = vld [vmem:[#allocation95_spill] sm:$0xff] }
 0x444   : > { %v3173_v62 = vpop.f32.mrf.mxu3 }
 0x445   : > { %v3174_v19 = vadd.f32 %v3173_v62, %v9487_v21  ;;  %v12049_v62 = vpack.c.bf16 %v12047_v20, %v12048_v31  ;;  %v12059_v20 = vld [vmem:[#allocation104_spill] sm:$0xff]  ;;  %v12060_v31 = vld [vmem:[#allocation101_spill] sm:$0xff] }
 0x446   : > { %v9705_v13 = vpop.f32.mrf.mxu2  ;;  %v3409_v7 = vpop.f32.mrf.mxu0 }
 0x447   : > { %v3407_v5 = vadd.f32 %v3406_v14, %v3174_v19  ;;  %v3498_v11 = vpop.f32.mrf.mxu1 }
 0x449   : > { %3215 = vmatmul.bf16.gmra.mxu3 %v12039_v33  ;;  %3448 = vmatmul.bf16.gmra.mxu0 %v12040_v32  ;;  %v9713_v54 = vadd.f32 %v3495_v17, %v3407_v5  ;;  %v12051_v5 = vld [vmem:[#allocation92_spill] sm:$0xff]  ;;  %v6819_v33 = vld [vmem:[%s11395_s9 + $0x19c] sm:$0xf0] }
 0x44a   : > { %3537 = vmatmul.bf16.gmra.mxu1 %v12042_v27 }
 0x44c   : > { %v3176_v21 = vpop.f32.mrf.mxu3 }
 0x44d   : > { %v3177_v25 = vadd.f32 %v3176_v21, %v9495_v28 }
 0x44e   : > { %v9719_v63 = vpop.f32.mrf.mxu2  ;;  %v3411_v43 = vpop.f32.mrf.mxu0 }
 0x44f   : > { %v3410_v55 = vadd.f32 %v3409_v7, %v3177_v25  ;;  %v3500_v22 = vpop.f32.mrf.mxu1  ;;  %v12050_v7 = vld [vmem:[#allocation97_spill] sm:$0xff] }
 0x451   : > { %v9721_v61 = vadd.f32 %v3498_v11, %v3410_v55  ;;  %v12052_v11 = vpack.c.bf16 %v12050_v7, %v12051_v5  ;;  %v12053_v55 = vld [vmem:[#allocation15_spill] sm:$0xff] }
 0x453   : > { %3586 = vmatmul.bf16.gmra.mxu2 %v12045_v51 }
 0x454   : > { %v3178_v28 = vpop.f32.mrf.mxu3 }
 0x455   : > { %v3179_v40 = vadd.f32 %v3178_v28, %v9515_v44  ;;  %v6445_v44 = vld [vmem:[%s11395_s9 + $0x17c] sm:$0xf] }
 0x456   : > { %v9733_v36 = vpop.f32.mrf.mxu2  ;;  %v3414_v14 = vpop.f32.mrf.mxu0  ;;  %v6446_v30 = vor.u32 %v6819_v33, %v6445_v44 }
 0x457   : > { %v3412_v12 = vadd.f32 %v3411_v43, %v3179_v40  ;;  %v3503_v17 = vpop.f32.mrf.mxu1 }
 0x458   : > { %3995 = vmatpush.bf16.msrb.mxu1 %v6446_v30 }
 0x459   : > { %3220 = vmatmul.bf16.gmra.mxu3 %v12046_v0  ;;  %3453 = vmatmul.bf16.gmra.mxu0 %v12049_v62  ;;  %v9741_v19 = vadd.f32 %v3500_v22, %v3412_v12  ;;  %v12054_v22 = vld [vmem:[#allocation55_spill] sm:$0xff]  ;;  %v12061_v62 = vpack.c.bf16 %v12059_v20, %v12060_v31  ;;  %v12069_v20 = vld [vmem:[#allocation109_spill] sm:$0xff] }
 0x45a   : > { %3542 = vmatmul.bf16.gmra.mxu1 %v12052_v11  ;;  %v12055_v6 = vpack.c.bf16 %v12053_v55, %v12054_v22  ;;  %v12057_v12 = vld [vmem:[#allocation103_spill] sm:$0xff] }
 0x45c   : > { %v3181_v47 = vpop.f32.mrf.mxu3 }
 0x45d   : > { %v3182_v32 = vadd.f32 %v3181_v47, %v9526_v24  ;;  %v3658_v24 = vld [vmem:[%s11391_s5 + $0x30] sm:$0xff]  ;;  %v6816_v47 = vld [vmem:[%s11395_s9 + $0x138] sm:$0xf] }
 0x45e   : > { %v9753_v56 = vpop.f32.mrf.mxu2  ;;  %v3416_v27 = vpop.f32.mrf.mxu0  ;;  %3799 = vmatpush.msrb.mxu0 %v3658_v24 }
 0x45f   : > { %v3415_v21 = vadd.f32 %v3414_v14, %v3182_v32  ;;  %v3505_v25 = vpop.f32.mrf.mxu1  ;;  %v12056_v14 = vld [vmem:[#allocation107_spill] sm:$0xff]  ;;  %v6439_v32 = vld [vmem:[%s11395_s9 + $0x158] sm:$0xf0] }
 0x461   : > { %v9755_v43 = vadd.f32 %v3503_v17, %v3415_v21  ;;  %v12058_v17 = vpack.c.bf16 %v12056_v14, %v12057_v12  ;;  %v6437_v21 = vld [vmem:[%s11395_s9 + $0x134] sm:$0xf] }
 0x463   : > { %3591 = vmatmul.bf16.gmra.mxu2 %v12055_v6 }
 0x464   : > { %v3183_v51 = vpop.f32.mrf.mxu3 }
 0x465   : > { %v3184_v46 = vadd.f32 %v3183_v51, %v9546_v53 }
 0x466   : > { %v9767_v23 = vpop.f32.mrf.mxu2  ;;  %v3419_v28 = vpop.f32.mrf.mxu0 }
 0x467   : > { %v3417_v18 = vadd.f32 %v3416_v27, %v3184_v46  ;;  %v3508_v40 = vpop.f32.mrf.mxu1  ;;  %v6442_v27 = vor.u32 %v6816_v47, %v6439_v32  ;;  %v6429_v46 = vld [vmem:[%s11395_s9 + $0xec] sm:$0xf]  ;;  %v12071_v32 = vld [vmem:[#allocation73_spill] sm:$0xff] }
 0x469   : > { %3225 = vmatmul.bf16.gmra.mxu3 %v2933_v50  ;;  %3458 = vmatmul.bf16.gmra.mxu0 %v12058_v17  ;;  %v9775_v0 = vadd.f32 %v3505_v25, %v3417_v18  ;;  %v12063_v50 = vld [vmem:[#allocation63_spill] sm:$0xff]  ;;  %v6817_v25 = vld [vmem:[%s11395_s9 + $0x154] sm:$0xf0]  ;;  %v12068_v17 = vld [vmem:[#allocation113_spill] sm:$0xff] }
 0x46a   : > { %3547 = vmatmul.bf16.gmra.mxu1 %v12061_v62  ;;  %v12064_v30 = vpack.c.bf16 %v12062_v9, %v12063_v50  ;;  %v6438_v22 = vor.u32 %v6817_v25, %v6437_v21  ;;  %4085 = vmatpush.bf16.msrb.mxu2 %v6442_v27  ;;  %v12066_v18 = vld [vmem:[#allocation111_spill] sm:$0xff]  ;;  %v12070_v31 = vpack.c.bf16 %v12068_v17, %v12069_v20  ;;  %v6413_v9 = vld [vmem:[%s11395_s9 + $0x5c] sm:$0xf]  ;;  %v6811_v50 = vld [vmem:[%s11395_s9 + $0x7c] sm:$0xf0] }
 0x46b   : > { %v6405_v21 = vld [vmem:[%s11395_s9 + $0x14] sm:$0xf]  ;;  %v6809_v25 = vld [vmem:[%s11395_s9 + $0x34] sm:$0xf0] }
 0x46c   : > { %v3186_v53 = vpop.f32.mrf.mxu3  ;;  %3996 = vmatpush.bf16.msrb.mxu1 %v6438_v22  ;;  %v6406_v22 = vor.u32 %v6809_v25, %v6405_v21  ;;  %v12078_v17 = vld [vmem:[#allocation116_spill] sm:$0xff] }
 0x46d   : > { %v3187_v7 = vadd.f32 %v3186_v53, %v9554_v45  ;;  %v6421_v53 = vld [vmem:[%s11395_s9 + $0xa4] sm:$0xf] }
 0x46e   : > { %v9781_v5 = vpop.f32.mrf.mxu2  ;;  %v3421_v11 = vpop.f32.mrf.mxu0 }
 0x46f   : > { %v3420_v44 = vadd.f32 %v3419_v28, %v3187_v7  ;;  %v3510_v33 = vpop.f32.mrf.mxu1  ;;  %v6815_v28 = vld [vmem:[%s11395_s9 + $0x10c] sm:$0xf0] }
 0x470   : > { %v6430_v14 = vor.u32 %v6815_v28, %v6429_v46  ;;  %v12074_v28 = vld [vmem:[#allocation122_spill] sm:$0xff] }
 0x471   : > { %v9783_v2 = vadd.f32 %v3508_v40, %v3420_v44 }
 0x472   : > { %3997 = vmatpush.bf16.msrb.mxu1 %v6430_v14  ;;  %v12077_v14 = vld [vmem:[#allocation120_spill] sm:$0xff] }
 0x473   : > { %3596 = vmatmul.bf16.gmra.mxu2 %v12064_v30  ;;  %v6414_v30 = vor.u32 %v6811_v50, %v6413_v9 }
 0x474   : > { %v3188_v45 = vpop.f32.mrf.mxu3 }
 0x475   : > { %v3189_v55 = vadd.f32 %v3188_v45, %v9574_v15  ;;  %v12065_v15 = vld [vmem:[#allocation115_spill] sm:$0xff] }
 0x476   : > { %v9801_v6 = vpop.f32.mrf.mxu2  ;;  %v3424_v10 = vpop.f32.mrf.mxu0  ;;  %v12067_v40 = vpack.c.bf16 %v12065_v15, %v12066_v18  ;;  %v12075_v15 = vld [vmem:[#allocation119_spill] sm:$0xff] }
 0x477   : > { %v3422_v24 = vadd.f32 %v3421_v11, %v3189_v55  ;;  %v3513_v51 = vpop.f32.mrf.mxu1  ;;  %v12076_v18 = vpack.c.bf16 %v12074_v28, %v12075_v15 }
 0x479   : > { %3230 = vmatmul.bf16.gmra.mxu3 %v2935_v4  ;;  %3463 = vmatmul.bf16.gmra.mxu0 %v12067_v40  ;;  %v9815_v12 = vadd.f32 %v3510_v33, %v3422_v24  ;;  %v6422_v4 = vor.u32 %v6813_v35, %v6421_v53 }
 0x47a   : > { %3552 = vmatmul.bf16.gmra.mxu1 %v12070_v31 }
 0x47b   : > { %3998 = vmatpush.bf16.msrb.mxu1 %v6422_v4 }
 0x47c   : > { %v3191_v62 = vpop.f32.mrf.mxu3 }
 0x47d   : > { %v3192_v42 = vadd.f32 %v3191_v62, %v9579_v60  ;;  %v12072_v60 = vld [vmem:[#allocation70_spill] sm:$0xff] }
 0x47e   : > { %v9827_v7 = vpop.f32.mrf.mxu2  ;;  %v3426_v11 = vpop.f32.mrf.mxu0  ;;  %v12073_v45 = vpack.c.bf16 %v12071_v32, %v12072_v60 }
 0x47f   : > { %v3425_v44 = vadd.f32 %v3424_v10, %v3192_v42  ;;  %v3515_v33 = vpop.f32.mrf.mxu1  ;;  %3999 = vmatpush.bf16.msrb.mxu1 %v6414_v30 }
 0x481   : > { %v9835_v47 = vadd.f32 %v3513_v51, %v3425_v44  ;;  %v6431_v44 = vld [vmem:[%s11395_s9 + $0x110] sm:$0xf0] }
 0x483   : > { %3601 = vmatmul.bf16.gmra.mxu2 %v12073_v45  ;;  %4000 = vmatpush.bf16.msrb.mxu1 %v6406_v22  ;;  %v12083_v45 = vld [vmem:[#allocation128_spill] sm:$0xff]  ;;  %v12087_v22 = vld [vmem:[#allocation123_spill] sm:$0xff] }
 0x484   : > { %v3193_v27 = vpop.f32.mrf.mxu3 }
 0x485   : > { %v3194_v55 = vadd.f32 %v3193_v27, %v9599_v26  ;;  %v12079_v26 = vpack.c.bf16 %v12077_v14, %v12078_v17  ;;  %v12084_v27 = vld [vmem:[#allocation124_spill] sm:$0xff] }
 0x486   : > { %v9847_v10 = vpop.f32.mrf.mxu2  ;;  %v3429_v24 = vpop.f32.mrf.mxu0  ;;  %v12085_v21 = vpack.c.bf16 %v12083_v45, %v12084_v27  ;;  %v6831_v17 = vld [vmem:[%s11396_s10 + $0x178] sm:$0xff]  ;;  %v12096_v45 = vld [vmem:[#allocation87_spill] sm:$0xff] }
 0x487   : > { %v3427_v51 = vadd.f32 %v3426_v11, %v3194_v55  ;;  %v3518_v46 = vpop.f32.mrf.mxu1  ;;  %v6814_v11 = vld [vmem:[%s11395_s9 + $0xf0] sm:$0xf]  ;;  %v12086_v55 = vld [vmem:[#allocation125_spill] sm:$0xff]  ;;  %4395 = vmatpush.bf16.msra.mxu3 %v6831_v17 }
 0x489   : > { %3235 = vmatmul.bf16.gmra.mxu3 %v2937_v16  ;;  %3468 = vmatmul.bf16.gmra.mxu0 %v12076_v18  ;;  %v9855_v40 = vadd.f32 %v3515_v33, %v3427_v51  ;;  %v12081_v16 = vld [vmem:[#allocation72_spill] sm:$0xff]  ;;  %v6434_v33 = vor.u32 %v6814_v11, %v6431_v44 }
 0x48a   : > { %3557 = vmatmul.bf16.gmra.mxu1 %v12079_v26  ;;  %v12082_v4 = vpack.c.bf16 %v12080_v8, %v12081_v16  ;;  %v6839_v26 = vld [vmem:[%s11396_s10 + $0x1b8] sm:$0xff]  ;;  %v12092_v8 = vld [vmem:[#allocation5_spill] sm:$0xff] }
 0x48b   : > { %4086 = vmatpush.bf16.msrb.mxu2 %v6434_v33  ;;  %4484 = vmatpush.bf16.msra.mxu0 %v6839_v26 }
 0x48c   : > { %v3196_v20 = vpop.f32.mrf.mxu3 }
 0x48d   : > { %v3197_v31 = vadd.f32 %v3196_v20, %v9610_v59 }
 0x48e   : > { %v9861_v62 = vpop.f32.mrf.mxu2  ;;  %v3431_v53 = vpop.f32.mrf.mxu0 }
 0x48f   : > { %v3430_v35 = vadd.f32 %v3429_v24, %v3197_v31  ;;  %v3520_v42 = vpop.f32.mrf.mxu1  ;;  %v12088_v24 = vpack.c.bf16 %v12086_v55, %v12087_v22 }
 0x491   : > { %v9863_v58 = vadd.f32 %v3518_v46, %v3430_v35 }
 0x493   : > { %3606 = vmatmul.bf16.gmra.mxu2 %v12082_v4  ;;  %v12093_v4 = vld [vmem:[#allocation96_spill] sm:$0xff] }
 0x494   : > { %v3198_v59 = vpop.f32.mrf.mxu3 }
 0x495   : > { %v3199_v9 = vadd.f32 %v3198_v59, %v9636_v41 }
 0x496   : > { %v9875_v50 = vpop.f32.mrf.mxu2  ;;  %v3434_v30 = vpop.f32.mrf.mxu0 }
 0x497   : > { %v3432_v32 = vadd.f32 %v3431_v53, %v3199_v9  ;;  %v3523_v60 = vpop.f32.mrf.mxu1 }
 0x499   : > { %3240 = vmatmul.bf16.gmra.mxu3 %v2939_v29  ;;  %3473 = vmatmul.bf16.gmra.mxu0 %v12085_v21  ;;  %v9883_v25 = vadd.f32 %v3520_v42, %v3432_v32  ;;  %v12090_v29 = vld [vmem:[#allocation80_spill] sm:$0xff]  ;;  %v6423_v21 = vld [vmem:[%s11395_s9 + $0xc8] sm:$0xf0] }
 0x49a   : > { %3562 = vmatmul.bf16.gmra.mxu1 %v12088_v24  ;;  %v12091_v14 = vpack.c.bf16 %v12089_v38, %v12090_v29  ;;  %v12099_v38 = vld [vmem:[#allocation8_spill] sm:$0xff] }
 0x49c   : > { %v3201_v41 = vpop.f32.mrf.mxu3 }
 0x49d   : > { %v3202_v51 = vadd.f32 %v3201_v41, %v9647_v37 }
 0x49e   : > { %v9889_v46 = vpop.f32.mrf.mxu2  ;;  %v3436_v28 = vpop.f32.mrf.mxu0 }
 0x49f   : > { %v3435_v15 = vadd.f32 %v3434_v30, %v3202_v51  ;;  %v3525_v18 = vpop.f32.mrf.mxu1  ;;  %v12094_v30 = vld [vmem:[#allocation6_spill] sm:$0xff] }
 0x4a1   : > { %v9891_v1 = vadd.f32 %v3523_v60, %v3435_v15  ;;  %v12095_v60 = vld [vmem:[#allocation90_spill] sm:$0xff] }
 0x4a2   : > { %v12097_v27 = vpack.c.bf16 %v12095_v60, %v12096_v45 }
 0x4a3   : > { %3611 = vmatmul.bf16.gmra.mxu2 %v12091_v14  ;;  %v12100_v14 = vld [vmem:[#allocation100_spill] sm:$0xff] }
 0x4a4   : > { %v3203_v37 = vpop.f32.mrf.mxu3 }
 0x4a5   : > { %v3204_v20 = vadd.f32 %v3203_v37, %v9663_v49 }
 0x4a6   : > { %v9903_v31 = vpop.f32.mrf.mxu2  ;;  %v3439_v53 = vpop.f32.mrf.mxu0 }
 0x4a7   : > { %v3437_v35 = vadd.f32 %v3436_v28, %v3204_v20  ;;  %v3528_v42 = vpop.f32.mrf.mxu1 }
 0x4a9   : > { %6339 = vmatmul.msk.f32.vlgmr.msrb.gmra.mxu3 %vm1014_vm2, %v12092_v8  ;;  %6371 = vmatmul.msk.f32.vlgmr.msrb.gmra.mxu0 %vm1014_vm2, %v12092_v8  ;;  %v9909_v16 = vadd.f32 %v3525_v18, %v3437_v35  ;;  %v12102_v35 = vld [vmem:[#allocation10_spill] sm:$0xff] }
 0x4aa   : > { %4001 = vmatmul.bf16.vlgmr.msrb.gmra.mxu1 %v12093_v4 }
 0x4ac   : > { %v3206_v11 = vpop.f32.mrf.mxu3 }
 0x4ad   : > { %v3207_v49 = vadd.f32 %v3206_v11, %v9677_v34  ;;  %v6812_v34 = vld [vmem:[%s11395_s9 + $0xa8] sm:$0xf] }
 0x4ae   : > { %v9913_v44 = vpop.f32.mrf.mxu2  ;;  %v3441_v59 = vpop.f32.mrf.mxu0  ;;  %v6426_v22 = vor.u32 %v6812_v34, %v6423_v21  ;;  %v12103_v11 = vld [vmem:[#allocation86_spill] sm:$0xff] }
 0x4af   : > { %v3440_v33 = vadd.f32 %v3439_v53, %v3207_v49  ;;  %v3530_v9 = vpop.f32.mrf.mxu1  ;;  %v12104_v49 = vld [vmem:[#allocation33_spill] sm:$0xff] }
 0x4b0   : > { %4087 = vmatpush.bf16.msrb.mxu2 %v6426_v22 }
 0x4b1   : > { %6340 = vmatmul.msk.f32.gmra.mxu3 %vm1014_vm2, %v12094_v30  ;;  %6372 = vmatmul.msk.f32.gmra.mxu0 %vm1014_vm2, %v12094_v30  ;;  %v9919_v32 = vadd.f32 %v3528_v42, %v3440_v33 }
 0x4b3   : > { %3616 = vmatmul.bf16.gmra.mxu2 %v12097_v27 }
 0x4b4   : > { %v3208_v55 = vpop.f32.mrf.mxu3 }
 0x4b5   : > { %v3209_v24 = vadd.f32 %v3208_v55, %v9697_v52  ;;  %v12107_v55 = vld [vmem:[#allocation12_spill] sm:$0xff] }
 0x4b6   : > { %v3444_v41 = vpop.f32.mrf.mxu0  ;;  %v3577_v51 = vpop.f32.mrf.mxu2 }
 0x4b7   : > { %v3442_v28 = vadd.f32 %v3441_v59, %v3209_v24  ;;  %v3533_v15 = vpop.f32.mrf.mxu1  ;;  %v9932_v18 = vadd.f32 %v3577_v51, %v9665_v3  ;;  %v12105_v59 = vpack.c.bf16 %v12103_v11, %v12104_v49  ;;  %v12108_v24 = vld [vmem:[#allocation105_spill] sm:$0xff] }
 0x4b9   : > { %12098 = vst [vmem:[#allocation129_spill] sm:$0xff] %v9932_v18  ;;  %6341 = vmatmul.msk.f32.gmra.mxu3 %vm1014_vm2, %v12099_v38  ;;  %6373 = vmatmul.msk.f32.gmra.mxu0 %vm1014_vm2, %v12099_v38  ;;  %v9938_v29 = vadd.f32 %v3530_v9, %v3442_v28 }
 0x4ba   : > { %4006 = vmatmul.bf16.gmra.mxu1 %v12100_v14 }
 0x4bc   : > { %v3211_v17 = vpop.f32.mrf.mxu3 }
 0x4bd   : > { %v3212_v52 = vadd.f32 %v3211_v17, %v9705_v13  ;;  %v6830_v13 = vld [vmem:[%s11396_s10 + $0x170] sm:$0xff] }
 0x4be   : > { %v3446_v26 = vpop.f32.mrf.mxu0  ;;  %v3579_v37 = vpop.f32.mrf.mxu2  ;;  %4396 = vmatpush.bf16.msra.mxu3 %v6830_v13 }
 0x4bf   : > { %v3445_v20 = vadd.f32 %v3444_v41, %v3212_v52  ;;  %v3535_v53 = vpop.f32.mrf.mxu1  ;;  %v9943_v3 = vadd.f32 %v3579_v37, %v9685_v39  ;;  %v6838_v39 = vld [vmem:[%s11396_s10 + $0x1b0] sm:$0xff]  ;;  %v12110_v52 = vld [vmem:[#allocation14_spill] sm:$0xff] }
 0x4c0   : > { %4485 = vmatpush.bf16.msra.mxu0 %v6838_v39  ;;  %v12111_v37 = vld [vmem:[#allocation91_spill] sm:$0xff] }
 0x4c1   : > { %12101 = vst [vmem:[#allocation40_spill] sm:$0xff] %v9943_v3  ;;  %6342 = vmatmul.msk.f32.gmra.mxu3 %vm1014_vm2, %v12102_v35  ;;  %6374 = vmatmul.msk.f32.gmra.mxu0 %vm1014_vm2, %v12102_v35  ;;  %v9949_v42 = vadd.f32 %v3533_v15, %v3445_v20  ;;  %v12112_v20 = vld [vmem:[#allocation88_spill] sm:$0xff]  ;;  %v12165_v3 = vld [vmem:[#allocation51_spill] sm:$0xff] }
 0x4c3   : > { %3621 = vmatmul.bf16.gmra.mxu2 %v12105_v59 }
 0x4c4   : > { %v3213_v33 = vpop.f32.mrf.mxu3 }
 0x4c5   : > { %v3214_v9 = vadd.f32 %v3213_v33, %v9719_v63 }
 0x4c6   : > { %v3449_v60 = vpop.f32.mrf.mxu0  ;;  %v3582_v45 = vpop.f32.mrf.mxu2 }
 0x4c7   : > { %v3447_v27 = vadd.f32 %v3446_v26, %v3214_v9  ;;  %v3538_v34 = vpop.f32.mrf.mxu1  ;;  %v9962_v21 = vadd.f32 %v3582_v45, %v9699_v57  ;;  %v12115_v45 = vld [vmem:[#allocation16_spill] sm:$0xff] }
 0x4c9   : > { %12106 = vst [vmem:[#allocation35_spill] sm:$0xff] %v9962_v21  ;;  %6343 = vmatmul.msk.f32.gmra.mxu3 %vm1014_vm2, %v12107_v55  ;;  %6375 = vmatmul.msk.f32.gmra.mxu0 %vm1014_vm2, %v12107_v55  ;;  %v9968_v22 = vadd.f32 %v3535_v53, %v3447_v27  ;;  %v12113_v53 = vpack.c.bf16 %v12111_v37, %v12112_v20  ;;  %v12118_v37 = vld [vmem:[#allocation18_spill] sm:$0xff] }
 0x4ca   : > { %4011 = vmatmul.bf16.gmra.mxu1 %v12108_v24  ;;  %v12119_v20 = vld [vmem:[#allocation98_spill] sm:$0xff] }
 0x4cc   : > { %v3216_v63 = vpop.f32.mrf.mxu3 }
 0x4cd   : > { %v3217_v41 = vadd.f32 %v3216_v63, %v9733_v36  ;;  %v6810_v36 = vld [vmem:[%s11395_s9 + $0x60] sm:$0xf] }
 0x4ce   : > { %v3451_v51 = vpop.f32.mrf.mxu0  ;;  %v3584_v28 = vpop.f32.mrf.mxu2 }
 0x4cf   : > { %v3450_v15 = vadd.f32 %v3449_v60, %v3217_v41  ;;  %v3540_v17 = vpop.f32.mrf.mxu1  ;;  %v9973_v57 = vadd.f32 %v3584_v28, %v9713_v54  ;;  %v6415_v54 = vld [vmem:[%s11395_s9 + $0x80] sm:$0xf0] }
 0x4d0   : > { %v6418_v49 = vor.u32 %v6810_v36, %v6415_v54 }
 0x4d1   : > { %12109 = vst [vmem:[#allocation132_spill] sm:$0xff] %v9973_v57  ;;  %6344 = vmatmul.msk.f32.gmra.mxu3 %vm1014_vm2, %v12110_v52  ;;  %6376 = vmatmul.msk.f32.gmra.mxu0 %vm1014_vm2, %v12110_v52  ;;  %v9979_v26 = vadd.f32 %v3538_v34, %v3450_v15  ;;  %v12116_v34 = vld [vmem:[#allocation108_spill] sm:$0xff] }
 0x4d2   : > { %4088 = vmatpush.bf16.msrb.mxu2 %v6418_v49 }
 0x4d3   : > { %3626 = vmatmul.bf16.gmra.mxu2 %v12113_v53  ;;  %v12120_v53 = vld [vmem:[#allocation94_spill] sm:$0xff] }
 0x4d4   : > { %v3218_v11 = vpop.f32.mrf.mxu3  ;;  %v12121_v36 = vpack.c.bf16 %v12119_v20, %v12120_v53 }
 0x4d5   : > { %v3219_v59 = vadd.f32 %v3218_v11, %v9753_v56 }
 0x4d6   : > { %v3454_v13 = vpop.f32.mrf.mxu0  ;;  %v3587_v39 = vpop.f32.mrf.mxu2 }
 0x4d7   : > { %v3452_v33 = vadd.f32 %v3451_v51, %v3219_v59  ;;  %v3543_v9 = vpop.f32.mrf.mxu1  ;;  %v9992_v60 = vadd.f32 %v3587_v39, %v9721_v61 }
 0x4d9   : > { %12114 = vst [vmem:[#allocation37_spill] sm:$0xff] %v9992_v60  ;;  %6345 = vmatmul.msk.f32.gmra.mxu3 %vm1014_vm2, %v12115_v45  ;;  %6377 = vmatmul.msk.f32.gmra.mxu0 %vm1014_vm2, %v12115_v45  ;;  %v9998_v27 = vadd.f32 %v3540_v17, %v3452_v33 }
 0x4da   : > { %4016 = vmatmul.bf16.gmra.mxu1 %v12116_v34 }
 0x4dc   : > { %v3221_v63 = vpop.f32.mrf.mxu3 }
 0x4dd   : > { %v3222_v56 = vadd.f32 %v3221_v63, %v9767_v23  ;;  %v6829_v23 = vld [vmem:[%s11396_s10 + $0x168] sm:$0xff] }
 0x4de   : > { %v3456_v41 = vpop.f32.mrf.mxu0  ;;  %v3589_v28 = vpop.f32.mrf.mxu2  ;;  %4397 = vmatpush.bf16.msra.mxu3 %v6829_v23  ;;  %v12127_v23 = vld [vmem:[#allocation106_spill] sm:$0xff] }
 0x4df   : > { %v3455_v51 = vadd.f32 %v3454_v13, %v3222_v56  ;;  %v3545_v15 = vpop.f32.mrf.mxu1  ;;  %v10003_v61 = vadd.f32 %v3589_v28, %v9741_v19  ;;  %v6837_v19 = vld [vmem:[%s11396_s10 + $0x1a8] sm:$0xff]  ;;  %v12124_v56 = vld [vmem:[#allocation112_spill] sm:$0xff] }
 0x4e0   : > { %4486 = vmatpush.bf16.msra.mxu0 %v6837_v19  ;;  %v12128_v19 = vld [vmem:[#allocation102_spill] sm:$0xff] }
 0x4e1   : > { %12117 = vst [vmem:[#allocation46_spill] sm:$0xff] %v10003_v61  ;;  %6346 = vmatmul.msk.f32.gmra.mxu3 %vm1014_vm2, %v12118_v37  ;;  %6378 = vmatmul.msk.f32.gmra.mxu0 %vm1014_vm2, %v12118_v37  ;;  %v10009_v17 = vadd.f32 %v3543_v9, %v3455_v51  ;;  %v12123_v9 = vld [vmem:[#allocation20_spill] sm:$0xff]  ;;  %v12160_v61 = vld [vmem:[#allocation42_spill] sm:$0xff] }
 0x4e3   : > { %3631 = vmatmul.bf16.gmra.mxu2 %v12121_v36  ;;  %v12126_v36 = vld [vmem:[#allocation22_spill] sm:$0xff] }
 0x4e4   : > { %v3223_v54 = vpop.f32.mrf.mxu3 }
 0x4e5   : > { %v3224_v11 = vadd.f32 %v3223_v54, %v9781_v5  ;;  %v12129_v54 = vpack.c.bf16 %v12127_v23, %v12128_v19  ;;  %v12132_v19 = vld [vmem:[#allocation117_spill] sm:$0xff] }
 0x4e6   : > { %v3459_v49 = vpop.f32.mrf.mxu0  ;;  %v3592_v59 = vpop.f32.mrf.mxu2 }
 0x4e7   : > { %v3457_v13 = vadd.f32 %v3456_v41, %v3224_v11  ;;  %v3548_v39 = vpop.f32.mrf.mxu1  ;;  %v10022_v33 = vadd.f32 %v3592_v59, %v9755_v43 }
 0x4e9   : > { %12122 = vst [vmem:[#allocation7_spill] sm:$0xff] %v10022_v33  ;;  %6347 = vmatmul.msk.f32.gmra.mxu3 %vm1014_vm2, %v12123_v9  ;;  %6379 = vmatmul.msk.f32.gmra.mxu0 %vm1014_vm2, %v12123_v9  ;;  %v10028_v63 = vadd.f32 %v3545_v15, %v3457_v13  ;;  %v4612_v33 = vld [vmem:[%s11391_s5 + $0x118] sm:$0xff] }
 0x4ea   : > { %4021 = vmatmul.bf16.gmra.mxu1 %v12124_v56 }
 0x4ec   : > { %v3226_v5 = vpop.f32.mrf.mxu3 }
 0x4ed   : > { %v3227_v28 = vadd.f32 %v3226_v5, %v9801_v6  ;;  %v6808_v6 = vld [vmem:[%s11395_s9 + $0x18] sm:$0xf] }
 0x4ee   : > { %v3461_v51 = vpop.f32.mrf.mxu0  ;;  %v3594_v20 = vpop.f32.mrf.mxu2 }
 0x4ef   : > { %v3460_v41 = vadd.f32 %v3459_v49, %v3227_v28  ;;  %v3550_v53 = vpop.f32.mrf.mxu1  ;;  %v10033_v43 = vadd.f32 %v3594_v20, %v9775_v0  ;;  %v6407_v0 = vld [vmem:[%s11395_s9 + $0x38] sm:$0xf0] }
 0x4f0   : > { %v6410_v49 = vor.u32 %v6808_v6, %v6407_v0 }
 0x4f1   : > { %12125 = vst [vmem:[#allocation44_spill] sm:$0xff] %v10033_v43  ;;  %6348 = vmatmul.msk.f32.gmra.mxu3 %vm1014_vm2, %v12126_v36  ;;  %6380 = vmatmul.msk.f32.gmra.mxu0 %vm1014_vm2, %v12126_v36  ;;  %v10039_v15 = vadd.f32 %v3548_v39, %v3460_v41  ;;  %v12131_v41 = vld [vmem:[#allocation24_spill] sm:$0xff] }
 0x4f2   : > { %4089 = vmatpush.bf16.msrb.mxu2 %v6410_v49  ;;  %v12134_v49 = vld [vmem:[#allocation26_spill] sm:$0xff] }
 0x4f3   : > { %3636 = vmatmul.bf16.gmra.mxu2 %v12129_v54 }
 0x4f4   : > { %v3228_v11 = vpop.f32.mrf.mxu3 }
 0x4f5   : > { %v3229_v59 = vadd.f32 %v3228_v11, %v9827_v7 }
 0x4f6   : > { %v3464_v13 = vpop.f32.mrf.mxu0  ;;  %v3597_v5 = vpop.f32.mrf.mxu2  ;;  %4744 = vmatpush.msra.mxu2 %v4612_v33 }
 0x4f7   : > { %v3462_v39 = vadd.f32 %v3461_v51, %v3229_v59  ;;  %v3553_v28 = vpop.f32.mrf.mxu1  ;;  %v10052_v20 = vadd.f32 %v3597_v5, %v9783_v2  ;;  %v12135_v59 = vld [vmem:[#allocation114_spill] sm:$0xff] }
 0x4f8   : > { %v12136_v5 = vld [vmem:[#allocation110_spill] sm:$0xff] }
 0x4f9   : > { %12130 = vst [vmem:[#allocation45_spill] sm:$0xff] %v10052_v20  ;;  %6349 = vmatmul.msk.f32.gmra.mxu3 %vm1014_vm2, %v12131_v41  ;;  %6381 = vmatmul.msk.f32.gmra.mxu0 %vm1014_vm2, %v12131_v41  ;;  %v10058_v23 = vadd.f32 %v3550_v53, %v3462_v39  ;;  %v12137_v39 = vpack.c.bf16 %v12135_v59, %v12136_v5  ;;  %v12139_v5 = vld [vmem:[#allocation28_spill] sm:$0xff] }
 0x4fa   : > { %4026 = vmatmul.bf16.gmra.mxu1 %v12132_v19 }
 0x4fc   : > { %v3231_v54 = vpop.f32.mrf.mxu3 }
 0x4fd   : > { %v3232_v7 = vadd.f32 %v3231_v54, %v9847_v10  ;;  %v6828_v10 = vld [vmem:[%s11396_s10 + $0x160] sm:$0xff] }
 0x4fe   : > { %v3466_v6 = vpop.f32.mrf.mxu0  ;;  %v3599_v0 = vpop.f32.mrf.mxu2  ;;  %4398 = vmatpush.bf16.msra.mxu3 %v6828_v10 }
 0x4ff   : > { %v3465_v51 = vadd.f32 %v3464_v13, %v3232_v7  ;;  %v3555_v11 = vpop.f32.mrf.mxu1  ;;  %v10063_v2 = vadd.f32 %v3599_v0, %v9815_v12  ;;  %v6836_v12 = vld [vmem:[%s11396_s10 + $0x1a0] sm:$0xff] }
 0x500   : > { %4487 = vmatpush.bf16.msra.mxu0 %v6836_v12 }
 0x501   : > { %12133 = vst [vmem:[#allocation53_spill] sm:$0xff] %v10063_v2  ;;  %6350 = vmatmul.msk.f32.gmra.mxu3 %vm1014_vm2, %v12134_v49  ;;  %6382 = vmatmul.msk.f32.gmra.mxu0 %vm1014_vm2, %v12134_v49  ;;  %v10069_v53 = vadd.f32 %v3553_v28, %v3465_v51  ;;  %v12140_v2 = vld [vmem:[#allocation121_spill] sm:$0xff] }
 0x503   : > { %3641 = vmatmul.bf16.gmra.mxu2 %v12137_v39 }
 0x504   : > { %v3233_v13 = vpop.f32.mrf.mxu3 }
 0x505   : > { %v3234_v54 = vadd.f32 %v3233_v13, %v9861_v62 }
 0x506   : > { %v3469_v7 = vpop.f32.mrf.mxu0  ;;  %v3602_v28 = vpop.f32.mrf.mxu2 }
 0x507   : > { %v3467_v0 = vadd.f32 %v3466_v6, %v3234_v54  ;;  %v3558_v51 = vpop.f32.mrf.mxu1  ;;  %v10082_v59 = vadd.f32 %v3602_v28, %v9835_v47  ;;  %v12142_v28 = vld [vmem:[#allocation30_spill] sm:$0xff] }
 0x509   : > { %12138 = vst [vmem:[#allocation13_spill] sm:$0xff] %v10082_v59  ;;  %6351 = vmatmul.msk.f32.gmra.mxu3 %vm1014_vm2, %v12139_v5  ;;  %6383 = vmatmul.msk.f32.gmra.mxu0 %vm1014_vm2, %v12139_v5  ;;  %v10088_v39 = vadd.f32 %v3555_v11, %v3467_v0  ;;  %v12143_v0 = vld [vmem:[#allocation133_spill] sm:$0xff]  ;;  %v12144_v59 = vld [vmem:[#allocation118_spill] sm:$0xff] }
 0x50a   : > { %4031 = vmatmul.bf16.gmra.mxu1 %v12140_v2  ;;  %v12145_v20 = vpack.c.bf16 %v12143_v0, %v12144_v59  ;;  %v12148_v59 = vld [vmem:[#allocation126_spill] sm:$0xff] }
 0x50c   : > { %v3236_v62 = vpop.f32.mrf.mxu3 }
 0x50d   : > { %v3237_v10 = vadd.f32 %v3236_v62, %v9875_v50 }
 0x50e   : > { %v3471_v12 = vpop.f32.mrf.mxu0  ;;  %v3604_v13 = vpop.f32.mrf.mxu2 }
 0x50f   : > { %v3470_v6 = vadd.f32 %v3469_v7, %v3237_v10  ;;  %v3560_v54 = vpop.f32.mrf.mxu1  ;;  %v10093_v47 = vadd.f32 %v3604_v13, %v9855_v40 }
 0x511   : > { %12141 = vst [vmem:[#allocation11_spill] sm:$0xff] %v10093_v47  ;;  %6352 = vmatmul.msk.f32.gmra.mxu3 %vm1014_vm2, %v12142_v28  ;;  %6384 = vmatmul.msk.f32.gmra.mxu0 %vm1014_vm2, %v12142_v28  ;;  %v10099_v11 = vadd.f32 %v3558_v51, %v3470_v6  ;;  %v12147_v47 = vld [vmem:[#allocation32_spill] sm:$0xff] }
 0x513   : > { %3646 = vmatmul.bf16.gmra.mxu2 %v12145_v20 }
 0x514   : > { %v3238_v50 = vpop.f32.mrf.mxu3 }
 0x515   : > { %v3239_v62 = vadd.f32 %v3238_v50, %v9889_v46 }
 0x516   : > { %v3474_v7 = vpop.f32.mrf.mxu0  ;;  %v3607_v10 = vpop.f32.mrf.mxu2 }
 0x517   : > { %v3472_v43 = vadd.f32 %v3471_v12, %v3239_v62  ;;  %v3563_v40 = vpop.f32.mrf.mxu1  ;;  %v10106_v13 = vadd.f32 %v3607_v10, %v9863_v58  ;;  %v12150_v62 = vld [vmem:[#allocation34_spill] sm:$0xff]  ;;  %v12152_v10 = vld [vmem:[#allocation39_spill] sm:$0xff] }
 0x519   : > { %12146 = vst [vmem:[#allocation48_spill] sm:$0xff] %v10106_v13  ;;  %6353 = vmatmul.msk.f32.gmra.mxu3 %vm1014_vm2, %v12147_v47  ;;  %6385 = vmatmul.msk.f32.gmra.mxu0 %vm1014_vm2, %v12147_v47  ;;  %v10112_v51 = vadd.f32 %v3560_v54, %v3472_v43  ;;  %v12151_v54 = vld [vmem:[#allocation127_spill] sm:$0xff] }
 0x51a   : > { %4036 = vmatmul.bf16.gmra.mxu1 %v12148_v59  ;;  %v12153_v13 = vpack.c.bf16 %v12151_v54, %v12152_v10  ;;  %v10143_v54 = vld [vmem:[%s11392_s6 + $0x5] sm:$0x3]  ;;  %v12155_v10 = vld [vmem:[#allocation36_spill] sm:$0xff] }
 0x51c   : > { %v3241_v20 = vpop.f32.mrf.mxu3 }
 0x51d   : > { %v3242_v46 = vadd.f32 %v3241_v20, %v9903_v31  ;;  %v6827_v31 = vld [vmem:[%s11396_s10 + $0x158] sm:$0xff] }
 0x51e   : > { %v3476_v6 = vpop.f32.mrf.mxu0  ;;  %v3609_v0 = vpop.f32.mrf.mxu2  ;;  %4399 = vmatpush.bf16.msra.mxu3 %v6827_v31 }
 0x51f   : > { %v3475_v12 = vadd.f32 %v3474_v7, %v3242_v46  ;;  %v3565_v50 = vpop.f32.mrf.mxu1  ;;  %v10117_v58 = vadd.f32 %v3609_v0, %v9883_v25  ;;  %v6835_v25 = vld [vmem:[%s11396_s10 + $0x198] sm:$0xff] }
 0x520   : > { %4488 = vmatpush.bf16.msra.mxu0 %v6835_v25 }
 0x521   : > { %12149 = vst [vmem:[#allocation62_spill] sm:$0xff] %v10117_v58  ;;  %6354 = vmatmul.msk.f32.gmra.mxu3 %vm1014_vm2, %v12150_v62  ;;  %6386 = vmatmul.msk.f32.gmra.mxu0 %vm1014_vm2, %v12150_v62  ;;  %v10123_v43 = vadd.f32 %v3563_v40, %v3475_v12 }
 0x523   : > { %3651 = vmatmul.bf16.gmra.mxu2 %v12153_v13 }
 0x524   : > { %v3243_v7 = vpop.f32.mrf.mxu3 }
 0x525   : > { %v3244_v20 = vadd.f32 %v3243_v7, %v9913_v44  ;;  %v10150_v44 = vperm.slane %v10143_v54, 0 }
 0x526   : > { %v3612_v46 = vpop.f32.mrf.mxu2  ;;  %v10135_v40 = vpop.f32.mrf.mxu0 }
 0x527   : > { %v3477_v0 = vadd.f32 %v3476_v6, %v3244_v20  ;;  %v10138_v12 = vadd.f32 %v3612_v46, %v9891_v1  ;;  %v4002_v13 = vpop.f32.mrf.mxu1  ;;  %v12156_v6 = vld [vmem:[#allocation130_spill] sm:$0xff] }
 0x529   : > { %12154 = vst [vmem:[#allocation60_spill] sm:$0xff] %v10138_v12  ;;  %6355 = vmatmul.msk.f32.gmra.mxu3 %vm1014_vm2, %v12155_v10  ;;  %6387 = vmatmul.msk.f32.gmra.mxu0 %vm1014_vm2, %v12155_v10  ;;  %v10152_v31 = vadd.f32 %v3565_v50, %v3477_v0  ;;  %v12158_v50 = vld [vmem:[#allocation38_spill] sm:$0xff]  ;;  %v4611_v0 = vld [vmem:[%s11391_s5 + $0x110] sm:$0xff] }
 0x52a   : > { %4041 = vmatmul.bf16.gmra.mxu1 %v12156_v6 }
 0x52b   : > { %4631 = vmatpush.msra.mxu1 %v4611_v0  ;;  %v12161_v0 = vld [vmem:[#allocation43_spill] sm:$0xff] }
 0x52c   : > { %v3688_v1 = vpop.f32.mrf.mxu3 }
 0x52d   : > { %v3689_v25 = vadd.f32 %v3688_v1, %v10150_v44 }
 0x52e   : > { %v3614_v7 = vpop.f32.mrf.mxu2  ;;  %v10156_v20 = vpop.f32.mrf.mxu0 }
 0x52f   : > { %v10158_v46 = vmul.f32 %v4002_v13, %v3689_v25  ;;  %v10161_v12 = vadd.f32 %v3614_v7, %v9909_v16  ;;  %v4004_v58 = vpop.f32.mrf.mxu1 }
 0x531   : > { %12157 = vst [vmem:[#allocation57_spill] sm:$0xff] %v10161_v12  ;;  %6356 = vmatmul.msk.f32.gmra.mxu3 %vm1014_vm2, %v12158_v50  ;;  %6388 = vmatmul.msk.f32.gmra.mxu0 %vm1014_vm2, %v12158_v50  ;;  %v12173_v50 = vld [vmem:[#allocation64_spill] sm:$0xff] }
 0x533   : > { %4090 = vmatmul.bf16.vlgmr.msrb.gmra.mxu2 %v12093_v4 }
 0x534   : > { %v3691_v16 = vpop.f32.mrf.mxu3 }
 0x535   : > { %v3692_v13 = vadd.f32 %v3691_v16, %v10150_v44 }
 0x536   : > { %v3617_v1 = vpop.f32.mrf.mxu2  ;;  %v10175_v25 = vpop.f32.mrf.mxu0 }
 0x537   : > { %v10177_v33 = vmul.f32 %v4004_v58, %v3692_v13  ;;  %v10180_v7 = vadd.f32 %v3617_v1, %v9919_v32  ;;  %v4007_v12 = vpop.f32.mrf.mxu1 }
 0x539   : > { %12159 = vst [vmem:[#allocation17_spill] sm:$0xff] %v10180_v7  ;;  %6357 = vmatmul.msk.f32.gmra.mxu3 %vm1014_vm2, %v12160_v61  ;;  %6389 = vmatmul.msk.f32.gmra.mxu0 %vm1014_vm2, %v12160_v61  ;;  %v12163_v7 = vld [vmem:[#allocation47_spill] sm:$0xff] }
 0x53a   : > { %4046 = vmatmul.bf16.gmra.mxu1 %v12161_v0 }
 0x53c   : > { %v3694_v16 = vpop.f32.mrf.mxu3 }
 0x53d   : > { %v3695_v60 = vadd.f32 %v3694_v16, %v10150_v44  ;;  %v6826_v16 = vld [vmem:[%s11396_s10 + $0x150] sm:$0xff] }
 0x53e   : > { %v3619_v58 = vpop.f32.mrf.mxu2  ;;  %v10190_v13 = vpop.f32.mrf.mxu0  ;;  %4400 = vmatpush.bf16.msra.mxu3 %v6826_v16  ;;  %v12166_v16 = vld [vmem:[#allocation49_spill] sm:$0xff] }
 0x53f   : > { %v10192_v32 = vmul.f32 %v4007_v12, %v3695_v60  ;;  %v10195_v1 = vadd.f32 %v3619_v58, %v9938_v29  ;;  %v4009_v4 = vpop.f32.mrf.mxu1  ;;  %v6834_v60 = vld [vmem:[%s11396_s10 + $0x190] sm:$0xff] }
 0x540   : > { %4489 = vmatpush.bf16.msra.mxu0 %v6834_v60 }
 0x541   : > { %12162 = vst [vmem:[#allocation66_spill] sm:$0xff] %v10195_v1  ;;  %6358 = vmatmul.msk.f32.gmra.mxu3 %vm1014_vm2, %v12163_v7  ;;  %6390 = vmatmul.msk.f32.gmra.mxu0 %vm1014_vm2, %v12163_v7  ;;  %v12168_v7 = vld [vmem:[#allocation56_spill] sm:$0xff] }
 0x543   : > { %4095 = vmatmul.bf16.gmra.mxu2 %v12100_v14 }
 0x544   : > { %v3697_v12 = vpop.f32.mrf.mxu3 }
 0x545   : > { %v3698_v29 = vadd.f32 %v3697_v12, %v10150_v44 }
 0x546   : > { %v3622_v58 = vpop.f32.mrf.mxu2  ;;  %v10209_v1 = vpop.f32.mrf.mxu0 }
 0x547   : > { %v10211_v57 = vmul.f32 %v4009_v4, %v3698_v29  ;;  %v10214_v14 = vadd.f32 %v3622_v58, %v9949_v42  ;;  %v4012_v21 = vpop.f32.mrf.mxu1 }
 0x549   : > { %12164 = vst [vmem:[#allocation21_spill] sm:$0xff] %v10214_v14  ;;  %6359 = vmatmul.msk.f32.gmra.mxu3 %vm1014_vm2, %v12165_v3  ;;  %6391 = vmatmul.msk.f32.gmra.mxu0 %vm1014_vm2, %v12165_v3 }
 0x54a   : > { %4051 = vmatmul.bf16.gmra.mxu1 %v12166_v16 }
 0x54c   : > { %v3700_v60 = vpop.f32.mrf.mxu3 }
 0x54d   : > { %v3701_v18 = vadd.f32 %v3700_v60, %v10150_v44 }
 0x54e   : > { %v3624_v4 = vpop.f32.mrf.mxu2  ;;  %v10224_v29 = vpop.f32.mrf.mxu0 }
 0x54f   : > { %v10226_v42 = vmul.f32 %v4012_v21, %v3701_v18  ;;  %v10229_v58 = vadd.f32 %v3624_v4, %v9968_v22  ;;  %v4014_v14 = vpop.f32.mrf.mxu1  ;;  %v12170_v4 = vld [vmem:[#allocation59_spill] sm:$0xff] }
 0x551   : > { %12167 = vst [vmem:[#allocation65_spill] sm:$0xff] %v10229_v58  ;;  %6360 = vmatmul.msk.f32.gmra.mxu3 %vm1014_vm2, %v12168_v7  ;;  %6392 = vmatmul.msk.f32.gmra.mxu0 %vm1014_vm2, %v12168_v7 }
 0x553   : > { %4100 = vmatmul.bf16.gmra.mxu2 %v12108_v24  ;;  %v12171_v24 = vld [vmem:[#allocation50_spill] sm:$0xff] }
 0x554   : > { %v3703_v12 = vpop.f32.mrf.mxu3 }
 0x555   : > { %v3704_v60 = vadd.f32 %v3703_v12, %v10150_v44 }
 0x556   : > { %v3627_v3 = vpop.f32.mrf.mxu2  ;;  %v10237_v61 = vpop.f32.mrf.mxu0 }
 0x557   : > { %v10239_v18 = vmul.f32 %v4014_v14, %v3704_v60  ;;  %v10242_v21 = vadd.f32 %v3627_v3, %v9979_v26  ;;  %v4017_v22 = vpop.f32.mrf.mxu1 }
 0x559   : > { %12169 = vst [vmem:[#allocation58_spill] sm:$0xff] %v10242_v21  ;;  %6361 = vmatmul.msk.f32.gmra.mxu3 %vm1014_vm2, %v12170_v4  ;;  %6393 = vmatmul.msk.f32.gmra.mxu0 %vm1014_vm2, %v12170_v4  ;;  %v12175_v4 = vld [vmem:[#allocation67_spill] sm:$0xff] }
 0x55a   : > { %4056 = vmatmul.bf16.gmra.mxu1 %v12171_v24 }
 0x55c   : > { %v3706_v12 = vpop.f32.mrf.mxu3 }
 0x55d   : > { %v3707_v7 = vadd.f32 %v3706_v12, %v10150_v44  ;;  %v6825_v12 = vld [vmem:[%s11396_s10 + $0x148] sm:$0xff] }
 0x55e   : > { %v3629_v14 = vpop.f32.mrf.mxu2  ;;  %v10252_v60 = vpop.f32.mrf.mxu0  ;;  %4401 = vmatpush.bf16.msra.mxu3 %v6825_v12  ;;  %v12176_v12 = vld [vmem:[#allocation61_spill] sm:$0xff] }
 0x55f   : > { %v10254_v3 = vmul.f32 %v4017_v22, %v3707_v7  ;;  %v10257_v26 = vadd.f32 %v3629_v14, %v9998_v27  ;;  %v4019_v21 = vpop.f32.mrf.mxu1  ;;  %v6833_v7 = vld [vmem:[%s11396_s10 + $0x188] sm:$0xff] }
 0x560   : > { %4490 = vmatpush.bf16.msra.mxu0 %v6833_v7 }
 0x561   : > { %12172 = vst [vmem:[#allocation74_spill] sm:$0xff] %v10257_v26  ;;  %6362 = vmatmul.msk.f32.gmra.mxu3 %vm1014_vm2, %v12173_v50  ;;  %6394 = vmatmul.msk.f32.gmra.mxu0 %vm1014_vm2, %v12173_v50 }
 0x563   : > { %4105 = vmatmul.bf16.gmra.mxu2 %v12116_v34 }
 0x564   : > { %v3709_v22 = vpop.f32.mrf.mxu3 }
 0x565   : > { %v3710_v27 = vadd.f32 %v3709_v22, %v10150_v44 }
 0x566   : > { %v3632_v14 = vpop.f32.mrf.mxu2  ;;  %v10271_v58 = vpop.f32.mrf.mxu0 }
 0x567   : > { %v10273_v26 = vmul.f32 %v4019_v21, %v3710_v27  ;;  %v10276_v34 = vadd.f32 %v3632_v14, %v10009_v17  ;;  %v4022_v50 = vpop.f32.mrf.mxu1  ;;  %v4610_v27 = vld [vmem:[%s11391_s5 + $0xd0] sm:$0xff] }
 0x568   : > { %4745 = vmatpush.msra.mxu2 %v4610_v27  ;;  %v12178_v14 = vld [vmem:[#allocation71_spill] sm:$0xff] }
 0x569   : > { %12174 = vst [vmem:[#allocation68_spill] sm:$0xff] %v10276_v34  ;;  %6363 = vmatmul.msk.f32.gmra.mxu3 %vm1014_vm2, %v12175_v4  ;;  %6395 = vmatmul.msk.f32.gmra.mxu0 %vm1014_vm2, %v12175_v4 }
 0x56a   : > { %4061 = vmatmul.bf16.gmra.mxu1 %v12176_v12 }
 0x56c   : > { %v3712_v7 = vpop.f32.mrf.mxu3 }
 0x56d   : > { %v3713_v22 = vadd.f32 %v3712_v7, %v10150_v44 }
 0x56e   : > { %v3634_v10 = vpop.f32.mrf.mxu2  ;;  %v10285_v62 = vpop.f32.mrf.mxu0 }
 0x56f   : > { %v10288_v21 = vadd.f32 %v3634_v10, %v10028_v63  ;;  %v4024_v17 = vpop.f32.mrf.mxu1  ;;  %v4609_v63 = vld [vmem:[%s11391_s5 + $0xc8] sm:$0xff]  ;;  %v10305_v4 = vmul.f32 %v4022_v50, %v3713_v22 }
 0x570   : > { %4632 = vmatpush.msra.mxu1 %v4609_v63 }
 0x571   : > { %12177 = vst [vmem:[#allocation81_spill] sm:$0xff] %v10288_v21  ;;  %6364 = vmatmul.msk.f32.gmra.mxu3 %vm1014_vm2, %v12178_v14  ;;  %6396 = vmatmul.msk.f32.gmra.mxu0 %vm1014_vm2, %v12178_v14 }
 0x573   : > { %4110 = vmatmul.bf16.gmra.mxu2 %v12124_v56  ;;  %v12181_v56 = vld [vmem:[#allocation76_spill] sm:$0xff] }
 0x574   : > { %v3715_v10 = vpop.f32.mrf.mxu3 }
 0x575   : > { %v3716_v21 = vadd.f32 %v3715_v10, %v10150_v44  ;;  %v12182_v10 = vld [vmem:[#allocation69_spill] sm:$0xff] }
 0x576   : > { %v3637_v34 = vpop.f32.mrf.mxu2  ;;  %v10303_v27 = vpop.f32.mrf.mxu0 }
 0x577   : > { %12179 = vst [vmem:[#allocation23_spill] sm:$0xff] %v10303_v27  ;;  %v10307_v47 = vmul.f32 %v4024_v17, %v3716_v21  ;;  %v10310_v14 = vadd.f32 %v3637_v34, %v10039_v15  ;;  %v4027_v7 = vpop.f32.mrf.mxu1  ;;  %v6824_v17 = vld [vmem:[%s11396_s10 + $0x140] sm:$0xff] }
 0x578   : > { %4402 = vmatpush.bf16.msra.mxu3 %v6824_v17  ;;  %v4605_v17 = vld [vmem:[%s11391_s5 + $0x38] sm:$0xff] }
 0x579   : > { %12180 = vst [vmem:[#allocation75_spill] sm:$0xff] %v10310_v14  ;;  %6365 = vmatmul.msk.f32.gmra.mxu3 %vm1014_vm2, %v12181_v56  ;;  %6397 = vmatmul.msk.f32.gmra.mxu0 %vm1014_vm2, %v12181_v56 }
 0x57a   : > { %4066 = vmatmul.bf16.gmra.mxu1 %v12182_v10 }
 0x57c   : > { %v3718_v28 = vpop.f32.mrf.mxu3 }
 0x57d   : > { %v3719_v15 = vadd.f32 %v3718_v28, %v10150_v44  ;;  %v4607_v28 = vld [vmem:[%s11391_s5 + $0x80] sm:$0xff] }
 0x57e   : > { %v3639_v50 = vpop.f32.mrf.mxu2  ;;  %v10319_v22 = vpop.f32.mrf.mxu0  ;;  %4633 = vmatpush.msra.mxu1 %v4607_v28  ;;  %v12191_v28 = vld [vmem:[#allocation85_spill] sm:$0xff] }
 0x57f   : > { %12183 = vst [vmem:[#allocation25_spill] sm:$0xff] %v10319_v22  ;;  %v10322_v21 = vadd.f32 %v3639_v50, %v10058_v23  ;;  %v4029_v34 = vpop.f32.mrf.mxu1  ;;  %v6832_v23 = vld [vmem:[%s11396_s10 + $0x180] sm:$0xff] }
 0x580   : > { %4491 = vmatpush.bf16.msra.mxu0 %v6832_v23  ;;  %v12187_v23 = vld [vmem:[#allocation83_spill] sm:$0xff]  ;;  %4634 = vmatpush.msra.mxu1 %v4605_v17 }
 0x581   : > { %12184 = vst [vmem:[#allocation27_spill] sm:$0xff] %v10322_v21  ;;  %6366 = vmatmul.msk.f32.gmra.mxu3 %vm1014_vm2, %v11975_v48  ;;  %6398 = vmatmul.msk.f32.gmra.mxu0 %vm1014_vm2, %v11975_v48 }
 0x583   : > { %4115 = vmatmul.bf16.gmra.mxu2 %v12132_v19  ;;  %v10342_v19 = vmul.f32 %v4027_v7, %v3719_v15 }
 0x584   : > { %v3721_v50 = vpop.f32.mrf.mxu3 }
 0x585   : > { %v3722_v63 = vadd.f32 %v3721_v50, %v10150_v44 }
 0x586   : > { %v3642_v21 = vpop.f32.mrf.mxu2  ;;  %v10337_v14 = vpop.f32.mrf.mxu0 }
 0x587   : > { %12185 = vst [vmem:[#allocation29_spill] sm:$0xff] %v10337_v14  ;;  %v10344_v48 = vmul.f32 %v4029_v34, %v3722_v63  ;;  %v10347_v56 = vadd.f32 %v3642_v21, %v10069_v53  ;;  %v4032_v22 = vpop.f32.mrf.mxu1  ;;  %v12188_v63 = vld [vmem:[#allocation77_spill] sm:$0xff] }
 0x589   : > { %12186 = vst [vmem:[#allocation134_spill] sm:$0xff] %v10347_v56  ;;  %6367 = vmatmul.msk.f32.gmra.mxu3 %vm1014_vm2, %v12187_v23  ;;  %6399 = vmatmul.msk.f32.gmra.mxu0 %vm1014_vm2, %v12187_v23 }
 0x58a   : > { %4071 = vmatmul.bf16.gmra.mxu1 %v12188_v63  ;;  %v12194_v63 = vld [vmem:[#allocation89_spill] sm:$0xff] }
 0x58c   : > { %v3724_v53 = vpop.f32.mrf.mxu3 }
 0x58d   : > { %v3725_v56 = vadd.f32 %v3724_v53, %v10150_v44  ;;  %v12195_v53 = vld [vmem:[#allocation84_spill] sm:$0xff] }
 0x58e   : > { %v3644_v21 = vpop.f32.mrf.mxu2  ;;  %v10359_v34 = vpop.f32.mrf.mxu0 }
 0x58f   : > { %12189 = vst [vmem:[#allocation131_spill] sm:$0xff] %v10359_v34  ;;  %v10362_v15 = vadd.f32 %v3644_v21, %v10088_v39  ;;  %v4034_v50 = vpop.f32.mrf.mxu1  ;;  %v10373_v34 = vmul.f32 %v4032_v22, %v3725_v56 }
 0x591   : > { %12190 = vst [vmem:[#allocation41_spill] sm:$0xff] %v10362_v15  ;;  %6368 = vmatmul.msk.f32.gmra.mxu3 %vm1014_vm2, %v12191_v28  ;;  %6400 = vmatmul.msk.f32.gmra.mxu0 %vm1014_vm2, %v12191_v28 }
 0x593   : > { %4120 = vmatmul.bf16.gmra.mxu2 %v12140_v2 }
 0x594   : > { %v3727_v7 = vpop.f32.mrf.mxu3 }
 0x595   : > { %v3728_v17 = vadd.f32 %v3727_v7, %v10150_v44  ;;  %v6653_v7 = vld [vmem:[%s11395_s9 + $0x214] sm:$0xf] }
 0x596   : > { %v3647_v23 = vpop.f32.mrf.mxu2  ;;  %v10371_v14 = vpop.f32.mrf.mxu0 }
 0x597   : > { %12192 = vst [vmem:[#allocation9_spill] sm:$0xff] %v10371_v14  ;;  %v10375_v39 = vmul.f32 %v4034_v50, %v3728_v17  ;;  %v10378_v21 = vadd.f32 %v3647_v23, %v10099_v11  ;;  %v4037_v15 = vpop.f32.mrf.mxu1  ;;  %v12198_v23 = vld [vmem:[#allocation93_spill] sm:$0xff] }
 0x599   : > { %12193 = vst [vmem:[#allocation31_spill] sm:$0xff] %v10378_v21  ;;  %6369 = vmatmul.msk.f32.gmra.mxu3 %vm1014_vm2, %v12194_v63  ;;  %6401 = vmatmul.msk.f32.gmra.mxu0 %vm1014_vm2, %v12194_v63 }
 0x59a   : > { %4076 = vmatmul.bf16.gmra.mxu1 %v12195_v53 }
 0x59c   : > { %v3730_v2 = vpop.f32.mrf.mxu3 }
 0x59d   : > { %v3731_v17 = vadd.f32 %v3730_v2, %v10150_v44  ;;  %v6655_v2 = vld [vmem:[%s11395_s9 + $0x238] sm:$0xf0] }
 0x59e   : > { %v3649_v56 = vpop.f32.mrf.mxu2  ;;  %v10387_v22 = vpop.f32.mrf.mxu0 }
 0x59f   : > { %12196 = vst [vmem:[#allocation54_spill] sm:$0xff] %v10387_v22  ;;  %v10390_v50 = vadd.f32 %v3649_v56, %v10112_v51  ;;  %v4039_v11 = vpop.f32.mrf.mxu1  ;;  %v6855_v51 = vld [vmem:[%s11395_s9 + $0x234] sm:$0xf0]  ;;  %v10413_v22 = vmul.f32 %v4037_v15, %v3731_v17 }
 0x5a0   : > { %v6854_v56 = vld [vmem:[%s11395_s9 + $0x218] sm:$0xf]  ;;  %v6654_v21 = vor.u32 %v6855_v51, %v6653_v7  ;;  %v12199_v7 = vpack.c.bf16 %v10177_v33, %v10158_v46 }
 0x5a1   : > { %12197 = vst [vmem:[#allocation52_spill] sm:$0xff] %v10390_v50  ;;  %6370 = vmatmul.msk.f32.gmra.mxu3 %vm1014_vm2, %v12198_v23  ;;  %6402 = vmatmul.msk.f32.gmra.mxu0 %vm1014_vm2, %v12198_v23  ;;  %v6658_v23 = vor.u32 %v6854_v56, %v6655_v2 }
 0x5a2   : > { %4941 = vmatpush.bf16.msrb.mxu3 %v6654_v21 }
 0x5a3   : > { %4125 = vmatmul.bf16.gmra.mxu2 %v12148_v59  ;;  %5030 = vmatpush.bf16.msrb.mxu0 %v6658_v23 }
 0x5a4   : > { %v3733_v50 = vpop.f32.mrf.mxu3 }
 0x5a5   : > { %v3734_v59 = vadd.f32 %v3733_v50, %v10150_v44 }
 0x5a6   : > { %v3652_v63 = vpop.f32.mrf.mxu2  ;;  %v10411_v28 = vpop.f32.mrf.mxu0 }
 0x5a7   : > { %v10415_v14 = vmul.f32 %v4039_v11, %v3734_v59  ;;  %v10418_v53 = vadd.f32 %v3652_v63, %v10123_v43  ;;  %v4042_v27 = vpop.f32.mrf.mxu1  ;;  %v4608_v63 = vld [vmem:[%s11391_s5 + $0x88] sm:$0xff] }
 0x5a8   : > { %4746 = vmatpush.msra.mxu2 %v4608_v63 }
 0x5a9   : > { %4403 = vmatmul.bf16.vlgmr.msra.gmra.mxu3 %v12199_v7  ;;  %v10447_v7 = vperm.slane %v10143_v54, 1 }
 0x5aa   : > { %6531 = vmatmul.msk.f32.vlgmr.msra.gmra.mxu1 %vm1014_vm2, %v12092_v8 }
 0x5ac   : > { %v3736_v21 = vpop.f32.mrf.mxu3 }
 0x5ad   : > { %v3737_v46 = vadd.f32 %v3736_v21, %v10150_v44 }
 0x5ae   : > { %v3654_v15 = vpop.f32.mrf.mxu2  ;;  %v10427_v17 = vpop.f32.mrf.mxu0 }
 0x5af   : > { %v10430_v59 = vadd.f32 %v3654_v15, %v10152_v31  ;;  %v4044_v43 = vpop.f32.mrf.mxu1  ;;  %v10442_v51 = vmul.f32 %v4042_v27, %v3737_v46  ;;  %v12201_v15 = vpack.c.bf16 %v10211_v57, %v10192_v32  ;;  %v3802_v27 = vadd.f32 %v10135_v40, %v10447_v7  ;;  %v6645_v40 = vld [vmem:[%s11395_s9 + $0x1cc] sm:$0xf] }
 0x5b1   : > { %12200 = vst [vmem:[#allocation99_spill] sm:$0xff] %v10430_v59  ;;  %v12202_v59 = vpack.c.bf16 %v10239_v18, %v10226_v42 }
 0x5b2   : > { %6532 = vmatmul.msk.f32.gmra.mxu1 %vm1014_vm2, %v12094_v30 }
 0x5b3   : > { %4130 = vmatmul.bf16.gmra.mxu2 %v12156_v6 }
 0x5b4   : > { %v3739_v33 = vpop.f32.mrf.mxu3 }
 0x5b5   : > { %v3740_v11 = vadd.f32 %v3739_v33, %v10150_v44 }
 0x5b6   : > { %v10440_v23 = vpop.f32.mrf.mxu0  ;;  %v4091_v31 = vpop.f32.mrf.mxu2 }
 0x5b7   : > { %v10444_v56 = vmul.f32 %v4044_v43, %v3740_v11  ;;  %v4047_v2 = vpop.f32.mrf.mxu1  ;;  %v3805_v43 = vadd.f32 %v10156_v20, %v10447_v7  ;;  %v4172_v54 = vmul.f32 %v4091_v31, %v3802_v27  ;;  %v6853_v20 = vld [vmem:[%s11395_s9 + $0x1ec] sm:$0xf0] }
 0x5b8   : > { %v6852_v31 = vld [vmem:[%s11395_s9 + $0x1d0] sm:$0xf]  ;;  %v6646_v27 = vor.u32 %v6853_v20, %v6645_v40 }
 0x5b9   : > { %4408 = vmatmul.bf16.gmra.mxu3 %v12201_v15 }
 0x5ba   : > { %6533 = vmatmul.msk.f32.gmra.mxu1 %vm1014_vm2, %v12099_v38  ;;  %4942 = vmatpush.bf16.msrb.mxu3 %v6646_v27 }
 0x5bc   : > { %v3742_v63 = vpop.f32.mrf.mxu3 }
 0x5bd   : > { %v3743_v32 = vadd.f32 %v3742_v63, %v10150_v44  ;;  %v6647_v63 = vld [vmem:[%s11395_s9 + $0x1f0] sm:$0xf0] }
 0x5be   : > { %v4093_v46 = vpop.f32.mrf.mxu2  ;;  %v10460_v50 = vpop.f32.mrf.mxu0 }
 0x5bf   : > { %v4049_v33 = vpop.f32.mrf.mxu1  ;;  %v4174_v11 = vmul.f32 %v4093_v46, %v3805_v43  ;;  %v6650_v46 = vor.u32 %v6852_v31, %v6647_v63 }
 0x5c1   : > { %v4236_v57 = vpack.c.bf16 %v4174_v11, %v4172_v54  ;;  %v10479_v11 = vmul.f32 %v4047_v2, %v3743_v32  ;;  %5031 = vmatpush.bf16.msrb.mxu0 %v6650_v46  ;;  %v3808_v2 = vadd.f32 %v10175_v25, %v10447_v7 }
 0x5c2   : > { %6534 = vmatmul.msk.f32.gmra.mxu1 %vm1014_vm2, %v12102_v35 }
 0x5c3   : > { %4135 = vmatmul.bf16.gmra.mxu2 %v12161_v0  ;;  %4492 = vmatmul.bf16.vlgmr.msra.gmra.mxu0 %v4236_v57 }
 0x5c4   : > { %v3745_v15 = vpop.f32.mrf.mxu3 }
 0x5c5   : > { %v3746_v43 = vadd.f32 %v3745_v15, %v10150_v44 }
 0x5c6   : > { %v4096_v54 = vpop.f32.mrf.mxu2  ;;  %v10488_v20 = vpop.f32.mrf.mxu0 }
 0x5c7   : > { %v10481_v57 = vmul.f32 %v4049_v33, %v3746_v43  ;;  %v4052_v21 = vpop.f32.mrf.mxu1  ;;  %v3811_v33 = vadd.f32 %v10190_v13, %v10447_v7  ;;  %v4176_v15 = vmul.f32 %v4096_v54, %v3808_v2 }
 0x5c9   : > { %4413 = vmatmul.bf16.gmra.mxu3 %v12202_v59 }
 0x5ca   : > { %6535 = vmatmul.msk.f32.gmra.mxu1 %vm1014_vm2, %v12107_v55 }
 0x5cc   : > { %v3748_v31 = vpop.f32.mrf.mxu3 }
 0x5cd   : > { %v3749_v59 = vadd.f32 %v3748_v31, %v10150_v44 }
 0x5ce   : > { %v4098_v32 = vpop.f32.mrf.mxu2  ;;  %v10500_v63 = vpop.f32.mrf.mxu0 }
 0x5cf   : > { %v4054_v27 = vpop.f32.mrf.mxu1  ;;  %v4178_v42 = vmul.f32 %v4098_v32, %v3811_v33  ;;  %v10503_v13 = vmul.f32 %v4052_v21, %v3749_v59  ;;  %v12203_v33 = vpack.c.bf16 %v10273_v26, %v10254_v3  ;;  %v3817_v21 = vadd.f32 %v10224_v29, %v10447_v7  ;;  %v6851_v29 = vld [vmem:[%s11395_s9 + $0x1a4] sm:$0xf0] }
 0x5d1   : > { %v4238_v18 = vpack.c.bf16 %v4178_v42, %v4176_v15  ;;  %v3814_v15 = vadd.f32 %v10209_v1, %v10447_v7  ;;  %v6637_v1 = vld [vmem:[%s11395_s9 + $0x184] sm:$0xf] }
 0x5d2   : > { %6536 = vmatmul.msk.f32.gmra.mxu1 %vm1014_vm2, %v12110_v52 }
 0x5d3   : > { %4140 = vmatmul.bf16.gmra.mxu2 %v12166_v16  ;;  %4497 = vmatmul.bf16.gmra.mxu0 %v4238_v18  ;;  %v12217_v16 = vpack.c.bf16 %v10444_v56, %v10442_v51 }
 0x5d4   : > { %v3751_v43 = vpop.f32.mrf.mxu3 }
 0x5d5   : > { %v3752_v25 = vadd.f32 %v3751_v43, %v10150_v44 }
 0x5d6   : > { %v4101_v46 = vpop.f32.mrf.mxu2 }
 0x5d7   : > { %v10505_v54 = vmul.f32 %v4054_v27, %v3752_v25  ;;  %v4057_v2 = vpop.f32.mrf.mxu1  ;;  %v10518_v27 = vpop.f32.mrf.mxu0  ;;  %v4180_v18 = vmul.f32 %v4101_v46, %v3814_v15  ;;  %v6850_v25 = vld [vmem:[%s11395_s9 + $0x188] sm:$0xf] }
 0x5d9   : > { %4418 = vmatmul.bf16.gmra.mxu3 %v12203_v33  ;;  %v6638_v33 = vor.u32 %v6851_v29, %v6637_v1  ;;  %v12204_v1 = vpack.c.bf16 %v10307_v47, %v10305_v4  ;;  %v4606_v47 = vld [vmem:[%s11391_s5 + $0x40] sm:$0xff] }
 0x5da   : > { %6537 = vmatmul.msk.f32.gmra.mxu1 %vm1014_vm2, %v12115_v45  ;;  %4747 = vmatpush.msra.mxu2 %v4606_v47  ;;  %v12210_v29 = vld [vmem:[#allocation77_spill] sm:$0xff] }
 0x5db   : > { %4943 = vmatpush.bf16.msrb.mxu3 %v6638_v33 }
 0x5dc   : > { %v3754_v32 = vpop.f32.mrf.mxu3 }
 0x5dd   : > { %v3755_v43 = vadd.f32 %v3754_v32, %v10150_v44  ;;  %v6639_v32 = vld [vmem:[%s11395_s9 + $0x1a8] sm:$0xf0] }
 0x5de   : > { %v4103_v42 = vpop.f32.mrf.mxu2 }
 0x5df   : > { %v4059_v59 = vpop.f32.mrf.mxu1  ;;  %v4182_v3 = vmul.f32 %v4103_v42, %v3817_v21  ;;  %v6642_v21 = vor.u32 %v6850_v25, %v6639_v32  ;;  %v10541_v31 = vpop.f32.mrf.mxu0 }
 0x5e1   : > { %v4240_v26 = vpack.c.bf16 %v4182_v3, %v4180_v18  ;;  %v10537_v18 = vmul.f32 %v4057_v2, %v3755_v43  ;;  %5032 = vmatpush.bf16.msrb.mxu0 %v6642_v21  ;;  %v3820_v2 = vadd.f32 %v10237_v61, %v10447_v7 }
 0x5e2   : > { %6538 = vmatmul.msk.f32.gmra.mxu1 %vm1014_vm2, %v12118_v37 }
 0x5e3   : > { %4145 = vmatmul.bf16.gmra.mxu2 %v12171_v24  ;;  %4502 = vmatmul.bf16.gmra.mxu0 %v4240_v26 }
 0x5e4   : > { %v3757_v46 = vpop.f32.mrf.mxu3 }
 0x5e5   : > { %v3758_v15 = vadd.f32 %v3757_v46, %v10150_v44 }
 0x5e6   : > { %v4106_v42 = vpop.f32.mrf.mxu2 }
 0x5e7   : > { %v10539_v3 = vmul.f32 %v4059_v59, %v3758_v15  ;;  %v4062_v26 = vpop.f32.mrf.mxu1  ;;  %v3823_v59 = vadd.f32 %v10252_v60, %v10447_v7  ;;  %v4184_v46 = vmul.f32 %v4106_v42, %v3820_v2  ;;  %v10557_v15 = vpop.f32.mrf.mxu0 }
 0x5e9   : > { %4423 = vmatmul.bf16.gmra.mxu3 %v12204_v1 }
 0x5ea   : > { %6539 = vmatmul.msk.f32.gmra.mxu1 %vm1014_vm2, %v12123_v9 }
 0x5ec   : > { %v3760_v25 = vpop.f32.mrf.mxu3 }
 0x5ed   : > { %v3761_v61 = vadd.f32 %v3760_v25, %v10150_v44 }
 0x5ee   : > { %v4108_v43 = vpop.f32.mrf.mxu2 }
 0x5ef   : > { %v4064_v33 = vpop.f32.mrf.mxu1  ;;  %v4186_v32 = vmul.f32 %v4108_v43, %v3823_v59  ;;  %v10564_v1 = vmul.f32 %v4062_v26, %v3761_v61  ;;  %v12205_v43 = vpack.c.bf16 %v10344_v48, %v10342_v19  ;;  %v10575_v25 = vpop.f32.mrf.mxu0  ;;  %v3826_v26 = vadd.f32 %v10271_v58, %v10447_v7  ;;  %v6629_v58 = vld [vmem:[%s11395_s9 + $0x13c] sm:$0xf] }
 0x5f1   : > { %v4242_v4 = vpack.c.bf16 %v4186_v32, %v4184_v46 }
 0x5f2   : > { %6540 = vmatmul.msk.f32.gmra.mxu1 %vm1014_vm2, %v12126_v36 }
 0x5f3   : > { %4150 = vmatmul.bf16.gmra.mxu2 %v12176_v12  ;;  %4507 = vmatmul.bf16.gmra.mxu0 %v4242_v4  ;;  %v6621_v12 = vld [vmem:[%s11395_s9 + $0xf4] sm:$0xf] }
 0x5f4   : > { %v3763_v60 = vpop.f32.mrf.mxu3 }
 0x5f5   : > { %v3764_v21 = vadd.f32 %v3763_v60, %v10150_v44 }
 0x5f6   : > { %v4111_v42 = vpop.f32.mrf.mxu2 }
 0x5f7   : > { %v10566_v2 = vmul.f32 %v4064_v33, %v3764_v21  ;;  %v4067_v59 = vpop.f32.mrf.mxu1  ;;  %v3829_v33 = vadd.f32 %v10285_v62, %v10447_v7  ;;  %v4188_v4 = vmul.f32 %v4111_v42, %v3826_v26  ;;  %v6849_v62 = vld [vmem:[%s11395_s9 + $0x15c] sm:$0xf0] }
 0x5f8   : > { %v6848_v21 = vld [vmem:[%s11395_s9 + $0x140] sm:$0xf] }
 0x5f9   : > { %4428 = vmatmul.bf16.gmra.mxu3 %v12205_v43  ;;  %v6630_v43 = vor.u32 %v6849_v62, %v6629_v58  ;;  %v12206_v58 = vpack.c.bf16 %v10375_v39, %v10373_v34 }
 0x5fa   : > { %6541 = vmatmul.msk.f32.gmra.mxu1 %vm1014_vm2, %v12131_v41 }
 0x5fb   : > { %4944 = vmatpush.bf16.msrb.mxu3 %v6630_v43 }
 0x5fc   : > { %v3766_v32 = vpop.f32.mrf.mxu3 }
 0x5fd   : > { %v3767_v60 = vadd.f32 %v3766_v32, %v10150_v44  ;;  %v6631_v32 = vld [vmem:[%s11395_s9 + $0x160] sm:$0xf0] }
 0x5fe   : > { %v4113_v47 = vpop.f32.mrf.mxu2 }
 0x5ff   : > { %v4069_v61 = vpop.f32.mrf.mxu1  ;;  %v4190_v48 = vmul.f32 %v4113_v47, %v3829_v33  ;;  %v6634_v33 = vor.u32 %v6848_v21, %v6631_v32  ;;  %v10598_v47 = vpop.f32.mrf.mxu0 }
 0x601   : > { %v4244_v19 = vpack.c.bf16 %v4190_v48, %v4188_v4  ;;  %v10600_v48 = vmul.f32 %v4067_v59, %v3767_v60  ;;  %5033 = vmatpush.bf16.msrb.mxu0 %v6634_v33  ;;  %v12208_v59 = vld [vmem:[#allocation25_spill] sm:$0xff] }
 0x602   : > { %6542 = vmatmul.msk.f32.gmra.mxu1 %vm1014_vm2, %v12134_v49 }
 0x603   : > { %4155 = vmatmul.bf16.gmra.mxu2 %v12182_v10  ;;  %4512 = vmatmul.bf16.gmra.mxu0 %v4244_v19 }
 0x604   : > { %v3769_v42 = vpop.f32.mrf.mxu3 }
 0x605   : > { %v3770_v26 = vadd.f32 %v3769_v42, %v10150_v44  ;;  %v12207_v42 = vld [vmem:[#allocation23_spill] sm:$0xff] }
 0x606   : > { %v4116_v4 = vpop.f32.mrf.mxu2  ;;  %v3832_v43 = vadd.f32 %v12207_v42, %v10447_v7 }
 0x607   : > { %v10602_v19 = vmul.f32 %v4069_v61, %v3770_v26  ;;  %v4072_v46 = vpop.f32.mrf.mxu1  ;;  %v3835_v61 = vadd.f32 %v12208_v59, %v10447_v7  ;;  %v10615_v33 = vpop.f32.mrf.mxu0 }
 0x608   : > { %v4192_v32 = vmul.f32 %v4116_v4, %v3832_v43  ;;  %v12211_v43 = vpack.c.bf16 %v10415_v14, %v10413_v22 }
 0x609   : > { %4433 = vmatmul.bf16.gmra.mxu3 %v12206_v58  ;;  %v12209_v58 = vld [vmem:[#allocation30_spill] sm:$0xff] }
 0x60a   : > { %6543 = vmatmul.msk.f32.gmra.mxu1 %vm1014_vm2, %v12139_v5 }
 0x60c   : > { %v3772_v21 = vpop.f32.mrf.mxu3 }
 0x60d   : > { %v3773_v62 = vadd.f32 %v3772_v21, %v10150_v44  ;;  %v12212_v21 = vld [vmem:[#allocation32_spill] sm:$0xff] }
 0x60e   : > { %v4118_v60 = vpop.f32.mrf.mxu2 }
 0x60f   : > { %v4194_v26 = vmul.f32 %v4118_v60, %v3835_v61  ;;  %v4074_v39 = vpop.f32.mrf.mxu1  ;;  %v10622_v59 = vmul.f32 %v4072_v46, %v3773_v62  ;;  %v10631_v60 = vpop.f32.mrf.mxu0  ;;  %v12214_v62 = vld [vmem:[#allocation131_spill] sm:$0xff] }
 0x611   : > { %v4246_v34 = vpack.c.bf16 %v4194_v26, %v4192_v32 }
 0x612   : > { %6544 = vmatmul.msk.f32.gmra.mxu1 %vm1014_vm2, %v12209_v58 }
 0x613   : > { %4160 = vmatmul.bf16.gmra.mxu2 %v12210_v29  ;;  %4517 = vmatmul.bf16.gmra.mxu0 %v4246_v34  ;;  %v3841_v34 = vadd.f32 %v12214_v62, %v10447_v7  ;;  %v12216_v29 = vld [vmem:[#allocation84_spill] sm:$0xff] }
 0x614   : > { %v3775_v40 = vpop.f32.mrf.mxu3 }
 0x615   : > { %v3776_v42 = vadd.f32 %v3775_v40, %v10150_v44  ;;  %v12213_v40 = vld [vmem:[#allocation29_spill] sm:$0xff] }
 0x616   : > { %v4121_v10 = vpop.f32.mrf.mxu2  ;;  %v3838_v46 = vadd.f32 %v12213_v40, %v10447_v7  ;;  %v6847_v40 = vld [vmem:[%s11395_s9 + $0x114] sm:$0xf0] }
 0x617   : > { %v10624_v4 = vmul.f32 %v4074_v39, %v3776_v42  ;;  %v4077_v32 = vpop.f32.mrf.mxu1 }
 0x618   : > { %v4196_v42 = vmul.f32 %v4121_v10, %v3838_v46  ;;  %v6846_v10 = vld [vmem:[%s11395_s9 + $0xf8] sm:$0xf]  ;;  %v10652_v46 = vpop.f32.mrf.mxu0 }
 0x619   : > { %4438 = vmatmul.bf16.gmra.mxu3 %v12211_v43  ;;  %v12215_v43 = vld [vmem:[#allocation34_spill] sm:$0xff] }
 0x61a   : > { %6545 = vmatmul.msk.f32.gmra.mxu1 %vm1014_vm2, %v12212_v21 }
 0x61c   : > { %v3778_v26 = vpop.f32.mrf.mxu3 }
 0x61d   : > { %v3779_v61 = vadd.f32 %v3778_v26, %v10150_v44  ;;  %v6623_v26 = vld [vmem:[%s11395_s9 + $0x118] sm:$0xf0] }
 0x61e   : > { %v4123_v39 = vpop.f32.mrf.mxu2 }
 0x61f   : > { %v4198_v14 = vmul.f32 %v4123_v39, %v3841_v34  ;;  %v6622_v34 = vor.u32 %v6847_v40, %v6621_v12  ;;  %v12218_v40 = vld [vmem:[#allocation36_spill] sm:$0xff] }
 0x621   : > { %v4248_v22 = vpack.c.bf16 %v4198_v14, %v4196_v42  ;;  %v6626_v42 = vor.u32 %v6846_v10, %v6623_v26  ;;  %v4079_v14 = vpop.f32.mrf.mxu1  ;;  %4945 = vmatpush.bf16.msrb.mxu3 %v6622_v34  ;;  %v6871_v10 = vld [vmem:[%s11396_s10 + $0x238] sm:$0xff]  ;;  %v10676_v26 = vpop.f32.mrf.mxu0 }
 0x622   : > { %6546 = vmatmul.msk.f32.gmra.mxu1 %vm1014_vm2, %v12215_v43  ;;  %5432 = vmatpush.bf16.msrb.mxu2 %v6871_v10  ;;  %v12223_v10 = vld [vmem:[#allocation42_spill] sm:$0xff] }
 0x623   : > { %4165 = vmatmul.bf16.gmra.mxu2 %v12216_v29  ;;  %4522 = vmatmul.bf16.gmra.mxu0 %v4248_v22  ;;  %v10658_v29 = vmul.f32 %v4077_v32, %v3779_v61  ;;  %v12219_v61 = vld [vmem:[#allocation9_spill] sm:$0xff] }
 0x624   : > { %v3781_v62 = vpop.f32.mrf.mxu3  ;;  %5034 = vmatpush.bf16.msrb.mxu0 %v6626_v42  ;;  %v3844_v32 = vadd.f32 %v12219_v61, %v10447_v7  ;;  %v12221_v42 = vld [vmem:[#allocation38_spill] sm:$0xff] }
 0x625   : > { %v3782_v39 = vadd.f32 %v3781_v62, %v10150_v44  ;;  %v12220_v62 = vld [vmem:[#allocation54_spill] sm:$0xff] }
 0x626   : > { %v4126_v22 = vpop.f32.mrf.mxu2  ;;  %v3847_v34 = vadd.f32 %v12220_v62, %v10447_v7 }
 0x627   : > { %v10660_v24 = vmul.f32 %v4079_v14, %v3782_v39  ;;  %v4200_v51 = vmul.f32 %v4126_v22, %v3844_v32  ;;  %v6863_v14 = vld [vmem:[%s11396_s10 + $0x1f8] sm:$0xff]  ;;  %v12222_v22 = vpack.c.bf16 %v10481_v57, %v10479_v11  ;;  %v3850_v32 = vadd.f32 %v10411_v28, %v10447_v7  ;;  %v12224_v57 = vld [vmem:[#allocation47_spill] sm:$0xff] }
 0x628   : > { %5343 = vmatpush.bf16.msrb.mxu1 %v6863_v14  ;;  %v6845_v28 = vld [vmem:[%s11395_s9 + $0xcc] sm:$0xf0] }
 0x629   : > { %4443 = vmatmul.bf16.gmra.mxu3 %v12217_v16  ;;  %v10685_v12 = vpop.f32.mrf.mxu0 }
 0x62a   : > { %6547 = vmatmul.msk.f32.gmra.mxu1 %vm1014_vm2, %v12218_v40 }
 0x62c   : > { %v4404_v44 = vpop.f32.mrf.mxu3 }
 0x62e   : > { %v4128_v16 = vpop.f32.mrf.mxu2 }
 0x62f   : > { %v4202_v56 = vmul.f32 %v4128_v16, %v3847_v34  ;;  %v3853_v34 = vadd.f32 %v10427_v17, %v10447_v7  ;;  %v6844_v17 = vld [vmem:[%s11395_s9 + $0xb0] sm:$0xf] }
 0x631   : > { %v4250_v39 = vpack.c.bf16 %v4202_v56, %v4200_v51 }
 0x632   : > { %6548 = vmatmul.msk.f32.gmra.mxu1 %vm1014_vm2, %v12221_v42 }
 0x633   : > { %4527 = vmatmul.bf16.gmra.mxu0 %v4250_v39  ;;  %6563 = vmatmul.msk.f32.vlgmr.msra.gmra.mxu2 %vm1014_vm2, %v12092_v8 }
 0x634   : > { %v4406_v61 = vpop.f32.mrf.mxu3 }
 0x636   : > { %v4131_v62 = vpop.f32.mrf.mxu2 }
 0x637   : > { %v4204_v51 = vmul.f32 %v4131_v62, %v3850_v32  ;;  %v6615_v32 = vld [vmem:[%s11395_s9 + $0xd0] sm:$0xf0] }
 0x639   : > { %4448 = vmatmul.bf16.gmra.mxu3 %v12222_v22  ;;  %v12225_v22 = vld [vmem:[#allocation129_spill] sm:$0xff] }
 0x63a   : > { %6549 = vmatmul.msk.f32.gmra.mxu1 %vm1014_vm2, %v12223_v10 }
 0x63b   : > { %6564 = vmatmul.msk.f32.gmra.mxu2 %vm1014_vm2, %v12094_v30  ;;  %v6613_v30 = vld [vmem:[%s11395_s9 + $0xac] sm:$0xf] }
 0x63c   : > { %v4409_v8 = vpop.f32.mrf.mxu3  ;;  %v6614_v62 = vor.u32 %v6845_v28, %v6613_v30  ;;  %v6870_v30 = vld [vmem:[%s11396_s10 + $0x230] sm:$0xff] }
 0x63d   : > { %5433 = vmatpush.bf16.msrb.mxu2 %v6870_v30  ;;  %v12232_v30 = vld [vmem:[#allocation59_spill] sm:$0xff] }
 0x63e   : > { %v4133_v16 = vpop.f32.mrf.mxu2  ;;  %4946 = vmatpush.bf16.msrb.mxu3 %v6614_v62 }
 0x63f   : > { %v4206_v56 = vmul.f32 %v4133_v16, %v3853_v34  ;;  %v6618_v34 = vor.u32 %v6844_v17, %v6615_v32 }
 0x640   : > { %v4493_v39 = vpop.f32.mrf.mxu0 }
 0x641   : > { %v4252_v14 = vpack.c.bf16 %v4206_v56, %v4204_v51  ;;  %v4494_v11 = vadd.f32 %v4493_v39, %v4404_v44  ;;  %5035 = vmatpush.bf16.msrb.mxu0 %v6618_v34  ;;  %v12226_v56 = vpack.c.bf16 %v10505_v54, %v10503_v13  ;;  %v12227_v39 = vld [vmem:[#allocation51_spill] sm:$0xff]  ;;  %v3859_v13 = vadd.f32 %v10460_v50, %v10447_v7 }
 0x642   : > { %6550 = vmatmul.msk.f32.gmra.mxu1 %vm1014_vm2, %v12224_v57  ;;  %v6862_v50 = vld [vmem:[%s11396_s10 + $0x1f0] sm:$0xff] }
 0x643   : > { %v10701_v0 = vadd.f32 %v4494_v11, %v12225_v22  ;;  %4532 = vmatmul.bf16.gmra.mxu0 %v4252_v14  ;;  %6565 = vmatmul.msk.f32.gmra.mxu2 %vm1014_vm2, %v12099_v38  ;;  %v12228_v14 = vld [vmem:[#allocation40_spill] sm:$0xff] }
 0x644   : > { %v4411_v44 = vpop.f32.mrf.mxu3  ;;  %5344 = vmatpush.bf16.msrb.mxu1 %v6862_v50  ;;  %v12235_v50 = vld [vmem:[#allocation37_spill] sm:$0xff] }
 0x646   : > { %v4136_v38 = vpop.f32.mrf.mxu2 }
 0x648   : > { %v4495_v16 = vpop.f32.mrf.mxu0 }
 0x649   : > { %v4496_v51 = vadd.f32 %v4495_v16, %v4406_v61  ;;  %4453 = vmatmul.bf16.gmra.mxu3 %v12226_v56  ;;  %v3856_v61 = vadd.f32 %v10440_v23, %v10447_v7  ;;  %v12229_v16 = vld [vmem:[#allocation56_spill] sm:$0xff] }
 0x64a   : > { %6551 = vmatmul.msk.f32.gmra.mxu1 %vm1014_vm2, %v12227_v39 }
 0x64b   : > { %v10723_v11 = vadd.f32 %v4496_v51, %v12228_v14  ;;  %6566 = vmatmul.msk.f32.gmra.mxu2 %vm1014_vm2, %v12102_v35  ;;  %v4208_v28 = vmul.f32 %v4136_v38, %v3856_v61  ;;  %v12230_v35 = vld [vmem:[#allocation35_spill] sm:$0xff]  ;;  %v12233_v61 = vld [vmem:[#allocation132_spill] sm:$0xff] }
 0x64c   : > { %v4414_v22 = vpop.f32.mrf.mxu3 }
 0x64e   : > { %v4138_v54 = vpop.f32.mrf.mxu2 }
 0x64f   : > { %v4210_v17 = vmul.f32 %v4138_v54, %v3859_v13 }
 0x650   : > { %v4498_v62 = vpop.f32.mrf.mxu0 }
 0x651   : > { %v4254_v32 = vpack.c.bf16 %v4210_v17, %v4208_v28  ;;  %v4499_v34 = vadd.f32 %v4498_v62, %v4409_v8  ;;  %v12231_v8 = vpack.c.bf16 %v10539_v3, %v10537_v18  ;;  %v3862_v28 = vadd.f32 %v10488_v20, %v10447_v7  ;;  %v6605_v20 = vld [vmem:[%s11395_s9 + $0x64] sm:$0xf] }
 0x652   : > { %6552 = vmatmul.msk.f32.gmra.mxu1 %vm1014_vm2, %v12229_v16 }
 0x653   : > { %v10737_v51 = vadd.f32 %v4499_v34, %v12230_v35  ;;  %4537 = vmatmul.bf16.gmra.mxu0 %v4254_v32  ;;  %6567 = vmatmul.msk.f32.gmra.mxu2 %vm1014_vm2, %v12107_v55  ;;  %v10754_v55 = vpop.f32.mrf.mxu1  ;;  %v12234_v35 = vld [vmem:[#allocation64_spill] sm:$0xff] }
 0x654   : > { %v4416_v23 = vpop.f32.mrf.mxu3 }
 0x656   : > { %v4141_v38 = vpop.f32.mrf.mxu2 }
 0x657   : > { %v4212_v3 = vmul.f32 %v4141_v38, %v3862_v28 }
 0x658   : > { %v4500_v56 = vpop.f32.mrf.mxu0 }
 0x659   : > { %v4501_v14 = vadd.f32 %v4500_v56, %v4411_v44  ;;  %4458 = vmatmul.bf16.gmra.mxu3 %v12231_v8  ;;  %v3865_v44 = vadd.f32 %v10500_v63, %v10447_v7  ;;  %v6843_v63 = vld [vmem:[%s11395_s9 + $0x84] sm:$0xf0] }
 0x65a   : > { %6553 = vmatmul.msk.f32.gmra.mxu1 %vm1014_vm2, %v12232_v30  ;;  %v6606_v56 = vor.u32 %v6843_v63, %v6605_v20 }
 0x65b   : > { %v10750_v13 = vadd.f32 %v4501_v14, %v12233_v61  ;;  %6568 = vmatmul.msk.f32.gmra.mxu2 %vm1014_vm2, %v12110_v52  ;;  %v6607_v14 = vld [vmem:[%s11395_s9 + $0x88] sm:$0xf0] }
 0x65c   : > { %v4419_v54 = vpop.f32.mrf.mxu3  ;;  %4947 = vmatpush.bf16.msrb.mxu3 %v6606_v56 }
 0x65e   : > { %v4143_v18 = vpop.f32.mrf.mxu2 }
 0x65f   : > { %v4214_v17 = vmul.f32 %v4143_v18, %v3865_v44  ;;  %v12236_v18 = vpack.c.bf16 %v10566_v2, %v10564_v1  ;;  %v3871_v1 = vadd.f32 %v10541_v31, %v10447_v7  ;;  %v6861_v31 = vld [vmem:[%s11396_s10 + $0x1e8] sm:$0xff] }
 0x660   : > { %v4503_v62 = vpop.f32.mrf.mxu0  ;;  %5345 = vmatpush.bf16.msrb.mxu1 %v6861_v31 }
 0x661   : > { %v4256_v32 = vpack.c.bf16 %v4214_v17, %v4212_v3  ;;  %v4504_v34 = vadd.f32 %v4503_v62, %v4414_v22  ;;  %v6842_v22 = vld [vmem:[%s11395_s9 + $0x68] sm:$0xf]  ;;  %v12237_v3 = vld [vmem:[#allocation67_spill] sm:$0xff] }
 0x662   : > { %6554 = vmatmul.msk.f32.gmra.mxu1 %vm1014_vm2, %v12234_v35  ;;  %v6610_v8 = vor.u32 %v6842_v22, %v6607_v14  ;;  %v12238_v17 = vld [vmem:[#allocation46_spill] sm:$0xff]  ;;  %v12239_v14 = vld [vmem:[#allocation71_spill] sm:$0xff] }
 0x663   : > { %v10763_v52 = vadd.f32 %v4504_v34, %v12235_v50  ;;  %4542 = vmatmul.bf16.gmra.mxu0 %v4256_v32  ;;  %6569 = vmatmul.msk.f32.gmra.mxu2 %vm1014_vm2, %v12115_v45  ;;  %v10779_v45 = vpop.f32.mrf.mxu1  ;;  %v6869_v34 = vld [vmem:[%s11396_s10 + $0x228] sm:$0xff] }
 0x664   : > { %v4421_v38 = vpop.f32.mrf.mxu3  ;;  %5036 = vmatpush.bf16.msrb.mxu0 %v6610_v8  ;;  %5434 = vmatpush.bf16.msrb.mxu2 %v6869_v34  ;;  %v12240_v8 = vld [vmem:[#allocation7_spill] sm:$0xff]  ;;  %v12242_v34 = vld [vmem:[#allocation76_spill] sm:$0xff] }
 0x666   : > { %v4146_v61 = vpop.f32.mrf.mxu2 }
 0x668   : > { %v4505_v28 = vpop.f32.mrf.mxu0 }
 0x669   : > { %v4506_v44 = vadd.f32 %v4505_v28, %v4416_v23  ;;  %4463 = vmatmul.bf16.gmra.mxu3 %v12236_v18  ;;  %v3868_v23 = vadd.f32 %v10518_v27, %v10447_v7 }
 0x66a   : > { %6555 = vmatmul.msk.f32.gmra.mxu1 %vm1014_vm2, %v12237_v3 }
 0x66b   : > { %v10787_v62 = vadd.f32 %v4506_v44, %v12238_v17  ;;  %6570 = vmatmul.msk.f32.gmra.mxu2 %vm1014_vm2, %v12118_v37  ;;  %v4216_v50 = vmul.f32 %v4146_v61, %v3868_v23  ;;  %v10798_v63 = vpop.f32.mrf.mxu1  ;;  %v12243_v23 = vld [vmem:[#allocation44_spill] sm:$0xff] }
 0x66c   : > { %v4424_v32 = vpop.f32.mrf.mxu3 }
 0x66e   : > { %v4148_v2 = vpop.f32.mrf.mxu2 }
 0x66f   : > { %v4218_v20 = vmul.f32 %v4148_v2, %v3871_v1  ;;  %v3874_v2 = vadd.f32 %v10557_v15, %v10447_v7  ;;  %v6841_v15 = vld [vmem:[%s11395_s9 + $0x3c] sm:$0xf0] }
 0x670   : > { %v4508_v22 = vpop.f32.mrf.mxu0 }
 0x671   : > { %v4258_v56 = vpack.c.bf16 %v4218_v20, %v4216_v50  ;;  %v4509_v37 = vadd.f32 %v4508_v22, %v4419_v54  ;;  %v12241_v54 = vpack.c.bf16 %v10602_v19, %v10600_v48 }
 0x672   : > { %6556 = vmatmul.msk.f32.gmra.mxu1 %vm1014_vm2, %v12239_v14 }
 0x673   : > { %v10803_v28 = vadd.f32 %v4509_v37, %v12240_v8  ;;  %4547 = vmatmul.bf16.gmra.mxu0 %v4258_v56  ;;  %6571 = vmatmul.msk.f32.gmra.mxu2 %vm1014_vm2, %v12123_v9  ;;  %v10813_v17 = vpop.f32.mrf.mxu1  ;;  %v12244_v37 = vld [vmem:[#allocation79_spill] sm:$0xff]  ;;  %v12245_v8 = vld [vmem:[#allocation45_spill] sm:$0xff] }
 0x674   : > { %v4426_v27 = vpop.f32.mrf.mxu3 }
 0x676   : > { %v4151_v61 = vpop.f32.mrf.mxu2 }
 0x677   : > { %v4220_v19 = vmul.f32 %v4151_v61, %v3874_v2 }
 0x678   : > { %v4510_v44 = vpop.f32.mrf.mxu0 }
 0x679   : > { %v4511_v18 = vadd.f32 %v4510_v44, %v4421_v38  ;;  %4468 = vmatmul.bf16.gmra.mxu3 %v12241_v54  ;;  %v3877_v38 = vadd.f32 %v10575_v25, %v10447_v7  ;;  %v6840_v25 = vld [vmem:[%s11395_s9 + $0x20] sm:$0xf] }
 0x67a   : > { %6557 = vmatmul.msk.f32.gmra.mxu1 %vm1014_vm2, %v12242_v34 }
 0x67b   : > { %v10818_v9 = vadd.f32 %v4511_v18, %v12243_v23  ;;  %6572 = vmatmul.msk.f32.gmra.mxu2 %vm1014_vm2, %v12126_v36  ;;  %v6597_v36 = vld [vmem:[%s11395_s9 + $0x1c] sm:$0xf] }
 0x67c   : > { %v4429_v1 = vpop.f32.mrf.mxu3  ;;  %v6598_v44 = vor.u32 %v6841_v15, %v6597_v36 }
 0x67e   : > { %v4153_v48 = vpop.f32.mrf.mxu2  ;;  %4948 = vmatpush.bf16.msrb.mxu3 %v6598_v44  ;;  %v12250_v44 = vld [vmem:[#allocation85_spill] sm:$0xff] }
 0x67f   : > { %v4222_v50 = vmul.f32 %v4153_v48, %v3877_v38  ;;  %v12246_v38 = vpack.c.bf16 %v10624_v4, %v10622_v59  ;;  %v12247_v48 = vld [vmem:[#allocation83_spill] sm:$0xff]  ;;  %v3883_v59 = vadd.f32 %v10615_v33, %v10447_v7 }
 0x680   : > { %v4513_v20 = vpop.f32.mrf.mxu0 }
 0x681   : > { %v4260_v22 = vpack.c.bf16 %v4222_v50, %v4220_v19  ;;  %v4514_v56 = vadd.f32 %v4513_v20, %v4424_v32  ;;  %v10842_v32 = vpop.f32.mrf.mxu1  ;;  %v12248_v19 = vld [vmem:[#allocation53_spill] sm:$0xff] }
 0x682   : > { %6558 = vmatmul.msk.f32.gmra.mxu1 %vm1014_vm2, %v12244_v37 }
 0x683   : > { %v10829_v31 = vadd.f32 %v4514_v56, %v12245_v8  ;;  %4552 = vmatmul.bf16.gmra.mxu0 %v4260_v22  ;;  %6573 = vmatmul.msk.f32.gmra.mxu2 %vm1014_vm2, %v12131_v41  ;;  %v6599_v41 = vld [vmem:[%s11395_s9 + $0x40] sm:$0xf0] }
 0x684   : > { %v4431_v61 = vpop.f32.mrf.mxu3  ;;  %v6602_v18 = vor.u32 %v6840_v25, %v6599_v41  ;;  %v6868_v22 = vld [vmem:[%s11396_s10 + $0x220] sm:$0xff] }
 0x685   : > { %5435 = vmatpush.bf16.msrb.mxu2 %v6868_v22  ;;  %v12251_v41 = vld [vmem:[#allocation13_spill] sm:$0xff]  ;;  %v12255_v22 = vld [vmem:[#allocation11_spill] sm:$0xff] }
 0x686   : > { %v4156_v54 = vpop.f32.mrf.mxu2  ;;  %5037 = vmatpush.bf16.msrb.mxu0 %v6602_v18 }
 0x688   : > { %v4515_v23 = vpop.f32.mrf.mxu0 }
 0x689   : > { %v4516_v2 = vadd.f32 %v4515_v23, %v4426_v27  ;;  %4473 = vmatmul.bf16.gmra.mxu3 %v12246_v38  ;;  %v3880_v27 = vadd.f32 %v10598_v47, %v10447_v7  ;;  %v10864_v4 = vpop.f32.mrf.mxu1  ;;  %v6860_v47 = vld [vmem:[%s11396_s10 + $0x1e0] sm:$0xff]  ;;  %v12253_v38 = vpack.c.bf16 %v10660_v24, %v10658_v29 }
 0x68a   : > { %6559 = vmatmul.msk.f32.gmra.mxu1 %vm1014_vm2, %v12247_v48 }
 0x68b   : > { %v10853_v50 = vadd.f32 %v4516_v2, %v12248_v19  ;;  %6574 = vmatmul.msk.f32.gmra.mxu2 %vm1014_vm2, %v12134_v49  ;;  %v4224_v8 = vmul.f32 %v4156_v54, %v3880_v27  ;;  %5346 = vmatpush.bf16.msrb.mxu1 %v6860_v47  ;;  %v12254_v19 = vld [vmem:[#allocation89_spill] sm:$0xff] }
 0x68c   : > { %v4434_v20 = vpop.f32.mrf.mxu3 }
 0x68d   : > { %12249 = vst [vmem:[#allocation95_spill] sm:$0xff] %v10853_v50  ;;  %v12303_v50 = vld [vmem:[#allocation43_spill] sm:$0xff] }
 0x68e   : > { %v4158_v56 = vpop.f32.mrf.mxu2 }
 0x68f   : > { %v4226_v36 = vmul.f32 %v4158_v56, %v3883_v59  ;;  %v3886_v59 = vadd.f32 %v10631_v60, %v10447_v7 }
 0x690   : > { %v4518_v15 = vpop.f32.mrf.mxu0 }
 0x691   : > { %v4262_v25 = vpack.c.bf16 %v4226_v36, %v4224_v8  ;;  %v4519_v49 = vadd.f32 %v4518_v15, %v4429_v1  ;;  %v10876_v23 = vpop.f32.mrf.mxu1 }
 0x692   : > { %6560 = vmatmul.msk.f32.gmra.mxu1 %vm1014_vm2, %v12250_v44 }
 0x693   : > { %v10869_v18 = vadd.f32 %v4519_v49, %v12251_v41  ;;  %4557 = vmatmul.bf16.gmra.mxu0 %v4262_v25  ;;  %6575 = vmatmul.msk.f32.gmra.mxu2 %vm1014_vm2, %v12139_v5  ;;  %v12257_v49 = vld [vmem:[#allocation93_spill] sm:$0xff]  ;;  %v12258_v41 = vld [vmem:[#allocation48_spill] sm:$0xff] }
 0x694   : > { %v4436_v33 = vpop.f32.mrf.mxu3 }
 0x695   : > { %12252 = vst [vmem:[#allocation97_spill] sm:$0xff] %v10869_v18 }
 0x696   : > { %v4161_v54 = vpop.f32.mrf.mxu2 }
 0x697   : > { %v4228_v8 = vmul.f32 %v4161_v54, %v3886_v59  ;;  %v3895_v59 = vadd.f32 %v10685_v12, %v10447_v7 }
 0x698   : > { %v4520_v1 = vpop.f32.mrf.mxu0 }
 0x699   : > { %v4521_v2 = vadd.f32 %v4520_v1, %v4431_v61  ;;  %4478 = vmatmul.bf16.gmra.mxu3 %v12253_v38  ;;  %v3889_v61 = vadd.f32 %v10652_v46, %v10447_v7  ;;  %v10892_v25 = vpop.f32.mrf.mxu1  ;;  %v12260_v1 = vld [vmem:[#allocation96_spill] sm:$0xff] }
 0x69a   : > { %6561 = vmatmul.msk.f32.gmra.mxu1 %vm1014_vm2, %v12254_v19 }
 0x69b   : > { %v10884_v5 = vadd.f32 %v4521_v2, %v12255_v22  ;;  %6576 = vmatmul.msk.f32.gmra.mxu2 %vm1014_vm2, %v12209_v58  ;;  %v12261_v2 = vld [vmem:[#allocation62_spill] sm:$0xff]  ;;  %v6867_v22 = vld [vmem:[%s11396_s10 + $0x218] sm:$0xff] }
 0x69c   : > { %v4439_v27 = vpop.f32.mrf.mxu3  ;;  %5436 = vmatpush.bf16.msrb.mxu2 %v6867_v22 }
 0x69d   : > { %12256 = vst [vmem:[#allocation92_spill] sm:$0xff] %v10884_v5 }
 0x69e   : > { %v4163_v56 = vpop.f32.mrf.mxu2 }
 0x69f   : > { %v4230_v24 = vmul.f32 %v4163_v56, %v3889_v61 }
 0x6a0   : > { %v4523_v29 = vpop.f32.mrf.mxu0 }
 0x6a1   : > { %v4264_v36 = vpack.c.bf16 %v4230_v24, %v4228_v8  ;;  %v4524_v15 = vadd.f32 %v4523_v29, %v4434_v20 }
 0x6a2   : > { %6562 = vmatmul.msk.f32.gmra.mxu1 %vm1014_vm2, %v12257_v49 }
 0x6a3   : > { %v10897_v58 = vadd.f32 %v4524_v15, %v12258_v41  ;;  %4562 = vmatmul.bf16.gmra.mxu0 %v4264_v36  ;;  %6577 = vmatmul.msk.f32.gmra.mxu2 %vm1014_vm2, %v12212_v21  ;;  %v3892_v21 = vadd.f32 %v10676_v26, %v10447_v7  ;;  %v12263_v36 = vld [vmem:[#allocation60_spill] sm:$0xff] }
 0x6a4   : > { %v4441_v60 = vpop.f32.mrf.mxu3  ;;  %v6859_v26 = vld [vmem:[%s11396_s10 + $0x1d8] sm:$0xff] }
 0x6a5   : > { %12259 = vst [vmem:[#allocation15_spill] sm:$0xff] %v10897_v58  ;;  %5347 = vmatpush.bf16.msrb.mxu1 %v6859_v26 }
 0x6a6   : > { %v4166_v46 = vpop.f32.mrf.mxu2 }
 0x6a7   : > { %v4232_v61 = vmul.f32 %v4166_v46, %v3892_v21  ;;  %v12265_v46 = vld [vmem:[#allocation100_spill] sm:$0xff]  ;;  %v12268_v21 = vld [vmem:[#allocation17_spill] sm:$0xff] }
 0x6a8   : > { %v4525_v47 = vpop.f32.mrf.mxu0 }
 0x6a9   : > { %v4526_v54 = vadd.f32 %v4525_v47, %v4436_v33  ;;  %4949 = vmatmul.bf16.vlgmr.msrb.gmra.mxu3 %v12260_v1 }
 0x6ab   : > { %v10903_v20 = vadd.f32 %v4526_v54, %v12261_v2  ;;  %6578 = vmatmul.msk.f32.gmra.mxu2 %vm1014_vm2, %v12215_v43 }
 0x6ac   : > { %v4444_v38 = vpop.f32.mrf.mxu3 }
 0x6ad   : > { %12262 = vst [vmem:[#allocation55_spill] sm:$0xff] %v10903_v20 }
 0x6ae   : > { %v4168_v33 = vpop.f32.mrf.mxu2 }
 0x6af   : > { %v4234_v56 = vmul.f32 %v4168_v33, %v3895_v59 }
 0x6b0   : > { %v4528_v8 = vpop.f32.mrf.mxu0 }
 0x6b1   : > { %v4266_v24 = vpack.c.bf16 %v4234_v56, %v4232_v61  ;;  %v4529_v29 = vadd.f32 %v4528_v8, %v4439_v27  ;;  %v12266_v27 = vld [vmem:[#allocation57_spill] sm:$0xff]  ;;  %v10940_v61 = vpop.f32.mrf.mxu1 }
 0x6b2   : > { %v12270_v8 = vld [vmem:[#allocation105_spill] sm:$0xff] }
 0x6b3   : > { %v10915_v43 = vadd.f32 %v4529_v29, %v12263_v36  ;;  %4567 = vmatmul.bf16.gmra.mxu0 %v4266_v24  ;;  %6579 = vmatmul.msk.f32.gmra.mxu2 %vm1014_vm2, %v12218_v40  ;;  %v12271_v24 = vld [vmem:[#allocation66_spill] sm:$0xff] }
 0x6b4   : > { %v4446_v15 = vpop.f32.mrf.mxu3 }
 0x6b5   : > { %12264 = vst [vmem:[#allocation107_spill] sm:$0xff] %v10915_v43  ;;  %v12298_v43 = vld [vmem:[#allocation31_spill] sm:$0xff] }
 0x6b6   : > { %v10922_v7 = vpop.f32.mrf.mxu2 }
 0x6b8   : > { %v4530_v12 = vpop.f32.mrf.mxu0 }
 0x6b9   : > { %v4531_v41 = vadd.f32 %v4530_v12, %v4441_v60  ;;  %4954 = vmatmul.bf16.gmra.mxu3 %v12265_v46  ;;  %v10953_v12 = vpop.f32.mrf.mxu1 }
 0x6bb   : > { %v10926_v47 = vadd.f32 %v4531_v41, %v12266_v27  ;;  %6580 = vmatmul.msk.f32.gmra.mxu2 %vm1014_vm2, %v12221_v42 }
 0x6bc   : > { %v4449_v54 = vpop.f32.mrf.mxu3 }
 0x6bd   : > { %12267 = vst [vmem:[#allocation103_spill] sm:$0xff] %v10926_v47 }
 0x6be   : > { %v10930_v40 = vpop.f32.mrf.mxu2 }
 0x6c0   : > { %v4533_v2 = vpop.f32.mrf.mxu0 }
 0x6c1   : > { %v4534_v22 = vadd.f32 %v4533_v2, %v4444_v38 }
 0x6c3   : > { %v10933_v59 = vadd.f32 %v4534_v22, %v12268_v21  ;;  %6581 = vmatmul.msk.f32.gmra.mxu2 %vm1014_vm2, %v12223_v10  ;;  %5038 = vmatmul.bf16.vlgmr.msrb.gmra.mxu0 %v12260_v1  ;;  %v6866_v10 = vld [vmem:[%s11396_s10 + $0x210] sm:$0xff]  ;;  %v12275_v21 = vld [vmem:[#allocation108_spill] sm:$0xff] }
 0x6c4   : > { %v4451_v60 = vpop.f32.mrf.mxu3  ;;  %5437 = vmatpush.bf16.msrb.mxu2 %v6866_v10 }
 0x6c5   : > { %12269 = vst [vmem:[#allocation104_spill] sm:$0xff] %v10933_v59  ;;  %v12291_v59 = vld [vmem:[#allocation27_spill] sm:$0xff] }
 0x6c6   : > { %v10938_v33 = vpop.f32.mrf.mxu2 }
 0x6c8   : > { %v4535_v56 = vpop.f32.mrf.mxu0 }
 0x6c9   : > { %v4536_v42 = vadd.f32 %v4535_v56, %v4446_v15  ;;  %4959 = vmatmul.bf16.gmra.mxu3 %v12270_v8  ;;  %v12273_v15 = vld [vmem:[#allocation21_spill] sm:$0xff] }
 0x6ca   : > { %v12276_v56 = vld [vmem:[#allocation65_spill] sm:$0xff] }
 0x6cb   : > { %v10944_v29 = vadd.f32 %v4536_v42, %v12271_v24  ;;  %6582 = vmatmul.msk.f32.gmra.mxu2 %vm1014_vm2, %v12224_v57  ;;  %v6858_v57 = vld [vmem:[%s11396_s10 + $0x1d0] sm:$0xff] }
 0x6cc   : > { %v4454_v38 = vpop.f32.mrf.mxu3  ;;  %5348 = vmatpush.bf16.msrb.mxu1 %v6858_v57 }
 0x6cd   : > { %12272 = vst [vmem:[#allocation101_spill] sm:$0xff] %v10944_v29 }
 0x6ce   : > { %v10951_v1 = vpop.f32.mrf.mxu2 }
 0x6d0   : > { %v4538_v36 = vpop.f32.mrf.mxu0 }
 0x6d1   : > { %v4539_v26 = vadd.f32 %v4538_v36, %v4449_v54 }
 0x6d3   : > { %v10956_v41 = vadd.f32 %v4539_v26, %v12273_v15  ;;  %6583 = vmatmul.msk.f32.gmra.mxu2 %vm1014_vm2, %v12227_v39  ;;  %5043 = vmatmul.bf16.gmra.mxu0 %v12265_v46  ;;  %v10972_v39 = vpop.f32.mrf.mxu1  ;;  %v12278_v26 = vld [vmem:[#allocation58_spill] sm:$0xff] }
 0x6d4   : > { %v4456_v27 = vpop.f32.mrf.mxu3 }
 0x6d5   : > { %12274 = vst [vmem:[#allocation19_spill] sm:$0xff] %v10956_v41 }
 0x6d6   : > { %v10964_v2 = vpop.f32.mrf.mxu2 }
 0x6d8   : > { %v4540_v22 = vpop.f32.mrf.mxu0 }
 0x6d9   : > { %v4541_v54 = vadd.f32 %v4540_v22, %v4451_v60  ;;  %4964 = vmatmul.bf16.gmra.mxu3 %v12275_v21 }
 0x6db   : > { %v10968_v42 = vadd.f32 %v4541_v54, %v12276_v56  ;;  %6584 = vmatmul.msk.f32.gmra.mxu2 %vm1014_vm2, %v12229_v16  ;;  %v10982_v57 = vpop.f32.mrf.mxu1  ;;  %v12280_v56 = vld [vmem:[#allocation112_spill] sm:$0xff] }
 0x6dc   : > { %v4459_v46 = vpop.f32.mrf.mxu3 }
 0x6dd   : > { %12277 = vst [vmem:[#allocation63_spill] sm:$0xff] %v10968_v42  ;;  %v12281_v42 = vld [vmem:[#allocation74_spill] sm:$0xff] }
 0x6de   : > { %v10974_v24 = vpop.f32.mrf.mxu2 }
 0x6e0   : > { %v4543_v10 = vpop.f32.mrf.mxu0 }
 0x6e1   : > { %v4544_v36 = vadd.f32 %v4543_v10, %v4454_v38 }
 0x6e3   : > { %v10977_v15 = vadd.f32 %v4544_v36, %v12278_v26  ;;  %6585 = vmatmul.msk.f32.gmra.mxu2 %vm1014_vm2, %v12232_v30  ;;  %5048 = vmatmul.bf16.gmra.mxu0 %v12270_v8  ;;  %v6865_v30 = vld [vmem:[%s11396_s10 + $0x208] sm:$0xff]  ;;  %v10997_v10 = vpop.f32.mrf.mxu1  ;;  %v12283_v26 = vld [vmem:[#allocation68_spill] sm:$0xff] }
 0x6e4   : > { %v4461_v60 = vpop.f32.mrf.mxu3  ;;  %5438 = vmatpush.bf16.msrb.mxu2 %v6865_v30 }
 0x6e5   : > { %12279 = vst [vmem:[#allocation115_spill] sm:$0xff] %v10977_v15  ;;  %v12285_v15 = vld [vmem:[#allocation117_spill] sm:$0xff] }
 0x6e6   : > { %v10984_v22 = vpop.f32.mrf.mxu2 }
 0x6e8   : > { %v4545_v16 = vpop.f32.mrf.mxu0 }
 0x6e9   : > { %v4546_v54 = vadd.f32 %v4545_v16, %v4456_v27  ;;  %4969 = vmatmul.bf16.gmra.mxu3 %v12280_v56 }
 0x6eb   : > { %v10988_v41 = vadd.f32 %v4546_v54, %v12281_v42  ;;  %6586 = vmatmul.msk.f32.gmra.mxu2 %vm1014_vm2, %v12234_v35  ;;  %v6857_v35 = vld [vmem:[%s11396_s10 + $0x1c8] sm:$0xff] }
 0x6ec   : > { %v4464_v38 = vpop.f32.mrf.mxu3  ;;  %5349 = vmatpush.bf16.msrb.mxu1 %v6857_v35  ;;  %v12288_v35 = vld [vmem:[#allocation75_spill] sm:$0xff] }
 0x6ed   : > { %12282 = vst [vmem:[#allocation111_spill] sm:$0xff] %v10988_v41 }
 0x6ee   : > { %v10995_v8 = vpop.f32.mrf.mxu2 }
 0x6f0   : > { %v4548_v36 = vpop.f32.mrf.mxu0 }
 0x6f1   : > { %v4549_v27 = vadd.f32 %v4548_v36, %v4459_v46  ;;  %v11011_v46 = vpop.f32.mrf.mxu1  ;;  %v12286_v36 = vld [vmem:[#allocation81_spill] sm:$0xff] }
 0x6f3   : > { %v11000_v16 = vadd.f32 %v4549_v27, %v12283_v26  ;;  %6587 = vmatmul.msk.f32.gmra.mxu2 %vm1014_vm2, %v12237_v3  ;;  %5053 = vmatmul.bf16.gmra.mxu0 %v12275_v21 }
 0x6f4   : > { %v4466_v42 = vpop.f32.mrf.mxu3 }
 0x6f5   : > { %12284 = vst [vmem:[#allocation113_spill] sm:$0xff] %v11000_v16 }
 0x6f6   : > { %v11008_v54 = vpop.f32.mrf.mxu2 }
 0x6f8   : > { %v4550_v30 = vpop.f32.mrf.mxu0 }
 0x6f9   : > { %v4551_v41 = vadd.f32 %v4550_v30, %v4461_v60  ;;  %4974 = vmatmul.bf16.gmra.mxu3 %v12285_v15  ;;  %v11026_v60 = vpop.f32.mrf.mxu1 }
 0x6fb   : > { %v11014_v27 = vadd.f32 %v4551_v41, %v12286_v36  ;;  %6588 = vmatmul.msk.f32.gmra.mxu2 %vm1014_vm2, %v12239_v14 }
 0x6fc   : > { %v4469_v3 = vpop.f32.mrf.mxu3 }
 0x6fd   : > { %12287 = vst [vmem:[#allocation109_spill] sm:$0xff] %v11014_v27  ;;  %v12290_v27 = vld [vmem:[#allocation121_spill] sm:$0xff] }
 0x6fe   : > { %v11018_v21 = vpop.f32.mrf.mxu2 }
 0x700   : > { %v4553_v26 = vpop.f32.mrf.mxu0 }
 0x701   : > { %v4554_v16 = vadd.f32 %v4553_v26, %v4464_v38 }
 0x703   : > { %v11021_v29 = vadd.f32 %v4554_v16, %v12288_v35  ;;  %6589 = vmatmul.msk.f32.gmra.mxu2 %vm1014_vm2, %v12242_v34  ;;  %5058 = vmatmul.bf16.gmra.mxu0 %v12280_v56  ;;  %v6864_v34 = vld [vmem:[%s11396_s10 + $0x200] sm:$0xff]  ;;  %v11039_v56 = vpop.f32.mrf.mxu1  ;;  %v12293_v35 = vld [vmem:[#allocation134_spill] sm:$0xff] }
 0x704   : > { %v4471_v41 = vpop.f32.mrf.mxu3  ;;  %5439 = vmatpush.bf16.msrb.mxu2 %v6864_v34 }
 0x705   : > { %12289 = vst [vmem:[#allocation73_spill] sm:$0xff] %v11021_v29 }
 0x706   : > { %v11028_v30 = vpop.f32.mrf.mxu2 }
 0x708   : > { %v4555_v36 = vpop.f32.mrf.mxu0 }
 0x709   : > { %v4556_v14 = vadd.f32 %v4555_v36, %v4466_v42  ;;  %4979 = vmatmul.bf16.gmra.mxu3 %v12290_v27 }
 0x70b   : > { %v11032_v47 = vadd.f32 %v4556_v14, %v12291_v59  ;;  %6590 = vmatmul.msk.f32.gmra.mxu2 %vm1014_vm2, %v12244_v37  ;;  %v6856_v37 = vld [vmem:[%s11396_s10 + $0x1c0] sm:$0xff] }
 0x70c   : > { %v4474_v38 = vpop.f32.mrf.mxu3  ;;  %5350 = vmatpush.bf16.msrb.mxu1 %v6856_v37 }
 0x70d   : > { %12292 = vst [vmem:[#allocation70_spill] sm:$0xff] %v11032_v47  ;;  %v11054_v47 = vpop.f32.mrf.mxu1 }
 0x70e   : > { %v11041_v16 = vpop.f32.mrf.mxu2 }
 0x710   : > { %v4558_v26 = vpop.f32.mrf.mxu0 }
 0x711   : > { %v4559_v42 = vadd.f32 %v4558_v26, %v4469_v3  ;;  %v12295_v26 = vld [vmem:[#allocation126_spill] sm:$0xff] }
 0x713   : > { %v11044_v36 = vadd.f32 %v4559_v42, %v12293_v35  ;;  %6591 = vmatmul.msk.f32.gmra.mxu2 %vm1014_vm2, %v12247_v48  ;;  %5063 = vmatmul.bf16.gmra.mxu0 %v12285_v15  ;;  %v12296_v42 = vld [vmem:[#allocation41_spill] sm:$0xff] }
 0x714   : > { %v4476_v59 = vpop.f32.mrf.mxu3 }
 0x715   : > { %12294 = vst [vmem:[#allocation122_spill] sm:$0xff] %v11044_v36  ;;  %v11064_v37 = vpop.f32.mrf.mxu1 }
 0x716   : > { %v11052_v14 = vpop.f32.mrf.mxu2 }
 0x718   : > { %v4560_v34 = vpop.f32.mrf.mxu0 }
 0x719   : > { %v4561_v3 = vadd.f32 %v4560_v34, %v4471_v41  ;;  %4984 = vmatmul.bf16.gmra.mxu3 %v12295_v26 }
 0x71b   : > { %v11058_v35 = vadd.f32 %v4561_v3, %v12296_v42  ;;  %6592 = vmatmul.msk.f32.gmra.mxu2 %vm1014_vm2, %v12250_v44  ;;  %v12300_v42 = vld [vmem:[#allocation52_spill] sm:$0xff] }
 0x71c   : > { %v4479_v48 = vpop.f32.mrf.mxu3 }
 0x71d   : > { %12297 = vst [vmem:[#allocation119_spill] sm:$0xff] %v11058_v35 }
 0x71e   : > { %v11062_v15 = vpop.f32.mrf.mxu2 }
 0x720   : > { %v4563_v36 = vpop.f32.mrf.mxu0 }
 0x721   : > { %v4564_v29 = vadd.f32 %v4563_v36, %v4474_v38 }
 0x723   : > { %v11067_v20 = vadd.f32 %v4564_v29, %v12298_v43  ;;  %6593 = vmatmul.msk.f32.gmra.mxu2 %vm1014_vm2, %v12254_v19  ;;  %5068 = vmatmul.bf16.gmra.mxu0 %v12290_v27  ;;  %v4613_v43 = vld [vmem:[%s11392_s6 + $0x7] sm:$0x3]  ;;  %v11083_v19 = vpop.f32.mrf.mxu1 }
 0x724   : > { %v4481_v41 = vpop.f32.mrf.mxu3  ;;  %v11087_v38 = vperm.slane %v4613_v43, 0 }
 0x725   : > { %12299 = vst [vmem:[#allocation120_spill] sm:$0xff] %v11067_v20 }
 0x726   : > { %v11072_v34 = vpop.f32.mrf.mxu2 }
 0x728   : > { %v4565_v3 = vpop.f32.mrf.mxu0 }
 0x729   : > { %v4566_v44 = vadd.f32 %v4565_v3, %v4476_v59  ;;  %4989 = vmatmul.bf16.gmra.mxu3 %v12156_v6  ;;  %v4637_v3 = vadd.f32 %v10754_v55, %v11087_v38  ;;  %v12304_v55 = vld [vmem:[#allocation99_spill] sm:$0xff] }
 0x72b   : > { %v11076_v35 = vadd.f32 %v4566_v44, %v12300_v42  ;;  %6594 = vmatmul.msk.f32.gmra.mxu2 %vm1014_vm2, %v12257_v49  ;;  %v4640_v44 = vadd.f32 %v10779_v45, %v11087_v38  ;;  %v11097_v58 = vpop.f32.mrf.mxu1 }
 0x72c   : > { %v4950_v29 = vpop.f32.mrf.mxu3 }
 0x72d   : > { %12301 = vst [vmem:[#allocation116_spill] sm:$0xff] %v11076_v35  ;;  %v5119_v35 = vmul.f32 %v4950_v29, %v4637_v3  ;;  %v4643_v3 = vadd.f32 %v10798_v63, %v11087_v38 }
 0x72e   : > { %v11085_v27 = vpop.f32.mrf.mxu2 }
 0x730   : > { %v4568_v36 = vpop.f32.mrf.mxu0 }
 0x731   : > { %v4569_v59 = vadd.f32 %v4568_v36, %v4479_v48 }
 0x733   : > { %v11094_v49 = vadd.f32 %v4569_v59, %v10418_v53  ;;  %5073 = vmatmul.bf16.gmra.mxu0 %v12295_v26  ;;  %v11107_v26 = vpop.f32.mrf.mxu1 }
 0x734   : > { %v4952_v42 = vpop.f32.mrf.mxu3 }
 0x735   : > { %12302 = vst [vmem:[#allocation78_spill] sm:$0xff] %v11094_v49  ;;  %v5121_v20 = vmul.f32 %v4952_v42, %v4640_v44 }
 0x736   : > { %v11099_v5 = vpop.f32.mrf.mxu2 }
 0x737   : > { %v5183_v18 = vpack.c.bf16 %v5121_v20, %v5119_v35  ;;  %v4646_v20 = vadd.f32 %v10813_v17, %v11087_v38  ;;  %v11113_v35 = vperm.slane %v4613_v43, 1  ;;  %v12306_v17 = vld [vmem:[#allocation49_spill] sm:$0xff] }
 0x738   : > { %v4570_v48 = vpop.f32.mrf.mxu0 }
 0x739   : > { %v4571_v36 = vadd.f32 %v4570_v48, %v4481_v41  ;;  %4994 = vmatmul.bf16.gmra.mxu3 %v12303_v50  ;;  %5351 = vmatmul.bf16.vlgmr.msrb.gmra.mxu1 %v5183_v18  ;;  %v4750_v48 = vadd.f32 %v10922_v7, %v11113_v35  ;;  %v4649_v7 = vadd.f32 %v10842_v32, %v11087_v38 }
 0x73b   : > { %v11103_v45 = vadd.f32 %v4571_v36, %v12304_v55  ;;  %v4753_v36 = vadd.f32 %v10930_v40, %v11113_v35  ;;  %v11123_v43 = vpop.f32.mrf.mxu1  ;;  %v4652_v40 = vadd.f32 %v10864_v4, %v11087_v38 }
 0x73c   : > { %v4955_v53 = vpop.f32.mrf.mxu3 }
 0x73d   : > { %12305 = vst [vmem:[#allocation72_spill] sm:$0xff] %v11103_v45  ;;  %v5123_v41 = vmul.f32 %v4955_v53, %v4643_v3 }
 0x73e   : > { %v11105_v59 = vpop.f32.mrf.mxu2 }
 0x740   : > { %v5039_v29 = vpop.f32.mrf.mxu0 }
 0x741   : > { %v5120_v45 = vmul.f32 %v5039_v29, %v4750_v48 }
 0x743   : > { %5078 = vmatmul.bf16.gmra.mxu0 %v12156_v6  ;;  %v11132_v29 = vpop.f32.mrf.mxu1 }
 0x744   : > { %v4957_v18 = vpop.f32.mrf.mxu3 }
 0x745   : > { %v5125_v44 = vmul.f32 %v4957_v18, %v4646_v20 }
 0x746   : > { %v11116_v42 = vpop.f32.mrf.mxu2 }
 0x747   : > { %v5185_v55 = vpack.c.bf16 %v5125_v44, %v5123_v41 }
 0x748   : > { %v5041_v63 = vpop.f32.mrf.mxu0 }
 0x749   : > { %v5122_v49 = vmul.f32 %v5041_v63, %v4753_v36  ;;  %4999 = vmatmul.bf16.gmra.mxu3 %v12306_v17  ;;  %5356 = vmatmul.bf16.gmra.mxu1 %v5185_v55  ;;  %v12307_v63 = vld [vmem:[#allocation50_spill] sm:$0xff] }
 0x74b   : > { %v5184_v6 = vpack.c.bf16 %v5122_v49, %v5120_v45  ;;  %v4756_v49 = vadd.f32 %v10938_v33, %v11113_v35  ;;  %v4759_v45 = vadd.f32 %v10951_v1, %v11113_v35  ;;  %v4655_v33 = vadd.f32 %v10876_v23, %v11087_v38 }
 0x74c   : > { %v4960_v53 = vpop.f32.mrf.mxu3  ;;  %v4658_v1 = vadd.f32 %v10892_v25, %v11087_v38  ;;  %v12308_v25 = vld [vmem:[#allocation61_spill] sm:$0xff] }
 0x74d   : > { %5440 = vmatmul.bf16.vlgmr.msrb.gmra.mxu2 %v5184_v6  ;;  %v5127_v41 = vmul.f32 %v4960_v53, %v4649_v7  ;;  %v11141_v53 = vpop.f32.mrf.mxu1 }
 0x74e   : > { %v11125_v3 = vpop.f32.mrf.mxu2 }
 0x750   : > { %v5044_v20 = vpop.f32.mrf.mxu0 }
 0x751   : > { %v5124_v55 = vmul.f32 %v5044_v20, %v4756_v49  ;;  %v4765_v49 = vadd.f32 %v10974_v24, %v11113_v35  ;;  %v4664_v24 = vadd.f32 %v10953_v12, %v11087_v38 }
 0x753   : > { %5083 = vmatmul.bf16.gmra.mxu0 %v12303_v50 }
 0x754   : > { %v4962_v18 = vpop.f32.mrf.mxu3 }
 0x755   : > { %v5129_v44 = vmul.f32 %v4962_v18, %v4652_v40 }
 0x756   : > { %v11139_v4 = vpop.f32.mrf.mxu2 }
 0x757   : > { %v5187_v48 = vpack.c.bf16 %v5129_v44, %v5127_v41  ;;  %v4762_v44 = vadd.f32 %v10964_v2, %v11113_v35  ;;  %v4661_v2 = vadd.f32 %v10940_v61, %v11087_v38 }
 0x758   : > { %v5046_v36 = vpop.f32.mrf.mxu0 }
 0x759   : > { %v5126_v32 = vmul.f32 %v5046_v36, %v4759_v45  ;;  %5004 = vmatmul.bf16.gmra.mxu3 %v12307_v63  ;;  %5361 = vmatmul.bf16.gmra.mxu1 %v5187_v48  ;;  %v11154_v48 = vpop.f32.mrf.mxu1 }
 0x75b   : > { %v5186_v50 = vpack.c.bf16 %v5126_v32, %v5124_v55 }
 0x75c   : > { %v4965_v6 = vpop.f32.mrf.mxu3 }
 0x75d   : > { %5445 = vmatmul.bf16.gmra.mxu2 %v5186_v50  ;;  %v5131_v18 = vmul.f32 %v4965_v6, %v4655_v33 }
 0x75e   : > { %v11148_v20 = vpop.f32.mrf.mxu2 }
 0x760   : > { %v5049_v7 = vpop.f32.mrf.mxu0 }
 0x761   : > { %v5128_v36 = vmul.f32 %v5049_v7, %v4762_v44  ;;  %v11159_v33 = vpop.f32.mrf.mxu1 }
 0x763   : > { %5088 = vmatmul.bf16.gmra.mxu0 %v12306_v17 }
 0x764   : > { %v4967_v40 = vpop.f32.mrf.mxu3 }
 0x765   : > { %v5133_v41 = vmul.f32 %v4967_v40, %v4658_v1 }
 0x766   : > { %v11157_v50 = vpop.f32.mrf.mxu2 }
 0x767   : > { %v5189_v45 = vpack.c.bf16 %v5133_v41, %v5131_v18  ;;  %v4768_v18 = vadd.f32 %v10984_v22, %v11113_v35  ;;  %v4771_v41 = vadd.f32 %v10995_v8, %v11113_v35  ;;  %v4667_v22 = vadd.f32 %v10972_v39, %v11087_v38 }
 0x768   : > { %v5051_v23 = vpop.f32.mrf.mxu0  ;;  %v4670_v8 = vadd.f32 %v10982_v57, %v11087_v38 }
 0x769   : > { %v5130_v55 = vmul.f32 %v5051_v23, %v4765_v49  ;;  %5009 = vmatmul.bf16.gmra.mxu3 %v12308_v25  ;;  %5366 = vmatmul.bf16.gmra.mxu1 %v5189_v45 }
 0x76b   : > { %v5188_v17 = vpack.c.bf16 %v5130_v55, %v5128_v36  ;;  %v12309_v36 = vld [vmem:[#allocation69_spill] sm:$0xff] }
 0x76c   : > { %v4970_v32 = vpop.f32.mrf.mxu3 }
 0x76d   : > { %5450 = vmatmul.bf16.gmra.mxu2 %v5188_v17  ;;  %v5135_v1 = vmul.f32 %v4970_v32, %v4661_v2 }
 0x76e   : > { %v11170_v49 = vpop.f32.mrf.mxu2 }
 0x770   : > { %v5054_v6 = vpop.f32.mrf.mxu0 }
 0x771   : > { %v5132_v23 = vmul.f32 %v5054_v6, %v4768_v18 }
 0x773   : > { %5093 = vmatmul.bf16.gmra.mxu0 %v12307_v63  ;;  %v11173_v63 = vpop.f32.mrf.mxu1 }
 0x774   : > { %v4972_v7 = vpop.f32.mrf.mxu3 }
 0x775   : > { %v5137_v40 = vmul.f32 %v4972_v7, %v4664_v24 }
 0x776   : > { %v11175_v32 = vpop.f32.mrf.mxu2 }
 0x777   : > { %v5191_v44 = vpack.c.bf16 %v5137_v40, %v5135_v1  ;;  %v4774_v1 = vadd.f32 %v11008_v54, %v11113_v35  ;;  %v4777_v40 = vadd.f32 %v11018_v21, %v11113_v35  ;;  %v4673_v54 = vadd.f32 %v10997_v10, %v11087_v38 }
 0x778   : > { %v5056_v45 = vpop.f32.mrf.mxu0  ;;  %v4676_v21 = vadd.f32 %v11011_v46, %v11087_v38 }
 0x779   : > { %v5134_v61 = vmul.f32 %v5056_v45, %v4771_v41  ;;  %5014 = vmatmul.bf16.gmra.mxu3 %v12309_v36  ;;  %5371 = vmatmul.bf16.gmra.mxu1 %v5191_v44  ;;  %v12310_v45 = vld [vmem:[#allocation77_spill] sm:$0xff] }
 0x77b   : > { %v5190_v12 = vpack.c.bf16 %v5134_v61, %v5132_v23  ;;  %v11182_v7 = vpop.f32.mrf.mxu1 }
 0x77c   : > { %v4975_v55 = vpop.f32.mrf.mxu3 }
 0x77d   : > { %5455 = vmatmul.bf16.gmra.mxu2 %v5190_v12  ;;  %v5139_v2 = vmul.f32 %v4975_v55, %v4667_v22 }
 0x780   : > { %v5059_v17 = vpop.f32.mrf.mxu0 }
 0x781   : > { %v5136_v44 = vmul.f32 %v5059_v17, %v4774_v1 }
 0x783   : > { %5098 = vmatmul.bf16.gmra.mxu0 %v12308_v25  ;;  %v11189_v25 = vpop.f32.mrf.mxu2  ;;  %v11191_v61 = vpop.f32.mrf.mxu1 }
 0x784   : > { %v4977_v6 = vpop.f32.mrf.mxu3 }
 0x785   : > { %v5141_v24 = vmul.f32 %v4977_v6, %v4670_v8  ;;  %v4780_v6 = vadd.f32 %v11028_v30, %v11113_v35  ;;  %v4679_v30 = vadd.f32 %v11026_v60, %v11087_v38 }
 0x787   : > { %v5193_v18 = vpack.c.bf16 %v5141_v24, %v5139_v2  ;;  %v4783_v2 = vadd.f32 %v11041_v16, %v11113_v35  ;;  %v4682_v16 = vadd.f32 %v11039_v56, %v11087_v38 }
 0x788   : > { %v5061_v41 = vpop.f32.mrf.mxu0 }
 0x789   : > { %v5138_v39 = vmul.f32 %v5061_v41, %v4777_v40  ;;  %5019 = vmatmul.bf16.gmra.mxu3 %v12310_v45  ;;  %5376 = vmatmul.bf16.gmra.mxu1 %v5193_v18  ;;  %v12311_v18 = vld [vmem:[#allocation84_spill] sm:$0xff] }
 0x78b   : > { %v5192_v57 = vpack.c.bf16 %v5138_v39, %v5136_v44  ;;  %v11198_v8 = vpop.f32.mrf.mxu2  ;;  %v11205_v46 = vpop.f32.mrf.mxu1 }
 0x78c   : > { %v4980_v23 = vpop.f32.mrf.mxu3 }
 0x78d   : > { %5460 = vmatmul.bf16.gmra.mxu2 %v5192_v57  ;;  %v5143_v17 = vmul.f32 %v4980_v23, %v4673_v54 }
 0x790   : > { %v5064_v12 = vpop.f32.mrf.mxu0 }
 0x791   : > { %v5140_v40 = vmul.f32 %v5064_v12, %v4780_v6 }
 0x793   : > { %5103 = vmatmul.bf16.gmra.mxu0 %v12309_v36  ;;  %v11207_v44 = vpop.f32.mrf.mxu2  ;;  %v11214_v57 = vpop.f32.mrf.mxu1 }
 0x794   : > { %v4982_v55 = vpop.f32.mrf.mxu3 }
 0x795   : > { %v5145_v22 = vmul.f32 %v4982_v55, %v4676_v21  ;;  %v4786_v21 = vadd.f32 %v11052_v14, %v11113_v35  ;;  %v4789_v55 = vadd.f32 %v11062_v15, %v11113_v35  ;;  %v4688_v14 = vadd.f32 %v11064_v37, %v11087_v38 }
 0x797   : > { %v5195_v24 = vpack.c.bf16 %v5145_v22, %v5143_v17 }
 0x798   : > { %v5066_v1 = vpop.f32.mrf.mxu0 }
 0x799   : > { %v5142_v10 = vmul.f32 %v5066_v1, %v4783_v2  ;;  %5024 = vmatmul.bf16.gmra.mxu3 %v12311_v18  ;;  %5381 = vmatmul.bf16.gmra.mxu1 %v5195_v24 }
 0x79b   : > { %v5194_v36 = vpack.c.bf16 %v5142_v10, %v5140_v40  ;;  %v11220_v2 = vpop.f32.mrf.mxu2  ;;  %v11222_v24 = vpop.f32.mrf.mxu1  ;;  %v4685_v40 = vadd.f32 %v11054_v47, %v11087_v38 }
 0x79c   : > { %v4985_v41 = vpop.f32.mrf.mxu3 }
 0x79d   : > { %5465 = vmatmul.bf16.gmra.mxu2 %v5194_v36  ;;  %v5147_v12 = vmul.f32 %v4985_v41, %v4679_v30  ;;  %v4792_v30 = vadd.f32 %v11072_v34, %v11113_v35  ;;  %v4694_v34 = vadd.f32 %v11097_v58, %v11087_v38 }
 0x7a0   : > { %v5069_v39 = vpop.f32.mrf.mxu0 }
 0x7a1   : > { %v5144_v6 = vmul.f32 %v5069_v39, %v4786_v21 }
 0x7a3   : > { %5108 = vmatmul.bf16.gmra.mxu0 %v12310_v45  ;;  %v11229_v15 = vpop.f32.mrf.mxu2 }
 0x7a4   : > { %v4987_v23 = vpop.f32.mrf.mxu3 }
 0x7a5   : > { %v5149_v54 = vmul.f32 %v4987_v23, %v4682_v16  ;;  %v4795_v16 = vadd.f32 %v11085_v27, %v11113_v35 }
 0x7a7   : > { %v5197_v17 = vpack.c.bf16 %v5149_v54, %v5147_v12 }
 0x7a8   : > { %v5071_v22 = vpop.f32.mrf.mxu0 }
 0x7a9   : > { %v5146_v60 = vmul.f32 %v5071_v22, %v4789_v55  ;;  %5386 = vmatmul.bf16.gmra.mxu1 %v5197_v17  ;;  %v4691_v22 = vadd.f32 %v11083_v19, %v11087_v38 }
 0x7ab   : > { %v5196_v56 = vpack.c.bf16 %v5146_v60, %v5144_v6 }
 0x7ac   : > { %v4990_v45 = vpop.f32.mrf.mxu3 }
 0x7ad   : > { %5470 = vmatmul.bf16.gmra.mxu2 %v5196_v56  ;;  %v5151_v36 = vmul.f32 %v4990_v45, %v4685_v40  ;;  %v4798_v45 = vadd.f32 %v11099_v5, %v11113_v35  ;;  %v4697_v5 = vadd.f32 %v11107_v26, %v11087_v38 }
 0x7b0   : > { %v5074_v1 = vpop.f32.mrf.mxu0 }
 0x7b1   : > { %v5148_v47 = vmul.f32 %v5074_v1, %v4792_v30  ;;  %v4801_v1 = vadd.f32 %v11105_v59, %v11113_v35  ;;  %v4700_v59 = vadd.f32 %v11123_v43, %v11087_v38 }
 0x7b3   : > { %5113 = vmatmul.bf16.gmra.mxu0 %v12311_v18  ;;  %v11235_v18 = vpop.f32.mrf.mxu2 }
 0x7b4   : > { %v4992_v10 = vpop.f32.mrf.mxu3 }
 0x7b5   : > { %v5153_v41 = vmul.f32 %v4992_v10, %v4688_v14 }
 0x7b6   : > { %v5352_v39 = vpop.f32.mrf.mxu1 }
 0x7b7   : > { %v5199_v23 = vpack.c.bf16 %v5153_v41, %v5151_v36 }
 0x7b8   : > { %v5076_v12 = vpop.f32.mrf.mxu0 }
 0x7b9   : > { %v5150_v54 = vmul.f32 %v5076_v12, %v4795_v16  ;;  %5391 = vmatmul.bf16.gmra.mxu1 %v5199_v23 }
 0x7bb   : > { %v5198_v37 = vpack.c.bf16 %v5150_v54, %v5148_v47  ;;  %v11245_v14 = vpop.f32.mrf.mxu2 }
 0x7bc   : > { %v4995_v21 = vpop.f32.mrf.mxu3 }
 0x7bd   : > { %5475 = vmatmul.bf16.gmra.mxu2 %v5198_v37  ;;  %v5155_v27 = vmul.f32 %v4995_v21, %v4691_v22  ;;  %v4807_v22 = vadd.f32 %v11125_v3, %v11113_v35 }
 0x7be   : > { %v5354_v55 = vpop.f32.mrf.mxu1 }
 0x7c0   : > { %v5079_v17 = vpop.f32.mrf.mxu0 }
 0x7c1   : > { %v5152_v36 = vmul.f32 %v5079_v17, %v4798_v45  ;;  %v4804_v17 = vadd.f32 %v11116_v42, %v11113_v35 }
 0x7c4   : > { %v4997_v6 = vpop.f32.mrf.mxu3 }
 0x7c5   : > { %v5157_v60 = vmul.f32 %v4997_v6, %v4694_v34 }
 0x7c6   : > { %v5357_v56 = vpop.f32.mrf.mxu1 }
 0x7c7   : > { %v5201_v40 = vpack.c.bf16 %v5157_v60, %v5155_v27 }
 0x7c8   : > { %v5081_v10 = vpop.f32.mrf.mxu0 }
 0x7c9   : > { %v5154_v41 = vmul.f32 %v5081_v10, %v4801_v1  ;;  %5396 = vmatmul.bf16.gmra.mxu1 %v5201_v40 }
 0x7cb   : > { %v5200_v19 = vpack.c.bf16 %v5154_v41, %v5152_v36 }
 0x7cc   : > { %v5000_v30 = vpop.f32.mrf.mxu3 }
 0x7cd   : > { %5480 = vmatmul.bf16.gmra.mxu2 %v5200_v19  ;;  %v5159_v47 = vmul.f32 %v5000_v30, %v4697_v5 }
 0x7ce   : > { %v5359_v58 = vpop.f32.mrf.mxu1 }
 0x7d0   : > { %v5084_v16 = vpop.f32.mrf.mxu0  ;;  %v5441_v23 = vpop.f32.mrf.mxu2 }
 0x7d1   : > { %v5442_v54 = vadd.f32 %v5441_v23, %v5352_v39  ;;  %v5156_v26 = vmul.f32 %v5084_v16, %v4804_v17 }
 0x7d3   : > { %v5521_v60 = vadd.f32 %v5442_v54, %v10701_v0  ;;  %v4703_v0 = vadd.f32 %v11132_v29, %v11087_v38 }
 0x7d4   : > { %v5002_v12 = vpop.f32.mrf.mxu3 }
 0x7d5   : > { %v5161_v37 = vmul.f32 %v5002_v12, %v4700_v59  ;;  %v5553_v42 = vmul.f32 0.20412415, %v5521_v60  ;;  %v4810_v59 = vadd.f32 %v11139_v4, %v11113_v35  ;;  %v4813_v12 = vadd.f32 %v11148_v20, %v11113_v35 }
 0x7d6   : > { %v5362_v21 = vpop.f32.mrf.mxu1 }
 0x7d7   : > { %v5203_v34 = vpack.c.bf16 %v5161_v37, %v5159_v47 }
 0x7d8   : > { %v5086_v6 = vpop.f32.mrf.mxu0  ;;  %v5443_v27 = vpop.f32.mrf.mxu2 }
 0x7d9   : > { %v5158_v43 = vmul.f32 %v5086_v6, %v4807_v22  ;;  %v5444_v45 = vadd.f32 %v5443_v27, %v5354_v55  ;;  %5401 = vmatmul.bf16.gmra.mxu1 %v5203_v34  ;;  %v4706_v55 = vadd.f32 %v11141_v53, %v11087_v38 }
 0x7db   : > { %v5202_v1 = vpack.c.bf16 %v5158_v43, %v5156_v26  ;;  %v5522_v39 = vadd.f32 %v5444_v45, %v10723_v11  ;;  %v4709_v45 = vadd.f32 %v11154_v48, %v11087_v38 }
 0x7dc   : > { %v5005_v40 = vpop.f32.mrf.mxu3 }
 0x7dd   : > { %v5554_v10 = vmul.f32 0.20412415, %v5522_v39  ;;  %5485 = vmatmul.bf16.gmra.mxu2 %v5202_v1  ;;  %v5163_v11 = vmul.f32 %v5005_v40, %v4703_v0 }
 0x7de   : > { %v5364_v3 = vpop.f32.mrf.mxu1 }
 0x7df   : > { %v6876_v36 = vpack.c.bf16 %v5554_v10, %v5553_v42  ;;  %v4816_v42 = vadd.f32 %v11157_v50, %v11113_v35  ;;  %v4819_v10 = vadd.f32 %v11170_v49, %v11113_v35 }
 0x7e0   : > { %v5089_v41 = vpop.f32.mrf.mxu0  ;;  %v5446_v19 = vpop.f32.mrf.mxu2 }
 0x7e1   : > { %6877 = vst [vmem:[%s11260_s25] sm:$0xff] %v6876_v36   ;;  %v5447_v16 = vadd.f32 %v5446_v19, %v5357_v56  ;;  %v5160_v17 = vmul.f32 %v5089_v41, %v4810_v59 }
 0x7e3   : > { %v5523_v29 = vadd.f32 %v5447_v16, %v10737_v51  ;;  %v4712_v51 = vadd.f32 %v11159_v33, %v11087_v38 }
 0x7e4   : > { %v5007_v30 = vpop.f32.mrf.mxu3 }
 0x7e5   : > { %v5165_v23 = vmul.f32 %v5007_v30, %v4706_v55  ;;  %v5555_v27 = vmul.f32 0.20412415, %v5523_v29  ;;  %v4822_v29 = vadd.f32 %v11175_v32, %v11113_v35 }
 0x7e6   : > { %v5367_v5 = vpop.f32.mrf.mxu1 }
 0x7e7   : > { %v5205_v47 = vpack.c.bf16 %v5165_v23, %v5163_v11 }
 0x7e8   : > { %v5091_v54 = vpop.f32.mrf.mxu0  ;;  %v5448_v37 = vpop.f32.mrf.mxu2 }
 0x7e9   : > { %v5162_v22 = vmul.f32 %v5091_v54, %v4813_v12  ;;  %v5449_v53 = vadd.f32 %v5448_v37, %v5359_v58  ;;  %5406 = vmatmul.bf16.gmra.mxu1 %v5205_v47  ;;  %v4715_v47 = vadd.f32 %v11173_v63, %v11087_v38 }
 0x7eb   : > { %v5204_v34 = vpack.c.bf16 %v5162_v22, %v5160_v17  ;;  %v5524_v56 = vadd.f32 %v5449_v53, %v10750_v13  ;;  %v4825_v22 = vadd.f32 %v11189_v25, %v11113_v35 }
 0x7ec   : > { %v5010_v6 = vpop.f32.mrf.mxu3 }
 0x7ed   : > { %v5556_v26 = vmul.f32 0.20412415, %v5524_v56  ;;  %5490 = vmatmul.bf16.gmra.mxu2 %v5204_v34  ;;  %v5167_v1 = vmul.f32 %v5010_v6, %v4709_v45 }
 0x7ee   : > { %v5369_v4 = vpop.f32.mrf.mxu1 }
 0x7ef   : > { %v6881_v60 = vpack.c.bf16 %v5556_v26, %v5555_v27 }
 0x7f0   : > { %v5094_v20 = vpop.f32.mrf.mxu0  ;;  %v5451_v43 = vpop.f32.mrf.mxu2 }
 0x7f1   : > { %6953 = vst [vmem:[%s11260_s25 + $0x8] sm:$0xff] %v6881_v60   ;;  %v5452_v39 = vadd.f32 %v5451_v43, %v5362_v21  ;;  %v5164_v0 = vmul.f32 %v5094_v20, %v4816_v42  ;;  %v4828_v42 = vadd.f32 %v11198_v8, %v11113_v35 }
 0x7f3   : > { %v5525_v48 = vadd.f32 %v5452_v39, %v10763_v52  ;;  %v4718_v52 = vadd.f32 %v11182_v7, %v11087_v38 }
 0x7f4   : > { %v5012_v58 = vpop.f32.mrf.mxu3 }
 0x7f5   : > { %v5169_v40 = vmul.f32 %v5012_v58, %v4712_v51  ;;  %v5557_v16 = vmul.f32 0.20412415, %v5525_v48  ;;  %v4721_v58 = vadd.f32 %v11191_v61, %v11087_v38 }
 0x7f6   : > { %v5372_v13 = vpop.f32.mrf.mxu1 }
 0x7f7   : > { %v5207_v36 = vpack.c.bf16 %v5169_v40, %v5167_v1 }
 0x7f8   : > { %v5096_v41 = vpop.f32.mrf.mxu0  ;;  %v5453_v19 = vpop.f32.mrf.mxu2 }
 0x7f9   : > { %v5166_v55 = vmul.f32 %v5096_v41, %v4819_v10  ;;  %v5454_v33 = vadd.f32 %v5453_v19, %v5364_v3  ;;  %5411 = vmatmul.bf16.gmra.mxu1 %v5207_v36  ;;  %v4831_v10 = vadd.f32 %v11207_v44, %v11113_v35 }
 0x7fb   : > { %v5206_v30 = vpack.c.bf16 %v5166_v55, %v5164_v0  ;;  %v5526_v21 = vadd.f32 %v5454_v33, %v10787_v62 }
 0x7fc   : > { %v5015_v11 = vpop.f32.mrf.mxu3 }
 0x7fd   : > { %v5558_v23 = vmul.f32 0.20412415, %v5526_v21  ;;  %5495 = vmatmul.bf16.gmra.mxu2 %v5206_v30  ;;  %v5171_v54 = vmul.f32 %v5015_v11, %v4715_v47 }
 0x7fe   : > { %v5374_v50 = vpop.f32.mrf.mxu1 }
 0x7ff   : > { %v6886_v59 = vpack.c.bf16 %v5558_v23, %v5557_v16 }
 0x800   : > { %v5099_v49 = vpop.f32.mrf.mxu0  ;;  %v5456_v12 = vpop.f32.mrf.mxu2 }
 0x801   : > { %6954 = vst [vmem:[%s11260_s25 + $0x10] sm:$0xff] %v6886_v59   ;;  %v5457_v37 = vadd.f32 %v5456_v12, %v5367_v5  ;;  %v5168_v6 = vmul.f32 %v5099_v49, %v4822_v29  ;;  %v4727_v59 = vadd.f32 %v11214_v57, %v11087_v38  ;;  %v12313_v57 = vld [vmem:[#allocation97_spill] sm:$0xff] }
 0x803   : > { %v5527_v63 = vadd.f32 %v5457_v37, %v10803_v28  ;;  %v4724_v28 = vadd.f32 %v11205_v46, %v11087_v38 }
 0x804   : > { %v5017_v3 = vpop.f32.mrf.mxu3 }
 0x805   : > { %v5173_v17 = vmul.f32 %v5017_v3, %v4718_v52  ;;  %v5559_v20 = vmul.f32 0.20412415, %v5527_v63  ;;  %v4834_v3 = vadd.f32 %v11220_v2, %v11113_v35 }
 0x806   : > { %v5377_v62 = vpop.f32.mrf.mxu1 }
 0x807   : > { %v5209_v53 = vpack.c.bf16 %v5173_v17, %v5171_v54  ;;  %v4837_v54 = vadd.f32 %v11229_v15, %v11113_v35 }
 0x808   : > { %v5101_v34 = vpop.f32.mrf.mxu0  ;;  %v5458_v56 = vpop.f32.mrf.mxu2 }
 0x809   : > { %v5170_v27 = vmul.f32 %v5101_v34, %v4825_v22  ;;  %v5459_v7 = vadd.f32 %v5458_v56, %v5369_v4  ;;  %5416 = vmatmul.bf16.gmra.mxu1 %v5209_v53 }
 0x80b   : > { %v5208_v26 = vpack.c.bf16 %v5170_v27, %v5168_v6  ;;  %v5528_v5 = vadd.f32 %v5459_v7, %v10818_v9 }
 0x80c   : > { %v5020_v60 = vpop.f32.mrf.mxu3 }
 0x80d   : > { %v5560_v43 = vmul.f32 0.20412415, %v5528_v5  ;;  %5500 = vmatmul.bf16.gmra.mxu2 %v5208_v26  ;;  %v5175_v1 = vmul.f32 %v5020_v60, %v4721_v58  ;;  %v4840_v60 = vadd.f32 %v11235_v18, %v11113_v35 }
 0x80e   : > { %v5379_v32 = vpop.f32.mrf.mxu1 }
 0x80f   : > { %v6891_v45 = vpack.c.bf16 %v5560_v43, %v5559_v20  ;;  %v4843_v20 = vadd.f32 %v11245_v14, %v11113_v35 }
 0x810   : > { %v5104_v25 = vpop.f32.mrf.mxu0  ;;  %v5461_v51 = vpop.f32.mrf.mxu2 }
 0x811   : > { %6955 = vst [vmem:[%s11260_s25 + $0x18] sm:$0xff] %v6891_v45   ;;  %v5462_v39 = vadd.f32 %v5461_v51, %v5372_v13  ;;  %v5172_v0 = vmul.f32 %v5104_v25, %v4828_v42  ;;  %v12312_v13 = vld [vmem:[#allocation95_spill] sm:$0xff] }
 0x812   : > { %v12315_v25 = vld [vmem:[#allocation15_spill] sm:$0xff] }
 0x813   : > { %v5529_v61 = vadd.f32 %v5462_v39, %v10829_v31  ;;  %v4730_v31 = vadd.f32 %v11222_v24, %v11087_v38 }
 0x814   : > { %v5022_v4 = vpop.f32.mrf.mxu3 }
 0x815   : > { %v5177_v40 = vmul.f32 %v5022_v4, %v4724_v28  ;;  %v5561_v21 = vmul.f32 0.20412415, %v5529_v61  ;;  %v12318_v61 = vld [vmem:[#allocation103_spill] sm:$0xff] }
 0x816   : > { %v5382_v9 = vpop.f32.mrf.mxu1 }
 0x817   : > { %v5211_v36 = vpack.c.bf16 %v5177_v40, %v5175_v1  ;;  %v12316_v1 = vld [vmem:[#allocation55_spill] sm:$0xff] }
 0x818   : > { %v5106_v41 = vpop.f32.mrf.mxu0  ;;  %v5463_v19 = vpop.f32.mrf.mxu2 }
 0x819   : > { %v5174_v48 = vmul.f32 %v5106_v41, %v4831_v10  ;;  %v5464_v46 = vadd.f32 %v5463_v19, %v5374_v50  ;;  %5421 = vmatmul.bf16.gmra.mxu1 %v5211_v36  ;;  %v12317_v41 = vld [vmem:[#allocation107_spill] sm:$0xff] }
 0x81b   : > { %v5210_v55 = vpack.c.bf16 %v5174_v48, %v5172_v0  ;;  %v5530_v33 = vadd.f32 %v5464_v46, %v12312_v13 }
 0x81c   : > { %v5025_v30 = vpop.f32.mrf.mxu3 }
 0x81d   : > { %v5562_v11 = vmul.f32 0.20412415, %v5530_v33  ;;  %5505 = vmatmul.bf16.gmra.mxu2 %v5210_v55  ;;  %v5179_v49 = vmul.f32 %v5025_v30, %v4727_v59  ;;  %v12320_v59 = vld [vmem:[#allocation101_spill] sm:$0xff] }
 0x81e   : > { %v5384_v8 = vpop.f32.mrf.mxu1 }
 0x81f   : > { %v6896_v16 = vpack.c.bf16 %v5562_v11, %v5561_v21 }
 0x820   : > { %v5109_v44 = vpop.f32.mrf.mxu0  ;;  %v5466_v23 = vpop.f32.mrf.mxu2 }
 0x821   : > { %6956 = vst [vmem:[%s11260_s25 + $0x20] sm:$0xff] %v6896_v16   ;;  %v5467_v12 = vadd.f32 %v5466_v23, %v5377_v62  ;;  %v5176_v22 = vmul.f32 %v5109_v44, %v4834_v3  ;;  %v12314_v62 = vld [vmem:[#allocation92_spill] sm:$0xff] }
 0x823   : > { %v5531_v53 = vadd.f32 %v5467_v12, %v12313_v57 }
 0x824   : > { %v5027_v50 = vpop.f32.mrf.mxu3 }
 0x825   : > { %v5181_v47 = vmul.f32 %v5027_v50, %v4730_v31  ;;  %v5563_v6 = vmul.f32 0.20412415, %v5531_v53 }
 0x826   : > { %v5387_v52 = vpop.f32.mrf.mxu1 }
 0x827   : > { %v5213_v37 = vpack.c.bf16 %v5181_v47, %v5179_v49 }
 0x828   : > { %v5111_v17 = vpop.f32.mrf.mxu0  ;;  %v5468_v29 = vpop.f32.mrf.mxu2 }
 0x829   : > { %v5178_v34 = vmul.f32 %v5111_v17, %v4837_v54  ;;  %v5469_v38 = vadd.f32 %v5468_v29, %v5379_v32  ;;  %5426 = vmatmul.bf16.gmra.mxu1 %v5213_v37  ;;  %v12321_v37 = vld [vmem:[#allocation19_spill] sm:$0xff] }
 0x82b   : > { %v5212_v24 = vpack.c.bf16 %v5178_v34, %v5176_v22  ;;  %v5532_v56 = vadd.f32 %v5469_v38, %v12314_v62  ;;  %v12322_v22 = vld [vmem:[#allocation63_spill] sm:$0xff] }
 0x82d   : > { %v5564_v63 = vmul.f32 0.20412415, %v5532_v56  ;;  %5510 = vmatmul.bf16.gmra.mxu2 %v5212_v24 }
 0x82e   : > { %v5389_v2 = vpop.f32.mrf.mxu1 }
 0x82f   : > { %v6901_v27 = vpack.c.bf16 %v5564_v63, %v5563_v6 }
 0x830   : > { %v5114_v7 = vpop.f32.mrf.mxu0  ;;  %v5471_v15 = vpop.f32.mrf.mxu2 }
 0x831   : > { %6957 = vst [vmem:[%s11260_s25 + $0x28] sm:$0xff] %v6901_v27   ;;  %v5472_v26 = vadd.f32 %v5471_v15, %v5382_v9  ;;  %v5180_v45 = vmul.f32 %v5114_v7, %v4840_v60  ;;  %v12324_v15 = vld [vmem:[#allocation111_spill] sm:$0xff] }
 0x833   : > { %v5533_v51 = vadd.f32 %v5472_v26, %v12315_v25 }
 0x835   : > { %v5565_v40 = vmul.f32 0.20412415, %v5533_v51  ;;  %v12325_v51 = vld [vmem:[#allocation113_spill] sm:$0xff] }
 0x836   : > { %v5392_v5 = vpop.f32.mrf.mxu1 }
 0x838   : > { %v5116_v43 = vpop.f32.mrf.mxu0  ;;  %v5473_v32 = vpop.f32.mrf.mxu2 }
 0x839   : > { %v5182_v58 = vmul.f32 %v5116_v43, %v4843_v20  ;;  %v5474_v28 = vadd.f32 %v5473_v32, %v5384_v8  ;;  %v12319_v8 = vld [vmem:[#allocation104_spill] sm:$0xff] }
 0x83b   : > { %v5214_v4 = vpack.c.bf16 %v5182_v58, %v5180_v45  ;;  %v5534_v39 = vadd.f32 %v5474_v28, %v12316_v1 }
 0x83d   : > { %v5566_v9 = vmul.f32 0.20412415, %v5534_v39  ;;  %5515 = vmatmul.bf16.gmra.mxu2 %v5214_v4  ;;  %v12326_v4 = vld [vmem:[#allocation109_spill] sm:$0xff] }
 0x83e   : > { %v5394_v42 = vpop.f32.mrf.mxu1 }
 0x83f   : > { %v6906_v18 = vpack.c.bf16 %v5566_v9, %v5565_v40 }
 0x840   : > { %v5476_v10 = vpop.f32.mrf.mxu2 }
 0x841   : > { %6958 = vst [vmem:[%s11260_s25 + $0x30] sm:$0xff] %v6906_v18   ;;  %v5477_v36 = vadd.f32 %v5476_v10, %v5387_v52 }
 0x843   : > { %v5535_v19 = vadd.f32 %v5477_v36, %v12317_v41 }
 0x845   : > { %v5567_v46 = vmul.f32 0.20412415, %v5535_v19 }
 0x846   : > { %v5397_v35 = vpop.f32.mrf.mxu1 }
 0x848   : > { %v5478_v14 = vpop.f32.mrf.mxu2 }
 0x849   : > { %v5479_v0 = vadd.f32 %v5478_v14, %v5389_v2  ;;  %v12323_v2 = vld [vmem:[#allocation115_spill] sm:$0xff]  ;;  %v12327_v14 = vld [vmem:[#allocation73_spill] sm:$0xff] }
 0x84b   : > { %v5536_v48 = vadd.f32 %v5479_v0, %v12318_v61  ;;  %v12328_v0 = vld [vmem:[#allocation70_spill] sm:$0xff] }
 0x84d   : > { %v5568_v55 = vmul.f32 0.20412415, %v5536_v48 }
 0x84e   : > { %v5399_v33 = vpop.f32.mrf.mxu1 }
 0x84f   : > { %v6911_v13 = vpack.c.bf16 %v5568_v55, %v5567_v46 }
 0x850   : > { %v5481_v30 = vpop.f32.mrf.mxu2 }
 0x851   : > { %6959 = vst [vmem:[%s11260_s25 + $0x38] sm:$0xff] %v6911_v13   ;;  %v5482_v21 = vadd.f32 %v5481_v30, %v5392_v5 }
 0x853   : > { %v5537_v16 = vadd.f32 %v5482_v21, %v12319_v8 }
 0x855   : > { %v5569_v50 = vmul.f32 0.20412415, %v5537_v16 }
 0x856   : > { %v5402_v23 = vpop.f32.mrf.mxu1 }
 0x858   : > { %v5483_v11 = vpop.f32.mrf.mxu2 }
 0x859   : > { %v5484_v44 = vadd.f32 %v5483_v11, %v5394_v42  ;;  %v12329_v11 = vld [vmem:[#allocation122_spill] sm:$0xff] }
 0x85b   : > { %v5538_v31 = vadd.f32 %v5484_v44, %v12320_v59 }
 0x85d   : > { %v5570_v49 = vmul.f32 0.20412415, %v5538_v31 }
 0x85e   : > { %v5404_v52 = vpop.f32.mrf.mxu1 }
 0x85f   : > { %v6916_v12 = vpack.c.bf16 %v5570_v49, %v5569_v50 }
 0x860   : > { %v5486_v47 = vpop.f32.mrf.mxu2 }
 0x861   : > { %6960 = vst [vmem:[%s11260_s25 + $0x40] sm:$0xff] %v6916_v12   ;;  %v5487_v3 = vadd.f32 %v5486_v47, %v5397_v35 }
 0x863   : > { %v5539_v17 = vadd.f32 %v5487_v3, %v12321_v37 }
 0x865   : > { %v5571_v53 = vmul.f32 0.20412415, %v5539_v17 }
 0x866   : > { %v5407_v38 = vpop.f32.mrf.mxu1 }
 0x868   : > { %v5488_v54 = vpop.f32.mrf.mxu2 }
 0x869   : > { %v5489_v29 = vadd.f32 %v5488_v54, %v5399_v33  ;;  %v12331_v54 = vld [vmem:[#allocation120_spill] sm:$0xff] }
 0x86b   : > { %v5540_v57 = vadd.f32 %v5489_v29, %v12322_v22  ;;  %v12332_v29 = vld [vmem:[#allocation116_spill] sm:$0xff] }
 0x86d   : > { %v5572_v34 = vmul.f32 0.20412415, %v5540_v57 }
 0x86e   : > { %v5409_v6 = vpop.f32.mrf.mxu1 }
 0x86f   : > { %v6921_v24 = vpack.c.bf16 %v5572_v34, %v5571_v53 }
 0x870   : > { %v5491_v62 = vpop.f32.mrf.mxu2 }
 0x871   : > { %6961 = vst [vmem:[%s11260_s25 + $0x48] sm:$0xff] %v6921_v24   ;;  %v5492_v56 = vadd.f32 %v5491_v62, %v5402_v23  ;;  %v12330_v23 = vld [vmem:[#allocation119_spill] sm:$0xff] }
 0x873   : > { %v5541_v27 = vadd.f32 %v5492_v56, %v12323_v2 }
 0x875   : > { %v5573_v5 = vmul.f32 0.20412415, %v5541_v27 }
 0x876   : > { %v5412_v32 = vpop.f32.mrf.mxu1 }
 0x878   : > { %v5493_v63 = vpop.f32.mrf.mxu2 }
 0x879   : > { %v5494_v7 = vadd.f32 %v5493_v63, %v5404_v52  ;;  %v12333_v63 = vld [vmem:[#allocation78_spill] sm:$0xff] }
 0x87b   : > { %v5542_v26 = vadd.f32 %v5494_v7, %v12324_v15  ;;  %v12334_v7 = vld [vmem:[#allocation72_spill] sm:$0xff] }
 0x87d   : > { %v5574_v60 = vmul.f32 0.20412415, %v5542_v26 }
 0x87e   : > { %v5414_v39 = vpop.f32.mrf.mxu1 }
 0x87f   : > { %v6926_v20 = vpack.c.bf16 %v5574_v60, %v5573_v5 }
 0x880   : > { %v5496_v43 = vpop.f32.mrf.mxu2 }
 0x881   : > { %6962 = vst [vmem:[%s11260_s25 + $0x50] sm:$0xff] %v6926_v20   ;;  %v5497_v45 = vadd.f32 %v5496_v43, %v5407_v38 }
 0x883   : > { %v5543_v58 = vadd.f32 %v5497_v45, %v12325_v51 }
 0x885   : > { %v5575_v40 = vmul.f32 0.20412415, %v5543_v58 }
 0x886   : > { %v5417_v36 = vpop.f32.mrf.mxu1 }
 0x888   : > { %v5498_v25 = vpop.f32.mrf.mxu2 }
 0x889   : > { %v5499_v28 = vadd.f32 %v5498_v25, %v5409_v6 }
 0x88b   : > { %v5544_v1 = vadd.f32 %v5499_v28, %v12326_v4 }
 0x88d   : > { %v5576_v9 = vmul.f32 0.20412415, %v5544_v1 }
 0x88e   : > { %v5419_v13 = vpop.f32.mrf.mxu1 }
 0x88f   : > { %v6931_v42 = vpack.c.bf16 %v5576_v9, %v5575_v40 }
 0x890   : > { %v5501_v18 = vpop.f32.mrf.mxu2 }
 0x891   : > { %6963 = vst [vmem:[%s11260_s25 + $0x58] sm:$0xff] %v6931_v42   ;;  %v5502_v10 = vadd.f32 %v5501_v18, %v5412_v32 }
 0x893   : > { %v5545_v41 = vadd.f32 %v5502_v10, %v12327_v14 }
 0x895   : > { %v5577_v48 = vmul.f32 0.20412415, %v5545_v41 }
 0x896   : > { %v5422_v44 = vpop.f32.mrf.mxu1 }
 0x898   : > { %v5503_v35 = vpop.f32.mrf.mxu2 }
 0x899   : > { %v5504_v19 = vadd.f32 %v5503_v35, %v5414_v39 }
 0x89b   : > { %v5546_v61 = vadd.f32 %v5504_v19, %v12328_v0 }
 0x89d   : > { %v5578_v46 = vmul.f32 0.20412415, %v5546_v61 }
 0x89e   : > { %v5424_v47 = vpop.f32.mrf.mxu1 }
 0x89f   : > { %v6936_v55 = vpack.c.bf16 %v5578_v46, %v5577_v48 }
 0x8a0   : > { %v5506_v33 = vpop.f32.mrf.mxu2 }
 0x8a1   : > { %6964 = vst [vmem:[%s11260_s25 + $0x60] sm:$0xff] %v6936_v55   ;;  %v5507_v30 = vadd.f32 %v5506_v33, %v5417_v36 }
 0x8a3   : > { %v5547_v8 = vadd.f32 %v5507_v30, %v12329_v11 }
 0x8a5   : > { %v5579_v31 = vmul.f32 0.20412415, %v5547_v8 }
 0x8a6   : > { %v5427_v34 = vpop.f32.mrf.mxu1 }
 0x8a8   : > { %v5508_v21 = vpop.f32.mrf.mxu2 }
 0x8a9   : > { %v5509_v16 = vadd.f32 %v5508_v21, %v5419_v13 }
 0x8ab   : > { %v5548_v59 = vadd.f32 %v5509_v16, %v12330_v23 }
 0x8ad   : > { %v5580_v50 = vmul.f32 0.20412415, %v5548_v59 }
 0x8ae   : > { %v5429_v56 = vpop.f32.mrf.mxu1 }
 0x8af   : > { %v6941_v49 = vpack.c.bf16 %v5580_v50, %v5579_v31 }
 0x8b0   : > { %v5511_v12 = vpop.f32.mrf.mxu2 }
 0x8b1   : > { %6965 = vst [vmem:[%s11260_s25 + $0x68] sm:$0xff] %v6941_v49   ;;  %v5512_v52 = vadd.f32 %v5511_v12, %v5422_v44 }
 0x8b3   : > { %v5549_v37 = vadd.f32 %v5512_v52, %v12331_v54 }
 0x8b5   : > { %v5581_v57 = vmul.f32 0.20412415, %v5549_v37 }
 0x8b8   : > { %v5513_v3 = vpop.f32.mrf.mxu2 }
 0x8b9   : > { %v5514_v17 = vadd.f32 %v5513_v3, %v5424_v47 }
 0x8bb   : > { %v5550_v22 = vadd.f32 %v5514_v17, %v12332_v29 }
 0x8bd   : > { %v5582_v53 = vmul.f32 0.20412415, %v5550_v22 }
 0x8bf   : > { %v6946_v38 = vpack.c.bf16 %v5582_v53, %v5581_v57 }
 0x8c0   : > { %v5516_v24 = vpop.f32.mrf.mxu2 }
 0x8c1   : > { %6966 = vst [vmem:[%s11260_s25 + $0x70] sm:$0xff] %v6946_v38   ;;  %v5517_v62 = vadd.f32 %v5516_v24, %v5427_v34 }
 0x8c3   : > { %v5551_v2 = vadd.f32 %v5517_v62, %v12333_v63 }
 0x8c5   : > { %v5583_v26 = vmul.f32 0.20412415, %v5551_v2 }
 0x8c8   : > { %v5518_v6 = vpop.f32.mrf.mxu2 }
 0x8c9   : > { %v5519_v27 = vadd.f32 %v5518_v6, %v5429_v56 }
 0x8cb   : > { %v5552_v15 = vadd.f32 %v5519_v27, %v12334_v7 }
 0x8cd   : > { %v5584_v5 = vmul.f32 0.20412415, %v5552_v15 }
 0x8cf   : > { %v6951_v60 = vpack.c.bf16 %v5584_v5, %v5583_v26 }
 0x8d1   : > { %6967 = vst [vmem:[%s11260_s25 + $0x78] sm:$0xff] %v6951_v60  }
 0x8d2   : > { %7042 = shalt.err (!%p7039_p3)
}
 0x8d3   : > { %s7079_s24 = smov 64   ;;  %s7080_s25 = smov 4  }
 0x8d4   : > { %6973 = dma.vmem_to_hbm [thread:$0]  (%p7179_p5), %s5663_s12, 2048, %s5665_s14, %s5650_s21, %s7079_s24, %s7079_s24, %s7080_s25  }
 0x8d5 PF: > { %p6979_p4 = scmp.ge.s32.totalorder %s7077_s20, 2  ;;  %s5679_s16 = sand.u32 1, %s7065_s17  }
 0x8d6   : > { %s5680_s8 = scalar_lea.sflag [#allocation3], %s5679_s16 }
 0x8d7   : > { %p6976_p7 = pnand %p6979_p4, %p7183_p6 }
 0x8d9   : > { %p6977_p8 = pneg %p6976_p7 }
 0x8db   : > { %7060 = dma.done.wait (%p6977_p8), %s5680_s8, 2048  }
 0x8dc   : > { %7062 = vsyncadd (%p6977_p8), %s5680_s8, 4294965248  ;;  %p21_p9 = scmp.ge.s32.totalorder %s7166_s23, 4   ;;  %s12335_s17 = smov %s7069_s18 }
 0x8dd   : > { %s12336_s18 = smov %s7073_s19  ;;  %s12337_s19 = smov %s7177_s26 }
 0x8de   : > { %s12338_s20 = smov %s7166_s23  ;;  %23 = sbr.rel (!%p21_p9) target bundleno = 5 (0x5), region = 105 }
 0x8e3   :  { %5686 = vsyncpa [#allocation3], 1 }
 0x8e4   :  { %5688 = vsyncpa [#allocation3 + $0x1], 1 }

</bundles_post_ra>
